<compile_context>
chip_gen: v7x
topology: tpu7x:2x2x1
jax: 0.10.0
libtpu: 0.0.40
codegen_flags: <defaults>
</compile_context>

<pallas_src>
import numpy as np
import jax
import jax.numpy as jnp
from jax.experimental import pallas as pl
from jax.experimental.pallas import tpu as pltpu


# ----------------------------------------------------------------------------
# Static problem configuration (toy sizes consistent with the module)
# ----------------------------------------------------------------------------
B = 2                       # batch
C_LAT = 4                   # latent channels
D1 = H1 = W1 = 4            # latent spatial dims
S1 = D1 * H1 * W1           # 64   flattened latent spatial
LF = C_LAT * S1             # 256  latent_flat
AGE_DIM = 16                # age embedding dim
HID = 16                    # decoder hidden channels
D2, H2, W2 = 2 * D1, 2 * H1, 2 * W1
S2 = D2 * H2 * W2           # 512  flattened output spatial
PAD1, PAD2 = 32, 128        # zero-halo sizes (>= max conv lane shift: 21 / 73)

# kernel-tap offsets (kd-1, kh-1, kw-1) in the same order as the weight layout
TAPS = [(kd - 1, kh - 1, kw - 1)
        for kd in range(3) for kh in range(3) for kw in range(3)]


# ----------------------------------------------------------------------------
# Fused Pallas kernel: one grid step == one batch element
# ----------------------------------------------------------------------------
def _fused_kernel(z_ref, age_ref, wpq_ref, bpq_ref, w1a_ref, b1a_ref,
                  w2a_ref, b2a_ref, wz_ref, wa_ref, bcp_ref, w1d_ref,
                  b1d_ref, up_ref, w2d_ref, b2d_ref, m1_ref, m2_ref,
                  out_ref, zpad_ref, uppad_ref):
    f32 = jnp.float32

    # Zero-halo scratch buffers (halo must be zero every grid step; interiors
    # are fully overwritten below).
    zpad_ref[...] = jnp.zeros(zpad_ref.shape, f32)
    uppad_ref[...] = jnp.zeros(uppad_ref.shape, f32)

    # ---- post_quant_conv: 1x1x1 conv == channel matmul --------------------
    zpost = jnp.dot(wpq_ref[...], z_ref[...],
                    preferred_element_type=f32) + bpq_ref[...]       # (C_LAT,S1)

    # ---- AgeEmbedMLP: Linear(1,16)+ReLU, Linear(16,16)+ReLU ---------------
    a1 = jnp.maximum(age_ref[...] * w1a_ref[...] + b1a_ref[...], 0.0)   # (1,16)
    a2 = jnp.maximum(jnp.dot(a1, w2a_ref[...],
                             preferred_element_type=f32) + b2a_ref[...], 0.0)

    # ---- cond_proj(cat([z_flat, age_vec])) as split matmuls ---------------
    acc = bcp_ref[...] + jnp.dot(a2, wa_ref[...],
                                 preferred_element_type=f32)          # (1, LF)
    for ci in range(C_LAT):
        acc = acc + jnp.dot(zpost[ci:ci + 1, :],
                            wz_ref[pl.ds(ci * S1, S1), :],
                            preferred_element_type=f32)

    # scatter z_proj channels (lane chunks of acc) into the halo buffer
    for c in range(C_LAT):
        zpad_ref[pl.ds(c, 1), pl.ds(PAD1, S1)] = acc[:, c * S1:(c + 1) * S1]

    # ---- decoder conv1: 3x3x3, pad=1, C_LAT -> HID, then ReLU -------------
    h1 = jnp.zeros((HID, S1), f32)
    for t, (dd, dh, dw) in enumerate(TAPS):
        delta = dd * H1 * W1 + dh * W1 + dw
        shifted = zpad_ref[:, pl.ds(PAD1 + delta, S1)]                # (C_LAT,S1)
        masked = shifted * m1_ref[pl.ds(t, 1), :]                     # (1,S1) bcast
        h1 = h1 + jnp.dot(w1d_ref[pl.ds(t * HID, HID), :], masked,
                          preferred_element_type=f32)                 # (HID,S1)
    h1 = jnp.maximum(h1 + b1d_ref[...], 0.0)

    # ---- nearest x2 upsample as an exact 0/1 matmul ------------------------
    up = jnp.dot(h1, up_ref[...], preferred_element_type=f32)         # (HID,S2)
    uppad_ref[:, pl.ds(PAD2, S2)] = up

    # ---- decoder conv2: 3x3x3, pad=1, HID -> 1 -----------------------------
    out2 = jnp.zeros((1, S2), f32)
    for t, (dd, dh, dw) in enumerate(TAPS):
        delta = dd * H2 * W2 + dh * W2 + dw
        shifted = uppad_ref[:, pl.ds(PAD2 + delta, S2)]               # (HID,S2)
        masked = shifted * m2_ref[pl.ds(t, 1), :]
        out2 = out2 + jnp.dot(w2d_ref[pl.ds(t, 1), :], masked,
                              preferred_element_type=f32)             # (1,S2)
    out_ref[...] = (out2 + b2d_ref[...]).astype(out_ref.dtype)


# ----------------------------------------------------------------------------
# One-time host-side setup (hoisted out of the forward path)
# ----------------------------------------------------------------------------
def _conv_masks(D, H, W):
    """(27, D*H*W) 0/1 masks: validity of each tap at each output position."""
    d = np.arange(D)[:, None, None]
    h = np.arange(H)[None, :, None]
    w = np.arange(W)[None, None, :]
    rows = []
    for kd in range(3):
        for kh in range(3):
            for kw in range(3):
                valid = ((d + kd - 1 >= 0) & (d + kd - 1 < D) &
                         (h + kh - 1 >= 0) & (h + kh - 1 < H) &
                         (w + kw - 1 >= 0) & (w + kw - 1 < W))
                rows.append(valid.reshape(-1).astype(np.float32))
    return jnp.asarray(np.stack(rows, axis=0))


def _upsample_matrix():
    """(S1, S2) 0/1 matrix implementing nearest x2 upsampling exactly."""
    U = np.zeros((S1, S2), np.float32)
    for dp in range(D2):
        for hp in range(H2):
            for wp in range(W2):
                p_out = (dp * H2 + hp) * W2 + wp
                p_in = ((dp // 2) * H1 + hp // 2) * W1 + wp // 2
                U[p_in, p_out] = 1.0
    return jnp.asarray(U)


def init_params(key):
    """Synthetic PyTorch-layout parameters."""
    ks = jax.random.split(key, 12)
    s, sb = 0.05, 0.01
    return {
        "post_quant_w": s * jax.random.normal(ks[0], (C_LAT, C_LAT, 1, 1, 1), jnp.float32),
        "post_quant_b": sb * jax.random.normal(ks[1], (C_LAT,), jnp.float32),
        "age_w1": s * jax.random.normal(ks[2], (AGE_DIM, 1), jnp.float32),
        "age_b1": sb * jax.random.normal(ks[3], (AGE_DIM,), jnp.float32),
        "age_w2": s * jax.random.normal(ks[4], (AGE_DIM, AGE_DIM), jnp.float32),
        "age_b2": sb * jax.random.normal(ks[5], (AGE_DIM,), jnp.float32),
        "cond_w": s * jax.random.normal(ks[6], (LF, LF + AGE_DIM), jnp.float32),
        "cond_b": sb * jax.random.normal(ks[7], (LF,), jnp.float32),
        "dec1_w": s * jax.random.normal(ks[8], (HID, C_LAT, 3, 3, 3), jnp.float32),
        "dec1_b": sb * jax.random.normal(ks[9], (HID,), jnp.float32),
        "dec2_w": s * jax.random.normal(ks[10], (1, HID, 3, 3, 3), jnp.float32),
        "dec2_b": sb * jax.random.normal(ks[11], (1,), jnp.float32),
    }


def prepare_kernel_params(p):
    """One-time layout transforms into kernel (lane-dense, matmul-ready) form."""
    wpq = p["post_quant_w"].reshape(C_LAT, C_LAT)
    bpq = p["post_quant_b"].reshape(C_LAT, 1)
    w1a = p["age_w1"].T                                   # (1, 16)
    b1a = p["age_b1"].reshape(1, AGE_DIM)
    w2a = p["age_w2"].T                                   # (16, 16)
    b2a = p["age_b2"].reshape(1, AGE_DIM)
    wz = p["cond_w"][:, :LF].T                            # (LF, LF)
    wa = p["cond_w"][:, LF:].T                            # (16, LF)
    bcp = p["cond_b"].reshape(1, LF)
    w1d = jnp.transpose(p["dec1_w"], (2, 3, 4, 0, 1)).reshape(27 * HID, C_LAT)
    b1d = p["dec1_b"].reshape(HID, 1)
    upmat = _upsample_matrix()
    w2d = jnp.transpose(p["dec2_w"], (2, 3, 4, 0, 1)).reshape(27, HID)
    b2d = p["dec2_b"].reshape(1, 1)
    m1 = _conv_masks(D1, H1, W1)                          # (27, 64)
    m2 = _conv_masks(D2, H2, W2)                          # (27, 512)
    return (wpq, bpq, w1a, b1a, w2a, b2a, wz, wa, bcp,
            w1d, b1d, upmat, w2d, b2d, m1, m2)


# ----------------------------------------------------------------------------
# Forward pass: single fused pallas_call
# ----------------------------------------------------------------------------
@jax.jit
def age_conditional_decoder_forward(kp, z, age_scalar):
    B_ = z.shape[0]
    z3 = z.reshape(B_, C_LAT, S1).astype(jnp.float32)
    age3 = age_scalar.reshape(B_, 1, 1).astype(jnp.float32)

    in_specs = [
        pl.BlockSpec((None, C_LAT, S1), lambda i: (i, 0, 0)),   # z (per batch)
        pl.BlockSpec((None, 1, 1), lambda i: (i, 0, 0)),        # age (per batch)
    ]
    in_specs += [pl.BlockSpec(a.shape, lambda i: (0, 0)) for a in kp]

    out = pl.pallas_call(
        _fused_kernel,
        out_shape=jax.ShapeDtypeStruct((B_, 1, S2), jnp.float32),
        grid=(B_,),
        in_specs=in_specs,
        out_specs=pl.BlockSpec((None, 1, S2), lambda i: (i, 0, 0)),
        scratch_shapes=[
            pltpu.VMEM((C_LAT, S1 + 2 * PAD1), jnp.float32),
            pltpu.VMEM((HID, S2 + 2 * PAD2), jnp.float32),
        ],
        compiler_params=pltpu.CompilerParams(
            dimension_semantics=("parallel",)),
    )(z3, age3, *kp)
    return out.reshape(B_, 1, D2, H2, W2)


# ----------------------------------------------------------------------------
# Independent pure-JAX reference (mirrors the PyTorch forward)
# ----------------------------------------------------------------------------
def reference_forward(p, z, age_scalar):
    prec = jax.lax.Precision.HIGHEST
    B_, C, D, H, W = z.shape

    dn = jax.lax.conv_dimension_numbers(z.shape, p["post_quant_w"].shape,
                                        ("NCDHW", "OIDHW", "NCDHW"))
    z_post = jax.lax.conv_general_dilated(
        z, p["post_quant_w"], window_strides=(1, 1, 1),
        padding=[(0, 0)] * 3, dimension_numbers=dn, precision=prec)
    z_post = z_post + p["post_quant_b"].reshape(1, -1, 1, 1, 1)

    z_flat = z_post.reshape(B_, -1)
    a1 = jax.nn.relu(jnp.dot(age_scalar, p["age_w1"].T, precision=prec) + p["age_b1"])
    a2 = jax.nn.relu(jnp.dot(a1, p["age_w2"].T, precision=prec) + p["age_b2"])
    combined = jnp.concatenate([z_flat, a2], axis=1)
    z_proj = (jnp.dot(combined, p["cond_w"].T, precision=prec)
              + p["cond_b"]).reshape(B_, C, D, H, W)

    dn1 = jax.lax.conv_dimension_numbers(z_proj.shape, p["dec1_w"].shape,
                                         ("NCDHW", "OIDHW", "NCDHW"))
    h = jax.lax.conv_general_dilated(
        z_proj, p["dec1_w"], window_strides=(1, 1, 1),
        padding=[(1, 1)] * 3, dimension_numbers=dn1, precision=prec)
    h = jax.nn.relu(h + p["dec1_b"].reshape(1, -1, 1, 1, 1))
    h = jnp.repeat(jnp.repeat(jnp.repeat(h, 2, axis=2), 2, axis=3), 2, axis=4)

    dn2 = jax.lax.conv_dimension_numbers(h.shape, p["dec2_w"].shape,
                                         ("NCDHW", "OIDHW", "NCDHW"))
    x = jax.lax.conv_general_dilated(
        h, p["dec2_w"], window_strides=(1, 1, 1),
        padding=[(1, 1)] * 3, dimension_numbers=dn2, precision=prec)
    return x + p["dec2_b"].reshape(1, -1, 1, 1, 1)


if __name__ == "__main__":
    key = jax.random.PRNGKey(0)
    k_param, k_z, k_age = jax.random.split(key, 3)

    params = init_params(k_param)
    kparams = prepare_kernel_params(params)

    z = jax.random.normal(k_z, (B, C_LAT, D1, H1, W1), jnp.float32)
    age = jax.random.uniform(k_age, (B, 1), jnp.float32)   # normalized age in [0,1]

    x_pred = age_conditional_decoder_forward(kparams, z, age)
    x_pred = jax.block_until_ready(x_pred)

    assert x_pred.shape == (B, 1, D2, H2, W2), x_pred.shape
    assert bool(jnp.all(jnp.isfinite(x_pred)))

    x_ref = reference_forward(params, z, age)
    np.testing.assert_allclose(np.asarray(x_pred), np.asarray(x_ref),
                               rtol=5e-2, atol=5e-3)
    print("KERNEL_OK")
</pallas_src>

<mosaic_0001>
module attributes {stable_mosaic.version = 11 : i64} {
  func.func @_fused_kernel(%arg0: i32, %arg1: memref<1x4x64xf32, #tpu.memory_space<vmem>>, %arg2: memref<1x1x1xf32, #tpu.memory_space<vmem>>, %arg3: memref<4x4xf32, #tpu.memory_space<vmem>>, %arg4: memref<4x1xf32, #tpu.memory_space<vmem>>, %arg5: memref<1x16xf32, #tpu.memory_space<vmem>>, %arg6: memref<1x16xf32, #tpu.memory_space<vmem>>, %arg7: memref<16x16xf32, #tpu.memory_space<vmem>>, %arg8: memref<1x16xf32, #tpu.memory_space<vmem>>, %arg9: memref<256x256xf32, #tpu.memory_space<vmem>>, %arg10: memref<16x256xf32, #tpu.memory_space<vmem>>, %arg11: memref<1x256xf32, #tpu.memory_space<vmem>>, %arg12: memref<432x4xf32, #tpu.memory_space<vmem>>, %arg13: memref<16x1xf32, #tpu.memory_space<vmem>>, %arg14: memref<64x512xf32, #tpu.memory_space<vmem>>, %arg15: memref<27x16xf32, #tpu.memory_space<vmem>>, %arg16: memref<1x1xf32, #tpu.memory_space<vmem>>, %arg17: memref<27x64xf32, #tpu.memory_space<vmem>>, %arg18: memref<27x512xf32, #tpu.memory_space<vmem>>, %arg19: memref<1x1x512xf32, #tpu.memory_space<vmem>>, %arg20: memref<4x128xf32, #tpu.memory_space<vmem>>, %arg21: memref<16x768xf32, #tpu.memory_space<vmem>>) attributes {dimension_semantics = [#tpu.dimension_semantics<parallel>], iteration_bounds = array<i64: 2>, scalar_prefetch = 0 : i64, scratch_operands = 2 : i64, tpu.core_type = #tpu.core_type<tc>, window_params = [{transform_indices = @transform_0, window_bounds = array<i64: 1, 4, 64>}, {transform_indices = @transform_1, window_bounds = array<i64: 1, 1, 1>}, {pipeline_mode = #tpu.pipeline_mode<synchronous>, transform_indices = @transform_2, window_bounds = array<i64: 4, 4>}, {pipeline_mode = #tpu.pipeline_mode<synchronous>, transform_indices = @transform_3, window_bounds = array<i64: 4, 1>}, {pipeline_mode = #tpu.pipeline_mode<synchronous>, transform_indices = @transform_4, window_bounds = array<i64: 1, 16>}, {pipeline_mode = #tpu.pipeline_mode<synchronous>, transform_indices = @transform_5, window_bounds = array<i64: 1, 16>}, {pipeline_mode = #tpu.pipeline_mode<synchronous>, transform_indices = @transform_6, window_bounds = array<i64: 16, 16>}, {pipeline_mode = #tpu.pipeline_mode<synchronous>, transform_indices = @transform_7, window_bounds = array<i64: 1, 16>}, {pipeline_mode = #tpu.pipeline_mode<synchronous>, transform_indices = @transform_8, window_bounds = array<i64: 256, 256>}, {pipeline_mode = #tpu.pipeline_mode<synchronous>, transform_indices = @transform_9, window_bounds = array<i64: 16, 256>}, {pipeline_mode = #tpu.pipeline_mode<synchronous>, transform_indices = @transform_10, window_bounds = array<i64: 1, 256>}, {pipeline_mode = #tpu.pipeline_mode<synchronous>, transform_indices = @transform_11, window_bounds = array<i64: 432, 4>}, {pipeline_mode = #tpu.pipeline_mode<synchronous>, transform_indices = @transform_12, window_bounds = array<i64: 16, 1>}, {pipeline_mode = #tpu.pipeline_mode<synchronous>, transform_indices = @transform_13, window_bounds = array<i64: 64, 512>}, {pipeline_mode = #tpu.pipeline_mode<synchronous>, transform_indices = @transform_14, window_bounds = array<i64: 27, 16>}, {pipeline_mode = #tpu.pipeline_mode<synchronous>, transform_indices = @transform_15, window_bounds = array<i64: 1, 1>}, {pipeline_mode = #tpu.pipeline_mode<synchronous>, transform_indices = @transform_16, window_bounds = array<i64: 27, 64>}, {pipeline_mode = #tpu.pipeline_mode<synchronous>, transform_indices = @transform_17, window_bounds = array<i64: 27, 512>}, {transform_indices = @transform_18, window_bounds = array<i64: 1, 1, 512>}]} {
    %cst = arith.constant 0.000000e+00 : f32
    %0 = vector.broadcast %cst : f32 to vector<4x128xf32>
    %c0 = arith.constant 0 : index
    %c0_0 = arith.constant 0 : index
    %1 = vector.load %arg20[%c0, %c0_0] : memref<4x128xf32, #tpu.memory_space<vmem>>, vector<4x128xf32>
    tpu.vector_store %arg20[%c0, %c0_0], %0 {strides = array<i32>} : memref<4x128xf32, #tpu.memory_space<vmem>>, vector<4x128xf32>,
    %cst_1 = arith.constant 0.000000e+00 : f32
    %2 = vector.broadcast %cst_1 : f32 to vector<16x768xf32>
    %c0_2 = arith.constant 0 : index
    %c0_3 = arith.constant 0 : index
    %3 = vector.load %arg21[%c0_2, %c0_3] : memref<16x768xf32, #tpu.memory_space<vmem>>, vector<16x768xf32>
    tpu.vector_store %arg21[%c0_2, %c0_3], %2 {strides = array<i32>} : memref<16x768xf32, #tpu.memory_space<vmem>>, vector<16x768xf32>,
    %c0_4 = arith.constant 0 : index
    %c0_5 = arith.constant 0 : index
    %4 = vector.load %arg3[%c0_4, %c0_5] : memref<4x4xf32, #tpu.memory_space<vmem>>, vector<4x4xf32>
    %c0_6 = arith.constant 0 : index
    %c0_7 = arith.constant 0 : index
    %c0_8 = arith.constant 0 : index
    %5 = vector.load %arg1[%c0_6, %c0_7, %c0_8] : memref<1x4x64xf32, #tpu.memory_space<vmem>>, vector<1x4x64xf32>
    %6 = vector.shape_cast %5 : vector<1x4x64xf32> to vector<4x64xf32>
    %cst_9 = arith.constant dense<0.000000e+00> : vector<4x64xf32>
    %7 = tpu.matmul %4, %6, %cst_9 {dimension_numbers = #tpu.dot_dimension_numbers<[1], [0], [0], [1], [0, 0, 1, 1], [], []>} : vector<4x4xf32>, vector<4x64xf32>, vector<4x64xf32> -> vector<4x64xf32>
    %c0_10 = arith.constant 0 : index
    %c0_11 = arith.constant 0 : index
    %8 = vector.load %arg4[%c0_10, %c0_11] : memref<4x1xf32, #tpu.memory_space<vmem>>, vector<4x1xf32>
    %9 = vector.broadcast %8 : vector<4x1xf32> to vector<4x64xf32>
    %10 = arith.addf %7, %9 : vector<4x64xf32>
    %c0_12 = arith.constant 0 : index
    %c0_13 = arith.constant 0 : index
    %c0_14 = arith.constant 0 : index
    %11 = vector.load %arg2[%c0_12, %c0_13, %c0_14] : memref<1x1x1xf32, #tpu.memory_space<vmem>>, vector<1x1x1xf32>
    %12 = vector.shape_cast %11 : vector<1x1x1xf32> to vector<1x1xf32>
    %c0_15 = arith.constant 0 : index
    %c0_16 = arith.constant 0 : index
    %13 = vector.load %arg5[%c0_15, %c0_16] : memref<1x16xf32, #tpu.memory_space<vmem>>, vector<1x16xf32>
    %14 = vector.broadcast %12 : vector<1x1xf32> to vector<1x16xf32>
    %15 = arith.mulf %14, %13 : vector<1x16xf32>
    %c0_17 = arith.constant 0 : index
    %c0_18 = arith.constant 0 : index
    %16 = vector.load %arg6[%c0_17, %c0_18] : memref<1x16xf32, #tpu.memory_space<vmem>>, vector<1x16xf32>
    %17 = arith.addf %15, %16 : vector<1x16xf32>
    %cst_19 = arith.constant 0.000000e+00 : f32
    %18 = vector.broadcast %cst_19 : f32 to vector<1x16xf32>
    %19 = arith.maximumf %17, %18 : vector<1x16xf32>
    %c0_20 = arith.constant 0 : index
    %c0_21 = arith.constant 0 : index
    %20 = vector.load %arg7[%c0_20, %c0_21] : memref<16x16xf32, #tpu.memory_space<vmem>>, vector<16x16xf32>
    %cst_22 = arith.constant dense<0.000000e+00> : vector<1x16xf32>
    %21 = tpu.matmul %19, %20, %cst_22 {dimension_numbers = #tpu.dot_dimension_numbers<[1], [0], [0], [1], [0, 0, 1, 1], [], []>} : vector<1x16xf32>, vector<16x16xf32>, vector<1x16xf32> -> vector<1x16xf32>
    %c0_23 = arith.constant 0 : index
    %c0_24 = arith.constant 0 : index
    %22 = vector.load %arg8[%c0_23, %c0_24] : memref<1x16xf32, #tpu.memory_space<vmem>>, vector<1x16xf32>
    %23 = arith.addf %21, %22 : vector<1x16xf32>
    %cst_25 = arith.constant 0.000000e+00 : f32
    %24 = vector.broadcast %cst_25 : f32 to vector<1x16xf32>
    %25 = arith.maximumf %23, %24 : vector<1x16xf32>
    %c0_26 = arith.constant 0 : index
    %c0_27 = arith.constant 0 : index
    %26 = vector.load %arg11[%c0_26, %c0_27] : memref<1x256xf32, #tpu.memory_space<vmem>>, vector<1x256xf32>
    %c0_28 = arith.constant 0 : index
    %c0_29 = arith.constant 0 : index
    %27 = vector.load %arg10[%c0_28, %c0_29] : memref<16x256xf32, #tpu.memory_space<vmem>>, vector<16x256xf32>
    %cst_30 = arith.constant dense<0.000000e+00> : vector<1x256xf32>
    %28 = tpu.matmul %25, %27, %cst_30 {dimension_numbers = #tpu.dot_dimension_numbers<[1], [0], [0], [1], [0, 0, 1, 1], [], []>} : vector<1x16xf32>, vector<16x256xf32>, vector<1x256xf32> -> vector<1x256xf32>
    %29 = arith.addf %26, %28 : vector<1x256xf32>
    %30 = vector.extract_strided_slice %10 {offsets = [0, 0], sizes = [1, 64], strides = [1, 1]} : vector<4x64xf32> to vector<1x64xf32>
    %c0_31 = arith.constant 0 : index
    %c0_32 = arith.constant 0 : index
    %31 = vector.load %arg9[%c0_31, %c0_32] : memref<256x256xf32, #tpu.memory_space<vmem>>, vector<64x256xf32>
    %cst_33 = arith.constant dense<0.000000e+00> : vector<1x256xf32>
    %32 = tpu.matmul %30, %31, %cst_33 {dimension_numbers = #tpu.dot_dimension_numbers<[1], [0], [0], [1], [0, 0, 1, 1], [], []>} : vector<1x64xf32>, vector<64x256xf32>, vector<1x256xf32> -> vector<1x256xf32>
    %33 = arith.addf %29, %32 : vector<1x256xf32>
    %34 = vector.extract_strided_slice %10 {offsets = [1, 0], sizes = [1, 64], strides = [1, 1]} : vector<4x64xf32> to vector<1x64xf32>
    %c64 = arith.constant 64 : index
    %c0_34 = arith.constant 0 : index
    %35 = vector.load %arg9[%c64, %c0_34] : memref<256x256xf32, #tpu.memory_space<vmem>>, vector<64x256xf32>
    %cst_35 = arith.constant dense<0.000000e+00> : vector<1x256xf32>
    %36 = tpu.matmul %34, %35, %cst_35 {dimension_numbers = #tpu.dot_dimension_numbers<[1], [0], [0], [1], [0, 0, 1, 1], [], []>} : vector<1x64xf32>, vector<64x256xf32>, vector<1x256xf32> -> vector<1x256xf32>
    %37 = arith.addf %33, %36 : vector<1x256xf32>
    %38 = vector.extract_strided_slice %10 {offsets = [2, 0], sizes = [1, 64], strides = [1, 1]} : vector<4x64xf32> to vector<1x64xf32>
    %c128 = arith.constant 128 : index
    %c0_36 = arith.constant 0 : index
    %39 = vector.load %arg9[%c128, %c0_36] : memref<256x256xf32, #tpu.memory_space<vmem>>, vector<64x256xf32>
    %cst_37 = arith.constant dense<0.000000e+00> : vector<1x256xf32>
    %40 = tpu.matmul %38, %39, %cst_37 {dimension_numbers = #tpu.dot_dimension_numbers<[1], [0], [0], [1], [0, 0, 1, 1], [], []>} : vector<1x64xf32>, vector<64x256xf32>, vector<1x256xf32> -> vector<1x256xf32>
    %41 = arith.addf %37, %40 : vector<1x256xf32>
    %42 = vector.extract_strided_slice %10 {offsets = [3, 0], sizes = [1, 64], strides = [1, 1]} : vector<4x64xf32> to vector<1x64xf32>
    %c192 = arith.constant 192 : index
    %c0_38 = arith.constant 0 : index
    %43 = vector.load %arg9[%c192, %c0_38] : memref<256x256xf32, #tpu.memory_space<vmem>>, vector<64x256xf32>
    %cst_39 = arith.constant dense<0.000000e+00> : vector<1x256xf32>
    %44 = tpu.matmul %42, %43, %cst_39 {dimension_numbers = #tpu.dot_dimension_numbers<[1], [0], [0], [1], [0, 0, 1, 1], [], []>} : vector<1x64xf32>, vector<64x256xf32>, vector<1x256xf32> -> vector<1x256xf32>
    %45 = arith.addf %41, %44 : vector<1x256xf32>
    %46 = vector.extract_strided_slice %45 {offsets = [0, 0], sizes = [1, 64], strides = [1, 1]} : vector<1x256xf32> to vector<1x64xf32>
    %c0_40 = arith.constant 0 : index
    %c32 = arith.constant 32 : index
    %47 = vector.load %arg20[%c0_40, %c32] : memref<4x128xf32, #tpu.memory_space<vmem>>, vector<1x64xf32>
    tpu.vector_store %arg20[%c0_40, %c32], %46 {strides = array<i32>} : memref<4x128xf32, #tpu.memory_space<vmem>>, vector<1x64xf32>,
    %48 = vector.extract_strided_slice %45 {offsets = [0, 64], sizes = [1, 64], strides = [1, 1]} : vector<1x256xf32> to vector<1x64xf32>
    %c1 = arith.constant 1 : index
    %c32_41 = arith.constant 32 : index
    %49 = vector.load %arg20[%c1, %c32_41] : memref<4x128xf32, #tpu.memory_space<vmem>>, vector<1x64xf32>
    tpu.vector_store %arg20[%c1, %c32_41], %48 {strides = array<i32>} : memref<4x128xf32, #tpu.memory_space<vmem>>, vector<1x64xf32>,
    %50 = vector.extract_strided_slice %45 {offsets = [0, 128], sizes = [1, 64], strides = [1, 1]} : vector<1x256xf32> to vector<1x64xf32>
    %c2 = arith.constant 2 : index
    %c32_42 = arith.constant 32 : index
    %51 = vector.load %arg20[%c2, %c32_42] : memref<4x128xf32, #tpu.memory_space<vmem>>, vector<1x64xf32>
    tpu.vector_store %arg20[%c2, %c32_42], %50 {strides = array<i32>} : memref<4x128xf32, #tpu.memory_space<vmem>>, vector<1x64xf32>,
    %52 = vector.extract_strided_slice %45 {offsets = [0, 192], sizes = [1, 64], strides = [1, 1]} : vector<1x256xf32> to vector<1x64xf32>
    %c3 = arith.constant 3 : index
    %c32_43 = arith.constant 32 : index
    %53 = vector.load %arg20[%c3, %c32_43] : memref<4x128xf32, #tpu.memory_space<vmem>>, vector<1x64xf32>
    tpu.vector_store %arg20[%c3, %c32_43], %52 {strides = array<i32>} : memref<4x128xf32, #tpu.memory_space<vmem>>, vector<1x64xf32>,
    %cst_44 = arith.constant 0.000000e+00 : f32
    %54 = vector.broadcast %cst_44 : f32 to vector<16x64xf32>
    %c0_45 = arith.constant 0 : index
    %c11 = arith.constant 11 : index
    %55 = vector.load %arg20[%c0_45, %c11] : memref<4x128xf32, #tpu.memory_space<vmem>>, vector<4x64xf32>
    %c0_46 = arith.constant 0 : index
    %c0_47 = arith.constant 0 : index
    %56 = vector.load %arg17[%c0_46, %c0_47] : memref<27x64xf32, #tpu.memory_space<vmem>>, vector<1x64xf32>
    %57 = vector.broadcast %56 : vector<1x64xf32> to vector<4x64xf32>
    %58 = arith.mulf %55, %57 : vector<4x64xf32>
    %c0_48 = arith.constant 0 : index
    %c0_49 = arith.constant 0 : index
    %59 = vector.load %arg12[%c0_48, %c0_49] : memref<432x4xf32, #tpu.memory_space<vmem>>, vector<16x4xf32>
    %cst_50 = arith.constant dense<0.000000e+00> : vector<16x64xf32>
    %60 = tpu.matmul %59, %58, %cst_50 {dimension_numbers = #tpu.dot_dimension_numbers<[1], [0], [0], [1], [0, 0, 1, 1], [], []>} : vector<16x4xf32>, vector<4x64xf32>, vector<16x64xf32> -> vector<16x64xf32>
    %61 = arith.addf %54, %60 : vector<16x64xf32>
    %c0_51 = arith.constant 0 : index
    %c12 = arith.constant 12 : index
    %62 = vector.load %arg20[%c0_51, %c12] : memref<4x128xf32, #tpu.memory_space<vmem>>, vector<4x64xf32>
    %c1_52 = arith.constant 1 : index
    %c0_53 = arith.constant 0 : index
    %63 = vector.load %arg17[%c1_52, %c0_53] : memref<27x64xf32, #tpu.memory_space<vmem>>, vector<1x64xf32>
    %64 = vector.broadcast %63 : vector<1x64xf32> to vector<4x64xf32>
    %65 = arith.mulf %62, %64 : vector<4x64xf32>
    %c16 = arith.constant 16 : index
    %c0_54 = arith.constant 0 : index
    %66 = vector.load %arg12[%c16, %c0_54] : memref<432x4xf32, #tpu.memory_space<vmem>>, vector<16x4xf32>
    %cst_55 = arith.constant dense<0.000000e+00> : vector<16x64xf32>
    %67 = tpu.matmul %66, %65, %cst_55 {dimension_numbers = #tpu.dot_dimension_numbers<[1], [0], [0], [1], [0, 0, 1, 1], [], []>} : vector<16x4xf32>, vector<4x64xf32>, vector<16x64xf32> -> vector<16x64xf32>
    %68 = arith.addf %61, %67 : vector<16x64xf32>
    %c0_56 = arith.constant 0 : index
    %c13 = arith.constant 13 : index
    %69 = vector.load %arg20[%c0_56, %c13] : memref<4x128xf32, #tpu.memory_space<vmem>>, vector<4x64xf32>
    %c2_57 = arith.constant 2 : index
    %c0_58 = arith.constant 0 : index
    %70 = vector.load %arg17[%c2_57, %c0_58] : memref<27x64xf32, #tpu.memory_space<vmem>>, vector<1x64xf32>
    %71 = vector.broadcast %70 : vector<1x64xf32> to vector<4x64xf32>
    %72 = arith.mulf %69, %71 : vector<4x64xf32>
    %c32_59 = arith.constant 32 : index
    %c0_60 = arith.constant 0 : index
    %73 = vector.load %arg12[%c32_59, %c0_60] : memref<432x4xf32, #tpu.memory_space<vmem>>, vector<16x4xf32>
    %cst_61 = arith.constant dense<0.000000e+00> : vector<16x64xf32>
    %74 = tpu.matmul %73, %72, %cst_61 {dimension_numbers = #tpu.dot_dimension_numbers<[1], [0], [0], [1], [0, 0, 1, 1], [], []>} : vector<16x4xf32>, vector<4x64xf32>, vector<16x64xf32> -> vector<16x64xf32>
    %75 = arith.addf %68, %74 : vector<16x64xf32>
    %c0_62 = arith.constant 0 : index
    %c15 = arith.constant 15 : index
    %76 = vector.load %arg20[%c0_62, %c15] : memref<4x128xf32, #tpu.memory_space<vmem>>, vector<4x64xf32>
    %c3_63 = arith.constant 3 : index
    %c0_64 = arith.constant 0 : index
    %77 = vector.load %arg17[%c3_63, %c0_64] : memref<27x64xf32, #tpu.memory_space<vmem>>, vector<1x64xf32>
    %78 = vector.broadcast %77 : vector<1x64xf32> to vector<4x64xf32>
    %79 = arith.mulf %76, %78 : vector<4x64xf32>
    %c48 = arith.constant 48 : index
    %c0_65 = arith.constant 0 : index
    %80 = vector.load %arg12[%c48, %c0_65] : memref<432x4xf32, #tpu.memory_space<vmem>>, vector<16x4xf32>
    %cst_66 = arith.constant dense<0.000000e+00> : vector<16x64xf32>
    %81 = tpu.matmul %80, %79, %cst_66 {dimension_numbers = #tpu.dot_dimension_numbers<[1], [0], [0], [1], [0, 0, 1, 1], [], []>} : vector<16x4xf32>, vector<4x64xf32>, vector<16x64xf32> -> vector<16x64xf32>
    %82 = arith.addf %75, %81 : vector<16x64xf32>
    %c0_67 = arith.constant 0 : index
    %c16_68 = arith.constant 16 : index
    %83 = vector.load %arg20[%c0_67, %c16_68] : memref<4x128xf32, #tpu.memory_space<vmem>>, vector<4x64xf32>
    %c4 = arith.constant 4 : index
    %c0_69 = arith.constant 0 : index
    %84 = vector.load %arg17[%c4, %c0_69] : memref<27x64xf32, #tpu.memory_space<vmem>>, vector<1x64xf32>
    %85 = vector.broadcast %84 : vector<1x64xf32> to vector<4x64xf32>
    %86 = arith.mulf %83, %85 : vector<4x64xf32>
    %c64_70 = arith.constant 64 : index
    %c0_71 = arith.constant 0 : index
    %87 = vector.load %arg12[%c64_70, %c0_71] : memref<432x4xf32, #tpu.memory_space<vmem>>, vector<16x4xf32>
    %cst_72 = arith.constant dense<0.000000e+00> : vector<16x64xf32>
    %88 = tpu.matmul %87, %86, %cst_72 {dimension_numbers = #tpu.dot_dimension_numbers<[1], [0], [0], [1], [0, 0, 1, 1], [], []>} : vector<16x4xf32>, vector<4x64xf32>, vector<16x64xf32> -> vector<16x64xf32>
    %89 = arith.addf %82, %88 : vector<16x64xf32>
    %c0_73 = arith.constant 0 : index
    %c17 = arith.constant 17 : index
    %90 = vector.load %arg20[%c0_73, %c17] : memref<4x128xf32, #tpu.memory_space<vmem>>, vector<4x64xf32>
    %c5 = arith.constant 5 : index
    %c0_74 = arith.constant 0 : index
    %91 = vector.load %arg17[%c5, %c0_74] : memref<27x64xf32, #tpu.memory_space<vmem>>, vector<1x64xf32>
    %92 = vector.broadcast %91 : vector<1x64xf32> to vector<4x64xf32>
    %93 = arith.mulf %90, %92 : vector<4x64xf32>
    %c80 = arith.constant 80 : index
    %c0_75 = arith.constant 0 : index
    %94 = vector.load %arg12[%c80, %c0_75] : memref<432x4xf32, #tpu.memory_space<vmem>>, vector<16x4xf32>
    %cst_76 = arith.constant dense<0.000000e+00> : vector<16x64xf32>
    %95 = tpu.matmul %94, %93, %cst_76 {dimension_numbers = #tpu.dot_dimension_numbers<[1], [0], [0], [1], [0, 0, 1, 1], [], []>} : vector<16x4xf32>, vector<4x64xf32>, vector<16x64xf32> -> vector<16x64xf32>
    %96 = arith.addf %89, %95 : vector<16x64xf32>
    %c0_77 = arith.constant 0 : index
    %c19 = arith.constant 19 : index
    %97 = vector.load %arg20[%c0_77, %c19] : memref<4x128xf32, #tpu.memory_space<vmem>>, vector<4x64xf32>
    %c6 = arith.constant 6 : index
    %c0_78 = arith.constant 0 : index
    %98 = vector.load %arg17[%c6, %c0_78] : memref<27x64xf32, #tpu.memory_space<vmem>>, vector<1x64xf32>
    %99 = vector.broadcast %98 : vector<1x64xf32> to vector<4x64xf32>
    %100 = arith.mulf %97, %99 : vector<4x64xf32>
    %c96 = arith.constant 96 : index
    %c0_79 = arith.constant 0 : index
    %101 = vector.load %arg12[%c96, %c0_79] : memref<432x4xf32, #tpu.memory_space<vmem>>, vector<16x4xf32>
    %cst_80 = arith.constant dense<0.000000e+00> : vector<16x64xf32>
    %102 = tpu.matmul %101, %100, %cst_80 {dimension_numbers = #tpu.dot_dimension_numbers<[1], [0], [0], [1], [0, 0, 1, 1], [], []>} : vector<16x4xf32>, vector<4x64xf32>, vector<16x64xf32> -> vector<16x64xf32>
    %103 = arith.addf %96, %102 : vector<16x64xf32>
    %c0_81 = arith.constant 0 : index
    %c20 = arith.constant 20 : index
    %104 = vector.load %arg20[%c0_81, %c20] : memref<4x128xf32, #tpu.memory_space<vmem>>, vector<4x64xf32>
    %c7 = arith.constant 7 : index
    %c0_82 = arith.constant 0 : index
    %105 = vector.load %arg17[%c7, %c0_82] : memref<27x64xf32, #tpu.memory_space<vmem>>, vector<1x64xf32>
    %106 = vector.broadcast %105 : vector<1x64xf32> to vector<4x64xf32>
    %107 = arith.mulf %104, %106 : vector<4x64xf32>
    %c112 = arith.constant 112 : index
    %c0_83 = arith.constant 0 : index
    %108 = vector.load %arg12[%c112, %c0_83] : memref<432x4xf32, #tpu.memory_space<vmem>>, vector<16x4xf32>
    %cst_84 = arith.constant dense<0.000000e+00> : vector<16x64xf32>
    %109 = tpu.matmul %108, %107, %cst_84 {dimension_numbers = #tpu.dot_dimension_numbers<[1], [0], [0], [1], [0, 0, 1, 1], [], []>} : vector<16x4xf32>, vector<4x64xf32>, vector<16x64xf32> -> vector<16x64xf32>
    %110 = arith.addf %103, %109 : vector<16x64xf32>
    %c0_85 = arith.constant 0 : index
    %c21 = arith.constant 21 : index
    %111 = vector.load %arg20[%c0_85, %c21] : memref<4x128xf32, #tpu.memory_space<vmem>>, vector<4x64xf32>
    %c8 = arith.constant 8 : index
    %c0_86 = arith.constant 0 : index
    %112 = vector.load %arg17[%c8, %c0_86] : memref<27x64xf32, #tpu.memory_space<vmem>>, vector<1x64xf32>
    %113 = vector.broadcast %112 : vector<1x64xf32> to vector<4x64xf32>
    %114 = arith.mulf %111, %113 : vector<4x64xf32>
    %c128_87 = arith.constant 128 : index
    %c0_88 = arith.constant 0 : index
    %115 = vector.load %arg12[%c128_87, %c0_88] : memref<432x4xf32, #tpu.memory_space<vmem>>, vector<16x4xf32>
    %cst_89 = arith.constant dense<0.000000e+00> : vector<16x64xf32>
    %116 = tpu.matmul %115, %114, %cst_89 {dimension_numbers = #tpu.dot_dimension_numbers<[1], [0], [0], [1], [0, 0, 1, 1], [], []>} : vector<16x4xf32>, vector<4x64xf32>, vector<16x64xf32> -> vector<16x64xf32>
    %117 = arith.addf %110, %116 : vector<16x64xf32>
    %c0_90 = arith.constant 0 : index
    %c27 = arith.constant 27 : index
    %118 = vector.load %arg20[%c0_90, %c27] : memref<4x128xf32, #tpu.memory_space<vmem>>, vector<4x64xf32>
    %c9 = arith.constant 9 : index
    %c0_91 = arith.constant 0 : index
    %119 = vector.load %arg17[%c9, %c0_91] : memref<27x64xf32, #tpu.memory_space<vmem>>, vector<1x64xf32>
    %120 = vector.broadcast %119 : vector<1x64xf32> to vector<4x64xf32>
    %121 = arith.mulf %118, %120 : vector<4x64xf32>
    %c144 = arith.constant 144 : index
    %c0_92 = arith.constant 0 : index
    %122 = vector.load %arg12[%c144, %c0_92] : memref<432x4xf32, #tpu.memory_space<vmem>>, vector<16x4xf32>
    %cst_93 = arith.constant dense<0.000000e+00> : vector<16x64xf32>
    %123 = tpu.matmul %122, %121, %cst_93 {dimension_numbers = #tpu.dot_dimension_numbers<[1], [0], [0], [1], [0, 0, 1, 1], [], []>} : vector<16x4xf32>, vector<4x64xf32>, vector<16x64xf32> -> vector<16x64xf32>
    %124 = arith.addf %117, %123 : vector<16x64xf32>
    %c0_94 = arith.constant 0 : index
    %c28 = arith.constant 28 : index
    %125 = vector.load %arg20[%c0_94, %c28] : memref<4x128xf32, #tpu.memory_space<vmem>>, vector<4x64xf32>
    %c10 = arith.constant 10 : index
    %c0_95 = arith.constant 0 : index
    %126 = vector.load %arg17[%c10, %c0_95] : memref<27x64xf32, #tpu.memory_space<vmem>>, vector<1x64xf32>
    %127 = vector.broadcast %126 : vector<1x64xf32> to vector<4x64xf32>
    %128 = arith.mulf %125, %127 : vector<4x64xf32>
    %c160 = arith.constant 160 : index
    %c0_96 = arith.constant 0 : index
    %129 = vector.load %arg12[%c160, %c0_96] : memref<432x4xf32, #tpu.memory_space<vmem>>, vector<16x4xf32>
    %cst_97 = arith.constant dense<0.000000e+00> : vector<16x64xf32>
    %130 = tpu.matmul %129, %128, %cst_97 {dimension_numbers = #tpu.dot_dimension_numbers<[1], [0], [0], [1], [0, 0, 1, 1], [], []>} : vector<16x4xf32>, vector<4x64xf32>, vector<16x64xf32> -> vector<16x64xf32>
    %131 = arith.addf %124, %130 : vector<16x64xf32>
    %c0_98 = arith.constant 0 : index
    %c29 = arith.constant 29 : index
    %132 = vector.load %arg20[%c0_98, %c29] : memref<4x128xf32, #tpu.memory_space<vmem>>, vector<4x64xf32>
    %c11_99 = arith.constant 11 : index
    %c0_100 = arith.constant 0 : index
    %133 = vector.load %arg17[%c11_99, %c0_100] : memref<27x64xf32, #tpu.memory_space<vmem>>, vector<1x64xf32>
    %134 = vector.broadcast %133 : vector<1x64xf32> to vector<4x64xf32>
    %135 = arith.mulf %132, %134 : vector<4x64xf32>
    %c176 = arith.constant 176 : index
    %c0_101 = arith.constant 0 : index
    %136 = vector.load %arg12[%c176, %c0_101] : memref<432x4xf32, #tpu.memory_space<vmem>>, vector<16x4xf32>
    %cst_102 = arith.constant dense<0.000000e+00> : vector<16x64xf32>
    %137 = tpu.matmul %136, %135, %cst_102 {dimension_numbers = #tpu.dot_dimension_numbers<[1], [0], [0], [1], [0, 0, 1, 1], [], []>} : vector<16x4xf32>, vector<4x64xf32>, vector<16x64xf32> -> vector<16x64xf32>
    %138 = arith.addf %131, %137 : vector<16x64xf32>
    %c0_103 = arith.constant 0 : index
    %c31 = arith.constant 31 : index
    %139 = vector.load %arg20[%c0_103, %c31] : memref<4x128xf32, #tpu.memory_space<vmem>>, vector<4x64xf32>
    %c12_104 = arith.constant 12 : index
    %c0_105 = arith.constant 0 : index
    %140 = vector.load %arg17[%c12_104, %c0_105] : memref<27x64xf32, #tpu.memory_space<vmem>>, vector<1x64xf32>
    %141 = vector.broadcast %140 : vector<1x64xf32> to vector<4x64xf32>
    %142 = arith.mulf %139, %141 : vector<4x64xf32>
    %c192_106 = arith.constant 192 : index
    %c0_107 = arith.constant 0 : index
    %143 = vector.load %arg12[%c192_106, %c0_107] : memref<432x4xf32, #tpu.memory_space<vmem>>, vector<16x4xf32>
    %cst_108 = arith.constant dense<0.000000e+00> : vector<16x64xf32>
    %144 = tpu.matmul %143, %142, %cst_108 {dimension_numbers = #tpu.dot_dimension_numbers<[1], [0], [0], [1], [0, 0, 1, 1], [], []>} : vector<16x4xf32>, vector<4x64xf32>, vector<16x64xf32> -> vector<16x64xf32>
    %145 = arith.addf %138, %144 : vector<16x64xf32>
    %c0_109 = arith.constant 0 : index
    %c32_110 = arith.constant 32 : index
    %146 = vector.load %arg20[%c0_109, %c32_110] : memref<4x128xf32, #tpu.memory_space<vmem>>, vector<4x64xf32>
    %c13_111 = arith.constant 13 : index
    %c0_112 = arith.constant 0 : index
    %147 = vector.load %arg17[%c13_111, %c0_112] : memref<27x64xf32, #tpu.memory_space<vmem>>, vector<1x64xf32>
    %148 = vector.broadcast %147 : vector<1x64xf32> to vector<4x64xf32>
    %149 = arith.mulf %146, %148 : vector<4x64xf32>
    %c208 = arith.constant 208 : index
    %c0_113 = arith.constant 0 : index
    %150 = vector.load %arg12[%c208, %c0_113] : memref<432x4xf32, #tpu.memory_space<vmem>>, vector<16x4xf32>
    %cst_114 = arith.constant dense<0.000000e+00> : vector<16x64xf32>
    %151 = tpu.matmul %150, %149, %cst_114 {dimension_numbers = #tpu.dot_dimension_numbers<[1], [0], [0], [1], [0, 0, 1, 1], [], []>} : vector<16x4xf32>, vector<4x64xf32>, vector<16x64xf32> -> vector<16x64xf32>
    %152 = arith.addf %145, %151 : vector<16x64xf32>
    %c0_115 = arith.constant 0 : index
    %c33 = arith.constant 33 : index
    %153 = vector.load %arg20[%c0_115, %c33] : memref<4x128xf32, #tpu.memory_space<vmem>>, vector<4x64xf32>
    %c14 = arith.constant 14 : index
    %c0_116 = arith.constant 0 : index
    %154 = vector.load %arg17[%c14, %c0_116] : memref<27x64xf32, #tpu.memory_space<vmem>>, vector<1x64xf32>
    %155 = vector.broadcast %154 : vector<1x64xf32> to vector<4x64xf32>
    %156 = arith.mulf %153, %155 : vector<4x64xf32>
    %c224 = arith.constant 224 : index
    %c0_117 = arith.constant 0 : index
    %157 = vector.load %arg12[%c224, %c0_117] : memref<432x4xf32, #tpu.memory_space<vmem>>, vector<16x4xf32>
    %cst_118 = arith.constant dense<0.000000e+00> : vector<16x64xf32>
    %158 = tpu.matmul %157, %156, %cst_118 {dimension_numbers = #tpu.dot_dimension_numbers<[1], [0], [0], [1], [0, 0, 1, 1], [], []>} : vector<16x4xf32>, vector<4x64xf32>, vector<16x64xf32> -> vector<16x64xf32>
    %159 = arith.addf %152, %158 : vector<16x64xf32>
    %c0_119 = arith.constant 0 : index
    %c35 = arith.constant 35 : index
    %160 = vector.load %arg20[%c0_119, %c35] : memref<4x128xf32, #tpu.memory_space<vmem>>, vector<4x64xf32>
    %c15_120 = arith.constant 15 : index
    %c0_121 = arith.constant 0 : index
    %161 = vector.load %arg17[%c15_120, %c0_121] : memref<27x64xf32, #tpu.memory_space<vmem>>, vector<1x64xf32>
    %162 = vector.broadcast %161 : vector<1x64xf32> to vector<4x64xf32>
    %163 = arith.mulf %160, %162 : vector<4x64xf32>
    %c240 = arith.constant 240 : index
    %c0_122 = arith.constant 0 : index
    %164 = vector.load %arg12[%c240, %c0_122] : memref<432x4xf32, #tpu.memory_space<vmem>>, vector<16x4xf32>
    %cst_123 = arith.constant dense<0.000000e+00> : vector<16x64xf32>
    %165 = tpu.matmul %164, %163, %cst_123 {dimension_numbers = #tpu.dot_dimension_numbers<[1], [0], [0], [1], [0, 0, 1, 1], [], []>} : vector<16x4xf32>, vector<4x64xf32>, vector<16x64xf32> -> vector<16x64xf32>
    %166 = arith.addf %159, %165 : vector<16x64xf32>
    %c0_124 = arith.constant 0 : index
    %c36 = arith.constant 36 : index
    %167 = vector.load %arg20[%c0_124, %c36] : memref<4x128xf32, #tpu.memory_space<vmem>>, vector<4x64xf32>
    %c16_125 = arith.constant 16 : index
    %c0_126 = arith.constant 0 : index
    %168 = vector.load %arg17[%c16_125, %c0_126] : memref<27x64xf32, #tpu.memory_space<vmem>>, vector<1x64xf32>
    %169 = vector.broadcast %168 : vector<1x64xf32> to vector<4x64xf32>
    %170 = arith.mulf %167, %169 : vector<4x64xf32>
    %c256 = arith.constant 256 : index
    %c0_127 = arith.constant 0 : index
    %171 = vector.load %arg12[%c256, %c0_127] : memref<432x4xf32, #tpu.memory_space<vmem>>, vector<16x4xf32>
    %cst_128 = arith.constant dense<0.000000e+00> : vector<16x64xf32>
    %172 = tpu.matmul %171, %170, %cst_128 {dimension_numbers = #tpu.dot_dimension_numbers<[1], [0], [0], [1], [0, 0, 1, 1], [], []>} : vector<16x4xf32>, vector<4x64xf32>, vector<16x64xf32> -> vector<16x64xf32>
    %173 = arith.addf %166, %172 : vector<16x64xf32>
    %c0_129 = arith.constant 0 : index
    %c37 = arith.constant 37 : index
    %174 = vector.load %arg20[%c0_129, %c37] : memref<4x128xf32, #tpu.memory_space<vmem>>, vector<4x64xf32>
    %c17_130 = arith.constant 17 : index
    %c0_131 = arith.constant 0 : index
    %175 = vector.load %arg17[%c17_130, %c0_131] : memref<27x64xf32, #tpu.memory_space<vmem>>, vector<1x64xf32>
    %176 = vector.broadcast %175 : vector<1x64xf32> to vector<4x64xf32>
    %177 = arith.mulf %174, %176 : vector<4x64xf32>
    %c272 = arith.constant 272 : index
    %c0_132 = arith.constant 0 : index
    %178 = vector.load %arg12[%c272, %c0_132] : memref<432x4xf32, #tpu.memory_space<vmem>>, vector<16x4xf32>
    %cst_133 = arith.constant dense<0.000000e+00> : vector<16x64xf32>
    %179 = tpu.matmul %178, %177, %cst_133 {dimension_numbers = #tpu.dot_dimension_numbers<[1], [0], [0], [1], [0, 0, 1, 1], [], []>} : vector<16x4xf32>, vector<4x64xf32>, vector<16x64xf32> -> vector<16x64xf32>
    %180 = arith.addf %173, %179 : vector<16x64xf32>
    %c0_134 = arith.constant 0 : index
    %c43 = arith.constant 43 : index
    %181 = vector.load %arg20[%c0_134, %c43] : memref<4x128xf32, #tpu.memory_space<vmem>>, vector<4x64xf32>
    %c18 = arith.constant 18 : index
    %c0_135 = arith.constant 0 : index
    %182 = vector.load %arg17[%c18, %c0_135] : memref<27x64xf32, #tpu.memory_space<vmem>>, vector<1x64xf32>
    %183 = vector.broadcast %182 : vector<1x64xf32> to vector<4x64xf32>
    %184 = arith.mulf %181, %183 : vector<4x64xf32>
    %c288 = arith.constant 288 : index
    %c0_136 = arith.constant 0 : index
    %185 = vector.load %arg12[%c288, %c0_136] : memref<432x4xf32, #tpu.memory_space<vmem>>, vector<16x4xf32>
    %cst_137 = arith.constant dense<0.000000e+00> : vector<16x64xf32>
    %186 = tpu.matmul %185, %184, %cst_137 {dimension_numbers = #tpu.dot_dimension_numbers<[1], [0], [0], [1], [0, 0, 1, 1], [], []>} : vector<16x4xf32>, vector<4x64xf32>, vector<16x64xf32> -> vector<16x64xf32>
    %187 = arith.addf %180, %186 : vector<16x64xf32>
    %c0_138 = arith.constant 0 : index
    %c44 = arith.constant 44 : index
    %188 = vector.load %arg20[%c0_138, %c44] : memref<4x128xf32, #tpu.memory_space<vmem>>, vector<4x64xf32>
    %c19_139 = arith.constant 19 : index
    %c0_140 = arith.constant 0 : index
    %189 = vector.load %arg17[%c19_139, %c0_140] : memref<27x64xf32, #tpu.memory_space<vmem>>, vector<1x64xf32>
    %190 = vector.broadcast %189 : vector<1x64xf32> to vector<4x64xf32>
    %191 = arith.mulf %188, %190 : vector<4x64xf32>
    %c304 = arith.constant 304 : index
    %c0_141 = arith.constant 0 : index
    %192 = vector.load %arg12[%c304, %c0_141] : memref<432x4xf32, #tpu.memory_space<vmem>>, vector<16x4xf32>
    %cst_142 = arith.constant dense<0.000000e+00> : vector<16x64xf32>
    %193 = tpu.matmul %192, %191, %cst_142 {dimension_numbers = #tpu.dot_dimension_numbers<[1], [0], [0], [1], [0, 0, 1, 1], [], []>} : vector<16x4xf32>, vector<4x64xf32>, vector<16x64xf32> -> vector<16x64xf32>
    %194 = arith.addf %187, %193 : vector<16x64xf32>
    %c0_143 = arith.constant 0 : index
    %c45 = arith.constant 45 : index
    %195 = vector.load %arg20[%c0_143, %c45] : memref<4x128xf32, #tpu.memory_space<vmem>>, vector<4x64xf32>
    %c20_144 = arith.constant 20 : index
    %c0_145 = arith.constant 0 : index
    %196 = vector.load %arg17[%c20_144, %c0_145] : memref<27x64xf32, #tpu.memory_space<vmem>>, vector<1x64xf32>
    %197 = vector.broadcast %196 : vector<1x64xf32> to vector<4x64xf32>
    %198 = arith.mulf %195, %197 : vector<4x64xf32>
    %c320 = arith.constant 320 : index
    %c0_146 = arith.constant 0 : index
    %199 = vector.load %arg12[%c320, %c0_146] : memref<432x4xf32, #tpu.memory_space<vmem>>, vector<16x4xf32>
    %cst_147 = arith.constant dense<0.000000e+00> : vector<16x64xf32>
    %200 = tpu.matmul %199, %198, %cst_147 {dimension_numbers = #tpu.dot_dimension_numbers<[1], [0], [0], [1], [0, 0, 1, 1], [], []>} : vector<16x4xf32>, vector<4x64xf32>, vector<16x64xf32> -> vector<16x64xf32>
    %201 = arith.addf %194, %200 : vector<16x64xf32>
    %c0_148 = arith.constant 0 : index
    %c47 = arith.constant 47 : index
    %202 = vector.load %arg20[%c0_148, %c47] : memref<4x128xf32, #tpu.memory_space<vmem>>, vector<4x64xf32>
    %c21_149 = arith.constant 21 : index
    %c0_150 = arith.constant 0 : index
    %203 = vector.load %arg17[%c21_149, %c0_150] : memref<27x64xf32, #tpu.memory_space<vmem>>, vector<1x64xf32>
    %204 = vector.broadcast %203 : vector<1x64xf32> to vector<4x64xf32>
    %205 = arith.mulf %202, %204 : vector<4x64xf32>
    %c336 = arith.constant 336 : index
    %c0_151 = arith.constant 0 : index
    %206 = vector.load %arg12[%c336, %c0_151] : memref<432x4xf32, #tpu.memory_space<vmem>>, vector<16x4xf32>
    %cst_152 = arith.constant dense<0.000000e+00> : vector<16x64xf32>
    %207 = tpu.matmul %206, %205, %cst_152 {dimension_numbers = #tpu.dot_dimension_numbers<[1], [0], [0], [1], [0, 0, 1, 1], [], []>} : vector<16x4xf32>, vector<4x64xf32>, vector<16x64xf32> -> vector<16x64xf32>
    %208 = arith.addf %201, %207 : vector<16x64xf32>
    %c0_153 = arith.constant 0 : index
    %c48_154 = arith.constant 48 : index
    %209 = vector.load %arg20[%c0_153, %c48_154] : memref<4x128xf32, #tpu.memory_space<vmem>>, vector<4x64xf32>
    %c22 = arith.constant 22 : index
    %c0_155 = arith.constant 0 : index
    %210 = vector.load %arg17[%c22, %c0_155] : memref<27x64xf32, #tpu.memory_space<vmem>>, vector<1x64xf32>
    %211 = vector.broadcast %210 : vector<1x64xf32> to vector<4x64xf32>
    %212 = arith.mulf %209, %211 : vector<4x64xf32>
    %c352 = arith.constant 352 : index
    %c0_156 = arith.constant 0 : index
    %213 = vector.load %arg12[%c352, %c0_156] : memref<432x4xf32, #tpu.memory_space<vmem>>, vector<16x4xf32>
    %cst_157 = arith.constant dense<0.000000e+00> : vector<16x64xf32>
    %214 = tpu.matmul %213, %212, %cst_157 {dimension_numbers = #tpu.dot_dimension_numbers<[1], [0], [0], [1], [0, 0, 1, 1], [], []>} : vector<16x4xf32>, vector<4x64xf32>, vector<16x64xf32> -> vector<16x64xf32>
    %215 = arith.addf %208, %214 : vector<16x64xf32>
    %c0_158 = arith.constant 0 : index
    %c49 = arith.constant 49 : index
    %216 = vector.load %arg20[%c0_158, %c49] : memref<4x128xf32, #tpu.memory_space<vmem>>, vector<4x64xf32>
    %c23 = arith.constant 23 : index
    %c0_159 = arith.constant 0 : index
    %217 = vector.load %arg17[%c23, %c0_159] : memref<27x64xf32, #tpu.memory_space<vmem>>, vector<1x64xf32>
    %218 = vector.broadcast %217 : vector<1x64xf32> to vector<4x64xf32>
    %219 = arith.mulf %216, %218 : vector<4x64xf32>
    %c368 = arith.constant 368 : index
    %c0_160 = arith.constant 0 : index
    %220 = vector.load %arg12[%c368, %c0_160] : memref<432x4xf32, #tpu.memory_space<vmem>>, vector<16x4xf32>
    %cst_161 = arith.constant dense<0.000000e+00> : vector<16x64xf32>
    %221 = tpu.matmul %220, %219, %cst_161 {dimension_numbers = #tpu.dot_dimension_numbers<[1], [0], [0], [1], [0, 0, 1, 1], [], []>} : vector<16x4xf32>, vector<4x64xf32>, vector<16x64xf32> -> vector<16x64xf32>
    %222 = arith.addf %215, %221 : vector<16x64xf32>
    %c0_162 = arith.constant 0 : index
    %c51 = arith.constant 51 : index
    %223 = vector.load %arg20[%c0_162, %c51] : memref<4x128xf32, #tpu.memory_space<vmem>>, vector<4x64xf32>
    %c24 = arith.constant 24 : index
    %c0_163 = arith.constant 0 : index
    %224 = vector.load %arg17[%c24, %c0_163] : memref<27x64xf32, #tpu.memory_space<vmem>>, vector<1x64xf32>
    %225 = vector.broadcast %224 : vector<1x64xf32> to vector<4x64xf32>
    %226 = arith.mulf %223, %225 : vector<4x64xf32>
    %c384 = arith.constant 384 : index
    %c0_164 = arith.constant 0 : index
    %227 = vector.load %arg12[%c384, %c0_164] : memref<432x4xf32, #tpu.memory_space<vmem>>, vector<16x4xf32>
    %cst_165 = arith.constant dense<0.000000e+00> : vector<16x64xf32>
    %228 = tpu.matmul %227, %226, %cst_165 {dimension_numbers = #tpu.dot_dimension_numbers<[1], [0], [0], [1], [0, 0, 1, 1], [], []>} : vector<16x4xf32>, vector<4x64xf32>, vector<16x64xf32> -> vector<16x64xf32>
    %229 = arith.addf %222, %228 : vector<16x64xf32>
    %c0_166 = arith.constant 0 : index
    %c52 = arith.constant 52 : index
    %230 = vector.load %arg20[%c0_166, %c52] : memref<4x128xf32, #tpu.memory_space<vmem>>, vector<4x64xf32>
    %c25 = arith.constant 25 : index
    %c0_167 = arith.constant 0 : index
    %231 = vector.load %arg17[%c25, %c0_167] : memref<27x64xf32, #tpu.memory_space<vmem>>, vector<1x64xf32>
    %232 = vector.broadcast %231 : vector<1x64xf32> to vector<4x64xf32>
    %233 = arith.mulf %230, %232 : vector<4x64xf32>
    %c400 = arith.constant 400 : index
    %c0_168 = arith.constant 0 : index
    %234 = vector.load %arg12[%c400, %c0_168] : memref<432x4xf32, #tpu.memory_space<vmem>>, vector<16x4xf32>
    %cst_169 = arith.constant dense<0.000000e+00> : vector<16x64xf32>
    %235 = tpu.matmul %234, %233, %cst_169 {dimension_numbers = #tpu.dot_dimension_numbers<[1], [0], [0], [1], [0, 0, 1, 1], [], []>} : vector<16x4xf32>, vector<4x64xf32>, vector<16x64xf32> -> vector<16x64xf32>
    %236 = arith.addf %229, %235 : vector<16x64xf32>
    %c0_170 = arith.constant 0 : index
    %c53 = arith.constant 53 : index
    %237 = vector.load %arg20[%c0_170, %c53] : memref<4x128xf32, #tpu.memory_space<vmem>>, vector<4x64xf32>
    %c26 = arith.constant 26 : index
    %c0_171 = arith.constant 0 : index
    %238 = vector.load %arg17[%c26, %c0_171] : memref<27x64xf32, #tpu.memory_space<vmem>>, vector<1x64xf32>
    %239 = vector.broadcast %238 : vector<1x64xf32> to vector<4x64xf32>
    %240 = arith.mulf %237, %239 : vector<4x64xf32>
    %c416 = arith.constant 416 : index
    %c0_172 = arith.constant 0 : index
    %241 = vector.load %arg12[%c416, %c0_172] : memref<432x4xf32, #tpu.memory_space<vmem>>, vector<16x4xf32>
    %cst_173 = arith.constant dense<0.000000e+00> : vector<16x64xf32>
    %242 = tpu.matmul %241, %240, %cst_173 {dimension_numbers = #tpu.dot_dimension_numbers<[1], [0], [0], [1], [0, 0, 1, 1], [], []>} : vector<16x4xf32>, vector<4x64xf32>, vector<16x64xf32> -> vector<16x64xf32>
    %243 = arith.addf %236, %242 : vector<16x64xf32>
    %c0_174 = arith.constant 0 : index
    %c0_175 = arith.constant 0 : index
    %244 = vector.load %arg13[%c0_174, %c0_175] : memref<16x1xf32, #tpu.memory_space<vmem>>, vector<16x1xf32>
    %245 = vector.broadcast %244 : vector<16x1xf32> to vector<16x64xf32>
    %246 = arith.addf %243, %245 : vector<16x64xf32>
    %cst_176 = arith.constant 0.000000e+00 : f32
    %247 = vector.broadcast %cst_176 : f32 to vector<16x64xf32>
    %248 = arith.maximumf %246, %247 : vector<16x64xf32>
    %c0_177 = arith.constant 0 : index
    %c0_178 = arith.constant 0 : index
    %249 = vector.load %arg14[%c0_177, %c0_178] : memref<64x512xf32, #tpu.memory_space<vmem>>, vector<64x512xf32>
    %cst_179 = arith.constant dense<0.000000e+00> : vector<16x512xf32>
    %250 = tpu.matmul %248, %249, %cst_179 {dimension_numbers = #tpu.dot_dimension_numbers<[1], [0], [0], [1], [0, 0, 1, 1], [], []>} : vector<16x64xf32>, vector<64x512xf32>, vector<16x512xf32> -> vector<16x512xf32>
    %c0_180 = arith.constant 0 : index
    %c128_181 = arith.constant 128 : index
    %251 = vector.load %arg21[%c0_180, %c128_181] : memref<16x768xf32, #tpu.memory_space<vmem>>, vector<16x512xf32>
    tpu.vector_store %arg21[%c0_180, %c128_181], %250 {strides = array<i32>} : memref<16x768xf32, #tpu.memory_space<vmem>>, vector<16x512xf32>,
    %cst_182 = arith.constant 0.000000e+00 : f32
    %252 = vector.broadcast %cst_182 : f32 to vector<1x512xf32>
    %c0_183 = arith.constant 0 : index
    %c55 = arith.constant 55 : index
    %253 = vector.load %arg21[%c0_183, %c55] : memref<16x768xf32, #tpu.memory_space<vmem>>, vector<16x512xf32>
    %c0_184 = arith.constant 0 : index
    %c0_185 = arith.constant 0 : index
    %254 = vector.load %arg18[%c0_184, %c0_185] : memref<27x512xf32, #tpu.memory_space<vmem>>, vector<1x512xf32>
    %255 = vector.broadcast %254 : vector<1x512xf32> to vector<16x512xf32>
    %256 = arith.mulf %253, %255 : vector<16x512xf32>
    %c0_186 = arith.constant 0 : index
    %c0_187 = arith.constant 0 : index
    %257 = vector.load %arg15[%c0_186, %c0_187] : memref<27x16xf32, #tpu.memory_space<vmem>>, vector<1x16xf32>
    %cst_188 = arith.constant dense<0.000000e+00> : vector<1x512xf32>
    %258 = tpu.matmul %257, %256, %cst_188 {dimension_numbers = #tpu.dot_dimension_numbers<[1], [0], [0], [1], [0, 0, 1, 1], [], []>} : vector<1x16xf32>, vector<16x512xf32>, vector<1x512xf32> -> vector<1x512xf32>
    %259 = arith.addf %252, %258 : vector<1x512xf32>
    %c0_189 = arith.constant 0 : index
    %c56 = arith.constant 56 : index
    %260 = vector.load %arg21[%c0_189, %c56] : memref<16x768xf32, #tpu.memory_space<vmem>>, vector<16x512xf32>
    %c1_190 = arith.constant 1 : index
    %c0_191 = arith.constant 0 : index
    %261 = vector.load %arg18[%c1_190, %c0_191] : memref<27x512xf32, #tpu.memory_space<vmem>>, vector<1x512xf32>
    %262 = vector.broadcast %261 : vector<1x512xf32> to vector<16x512xf32>
    %263 = arith.mulf %260, %262 : vector<16x512xf32>
    %c1_192 = arith.constant 1 : index
    %c0_193 = arith.constant 0 : index
    %264 = vector.load %arg15[%c1_192, %c0_193] : memref<27x16xf32, #tpu.memory_space<vmem>>, vector<1x16xf32>
    %cst_194 = arith.constant dense<0.000000e+00> : vector<1x512xf32>
    %265 = tpu.matmul %264, %263, %cst_194 {dimension_numbers = #tpu.dot_dimension_numbers<[1], [0], [0], [1], [0, 0, 1, 1], [], []>} : vector<1x16xf32>, vector<16x512xf32>, vector<1x512xf32> -> vector<1x512xf32>
    %266 = arith.addf %259, %265 : vector<1x512xf32>
    %c0_195 = arith.constant 0 : index
    %c57 = arith.constant 57 : index
    %267 = vector.load %arg21[%c0_195, %c57] : memref<16x768xf32, #tpu.memory_space<vmem>>, vector<16x512xf32>
    %c2_196 = arith.constant 2 : index
    %c0_197 = arith.constant 0 : index
    %268 = vector.load %arg18[%c2_196, %c0_197] : memref<27x512xf32, #tpu.memory_space<vmem>>, vector<1x512xf32>
    %269 = vector.broadcast %268 : vector<1x512xf32> to vector<16x512xf32>
    %270 = arith.mulf %267, %269 : vector<16x512xf32>
    %c2_198 = arith.constant 2 : index
    %c0_199 = arith.constant 0 : index
    %271 = vector.load %arg15[%c2_198, %c0_199] : memref<27x16xf32, #tpu.memory_space<vmem>>, vector<1x16xf32>
    %cst_200 = arith.constant dense<0.000000e+00> : vector<1x512xf32>
    %272 = tpu.matmul %271, %270, %cst_200 {dimension_numbers = #tpu.dot_dimension_numbers<[1], [0], [0], [1], [0, 0, 1, 1], [], []>} : vector<1x16xf32>, vector<16x512xf32>, vector<1x512xf32> -> vector<1x512xf32>
    %273 = arith.addf %266, %272 : vector<1x512xf32>
    %c0_201 = arith.constant 0 : index
    %c63 = arith.constant 63 : index
    %274 = vector.load %arg21[%c0_201, %c63] : memref<16x768xf32, #tpu.memory_space<vmem>>, vector<16x512xf32>
    %c3_202 = arith.constant 3 : index
    %c0_203 = arith.constant 0 : index
    %275 = vector.load %arg18[%c3_202, %c0_203] : memref<27x512xf32, #tpu.memory_space<vmem>>, vector<1x512xf32>
    %276 = vector.broadcast %275 : vector<1x512xf32> to vector<16x512xf32>
    %277 = arith.mulf %274, %276 : vector<16x512xf32>
    %c3_204 = arith.constant 3 : index
    %c0_205 = arith.constant 0 : index
    %278 = vector.load %arg15[%c3_204, %c0_205] : memref<27x16xf32, #tpu.memory_space<vmem>>, vector<1x16xf32>
    %cst_206 = arith.constant dense<0.000000e+00> : vector<1x512xf32>
    %279 = tpu.matmul %278, %277, %cst_206 {dimension_numbers = #tpu.dot_dimension_numbers<[1], [0], [0], [1], [0, 0, 1, 1], [], []>} : vector<1x16xf32>, vector<16x512xf32>, vector<1x512xf32> -> vector<1x512xf32>
    %280 = arith.addf %273, %279 : vector<1x512xf32>
    %c0_207 = arith.constant 0 : index
    %c64_208 = arith.constant 64 : index
    %281 = vector.load %arg21[%c0_207, %c64_208] : memref<16x768xf32, #tpu.memory_space<vmem>>, vector<16x512xf32>
    %c4_209 = arith.constant 4 : index
    %c0_210 = arith.constant 0 : index
    %282 = vector.load %arg18[%c4_209, %c0_210] : memref<27x512xf32, #tpu.memory_space<vmem>>, vector<1x512xf32>
    %283 = vector.broadcast %282 : vector<1x512xf32> to vector<16x512xf32>
    %284 = arith.mulf %281, %283 : vector<16x512xf32>
    %c4_211 = arith.constant 4 : index
    %c0_212 = arith.constant 0 : index
    %285 = vector.load %arg15[%c4_211, %c0_212] : memref<27x16xf32, #tpu.memory_space<vmem>>, vector<1x16xf32>
    %cst_213 = arith.constant dense<0.000000e+00> : vector<1x512xf32>
    %286 = tpu.matmul %285, %284, %cst_213 {dimension_numbers = #tpu.dot_dimension_numbers<[1], [0], [0], [1], [0, 0, 1, 1], [], []>} : vector<1x16xf32>, vector<16x512xf32>, vector<1x512xf32> -> vector<1x512xf32>
    %287 = arith.addf %280, %286 : vector<1x512xf32>
    %c0_214 = arith.constant 0 : index
    %c65 = arith.constant 65 : index
    %288 = vector.load %arg21[%c0_214, %c65] : memref<16x768xf32, #tpu.memory_space<vmem>>, vector<16x512xf32>
    %c5_215 = arith.constant 5 : index
    %c0_216 = arith.constant 0 : index
    %289 = vector.load %arg18[%c5_215, %c0_216] : memref<27x512xf32, #tpu.memory_space<vmem>>, vector<1x512xf32>
    %290 = vector.broadcast %289 : vector<1x512xf32> to vector<16x512xf32>
    %291 = arith.mulf %288, %290 : vector<16x512xf32>
    %c5_217 = arith.constant 5 : index
    %c0_218 = arith.constant 0 : index
    %292 = vector.load %arg15[%c5_217, %c0_218] : memref<27x16xf32, #tpu.memory_space<vmem>>, vector<1x16xf32>
    %cst_219 = arith.constant dense<0.000000e+00> : vector<1x512xf32>
    %293 = tpu.matmul %292, %291, %cst_219 {dimension_numbers = #tpu.dot_dimension_numbers<[1], [0], [0], [1], [0, 0, 1, 1], [], []>} : vector<1x16xf32>, vector<16x512xf32>, vector<1x512xf32> -> vector<1x512xf32>
    %294 = arith.addf %287, %293 : vector<1x512xf32>
    %c0_220 = arith.constant 0 : index
    %c71 = arith.constant 71 : index
    %295 = vector.load %arg21[%c0_220, %c71] : memref<16x768xf32, #tpu.memory_space<vmem>>, vector<16x512xf32>
    %c6_221 = arith.constant 6 : index
    %c0_222 = arith.constant 0 : index
    %296 = vector.load %arg18[%c6_221, %c0_222] : memref<27x512xf32, #tpu.memory_space<vmem>>, vector<1x512xf32>
    %297 = vector.broadcast %296 : vector<1x512xf32> to vector<16x512xf32>
    %298 = arith.mulf %295, %297 : vector<16x512xf32>
    %c6_223 = arith.constant 6 : index
    %c0_224 = arith.constant 0 : index
    %299 = vector.load %arg15[%c6_223, %c0_224] : memref<27x16xf32, #tpu.memory_space<vmem>>, vector<1x16xf32>
    %cst_225 = arith.constant dense<0.000000e+00> : vector<1x512xf32>
    %300 = tpu.matmul %299, %298, %cst_225 {dimension_numbers = #tpu.dot_dimension_numbers<[1], [0], [0], [1], [0, 0, 1, 1], [], []>} : vector<1x16xf32>, vector<16x512xf32>, vector<1x512xf32> -> vector<1x512xf32>
    %301 = arith.addf %294, %300 : vector<1x512xf32>
    %c0_226 = arith.constant 0 : index
    %c72 = arith.constant 72 : index
    %302 = vector.load %arg21[%c0_226, %c72] : memref<16x768xf32, #tpu.memory_space<vmem>>, vector<16x512xf32>
    %c7_227 = arith.constant 7 : index
    %c0_228 = arith.constant 0 : index
    %303 = vector.load %arg18[%c7_227, %c0_228] : memref<27x512xf32, #tpu.memory_space<vmem>>, vector<1x512xf32>
    %304 = vector.broadcast %303 : vector<1x512xf32> to vector<16x512xf32>
    %305 = arith.mulf %302, %304 : vector<16x512xf32>
    %c7_229 = arith.constant 7 : index
    %c0_230 = arith.constant 0 : index
    %306 = vector.load %arg15[%c7_229, %c0_230] : memref<27x16xf32, #tpu.memory_space<vmem>>, vector<1x16xf32>
    %cst_231 = arith.constant dense<0.000000e+00> : vector<1x512xf32>
    %307 = tpu.matmul %306, %305, %cst_231 {dimension_numbers = #tpu.dot_dimension_numbers<[1], [0], [0], [1], [0, 0, 1, 1], [], []>} : vector<1x16xf32>, vector<16x512xf32>, vector<1x512xf32> -> vector<1x512xf32>
    %308 = arith.addf %301, %307 : vector<1x512xf32>
    %c0_232 = arith.constant 0 : index
    %c73 = arith.constant 73 : index
    %309 = vector.load %arg21[%c0_232, %c73] : memref<16x768xf32, #tpu.memory_space<vmem>>, vector<16x512xf32>
    %c8_233 = arith.constant 8 : index
    %c0_234 = arith.constant 0 : index
    %310 = vector.load %arg18[%c8_233, %c0_234] : memref<27x512xf32, #tpu.memory_space<vmem>>, vector<1x512xf32>
    %311 = vector.broadcast %310 : vector<1x512xf32> to vector<16x512xf32>
    %312 = arith.mulf %309, %311 : vector<16x512xf32>
    %c8_235 = arith.constant 8 : index
    %c0_236 = arith.constant 0 : index
    %313 = vector.load %arg15[%c8_235, %c0_236] : memref<27x16xf32, #tpu.memory_space<vmem>>, vector<1x16xf32>
    %cst_237 = arith.constant dense<0.000000e+00> : vector<1x512xf32>
    %314 = tpu.matmul %313, %312, %cst_237 {dimension_numbers = #tpu.dot_dimension_numbers<[1], [0], [0], [1], [0, 0, 1, 1], [], []>} : vector<1x16xf32>, vector<16x512xf32>, vector<1x512xf32> -> vector<1x512xf32>
    %315 = arith.addf %308, %314 : vector<1x512xf32>
    %c0_238 = arith.constant 0 : index
    %c119 = arith.constant 119 : index
    %316 = vector.load %arg21[%c0_238, %c119] : memref<16x768xf32, #tpu.memory_space<vmem>>, vector<16x512xf32>
    %c9_239 = arith.constant 9 : index
    %c0_240 = arith.constant 0 : index
    %317 = vector.load %arg18[%c9_239, %c0_240] : memref<27x512xf32, #tpu.memory_space<vmem>>, vector<1x512xf32>
    %318 = vector.broadcast %317 : vector<1x512xf32> to vector<16x512xf32>
    %319 = arith.mulf %316, %318 : vector<16x512xf32>
    %c9_241 = arith.constant 9 : index
    %c0_242 = arith.constant 0 : index
    %320 = vector.load %arg15[%c9_241, %c0_242] : memref<27x16xf32, #tpu.memory_space<vmem>>, vector<1x16xf32>
    %cst_243 = arith.constant dense<0.000000e+00> : vector<1x512xf32>
    %321 = tpu.matmul %320, %319, %cst_243 {dimension_numbers = #tpu.dot_dimension_numbers<[1], [0], [0], [1], [0, 0, 1, 1], [], []>} : vector<1x16xf32>, vector<16x512xf32>, vector<1x512xf32> -> vector<1x512xf32>
    %322 = arith.addf %315, %321 : vector<1x512xf32>
    %c0_244 = arith.constant 0 : index
    %c120 = arith.constant 120 : index
    %323 = vector.load %arg21[%c0_244, %c120] : memref<16x768xf32, #tpu.memory_space<vmem>>, vector<16x512xf32>
    %c10_245 = arith.constant 10 : index
    %c0_246 = arith.constant 0 : index
    %324 = vector.load %arg18[%c10_245, %c0_246] : memref<27x512xf32, #tpu.memory_space<vmem>>, vector<1x512xf32>
    %325 = vector.broadcast %324 : vector<1x512xf32> to vector<16x512xf32>
    %326 = arith.mulf %323, %325 : vector<16x512xf32>
    %c10_247 = arith.constant 10 : index
    %c0_248 = arith.constant 0 : index
    %327 = vector.load %arg15[%c10_247, %c0_248] : memref<27x16xf32, #tpu.memory_space<vmem>>, vector<1x16xf32>
    %cst_249 = arith.constant dense<0.000000e+00> : vector<1x512xf32>
    %328 = tpu.matmul %327, %326, %cst_249 {dimension_numbers = #tpu.dot_dimension_numbers<[1], [0], [0], [1], [0, 0, 1, 1], [], []>} : vector<1x16xf32>, vector<16x512xf32>, vector<1x512xf32> -> vector<1x512xf32>
    %329 = arith.addf %322, %328 : vector<1x512xf32>
    %c0_250 = arith.constant 0 : index
    %c121 = arith.constant 121 : index
    %330 = vector.load %arg21[%c0_250, %c121] : memref<16x768xf32, #tpu.memory_space<vmem>>, vector<16x512xf32>
    %c11_251 = arith.constant 11 : index
    %c0_252 = arith.constant 0 : index
    %331 = vector.load %arg18[%c11_251, %c0_252] : memref<27x512xf32, #tpu.memory_space<vmem>>, vector<1x512xf32>
    %332 = vector.broadcast %331 : vector<1x512xf32> to vector<16x512xf32>
    %333 = arith.mulf %330, %332 : vector<16x512xf32>
    %c11_253 = arith.constant 11 : index
    %c0_254 = arith.constant 0 : index
    %334 = vector.load %arg15[%c11_253, %c0_254] : memref<27x16xf32, #tpu.memory_space<vmem>>, vector<1x16xf32>
    %cst_255 = arith.constant dense<0.000000e+00> : vector<1x512xf32>
    %335 = tpu.matmul %334, %333, %cst_255 {dimension_numbers = #tpu.dot_dimension_numbers<[1], [0], [0], [1], [0, 0, 1, 1], [], []>} : vector<1x16xf32>, vector<16x512xf32>, vector<1x512xf32> -> vector<1x512xf32>
    %336 = arith.addf %329, %335 : vector<1x512xf32>
    %c0_256 = arith.constant 0 : index
    %c127 = arith.constant 127 : index
    %337 = vector.load %arg21[%c0_256, %c127] : memref<16x768xf32, #tpu.memory_space<vmem>>, vector<16x512xf32>
    %c12_257 = arith.constant 12 : index
    %c0_258 = arith.constant 0 : index
    %338 = vector.load %arg18[%c12_257, %c0_258] : memref<27x512xf32, #tpu.memory_space<vmem>>, vector<1x512xf32>
    %339 = vector.broadcast %338 : vector<1x512xf32> to vector<16x512xf32>
    %340 = arith.mulf %337, %339 : vector<16x512xf32>
    %c12_259 = arith.constant 12 : index
    %c0_260 = arith.constant 0 : index
    %341 = vector.load %arg15[%c12_259, %c0_260] : memref<27x16xf32, #tpu.memory_space<vmem>>, vector<1x16xf32>
    %cst_261 = arith.constant dense<0.000000e+00> : vector<1x512xf32>
    %342 = tpu.matmul %341, %340, %cst_261 {dimension_numbers = #tpu.dot_dimension_numbers<[1], [0], [0], [1], [0, 0, 1, 1], [], []>} : vector<1x16xf32>, vector<16x512xf32>, vector<1x512xf32> -> vector<1x512xf32>
    %343 = arith.addf %336, %342 : vector<1x512xf32>
    %c0_262 = arith.constant 0 : index
    %c128_263 = arith.constant 128 : index
    %344 = vector.load %arg21[%c0_262, %c128_263] : memref<16x768xf32, #tpu.memory_space<vmem>>, vector<16x512xf32>
    %c13_264 = arith.constant 13 : index
    %c0_265 = arith.constant 0 : index
    %345 = vector.load %arg18[%c13_264, %c0_265] : memref<27x512xf32, #tpu.memory_space<vmem>>, vector<1x512xf32>
    %346 = vector.broadcast %345 : vector<1x512xf32> to vector<16x512xf32>
    %347 = arith.mulf %344, %346 : vector<16x512xf32>
    %c13_266 = arith.constant 13 : index
    %c0_267 = arith.constant 0 : index
    %348 = vector.load %arg15[%c13_266, %c0_267] : memref<27x16xf32, #tpu.memory_space<vmem>>, vector<1x16xf32>
    %cst_268 = arith.constant dense<0.000000e+00> : vector<1x512xf32>
    %349 = tpu.matmul %348, %347, %cst_268 {dimension_numbers = #tpu.dot_dimension_numbers<[1], [0], [0], [1], [0, 0, 1, 1], [], []>} : vector<1x16xf32>, vector<16x512xf32>, vector<1x512xf32> -> vector<1x512xf32>
    %350 = arith.addf %343, %349 : vector<1x512xf32>
    %c0_269 = arith.constant 0 : index
    %c129 = arith.constant 129 : index
    %351 = vector.load %arg21[%c0_269, %c129] : memref<16x768xf32, #tpu.memory_space<vmem>>, vector<16x512xf32>
    %c14_270 = arith.constant 14 : index
    %c0_271 = arith.constant 0 : index
    %352 = vector.load %arg18[%c14_270, %c0_271] : memref<27x512xf32, #tpu.memory_space<vmem>>, vector<1x512xf32>
    %353 = vector.broadcast %352 : vector<1x512xf32> to vector<16x512xf32>
    %354 = arith.mulf %351, %353 : vector<16x512xf32>
    %c14_272 = arith.constant 14 : index
    %c0_273 = arith.constant 0 : index
    %355 = vector.load %arg15[%c14_272, %c0_273] : memref<27x16xf32, #tpu.memory_space<vmem>>, vector<1x16xf32>
    %cst_274 = arith.constant dense<0.000000e+00> : vector<1x512xf32>
    %356 = tpu.matmul %355, %354, %cst_274 {dimension_numbers = #tpu.dot_dimension_numbers<[1], [0], [0], [1], [0, 0, 1, 1], [], []>} : vector<1x16xf32>, vector<16x512xf32>, vector<1x512xf32> -> vector<1x512xf32>
    %357 = arith.addf %350, %356 : vector<1x512xf32>
    %c0_275 = arith.constant 0 : index
    %c135 = arith.constant 135 : index
    %358 = vector.load %arg21[%c0_275, %c135] : memref<16x768xf32, #tpu.memory_space<vmem>>, vector<16x512xf32>
    %c15_276 = arith.constant 15 : index
    %c0_277 = arith.constant 0 : index
    %359 = vector.load %arg18[%c15_276, %c0_277] : memref<27x512xf32, #tpu.memory_space<vmem>>, vector<1x512xf32>
    %360 = vector.broadcast %359 : vector<1x512xf32> to vector<16x512xf32>
    %361 = arith.mulf %358, %360 : vector<16x512xf32>
    %c15_278 = arith.constant 15 : index
    %c0_279 = arith.constant 0 : index
    %362 = vector.load %arg15[%c15_278, %c0_279] : memref<27x16xf32, #tpu.memory_space<vmem>>, vector<1x16xf32>
    %cst_280 = arith.constant dense<0.000000e+00> : vector<1x512xf32>
    %363 = tpu.matmul %362, %361, %cst_280 {dimension_numbers = #tpu.dot_dimension_numbers<[1], [0], [0], [1], [0, 0, 1, 1], [], []>} : vector<1x16xf32>, vector<16x512xf32>, vector<1x512xf32> -> vector<1x512xf32>
    %364 = arith.addf %357, %363 : vector<1x512xf32>
    %c0_281 = arith.constant 0 : index
    %c136 = arith.constant 136 : index
    %365 = vector.load %arg21[%c0_281, %c136] : memref<16x768xf32, #tpu.memory_space<vmem>>, vector<16x512xf32>
    %c16_282 = arith.constant 16 : index
    %c0_283 = arith.constant 0 : index
    %366 = vector.load %arg18[%c16_282, %c0_283] : memref<27x512xf32, #tpu.memory_space<vmem>>, vector<1x512xf32>
    %367 = vector.broadcast %366 : vector<1x512xf32> to vector<16x512xf32>
    %368 = arith.mulf %365, %367 : vector<16x512xf32>
    %c16_284 = arith.constant 16 : index
    %c0_285 = arith.constant 0 : index
    %369 = vector.load %arg15[%c16_284, %c0_285] : memref<27x16xf32, #tpu.memory_space<vmem>>, vector<1x16xf32>
    %cst_286 = arith.constant dense<0.000000e+00> : vector<1x512xf32>
    %370 = tpu.matmul %369, %368, %cst_286 {dimension_numbers = #tpu.dot_dimension_numbers<[1], [0], [0], [1], [0, 0, 1, 1], [], []>} : vector<1x16xf32>, vector<16x512xf32>, vector<1x512xf32> -> vector<1x512xf32>
    %371 = arith.addf %364, %370 : vector<1x512xf32>
    %c0_287 = arith.constant 0 : index
    %c137 = arith.constant 137 : index
    %372 = vector.load %arg21[%c0_287, %c137] : memref<16x768xf32, #tpu.memory_space<vmem>>, vector<16x512xf32>
    %c17_288 = arith.constant 17 : index
    %c0_289 = arith.constant 0 : index
    %373 = vector.load %arg18[%c17_288, %c0_289] : memref<27x512xf32, #tpu.memory_space<vmem>>, vector<1x512xf32>
    %374 = vector.broadcast %373 : vector<1x512xf32> to vector<16x512xf32>
    %375 = arith.mulf %372, %374 : vector<16x512xf32>
    %c17_290 = arith.constant 17 : index
    %c0_291 = arith.constant 0 : index
    %376 = vector.load %arg15[%c17_290, %c0_291] : memref<27x16xf32, #tpu.memory_space<vmem>>, vector<1x16xf32>
    %cst_292 = arith.constant dense<0.000000e+00> : vector<1x512xf32>
    %377 = tpu.matmul %376, %375, %cst_292 {dimension_numbers = #tpu.dot_dimension_numbers<[1], [0], [0], [1], [0, 0, 1, 1], [], []>} : vector<1x16xf32>, vector<16x512xf32>, vector<1x512xf32> -> vector<1x512xf32>
    %378 = arith.addf %371, %377 : vector<1x512xf32>
    %c0_293 = arith.constant 0 : index
    %c183 = arith.constant 183 : index
    %379 = vector.load %arg21[%c0_293, %c183] : memref<16x768xf32, #tpu.memory_space<vmem>>, vector<16x512xf32>
    %c18_294 = arith.constant 18 : index
    %c0_295 = arith.constant 0 : index
    %380 = vector.load %arg18[%c18_294, %c0_295] : memref<27x512xf32, #tpu.memory_space<vmem>>, vector<1x512xf32>
    %381 = vector.broadcast %380 : vector<1x512xf32> to vector<16x512xf32>
    %382 = arith.mulf %379, %381 : vector<16x512xf32>
    %c18_296 = arith.constant 18 : index
    %c0_297 = arith.constant 0 : index
    %383 = vector.load %arg15[%c18_296, %c0_297] : memref<27x16xf32, #tpu.memory_space<vmem>>, vector<1x16xf32>
    %cst_298 = arith.constant dense<0.000000e+00> : vector<1x512xf32>
    %384 = tpu.matmul %383, %382, %cst_298 {dimension_numbers = #tpu.dot_dimension_numbers<[1], [0], [0], [1], [0, 0, 1, 1], [], []>} : vector<1x16xf32>, vector<16x512xf32>, vector<1x512xf32> -> vector<1x512xf32>
    %385 = arith.addf %378, %384 : vector<1x512xf32>
    %c0_299 = arith.constant 0 : index
    %c184 = arith.constant 184 : index
    %386 = vector.load %arg21[%c0_299, %c184] : memref<16x768xf32, #tpu.memory_space<vmem>>, vector<16x512xf32>
    %c19_300 = arith.constant 19 : index
    %c0_301 = arith.constant 0 : index
    %387 = vector.load %arg18[%c19_300, %c0_301] : memref<27x512xf32, #tpu.memory_space<vmem>>, vector<1x512xf32>
    %388 = vector.broadcast %387 : vector<1x512xf32> to vector<16x512xf32>
    %389 = arith.mulf %386, %388 : vector<16x512xf32>
    %c19_302 = arith.constant 19 : index
    %c0_303 = arith.constant 0 : index
    %390 = vector.load %arg15[%c19_302, %c0_303] : memref<27x16xf32, #tpu.memory_space<vmem>>, vector<1x16xf32>
    %cst_304 = arith.constant dense<0.000000e+00> : vector<1x512xf32>
    %391 = tpu.matmul %390, %389, %cst_304 {dimension_numbers = #tpu.dot_dimension_numbers<[1], [0], [0], [1], [0, 0, 1, 1], [], []>} : vector<1x16xf32>, vector<16x512xf32>, vector<1x512xf32> -> vector<1x512xf32>
    %392 = arith.addf %385, %391 : vector<1x512xf32>
    %c0_305 = arith.constant 0 : index
    %c185 = arith.constant 185 : index
    %393 = vector.load %arg21[%c0_305, %c185] : memref<16x768xf32, #tpu.memory_space<vmem>>, vector<16x512xf32>
    %c20_306 = arith.constant 20 : index
    %c0_307 = arith.constant 0 : index
    %394 = vector.load %arg18[%c20_306, %c0_307] : memref<27x512xf32, #tpu.memory_space<vmem>>, vector<1x512xf32>
    %395 = vector.broadcast %394 : vector<1x512xf32> to vector<16x512xf32>
    %396 = arith.mulf %393, %395 : vector<16x512xf32>
    %c20_308 = arith.constant 20 : index
    %c0_309 = arith.constant 0 : index
    %397 = vector.load %arg15[%c20_308, %c0_309] : memref<27x16xf32, #tpu.memory_space<vmem>>, vector<1x16xf32>
    %cst_310 = arith.constant dense<0.000000e+00> : vector<1x512xf32>
    %398 = tpu.matmul %397, %396, %cst_310 {dimension_numbers = #tpu.dot_dimension_numbers<[1], [0], [0], [1], [0, 0, 1, 1], [], []>} : vector<1x16xf32>, vector<16x512xf32>, vector<1x512xf32> -> vector<1x512xf32>
    %399 = arith.addf %392, %398 : vector<1x512xf32>
    %c0_311 = arith.constant 0 : index
    %c191 = arith.constant 191 : index
    %400 = vector.load %arg21[%c0_311, %c191] : memref<16x768xf32, #tpu.memory_space<vmem>>, vector<16x512xf32>
    %c21_312 = arith.constant 21 : index
    %c0_313 = arith.constant 0 : index
    %401 = vector.load %arg18[%c21_312, %c0_313] : memref<27x512xf32, #tpu.memory_space<vmem>>, vector<1x512xf32>
    %402 = vector.broadcast %401 : vector<1x512xf32> to vector<16x512xf32>
    %403 = arith.mulf %400, %402 : vector<16x512xf32>
    %c21_314 = arith.constant 21 : index
    %c0_315 = arith.constant 0 : index
    %404 = vector.load %arg15[%c21_314, %c0_315] : memref<27x16xf32, #tpu.memory_space<vmem>>, vector<1x16xf32>
    %cst_316 = arith.constant dense<0.000000e+00> : vector<1x512xf32>
    %405 = tpu.matmul %404, %403, %cst_316 {dimension_numbers = #tpu.dot_dimension_numbers<[1], [0], [0], [1], [0, 0, 1, 1], [], []>} : vector<1x16xf32>, vector<16x512xf32>, vector<1x512xf32> -> vector<1x512xf32>
    %406 = arith.addf %399, %405 : vector<1x512xf32>
    %c0_317 = arith.constant 0 : index
    %c192_318 = arith.constant 192 : index
    %407 = vector.load %arg21[%c0_317, %c192_318] : memref<16x768xf32, #tpu.memory_space<vmem>>, vector<16x512xf32>
    %c22_319 = arith.constant 22 : index
    %c0_320 = arith.constant 0 : index
    %408 = vector.load %arg18[%c22_319, %c0_320] : memref<27x512xf32, #tpu.memory_space<vmem>>, vector<1x512xf32>
    %409 = vector.broadcast %408 : vector<1x512xf32> to vector<16x512xf32>
    %410 = arith.mulf %407, %409 : vector<16x512xf32>
    %c22_321 = arith.constant 22 : index
    %c0_322 = arith.constant 0 : index
    %411 = vector.load %arg15[%c22_321, %c0_322] : memref<27x16xf32, #tpu.memory_space<vmem>>, vector<1x16xf32>
    %cst_323 = arith.constant dense<0.000000e+00> : vector<1x512xf32>
    %412 = tpu.matmul %411, %410, %cst_323 {dimension_numbers = #tpu.dot_dimension_numbers<[1], [0], [0], [1], [0, 0, 1, 1], [], []>} : vector<1x16xf32>, vector<16x512xf32>, vector<1x512xf32> -> vector<1x512xf32>
    %413 = arith.addf %406, %412 : vector<1x512xf32>
    %c0_324 = arith.constant 0 : index
    %c193 = arith.constant 193 : index
    %414 = vector.load %arg21[%c0_324, %c193] : memref<16x768xf32, #tpu.memory_space<vmem>>, vector<16x512xf32>
    %c23_325 = arith.constant 23 : index
    %c0_326 = arith.constant 0 : index
    %415 = vector.load %arg18[%c23_325, %c0_326] : memref<27x512xf32, #tpu.memory_space<vmem>>, vector<1x512xf32>
    %416 = vector.broadcast %415 : vector<1x512xf32> to vector<16x512xf32>
    %417 = arith.mulf %414, %416 : vector<16x512xf32>
    %c23_327 = arith.constant 23 : index
    %c0_328 = arith.constant 0 : index
    %418 = vector.load %arg15[%c23_327, %c0_328] : memref<27x16xf32, #tpu.memory_space<vmem>>, vector<1x16xf32>
    %cst_329 = arith.constant dense<0.000000e+00> : vector<1x512xf32>
    %419 = tpu.matmul %418, %417, %cst_329 {dimension_numbers = #tpu.dot_dimension_numbers<[1], [0], [0], [1], [0, 0, 1, 1], [], []>} : vector<1x16xf32>, vector<16x512xf32>, vector<1x512xf32> -> vector<1x512xf32>
    %420 = arith.addf %413, %419 : vector<1x512xf32>
    %c0_330 = arith.constant 0 : index
    %c199 = arith.constant 199 : index
    %421 = vector.load %arg21[%c0_330, %c199] : memref<16x768xf32, #tpu.memory_space<vmem>>, vector<16x512xf32>
    %c24_331 = arith.constant 24 : index
    %c0_332 = arith.constant 0 : index
    %422 = vector.load %arg18[%c24_331, %c0_332] : memref<27x512xf32, #tpu.memory_space<vmem>>, vector<1x512xf32>
    %423 = vector.broadcast %422 : vector<1x512xf32> to vector<16x512xf32>
    %424 = arith.mulf %421, %423 : vector<16x512xf32>
    %c24_333 = arith.constant 24 : index
    %c0_334 = arith.constant 0 : index
    %425 = vector.load %arg15[%c24_333, %c0_334] : memref<27x16xf32, #tpu.memory_space<vmem>>, vector<1x16xf32>
    %cst_335 = arith.constant dense<0.000000e+00> : vector<1x512xf32>
    %426 = tpu.matmul %425, %424, %cst_335 {dimension_numbers = #tpu.dot_dimension_numbers<[1], [0], [0], [1], [0, 0, 1, 1], [], []>} : vector<1x16xf32>, vector<16x512xf32>, vector<1x512xf32> -> vector<1x512xf32>
    %427 = arith.addf %420, %426 : vector<1x512xf32>
    %c0_336 = arith.constant 0 : index
    %c200 = arith.constant 200 : index
    %428 = vector.load %arg21[%c0_336, %c200] : memref<16x768xf32, #tpu.memory_space<vmem>>, vector<16x512xf32>
    %c25_337 = arith.constant 25 : index
    %c0_338 = arith.constant 0 : index
    %429 = vector.load %arg18[%c25_337, %c0_338] : memref<27x512xf32, #tpu.memory_space<vmem>>, vector<1x512xf32>
    %430 = vector.broadcast %429 : vector<1x512xf32> to vector<16x512xf32>
    %431 = arith.mulf %428, %430 : vector<16x512xf32>
    %c25_339 = arith.constant 25 : index
    %c0_340 = arith.constant 0 : index
    %432 = vector.load %arg15[%c25_339, %c0_340] : memref<27x16xf32, #tpu.memory_space<vmem>>, vector<1x16xf32>
    %cst_341 = arith.constant dense<0.000000e+00> : vector<1x512xf32>
    %433 = tpu.matmul %432, %431, %cst_341 {dimension_numbers = #tpu.dot_dimension_numbers<[1], [0], [0], [1], [0, 0, 1, 1], [], []>} : vector<1x16xf32>, vector<16x512xf32>, vector<1x512xf32> -> vector<1x512xf32>
    %434 = arith.addf %427, %433 : vector<1x512xf32>
    %c0_342 = arith.constant 0 : index
    %c201 = arith.constant 201 : index
    %435 = vector.load %arg21[%c0_342, %c201] : memref<16x768xf32, #tpu.memory_space<vmem>>, vector<16x512xf32>
    %c26_343 = arith.constant 26 : index
    %c0_344 = arith.constant 0 : index
    %436 = vector.load %arg18[%c26_343, %c0_344] : memref<27x512xf32, #tpu.memory_space<vmem>>, vector<1x512xf32>
    %437 = vector.broadcast %436 : vector<1x512xf32> to vector<16x512xf32>
    %438 = arith.mulf %435, %437 : vector<16x512xf32>
    %c26_345 = arith.constant 26 : index
    %c0_346 = arith.constant 0 : index
    %439 = vector.load %arg15[%c26_345, %c0_346] : memref<27x16xf32, #tpu.memory_space<vmem>>, vector<1x16xf32>
    %cst_347 = arith.constant dense<0.000000e+00> : vector<1x512xf32>
    %440 = tpu.matmul %439, %438, %cst_347 {dimension_numbers = #tpu.dot_dimension_numbers<[1], [0], [0], [1], [0, 0, 1, 1], [], []>} : vector<1x16xf32>, vector<16x512xf32>, vector<1x512xf32> -> vector<1x512xf32>
    %441 = arith.addf %434, %440 : vector<1x512xf32>
    %c0_348 = arith.constant 0 : index
    %c0_349 = arith.constant 0 : index
    %442 = vector.load %arg16[%c0_348, %c0_349] : memref<1x1xf32, #tpu.memory_space<vmem>>, vector<1x1xf32>
    %443 = vector.broadcast %442 : vector<1x1xf32> to vector<1x512xf32>
    %444 = arith.addf %441, %443 : vector<1x512xf32>
    %c0_350 = arith.constant 0 : index
    %c0_351 = arith.constant 0 : index
    %c0_352 = arith.constant 0 : index
    %445 = vector.load %arg19[%c0_350, %c0_351, %c0_352] : memref<1x1x512xf32, #tpu.memory_space<vmem>>, vector<1x1x512xf32>
    %446 = vector.shape_cast %445 : vector<1x1x512xf32> to vector<1x512xf32>
    %447 = vector.shape_cast %444 : vector<1x512xf32> to vector<1x1x512xf32>
    tpu.vector_store %arg19[%c0_350, %c0_351, %c0_352], %447 {strides = array<i32>} : memref<1x1x512xf32, #tpu.memory_space<vmem>>, vector<1x1x512xf32>,
    return
  }
  func.func @transform_0(%arg0: i32) -> (i32, i32, i32) {
    %c0_i32 = arith.constant 0 : i32
    %c0_i32_0 = arith.constant 0 : i32
    %c0_i32_1 = arith.constant 0 : i32
    return %arg0, %c0_i32, %c0_i32_0 : i32, i32, i32
  }
  func.func @transform_1(%arg0: i32) -> (i32, i32, i32) {
    %c0_i32 = arith.constant 0 : i32
    %c0_i32_0 = arith.constant 0 : i32
    %c0_i32_1 = arith.constant 0 : i32
    return %arg0, %c0_i32, %c0_i32_0 : i32, i32, i32
  }
  func.func @transform_2(%arg0: i32) -> (i32, i32) {
    %c0_i32 = arith.constant 0 : i32
    %c0_i32_0 = arith.constant 0 : i32
    %c0_i32_1 = arith.constant 0 : i32
    return %c0_i32, %c0_i32_0 : i32, i32
  }
  func.func @transform_3(%arg0: i32) -> (i32, i32) {
    %c0_i32 = arith.constant 0 : i32
    %c0_i32_0 = arith.constant 0 : i32
    %c0_i32_1 = arith.constant 0 : i32
    return %c0_i32, %c0_i32_0 : i32, i32
  }
  func.func @transform_4(%arg0: i32) -> (i32, i32) {
    %c0_i32 = arith.constant 0 : i32
    %c0_i32_0 = arith.constant 0 : i32
    %c0_i32_1 = arith.constant 0 : i32
    return %c0_i32, %c0_i32_0 : i32, i32
  }
  func.func @transform_5(%arg0: i32) -> (i32, i32) {
    %c0_i32 = arith.constant 0 : i32
    %c0_i32_0 = arith.constant 0 : i32
    %c0_i32_1 = arith.constant 0 : i32
    return %c0_i32, %c0_i32_0 : i32, i32
  }
  func.func @transform_6(%arg0: i32) -> (i32, i32) {
    %c0_i32 = arith.constant 0 : i32
    %c0_i32_0 = arith.constant 0 : i32
    %c0_i32_1 = arith.constant 0 : i32
    return %c0_i32, %c0_i32_0 : i32, i32
  }
  func.func @transform_7(%arg0: i32) -> (i32, i32) {
    %c0_i32 = arith.constant 0 : i32
    %c0_i32_0 = arith.constant 0 : i32
    %c0_i32_1 = arith.constant 0 : i32
    return %c0_i32, %c0_i32_0 : i32, i32
  }
  func.func @transform_8(%arg0: i32) -> (i32, i32) {
    %c0_i32 = arith.constant 0 : i32
    %c0_i32_0 = arith.constant 0 : i32
    %c0_i32_1 = arith.constant 0 : i32
    return %c0_i32, %c0_i32_0 : i32, i32
  }
  func.func @transform_9(%arg0: i32) -> (i32, i32) {
    %c0_i32 = arith.constant 0 : i32
    %c0_i32_0 = arith.constant 0 : i32
    %c0_i32_1 = arith.constant 0 : i32
    return %c0_i32, %c0_i32_0 : i32, i32
  }
  func.func @transform_10(%arg0: i32) -> (i32, i32) {
    %c0_i32 = arith.constant 0 : i32
    %c0_i32_0 = arith.constant 0 : i32
    %c0_i32_1 = arith.constant 0 : i32
    return %c0_i32, %c0_i32_0 : i32, i32
  }
  func.func @transform_11(%arg0: i32) -> (i32, i32) {
    %c0_i32 = arith.constant 0 : i32
    %c0_i32_0 = arith.constant 0 : i32
    %c0_i32_1 = arith.constant 0 : i32
    return %c0_i32, %c0_i32_0 : i32, i32
  }
  func.func @transform_12(%arg0: i32) -> (i32, i32) {
    %c0_i32 = arith.constant 0 : i32
    %c0_i32_0 = arith.constant 0 : i32
    %c0_i32_1 = arith.constant 0 : i32
    return %c0_i32, %c0_i32_0 : i32, i32
  }
  func.func @transform_13(%arg0: i32) -> (i32, i32) {
    %c0_i32 = arith.constant 0 : i32
    %c0_i32_0 = arith.constant 0 : i32
    %c0_i32_1 = arith.constant 0 : i32
    return %c0_i32, %c0_i32_0 : i32, i32
  }
  func.func @transform_14(%arg0: i32) -> (i32, i32) {
    %c0_i32 = arith.constant 0 : i32
    %c0_i32_0 = arith.constant 0 : i32
    %c0_i32_1 = arith.constant 0 : i32
    return %c0_i32, %c0_i32_0 : i32, i32
  }
  func.func @transform_15(%arg0: i32) -> (i32, i32) {
    %c0_i32 = arith.constant 0 : i32
    %c0_i32_0 = arith.constant 0 : i32
    %c0_i32_1 = arith.constant 0 : i32
    return %c0_i32, %c0_i32_0 : i32, i32
  }
  func.func @transform_16(%arg0: i32) -> (i32, i32) {
    %c0_i32 = arith.constant 0 : i32
    %c0_i32_0 = arith.constant 0 : i32
    %c0_i32_1 = arith.constant 0 : i32
    return %c0_i32, %c0_i32_0 : i32, i32
  }
  func.func @transform_17(%arg0: i32) -> (i32, i32) {
    %c0_i32 = arith.constant 0 : i32
    %c0_i32_0 = arith.constant 0 : i32
    %c0_i32_1 = arith.constant 0 : i32
    return %c0_i32, %c0_i32_0 : i32, i32
  }
  func.func @transform_18(%arg0: i32) -> (i32, i32, i32) {
    %c0_i32 = arith.constant 0 : i32
    %c0_i32_0 = arith.constant 0 : i32
    %c0_i32_1 = arith.constant 0 : i32
    return %arg0, %c0_i32, %c0_i32_0 : i32, i32, i32
  }
}

</mosaic_0001>

<bundles_post_ra>
// kernel: age_conditional_decoder_forward.1
= control target key start
LH: loop header
LB: loop body
LE: loop exit
PB: predicated region body
PF: predicated region fallthrough
CT: control target
= control target key end

     0   :  { %s16968_s0 = inlined_call_operand.vmem [shape: f32[2,4,64], index: 0, kind: input, shape index: {}]   ;;  %s16969_s1 = inlined_call_operand.vmem [shape: f32[2,1,1], index: 1, kind: input, shape index: {}]   ;;  %s16970_s2 = inlined_call_operand.vmem [shape: f32[4,4], index: 2, kind: input, shape index: {}]   ;;  %s16971_s3 = inlined_call_operand.vmem [shape: f32[4,1], index: 3, kind: input, shape index: {}]   ;;  %s16972_s4 = inlined_call_operand.hbm [shape: f32[1,16], index: 4, kind: input, shape index: {}]   ;;  %s16973_s5 = inlined_call_operand.hbm [shape: f32[1,16], index: 5, kind: input, shape index: {}]   ;;  %s16974_s6 = inlined_call_operand.hbm [shape: f32[16,16], index: 6, kind: input, shape index: {}]   ;;  %s16975_s7 = inlined_call_operand.hbm [shape: f32[1,16], index: 7, kind: input, shape index: {}]   ;;  %s16976_s8 = inlined_call_operand.vmem [shape: f32[256,256], index: 8, kind: input, shape index: {}]   ;;  %s16977_s9 = inlined_call_operand.vmem [shape: f32[16,256], index: 9, kind: input, shape index: {}]   ;;  %s16978_s10 = inlined_call_operand.vmem [shape: f32[1,256], index: 10, kind: input, shape index: {}]   ;;  %s16979_s11 = inlined_call_operand.vmem [shape: f32[432,4], index: 11, kind: input, shape index: {}]   ;;  %s16980_s12 = inlined_call_operand.vmem [shape: f32[16,1], index: 12, kind: input, shape index: {}]   ;;  %s16981_s13 = inlined_call_operand.hbm [shape: f32[64,512], index: 13, kind: input, shape index: {}]   ;;  %s16982_s14 = inlined_call_operand.vmem [shape: f32[27,16], index: 14, kind: input, shape index: {}]   ;;  %s16983_s15 = inlined_call_operand.<no memory space> [shape: f32[1,1], index: 15, kind: input, shape index: {}]   ;;  %s16984_s16 = inlined_call_operand.vmem [shape: f32[27,64], index: 16, kind: input, shape index: {}]   ;;  %s16985_s17 = inlined_call_operand.vmem [shape: f32[27,512], index: 17, kind: input, shape index: {}]   ;;  %s16986_s18 = inlined_call_operand.vmem [shape: f32[2,1,512], index: 18, kind: output, shape index: {}]  }
   0x1   :  { %17220 = sst [smem:[#allocation108_spill]] %s16968_s0  ;;  %v23_v0 = vstv %s16983_s15 }
   0x2   :  { %17221 = sst [smem:[#allocation109_spill]] %s16969_s1  ;;  %24 = vst [vmem:[#allocation4] sm:$0x1] %v23_v0 }
   0x3   :  { %17222 = sst [smem:[#allocation110_spill]] %s16970_s2 }
   0x4   :  { %17223 = sst [smem:[#allocation111_spill]] %s16972_s4 }
   0x5   :  { %17224 = sst [smem:[#allocation112_spill]] %s16986_s18 }
   0x6   :  { %25 = vsyncpa [#allocation6], 0 }
   0x7   :  { %26 = vsyncpa [#allocation8], 0 }
   0x8   :  { %27 = vsyncpa [#allocation11], 0  ;;  %s13015_s29 = smov 0  }
   0x9 LB: > { %17225 = sst [smem:[#allocation16_spill]] %s12830_s29  ;;  %s12832_s30 = smov [#allocation7]   ;;  %s12830_s29 = sphi %s13015_s29, %s33_s29  }
   0xa   : > { %s482_s0 = sshll.u32 %s12832_s30, 4  ;;  %s13021_s19 = sadd.s32 4294967295, %s12830_s29   ;;  %s13026_s0 = int_to_ptr.vmem [resolvable:$true] %s482_s0 }
   0xb   : > { %p10956_p0 = scmp.ge.s32.totalorder %s12830_s29, 1  ;;  %p452_p1 = scmp.lt.s32.totalorder %s12830_s29, 3 }
   0xc   : > { %p16988_p2 = scmp.eq.s32.totalorder %s13021_s19, 0  ;;  %s12833_s1 = smov [#allocation10]  }
   0xd   : > { %p13028_p3 = pnand %p10956_p0, %p452_p1  ;;  %s506_s20 = sshll.u32 %s12833_s1, 4  ;;  %s13034_s20 = int_to_ptr.vmem [resolvable:$true] %s506_s20 }
   0xe   : > { %s12834_s21 = smov [#allocation5]   ;;  %s12835_s23 = smov [#allocation9]  }
   0xf   : > { %s17226_s15 = scalar_select %p13028_p3, 1, 0 }
  0x10   : > { %p11901_p4 = pneg %p13028_p3  ;;  %s471_s22 = sshll.u32 %s12834_s21, 4  ;;  %s13042_s22 = int_to_ptr.vmem [resolvable:$true] %s471_s22 }
  0x11   : > { %s492_s24 = sshll.u32 %s12835_s23, 4  ;;  %s12672_s27 = scalar_lea.hbm %s16973_s5, 16  ;;  %s13044_s24 = int_to_ptr.vmem [resolvable:$true] %s492_s24 }
  0x12   : > { %p13038_p5 = pnand %p16988_p2, %p11901_p4  ;;  %p12673_p6 = scmp.ne.s32.totalorder %s16973_s5, %s12672_s27 }
  0x13   : > { %p12679_p10 = scmp.lt.u32.totalorder %s12672_s27, %s16973_s5 }
  0x14   : > { %p13054_p7 = pneg %p13038_p5 }
  0x16   : > { %p12675_p8 = pnand %p13054_p7, %p12673_p6 }
  0x18   : > { %p12676_p9 = pneg %p12675_p8 }
  0x1a   : > { %p12681_p11 = pnand %p12679_p10, %p12676_p9 }
  0x1c   : > { %12684 = shalt.err (!%p12681_p11)
}
  0x1d   : > { %s12685_s25 = scalar_lea.vmem %s13026_s0, 16  ;;  %s12692_s26 = scalar_lea.vmem %s13026_s0, 32 }
  0x1e   : > { %p12686_p12 = scmp.ne.s32.totalorder %s13026_s0, %s12685_s25  ;;  %p12693_p1 = scmp.lt.s32.totalorder %s13026_s0, %s13026_s0 }
  0x1f   : > { %p12694_p4 = scmp.lt.s32.totalorder %s12692_s26, %s12685_s25 }
  0x20   : > { %p12688_p13 = pnand %p12686_p12, %p13054_p7 }
  0x21   : > { %p12695_p6 = por %p12694_p4, %p12693_p1 }
  0x22   : > { %p12689_p0 = pneg %p12688_p13 }
  0x24   : > { %p12696_p8 = pnand %p12695_p6, %p12689_p0 }
  0x26   : > { %12699 = shalt.err (!%p12696_p8)
}
  0x27   : > { %11907 = dma.hbm_to_vmem [thread:$0]  (!%p13038_p5), %s16973_s5, 16, %s13026_s0, [#allocation8]  }
  0x28   : > { %s12700_s23 = scalar_lea.hbm %s16975_s7, 16 }
  0x29   : > { %p12701_p9 = scmp.ne.s32.totalorder %s16975_s7, %s12700_s23  ;;  %p12707_p12 = scmp.lt.u32.totalorder %s12700_s23, %s16975_s7 }
  0x2b   : > { %p12703_p10 = pnand %p12701_p9, %p13054_p7 }
  0x2d   : > { %p12704_p11 = pneg %p12703_p10 }
  0x2f   : > { %p12709_p13 = pnand %p12707_p12, %p12704_p11 }
  0x31   : > { %12712 = shalt.err (!%p12709_p13)
}
  0x32   : > { %s12713_s0 = scalar_lea.vmem %s13034_s20, 16  ;;  %s12720_s18 = scalar_lea.vmem %s13034_s20, 32 }
  0x33   : > { %p12714_p0 = scmp.ne.s32.totalorder %s13034_s20, %s12713_s0  ;;  %p12721_p6 = scmp.lt.s32.totalorder %s13034_s20, %s13034_s20 }
  0x34   : > { %p12722_p8 = scmp.lt.s32.totalorder %s12720_s18, %s12713_s0 }
  0x35   : > { %p12716_p1 = pnand %p12714_p0, %p13054_p7 }
  0x36   : > { %p12723_p9 = por %p12722_p8, %p12721_p6 }
  0x37   : > { %p12717_p4 = pneg %p12716_p1 }
  0x39   : > { %p12724_p10 = pnand %p12723_p9, %p12717_p4 }
  0x3b   : > { %12727 = shalt.err (!%p12724_p10)
}
  0x3c   : > { %11913 = dma.hbm_to_vmem [thread:$0]  (!%p13038_p5), %s16975_s7, 16, %s13034_s20, [#allocation11]  }
  0x3d   : > { %s17229_s4 = sld [smem:[#allocation111_spill]] }
  0x43   : > { %s12728_s21 = scalar_lea.hbm %s17229_s4, 16 }
  0x44   : > { %p12729_p11 = scmp.ne.s32.totalorder %s17229_s4, %s12728_s21  ;;  %p12735_p0 = scmp.lt.u32.totalorder %s12728_s21, %s17229_s4 }
  0x46   : > { %p12731_p12 = pnand %p12729_p11, %p13054_p7 }
  0x48   : > { %p12732_p13 = pneg %p12731_p12 }
  0x4a   : > { %p12737_p1 = pnand %p12735_p0, %p12732_p13 }
  0x4c   : > { %12740 = shalt.err (!%p12737_p1)
}
  0x4d   : > { %s12741_s20 = scalar_lea.vmem %s13042_s22, 16  ;;  %s12748_s18 = scalar_lea.vmem %s13042_s22, 32 }
  0x4e   : > { %p12742_p4 = scmp.ne.s32.totalorder %s13042_s22, %s12741_s20  ;;  %p12749_p9 = scmp.lt.s32.totalorder %s13042_s22, %s13042_s22 }
  0x4f   : > { %p12750_p10 = scmp.lt.s32.totalorder %s12748_s18, %s12741_s20 }
  0x50   : > { %p12744_p6 = pnand %p12742_p4, %p13054_p7 }
  0x51   : > { %p12751_p11 = por %p12750_p10, %p12749_p9 }
  0x52   : > { %p12745_p8 = pneg %p12744_p6 }
  0x54   : > { %p12752_p12 = pnand %p12751_p11, %p12745_p8 }
  0x56   : > { %12755 = shalt.err (!%p12752_p12)
}
  0x57   : > { %11904 = dma.hbm_to_vmem [thread:$0]  (!%p13038_p5), %s17229_s4, 16, %s13042_s22, [#allocation6]  }
  0x58   : > { %s12756_s21 = scalar_lea.hbm %s16974_s6, 256 }
  0x59   : > { %p12757_p13 = scmp.ne.s32.totalorder %s16974_s6, %s12756_s21  ;;  %p12763_p4 = scmp.lt.u32.totalorder %s12756_s21, %s16974_s6 }
  0x5b   : > { %p12759_p0 = pnand %p12757_p13, %p13054_p7 }
  0x5d   : > { %p12760_p1 = pneg %p12759_p0 }
  0x5f   : > { %p12765_p6 = pnand %p12763_p4, %p12760_p1 }
  0x61   : > { %12768 = shalt.err (!%p12765_p6)
}
  0x62   : > { %s12769_s22 = scalar_lea.vmem %s13044_s24, 256  ;;  %p12777_p11 = scmp.lt.s32.totalorder %s13044_s24, %s13044_s24 }
  0x63   : > { %p12770_p8 = scmp.ne.s32.totalorder %s13044_s24, %s12769_s22  ;;  %p12778_p12 = scmp.lt.s32.totalorder %s12769_s22, %s12769_s22 }
  0x65   : > { %p12772_p9 = pnand %p12770_p8, %p13054_p7  ;;  %p12779_p13 = por %p12778_p12, %p12777_p11 }
  0x67   : > { %p12773_p10 = pneg %p12772_p9 }
  0x69   : > { %p12780_p0 = pnand %p12779_p13, %p12773_p10 }
  0x6b   : > { %12783 = shalt.err (!%p12780_p0)
}
  0x6c   : > { %s12836_s20 = smov 128   ;;  %s12837_s18 = smov 8  }
  0x6d   : > { %11910 = dma.hbm_to_vmem [thread:$0]  (!%p13038_p5), %s16974_s6, 256, %s13044_s24, [#allocation8], %s12836_s20, %s12836_s20, %s12837_s18  }
  0x6e   : > { %s12838_s28 = smov [#allocation12]   ;;  %s12784_s25 = scalar_lea.hbm %s16981_s13, 4096 }
  0x6f   : > { %s531_s30 = sshll.u32 %s12838_s28, 4  ;;  %p12785_p1 = scmp.ne.s32.totalorder %s16981_s13, %s12784_s25  ;;  %s532_s30 = int_to_ptr.vmem [resolvable:$true] %s531_s30 }
  0x70   : > { %p12791_p8 = scmp.lt.u32.totalorder %s12784_s25, %s16981_s13 }
  0x71   : > { %p12787_p4 = pnand %p12785_p1, %p13054_p7 }
  0x73   : > { %p12788_p6 = pneg %p12787_p4 }
  0x75   : > { %p12793_p9 = pnand %p12791_p8, %p12788_p6 }
  0x77   : > { %12796 = shalt.err (!%p12793_p9)
}
  0x78   : > { %s12797_s24 = scalar_lea.vmem %s532_s30, 4096  ;;  %p12805_p13 = scmp.lt.s32.totalorder %s532_s30, %s532_s30 }
  0x79   : > { %p12798_p10 = scmp.ne.s32.totalorder %s532_s30, %s12797_s24  ;;  %p12806_p0 = scmp.lt.s32.totalorder %s12797_s24, %s12797_s24 }
  0x7b   : > { %p12800_p11 = pnand %p12798_p10, %p13054_p7  ;;  %p12807_p2 = por %p12806_p0, %p12805_p13 }
  0x7d   : > { %p12801_p12 = pneg %p12800_p11 }
  0x7f   : > { %p12808_p3 = pnand %p12807_p2, %p12801_p12 }
  0x81   : > { %12811 = shalt.err (!%p12808_p3)
}
  0x82   : > { %s12839_s20 = smov 512   ;;  %s12840_s18 = smov 32  }
  0x83   : > { %11916 = dma.hbm_to_vmem [thread:$0]  (!%p13038_p5), %s16981_s13, 4096, %s532_s30, [#allocation11], %s12839_s20, %s12839_s20, %s12840_s18  }
  0x84   : > { %p17230_p1 = scmp.ne.s32.totalorder %s17226_s15, 0 }
  0x86   : > { %572 = sbr.rel (%p17230_p1) target bundleno = 2380 (0x94c), region = 92 }
  0x8d   : > { %p17231_p4 = scmp.eq.s32.totalorder %s13021_s19, 0 }
  0x8f   : > { %12817 = dma.done.wait (%p17231_p4), [#allocation6], 16   ;;  %p17232_p7 = pmov %p17231_p4 }
  0x90   : > { %p17233_p2 = pmov %p17231_p4 }
  0x91   : > { %12819 = vsyncadd (%p17232_p7), [#allocation6], 4294967280 }
  0x92   : > { %12821 = dma.done.wait (%p17233_p2), [#allocation8], 272   ;;  %p17234_p3 = pmov %p17233_p2 }
  0x93   : > { %p17235_p6 = pmov %p17233_p2 }
  0x94   : > { %12823 = vsyncadd (%p17234_p3), [#allocation8], 4294967024 }
  0x95   : > { %12825 = dma.done.wait (%p17235_p6), [#allocation11], 4112   ;;  %p17236_p5 = pmov %p17233_p2 }
  0x96   : > { %p643_p8 = scmp.lt.s32.totalorder %s13021_s19, 1  ;;  %v12841_v1 = vmov 0   ;;  %v16996_v2 = vmov 0.0   ;;  %vm12843_vm0 = vmmov 0   ;;  %s17237_s1 = sld [smem:[#allocation109_spill]]  ;;  %vm679_vm1 = vcmask 1043456  }
  0x97   : > { %12827 = vsyncadd (%p17236_p5), [#allocation11], 4294963184  ;;  %12020 = vset.pattern.permute.xlu0 %v12841_v1  ;;  %11259 = vmatprep.subr.mxu0 %v16996_v2  ;;  %654 = vst [vmem:[#allocation2] sm:$0xf] %v16996_v2  ;;  %s17238_s23 = sld [smem:[#allocation108_spill]]  ;;  %vm675_vm2 = vcmask 31744   ;;  %v16995_v11 = vlaneseq }
  0x98   : > { %11261 = vmatprep.mubr.msk.f32.mxu0 %vm12843_vm0, %v16996_v2  ;;  %s17752_s19 = smov (!%p643_p8, %s13021_s19), 1  ;;  %11268 = vmatprep.mubr.msk.f32.mxu1 %vm12843_vm0, %v16996_v2  ;;  %s17239_s22 = sld [smem:[#allocation110_spill]]  ;;  %v669_v6 = vld [vmem:[%s16971_s3] sm:$0xf]  ;;  %v768_v7 = vld [vmem:[#allocation9] sm:$0xff]  ;;  %v769_v8 = vld [vmem:[#allocation9 + $0x8] sm:$0xff] }
  0x99   : > { %12021 = vset.pattern.permute.xlu1 %v12841_v1  ;;  %s16990_s28 = sshll.u32 %s17752_s19, 2  ;;  %v11407_v9 = vpack.c.bf16 %v769_v8, %v768_v7  ;;  %v12844_v10 = vmov 0.0|0.0   ;;  %v13207_v12 = vshrl.u32 %v16995_v11, 7  ;;  %v754_v14 = vld [vmem:[#allocation5] sm:$0x1]  ;;  %vm771_vm3 = vcmask 130048  }
  0x9a   : > { %11406 = vmatprep.subr.bf16.mxu1 %v12844_v10  ;;  %v765_v17 = vld [vmem:[#allocation7] sm:$0x1]  ;;  %v848_v23 = vld [vmem:[%s16977_s9 + $0x8] sm:$0xff]  ;;  %v850_v24 = vld [vmem:[%s16977_s9 + $0x18] sm:$0xff]  ;;  %vm960_vm4 = vcmask 523264   ;;  %s12848_s24 = smov 96  }
  0x9b   : > { %11408 = vmatpush3.bf16.msra.mxu1 %v11407_v9  ;;  %v13210_v13 = vsub.s32 0, %v13207_v12  ;;  %v11409_v25 = vpack.c.bf16 %v850_v24, %v848_v23  ;;  %v847_v26 = vld [vmem:[%s16977_s9] sm:$0xff]  ;;  %v849_v27 = vld [vmem:[%s16977_s9 + $0x10] sm:$0xff]  ;;  %v945_v29 = vld [vmem:[%s16976_s8 + $0x8] sm:$0xff]  ;;  %s12849_s29 = smov 13   ;;  %s12851_s30 = smov 11  }
  0x9c   : > { %s649_s27 = scalar_lea.vmem %s17237_s1, %s17752_s19  ;;  %v11411_v28 = vpack.c.bf16 %v849_v27, %v847_v26  ;;  %v947_v30 = vld [vmem:[%s16976_s8 + $0x18] sm:$0xff]  ;;  %v944_v33 = vld [vmem:[%s16976_s8] sm:$0xff]  ;;  %v946_v34 = vld [vmem:[%s16976_s8 + $0x10] sm:$0xff]  ;;  %s12853_s20 = smov 15   ;;  %vm1389_vm5 = vcmask 778496   ;;  %vm4356_vm6 = vcmask 449536  }
  0x9d   : > { %s646_s25 = scalar_lea.vmem %s17238_s23, %s16990_s28  ;;  %v753_v3 = vld [vmem:[%s649_s27] sm:$0x1]  ;;  %17240 = vst [vmem:[#allocation17_spill] sm:$0xff] %v13210_v13  ;;  %11410 = vmatprep.subr.bf16.mxu1 %v11409_v25  ;;  %v11413_v31 = vpack.c.bf16 %v947_v30, %v945_v29  ;;  %v770_v32 = vld [vmem:[#allocation10] sm:$0x1]  ;;  %v949_v36 = vld [vmem:[%s16976_s8 + $0x28] sm:$0xff]  ;;  %v11415_v40 = vpack.c.bf16 %v946_v34, %v944_v33 }
  0x9e   : > { %v668_v4 = vld [vmem:[%s646_s25] sm:$0xf]  ;;  %757 = vperm.xlu0 %12020, %v753_v3   ;;  %v951_v37 = vld [vmem:[%s16976_s8 + $0x38] sm:$0xff]  ;;  %v950_v44 = vld [vmem:[%s16976_s8 + $0x30] sm:$0xff]  ;;  %s12846_s25 = smov 32   ;;  %s12850_s27 = smov 16  }
  0x9f   : > { %v667_v5 = vld [vmem:[%s17239_s22] sm:$0xf]  ;;  %11260 = vmatpush3.msk.msra.mxu0 %vm679_vm1, %v668_v4  ;;  %v11417_v42 = vpack.c.bf16 %v951_v37, %v949_v36  ;;  %v953_v45 = vld [vmem:[%s16976_s8 + $0x48] sm:$0xff]  ;;  %v955_v46 = vld [vmem:[%s16976_s8 + $0x58] sm:$0xff]  ;;  %s12847_s22 = smov 12   ;;  %s12854_s4 = smov 17  }
  0xa0   : > { %11262 = vmatmul.mubr.msk.f32.vlgmr.msra.gmra.mrb[0].mxu0 %vm675_vm2, %v667_v5  ;;  %v948_v43 = vld [vmem:[%s16976_s8 + $0x20] sm:$0xff]  ;;  %v11421_v48 = vpack.c.bf16 %v955_v46, %v953_v45  ;;  %v954_v50 = vld [vmem:[%s16976_s8 + $0x50] sm:$0xff]  ;;  %v957_v51 = vld [vmem:[%s16976_s8 + $0x68] sm:$0xff]  ;;  %s12855_s1 = smov 20   ;;  %s12856_s21 = smov 21   ;;  %vm4403_vm7 = vcmask 457728  }
  0xa1   : > { %4537 = vmatprep.mubr.f32.mxu0 %v16996_v2  ;;  %v11419_v47 = vpack.c.bf16 %v950_v44, %v948_v43  ;;  %v952_v49 = vld [vmem:[%s16976_s8 + $0x40] sm:$0xff]  ;;  %v959_v52 = vld [vmem:[%s16976_s8 + $0x78] sm:$0xff]  ;;  %v958_v56 = vld [vmem:[%s16976_s8 + $0x70] sm:$0xff]  ;;  %s12857_s0 = smov 27   ;;  %s12858_s18 = smov 28   ;;  %vm4834_vm8 = vcmask 465920  }
  0xa2   : > { %672 = vperm.xlu0 %12020, %v669_v6   ;;  %v11423_v53 = vpack.c.bf16 %v954_v50, %v952_v49  ;;  %v11425_v54 = vpack.c.bf16 %v959_v52, %v957_v51  ;;  %v956_v55 = vld [vmem:[%s16976_s8 + $0x60] sm:$0xff]  ;;  %v1055_v57 = vld [vmem:[%s16976_s8 + $0x88] sm:$0xff]  ;;  %v1057_v58 = vld [vmem:[%s16976_s8 + $0x98] sm:$0xff]  ;;  %s12859_s15 = smov 29   ;;  %s12878_s23 = smov 112   ;;  %vm5077_vm9 = vcmask 515072  }
  0xa3   : > { %v11427_v59 = vpack.c.bf16 %v958_v56, %v956_v55  ;;  %v11429_v60 = vpack.c.bf16 %v1057_v58, %v1055_v57  ;;  %v1054_v61 = vld [vmem:[%s16976_s8 + $0x80] sm:$0xff]  ;;  %v1056_v62 = vld [vmem:[%s16976_s8 + $0x90] sm:$0xff]  ;;  %v1059_v63 = vld [vmem:[%s16976_s8 + $0xa8] sm:$0xff]  ;;  %s12879_s26 = smov 111   ;;  %s12887_s2 = smov 95   ;;  %vm5127_vm10 = vcmask 531456  }
  0xa4   : > { %v1061_v0 = vld [vmem:[%s16976_s8 + $0xb8] sm:$0xff]  ;;  %v11431_v3 = vpack.c.bf16 %v1056_v62, %v1054_v61  ;;  %v1058_v6 = vld [vmem:[%s16976_s8 + $0xa0] sm:$0xff]  ;;  %v1060_v7 = vld [vmem:[%s16976_s8 + $0xb0] sm:$0xff]  ;;  %s12916_s28 = smov 9   ;;  %vm4884_vm11 = vcmask 580608   ;;  %vm4453_vm12 = vcmask 588800  }
  0xa5   : > { %v11433_v5 = vpack.c.bf16 %v1061_v0, %v1059_v63  ;;  %v1063_v8 = vld [vmem:[%s16976_s8 + $0xc8] sm:$0xff]  ;;  %v1065_v9 = vld [vmem:[%s16976_s8 + $0xd8] sm:$0xff]  ;;  %v11435_v10 = vpack.c.bf16 %v1060_v7, %v1058_v6  ;;  %v1163_v27 = vld [vmem:[%s16976_s8 + $0x100] sm:$0xff]  ;;  %vm4645_vm13 = vcmask 596992   ;;  %vm17112_vm14 = vcmask 973824  }
  0xa6   : > { %v1164_v23 = vld [vmem:[%s16976_s8 + $0x108] sm:$0xff]  ;;  %v1166_v24 = vld [vmem:[%s16976_s8 + $0x118] sm:$0xff]  ;;  %v1167_v34 = vld [vmem:[%s16976_s8 + $0x120] sm:$0xff]  ;;  %vm17125_vm15 = vcmask 982016   ;;  %vm7011_vm0 = vcmask 990208  }
  0xa7   : > { %v11445_v26 = vpack.c.bf16 %v1166_v24, %v1164_v23  ;;  %v1168_v29 = vld [vmem:[%s16976_s8 + $0x128] sm:$0xff]  ;;  %v1170_v30 = vld [vmem:[%s16976_s8 + $0x138] sm:$0xff]  ;;  %v1175_v46 = vld [vmem:[%s16976_s8 + $0x160] sm:$0xff] }
  0xa8   : > { %v11449_v33 = vpack.c.bf16 %v1170_v30, %v1168_v29  ;;  %v1172_v36 = vld [vmem:[%s16976_s8 + $0x148] sm:$0xff]  ;;  %v1174_v37 = vld [vmem:[%s16976_s8 + $0x158] sm:$0xff]  ;;  %v1272_v52 = vld [vmem:[%s16976_s8 + $0x180] sm:$0xff] }
  0xa9   : > { %v1178_v43 = vld [vmem:[%s16976_s8 + $0x178] sm:$0xff]  ;;  %v1281_v61 = vld [vmem:[%s16976_s8 + $0x1c8] sm:$0xff] }
  0xaa   : > { %v1275_v49 = vld [vmem:[%s16976_s8 + $0x198] sm:$0xff] }
  0xab   : > { %v1279_v55 = vld [vmem:[%s16976_s8 + $0x1b8] sm:$0xff] }
  0xac   : > { %v1283_v62 = vld [vmem:[%s16976_s8 + $0x1d8] sm:$0xff] }
  0xad   : > { %v11469_v0 = vpack.c.bf16 %v1283_v62, %v1281_v61  ;;  %v1287_v6 = vld [vmem:[%s16976_s8 + $0x1f8] sm:$0xff]  ;;  %v11011_v61 = vld [vmem:[%s16984_s16 + $0x8] ss:$0 sm:$0xff]  ;;  %v11015_v62 = vld [vmem:[%s16984_s16 + $0x9] ss:$0 sm:$0xff] }
 0x11d   : > { %v758_v15 = vpop.permute.xlu0 %757 }
 0x11e   : > { %v763_v16 = vrot.slane %v758_v15, %v13210_v13  ;;  %v1062_v15 = vld [vmem:[%s16976_s8 + $0xc0] sm:$0xff] }
 0x120   : > { %v764_v18 = vmul.f32 %v763_v16, %v754_v14  ;;  %v11437_v14 = vpack.c.bf16 %v1065_v9, %v1063_v8  ;;  %v1064_v16 = vld [vmem:[%s16976_s8 + $0xd0] sm:$0xff]  ;;  %v1284_v9 = vld [vmem:[%s16976_s8 + $0x1e0] sm:$0xff] }
 0x121   : > { %v673_v1 = vpop.permute.xlu0 %672 }
 0x122   : > { %v766_v19 = vadd.f32 %v765_v17, %v764_v18  ;;  %v1067_v17 = vld [vmem:[%s16976_s8 + $0xe8] sm:$0xff]  ;;  %v1069_v18 = vld [vmem:[%s16976_s8 + $0xf8] sm:$0xff] }
 0x124   : > { %v767_v20 = vmax.f32 %v766_v19, 0.0  ;;  %v11439_v19 = vpack.c.bf16 %v1064_v16, %v1062_v15 }
 0x126   : > { %11269 = vmatmul.mubr.msk.f32.vlgmr.msra.gmra.mrb[0].mxu1 %vm771_vm3, %v767_v20  ;;  %v11441_v20 = vpack.c.bf16 %v1069_v18, %v1067_v17 }
 0x127   : > { %918 = vmatprep.mubr.f32.mxu1 %v16996_v2  ;;  %11412 = vmatpush1.bf16.msra.mxu1 %v11411_v28  ;;  %v1165_v28 = vld [vmem:[%s16976_s8 + $0x110] sm:$0xff] }
 0x128   : > { %11414 = vmatprep.subr.bf16.mxu1 %v11413_v31  ;;  %v11447_v31 = vpack.c.bf16 %v1165_v28, %v1163_v27 }
 0x173   : > { %v749_v21 = vpop.f32.mrb[0].mxu0 }
 0x174   : > { %v11263_v22 = vpop.f32.mrb[1].mxu0  ;;  %v13295_v4 = vadd.f32 %v749_v21, %v673_v1  ;;  %v1066_v21 = vld [vmem:[%s16976_s8 + $0xe0] sm:$0xff] }
 0x175   : > { %v1068_v22 = vld [vmem:[%s16976_s8 + $0xf0] sm:$0xff]  ;;  %v1280_v1 = vld [vmem:[%s16976_s8 + $0x1c0] sm:$0xff] }
 0x176   : > { %v11443_v25 = vpack.c.bf16 %v1068_v22, %v1066_v21  ;;  %v1179_v57 = vrot.slane %v13295_v4, 2  ;;  %v1288_v15 = vrot.slane %v13295_v4, 3 }
 0x1f9   : > { %v841_v35 = vpop.f32.mrb[0].mxu1 }
 0x1fa   : > { %v842_v38 = vadd.f32 %v841_v35, %v770_v32  ;;  %v11270_v39 = vpop.f32.mrb[1].mxu1  ;;  %v1070_v32 = vrot.slane %v13295_v4, 1  ;;  %v1169_v35 = vld [vmem:[%s16976_s8 + $0x130] sm:$0xff] }
 0x1fb   : > { %v11453_v39 = vpack.c.bf16 %v1174_v37, %v1172_v36 }
 0x1fc   : > { %v845_v41 = vmax.f32 %v842_v38, 0.0  ;;  %v11451_v38 = vpack.c.bf16 %v1169_v35, %v1167_v34 }
 0x1fe   : > { %10974 = vmatmul.mubr.msk.f32.vlgmr.msra.gmra.mrb[2].mxu1 %vm771_vm3, %v845_v41  ;;  %v1173_v41 = vld [vmem:[%s16976_s8 + $0x150] sm:$0xff] }
 0x1ff   : > { %11416 = vmatpush1.bf16.msra.mxu1 %v11415_v40  ;;  %1028 = vmatprep.mubr.f32.mxu1 %v16996_v2  ;;  %v1171_v40 = vld [vmem:[%s16976_s8 + $0x140] sm:$0xff] }
 0x200   : > { %11418 = vmatprep.subr.bf16.mxu1 %v11417_v42  ;;  %v1176_v42 = vld [vmem:[%s16976_s8 + $0x168] sm:$0xff]  ;;  %v11455_v44 = vpack.c.bf16 %v1173_v41, %v1171_v40 }
 0x201   : > { %v11457_v45 = vpack.c.bf16 %v1178_v43, %v1176_v42 }
 0x203   : > { %11420 = vmatpush1.bf16.msra.mxu1 %v11419_v47  ;;  %v1177_v47 = vld [vmem:[%s16976_s8 + $0x170] sm:$0xff] }
 0x204   : > { %11422 = vmatprep.subr.bf16.mxu1 %v11421_v48  ;;  %v1273_v48 = vld [vmem:[%s16976_s8 + $0x188] sm:$0xff]  ;;  %v11459_v50 = vpack.c.bf16 %v1177_v47, %v1175_v46 }
 0x205   : > { %v11461_v51 = vpack.c.bf16 %v1275_v49, %v1273_v48  ;;  %v13451_v49 = vsub.s32 1, %v13207_v12 }
 0x207   : > { %11424 = vmatpush1.bf16.msra.mxu1 %v11423_v53  ;;  %v1274_v53 = vld [vmem:[%s16976_s8 + $0x190] sm:$0xff]  ;;  %17242 = vst [vmem:[#allocation19_spill] sm:$0xff] %v13451_v49 }
 0x208   : > { %11426 = vmatprep.subr.bf16.mxu1 %v11425_v54  ;;  %v1277_v54 = vld [vmem:[%s16976_s8 + $0x1a8] sm:$0xff]  ;;  %v11463_v56 = vpack.c.bf16 %v1274_v53, %v1272_v52  ;;  %v10980_v53 = vld [vmem:[%s16984_s16 + $0x1] ss:$0 sm:$0xff] }
 0x209   : > { %v11465_v58 = vpack.c.bf16 %v1279_v55, %v1277_v54  ;;  %v10987_v54 = vld [vmem:[%s16984_s16 + $0x2] ss:$0 sm:$0xff]  ;;  %v10995_v55 = vld [vmem:[%s16984_s16 + $0x4] ss:$0 sm:$0xff] }
 0x20b   : > { %11428 = vmatpush1.bf16.msra.mxu1 %v11427_v59  ;;  %v1276_v59 = vld [vmem:[%s16976_s8 + $0x1a0] sm:$0xff] }
 0x20c   : > { %11430 = vmatprep.subr.bf16.mxu1 %v11429_v60  ;;  %v1278_v60 = vld [vmem:[%s16976_s8 + $0x1b0] sm:$0xff] }
 0x20d   : > { %v11467_v63 = vpack.c.bf16 %v1278_v60, %v1276_v59  ;;  %v10999_v59 = vld [vmem:[%s16984_s16 + $0x5] ss:$0 sm:$0xff]  ;;  %v11007_v60 = vld [vmem:[%s16984_s16 + $0x7] ss:$0 sm:$0xff] }
 0x20e   : > { %10975 = vmatmul.mubr.msk.f32.vlgmr.msra.gmra.mrb[4].mxu1 %vm960_vm4, %v13295_v4  ;;  %v846_v4 = vld [vmem:[%s16978_s10] sm:$0x3] }
 0x20f   : > { %11432 = vmatpush1.bf16.msra.mxu1 %v11431_v3  ;;  %1137 = vmatprep.mubr.f32.mxu1 %v16996_v2  ;;  %v1282_v3 = vld [vmem:[%s16976_s8 + $0x1d0] sm:$0xff] }
 0x210   : > { %11434 = vmatprep.subr.bf16.mxu1 %v11433_v5  ;;  %v1285_v5 = vld [vmem:[%s16976_s8 + $0x1e8] sm:$0xff]  ;;  %v11471_v7 = vpack.c.bf16 %v1282_v3, %v1280_v1 }
 0x211   : > { %v11473_v8 = vpack.c.bf16 %v1287_v6, %v1285_v5  ;;  %v11027_v1 = vld [vmem:[%s16984_s16 + $0xc] ss:$0 sm:$0xff]  ;;  %v11031_v3 = vld [vmem:[%s16984_s16 + $0xd] ss:$0 sm:$0xff]  ;;  %v11035_v5 = vld [vmem:[%s16984_s16 + $0xe] ss:$0 sm:$0xff] }
 0x212   : > { %v11039_v6 = vld [vmem:[%s16984_s16 + $0xf] ss:$0 sm:$0xff] }
 0x213   : > { %11436 = vmatpush1.bf16.msra.mxu1 %v11435_v10  ;;  %v1286_v10 = vld [vmem:[%s16976_s8 + $0x1f0] sm:$0xff] }
 0x214   : > { %11438 = vmatprep.subr.bf16.mxu1 %v11437_v14  ;;  %v11475_v14 = vpack.c.bf16 %v1286_v10, %v1284_v9  ;;  %v11051_v9 = vld [vmem:[%s16984_s16 + $0x12] ss:$0 sm:$0xff]  ;;  %v11055_v10 = vld [vmem:[%s16984_s16 + $0x13] ss:$0 sm:$0xff] }
 0x217   : > { %11440 = vmatpush1.bf16.msra.mxu1 %v11439_v19  ;;  %v12845_v19 = vmov 1966171168  }
 0x218   : > { %11442 = vmatprep.subr.bf16.mxu1 %v11441_v20  ;;  %v929_v20 = vunpack.c.l.s4 %v12845_v19  ;;  %v11079_v19 = vld [vmem:[%s16984_s16 + $0x19] ss:$0 sm:$0xff] }
 0x21a   : > { %v930_v21 = vunpack.c.0.s8 %v929_v20  ;;  %v11083_v20 = vld [vmem:[%s16984_s16 + $0x1a] ss:$0 sm:$0xff] }
 0x21b   : > { %11444 = vmatpush1.bf16.msra.mxu1 %v11443_v25 }
 0x21c   : > { %11446 = vmatprep.subr.bf16.mxu1 %v11445_v26  ;;  %v13435_v22 = vsub.s32 %v930_v21, %v13207_v12 }
 0x21e   : > { %10976 = vmatmul.mubr.msk.f32.vlgmr.msra.gmra.mrb[6].mxu1 %vm960_vm4, %v1070_v32  ;;  %17241 = vst [vmem:[#allocation18_spill] sm:$0xff] %v13435_v22 }
 0x21f   : > { %11448 = vmatpush1.bf16.msra.mxu1 %v11447_v31  ;;  %1246 = vmatprep.mubr.f32.mxu1 %v16996_v2 }
 0x220   : > { %11450 = vmatprep.subr.bf16.mxu1 %v11449_v33 }
 0x223   : > { %11452 = vmatpush1.bf16.msra.mxu1 %v11451_v38 }
 0x224   : > { %11454 = vmatprep.subr.bf16.mxu1 %v11453_v39 }
 0x227   : > { %11456 = vmatpush1.bf16.msra.mxu1 %v11455_v44 }
 0x228   : > { %11458 = vmatprep.subr.bf16.mxu1 %v11457_v45 }
 0x22b   : > { %11460 = vmatpush1.bf16.msra.mxu1 %v11459_v50 }
 0x22c   : > { %11462 = vmatprep.subr.bf16.mxu1 %v11461_v51 }
 0x22e   : > { %10977 = vmatmul.mubr.msk.f32.vlgmr.msra.gmra.mrb[8].mxu1 %vm960_vm4, %v1179_v57  ;;  %v11003_v57 = vld [vmem:[%s16984_s16 + $0x6] ss:$0 sm:$0xff] }
 0x22f   : > { %11464 = vmatpush1.bf16.msra.mxu1 %v11463_v56  ;;  %1355 = vmatprep.mubr.f32.mxu1 %v16996_v2  ;;  %v10979_v56 = vld [vmem:[%s16984_s16] ss:$0 sm:$0xff] }
 0x230   : > { %11466 = vmatprep.subr.bf16.mxu1 %v11465_v58  ;;  %v10991_v58 = vld [vmem:[%s16984_s16 + $0x3] ss:$0 sm:$0xff] }
 0x233   : > { %11468 = vmatpush1.bf16.msra.mxu1 %v11467_v63  ;;  %v11019_v63 = vld [vmem:[%s16984_s16 + $0xa] ss:$0 sm:$0xff] }
 0x234   : > { %11470 = vmatprep.subr.bf16.mxu1 %v11469_v0  ;;  %v11023_v0 = vld [vmem:[%s16984_s16 + $0xb] ss:$0 sm:$0xff] }
 0x237   : > { %11472 = vmatpush1.bf16.msra.mxu1 %v11471_v7  ;;  %v11043_v7 = vld [vmem:[%s16984_s16 + $0x10] ss:$0 sm:$0xff] }
 0x238   : > { %11474 = vmatprep.subr.bf16.mxu1 %v11473_v8  ;;  %v11047_v8 = vld [vmem:[%s16984_s16 + $0x11] ss:$0 sm:$0xff] }
 0x23b   : > { %11476 = vmatpush1.bf16.msra.mxu1 %v11475_v14  ;;  %v11059_v14 = vld [vmem:[%s16984_s16 + $0x14] ss:$0 sm:$0xff] }
 0x23e   : > { %10978 = vmatmul.mubr.msk.f32.vlgmr.msra.gmra.mrb[10].mxu1 %vm960_vm4, %v1288_v15  ;;  %v11063_v15 = vld [vmem:[%s16984_s16 + $0x15] ss:$0 sm:$0xff] }
 0x2d1   : > { %v920_v16 = vpop.f32.mrb[2].mxu1 }
 0x2d2   : > { %v922_v17 = vpop.f32.mrb[3].mxu1 }
 0x2d3   : > { %v927_v18 = vcombine.low %v920_v16, %v922_v17  ;;  %v11067_v16 = vld [vmem:[%s16984_s16 + $0x16] ss:$0 sm:$0xff]  ;;  %v11071_v17 = vld [vmem:[%s16984_s16 + $0x17] ss:$0 sm:$0xff] }
 0x2d5   : > { %v934_v23 = vrot.slane %v927_v18, %v13435_v22  ;;  %v11075_v18 = vld [vmem:[%s16984_s16 + $0x18] ss:$0 sm:$0xff] }
 0x2d7   : > { %v941_v26 = vrot.slane %v934_v23, %v13435_v22 }
 0x2d9   : > { %v943_v29 = vadd.f32 %v941_v26, %v846_v4 }
 0x2e1   : > { %v1030_v24 = vpop.f32.mrb[4].mxu1 }
 0x2e2   : > { %v1032_v25 = vpop.f32.mrb[5].mxu1 }
 0x2e3   : > { %v1037_v27 = vcombine.low %v1030_v24, %v1032_v25  ;;  %v1430_v25 = vld [vmem:[%s16979_s11 + $0x10] sm:$0xff] }
 0x2e4   : > { %11273 = vmatprep.mubr.msk.f32.mxu1 %vm675_vm2, %v1430_v25 }
 0x2e5   : > { %v1044_v28 = vrot.slane %v1037_v27, %v13435_v22 }
 0x2e7   : > { %v1051_v30 = vrot.slane %v1044_v28, %v13435_v22 }
 0x2e9   : > { %v1053_v31 = vadd.f32 %v1051_v30, %v943_v29 }
 0x2f1   : > { %v1139_v32 = vpop.f32.mrb[6].mxu1 }
 0x2f2   : > { %v1141_v33 = vpop.f32.mrb[7].mxu1 }
 0x2f3   : > { %v1146_v34 = vcombine.low %v1139_v32, %v1141_v33 }
 0x2f5   : > { %v1153_v35 = vrot.slane %v1146_v34, %v13435_v22 }
 0x2f7   : > { %v1160_v36 = vrot.slane %v1153_v35, %v13435_v22 }
 0x2f9   : > { %v1162_v37 = vadd.f32 %v1160_v36, %v1053_v31 }
 0x301   : > { %v1248_v38 = vpop.f32.mrb[8].mxu1 }
 0x302   : > { %v1250_v39 = vpop.f32.mrb[9].mxu1 }
 0x303   : > { %v1255_v40 = vcombine.low %v1248_v38, %v1250_v39 }
 0x305   : > { %v1262_v41 = vrot.slane %v1255_v40, %v13435_v22 }
 0x307   : > { %v1269_v42 = vrot.slane %v1262_v41, %v13435_v22 }
 0x309   : > { %v1271_v43 = vadd.f32 %v1269_v42, %v1162_v37 }
 0x311   : > { %v1357_v44 = vpop.f32.mrb[10].mxu1 }
 0x312   : > { %v1359_v45 = vpop.f32.mrb[11].mxu1 }
 0x313   : > { %v1364_v46 = vcombine.low %v1357_v44, %v1359_v45 }
 0x315   : > { %v1371_v47 = vrot.slane %v1364_v46, %v13435_v22 }
 0x317   : > { %v1378_v48 = vrot.slane %v1371_v47, %v13435_v22 }
 0x319   : > { %v1380_v50 = vadd.f32 %v1378_v48, %v1271_v43 }
 0x31b   : > { %v1398_v51 = vrot.slane %v1380_v50, %v13451_v49  ;;  %v1385_v52 = vrot.slane %v1380_v50, %v13210_v13 }
 0x31d   : > { %1399 = vrot.lane.b32.xlu0 %v1398_v51, %s12846_s25  ;;  %1386 = vrot.lane.b32.xlu1 %v1385_v52, %s12846_s25 }
 0x321   : > { %1426 = vrot.lane.b32.xlu0 %v10980_v53, %s12847_s22  ;;  %1391 = vrot.lane.b32.xlu1 %v1385_v52, %s12848_s24  ;;  %s12852_s22 = smov 19  }
 0x325   : > { %1610 = vrot.lane.b32.xlu0 %v10987_v54, %s12849_s29  ;;  %1403 = vrot.lane.b32.xlu1 %v1398_v51, %s12848_s24  ;;  %s12884_s29 = smov 100  }
 0x329   : > { %1810 = vrot.lane.b32.xlu0 %v10995_v55, %s12850_s27  ;;  %1414 = vrot.lane.b32.xlu1 %v10979_v56, %s12851_s30  ;;  %s12860_s27 = smov 31   ;;  %s12876_s30 = smov 115  }
 0x32d   : > { %2010 = vrot.lane.b32.xlu0 %v11003_v57, %s12852_s22  ;;  %1710 = vrot.lane.b32.xlu1 %v10991_v58, %s12853_s20  ;;  %s12881_s22 = smov 108   ;;  %s12882_s20 = smov 107  }
 0x331   : > { %1910 = vrot.lane.b32.xlu1 %v10999_v59, %s12854_s4  ;;  %s12885_s4 = smov 99  }
 0x335   : > { %2110 = vrot.lane.b32.xlu1 %v11007_v60, %s12855_s1  ;;  %s12864_s1 = smov 37  }
 0x339   : > { %2210 = vrot.lane.b32.xlu1 %v11011_v61, %s12856_s21  ;;  %s12865_s21 = smov 43  }
 0x33d   : > { %2310 = vrot.lane.b32.xlu1 %v11015_v62, %s12857_s0  ;;  %s12861_s0 = smov 33  }
 0x341   : > { %2410 = vrot.lane.b32.xlu1 %v11019_v63, %s12858_s18  ;;  %s12862_s18 = smov 35  }
 0x345   : > { %2510 = vrot.lane.b32.xlu1 %v11023_v0, %s12859_s15  ;;  %s12863_s15 = smov 36  }
 0x349   : > { %2610 = vrot.lane.b32.xlu1 %v11027_v1, %s12860_s27  ;;  %s12875_s27 = smov 117  }
 0x34d   : > { %2710 = vrot.lane.b32.xlu1 %v11031_v3, %s12846_s25  ;;  %s12888_s25 = smov 83  }
 0x351   : > { %2810 = vrot.lane.b32.xlu1 %v11035_v5, %s12861_s0  ;;  %s12866_s0 = smov 44  }
 0x355   : > { %2910 = vrot.lane.b32.xlu1 %v11039_v6, %s12862_s18  ;;  %s12867_s18 = smov 45  }
 0x359   : > { %3010 = vrot.lane.b32.xlu1 %v11043_v7, %s12863_s15  ;;  %s12868_s15 = smov 47  }
 0x35d   : > { %3110 = vrot.lane.b32.xlu1 %v11047_v8, %s12864_s1  ;;  %s12869_s1 = smov 48  }
 0x361   : > { %3210 = vrot.lane.b32.xlu1 %v11051_v9, %s12865_s21  ;;  %s12870_s21 = smov 49  }
 0x365   : > { %3310 = vrot.lane.b32.xlu1 %v11055_v10, %s12866_s0  ;;  %s12871_s0 = smov 51  }
 0x369   : > { %3410 = vrot.lane.b32.xlu1 %v11059_v14, %s12867_s18  ;;  %s12872_s18 = smov 52  }
 0x36d   : > { %3510 = vrot.lane.b32.xlu1 %v11063_v15, %s12868_s15  ;;  %s12873_s15 = smov 53  }
 0x371   : > { %3610 = vrot.lane.b32.xlu1 %v11067_v16, %s12869_s1  ;;  %s12874_s1 = smov 116  }
 0x375   : > { %3710 = vrot.lane.b32.xlu1 %v11071_v17, %s12870_s21  ;;  %s12877_s21 = smov 113  }
 0x379   : > { %3810 = vrot.lane.b32.xlu1 %v11075_v18, %s12871_s0  ;;  %s12880_s0 = smov 109  }
 0x37d   : > { %3910 = vrot.lane.b32.xlu1 %v11079_v19, %s12872_s18  ;;  %s12883_s18 = smov 101  }
 0x381   : > { %4010 = vrot.lane.b32.xlu1 %v11083_v20, %s12873_s15  ;;  %s12886_s15 = smov 97  }
 0x38f   : > { %v1400_v21 = vpop.permute.xlu0 %1399  ;;  %v1387_v23 = vpop.permute.xlu1 %1386 }
 0x390   : > { %1402 = vst.msk [vmem:[#allocation2 + $0x2] sm:$0x1] %vm1389_vm5, %v1400_v21  ;;  %1390 = vst.msk [vmem:[#allocation2] sm:$0x1] %vm1389_vm5, %v1387_v23 }
 0x393   : > { %v1392_v24 = vpop.permute.xlu1 %1391  ;;  %v1427_v29 = vpop.permute.xlu0 %1426 }
 0x394   : > { %1394 = vst.msk [vmem:[#allocation2 + $0x1] sm:$0x1] %vm1389_vm5, %v1392_v24  ;;  %v4104_v24 = vld [vmem:[%s16980_s12] sm:$0xff] }
 0x397   : > { %v1404_v26 = vpop.permute.xlu1 %1403  ;;  %v1611_v34 = vpop.permute.xlu0 %1610 }
 0x398   : > { %1406 = vst.msk [vmem:[#allocation2 + $0x3] sm:$0x1] %vm1389_vm5, %v1404_v26  ;;  %v1431_v26 = vld [vmem:[%s16979_s11 + $0x18] sm:$0xff]  ;;  %vm7061_vm5 = vcmask 56320  }
 0x39b   : > { %v1415_v27 = vpop.permute.xlu1 %1414  ;;  %v1811_v39 = vpop.permute.xlu0 %1810 }
 0x39f   : > { %v13545_v4 = vld [vmem:[#allocation2] sm:$0xf]  ;;  %v1711_v28 = vpop.permute.xlu1 %1710  ;;  %v2011_v43 = vpop.permute.xlu0 %2010 }
 0x3a0   : > { %v1429_v30 = vmul.f32 %v1427_v29, %v13545_v4  ;;  %v1417_v32 = vmul.f32 %v1415_v27, %v13545_v4  ;;  %v1613_v35 = vmul.f32 %v1611_v34, %v13545_v4  ;;  %v1713_v37 = vmul.f32 %v1711_v28, %v13545_v4  ;;  %v1418_v27 = vld [vmem:[%s16979_s11] sm:$0xff]  ;;  %v1419_v29 = vld [vmem:[%s16979_s11 + $0x8] sm:$0xff] }
 0x3a1   : > { %v1813_v40 = vmul.f32 %v1811_v39, %v13545_v4  ;;  %v2013_v45 = vmul.f32 %v2011_v43, %v13545_v4  ;;  %v1914_v39 = vld [vmem:[%s16979_s11 + $0x50] sm:$0xff] }
 0x3a2   : > { %1433 = vrot.lane.b32.xlu0 %v1429_v30, %s12874_s1  ;;  %s12889_s1 = smov 93   ;;  %v1614_v30 = vld [vmem:[%s16979_s11 + $0x20] sm:$0xff] }
 0x3a3   : > { %v1911_v31 = vpop.permute.xlu1 %1910 }
 0x3a4   : > { %v1913_v42 = vmul.f32 %v1911_v31, %v13545_v4 }
 0x3a6   : > { %1519 = vrot.lane.b32.xlu0 %v1417_v32, %s12875_s27  ;;  %s12890_s27 = smov 92   ;;  %v1615_v32 = vld [vmem:[%s16979_s11 + $0x28] sm:$0xff] }
 0x3a7   : > { %v2111_v33 = vpop.permute.xlu1 %2110 }
 0x3a8   : > { %v2113_v47 = vmul.f32 %v2111_v33, %v13545_v4  ;;  %v1714_v33 = vld [vmem:[%s16979_s11 + $0x30] sm:$0xff] }
 0x3aa   : > { %1617 = vrot.lane.b32.xlu0 %v1613_v35, %s12876_s30  ;;  %s12892_s30 = smov 91   ;;  %v1715_v35 = vld [vmem:[%s16979_s11 + $0x38] sm:$0xff] }
 0x3ab   : > { %v2211_v36 = vpop.permute.xlu1 %2210 }
 0x3ac   : > { %v2213_v50 = vmul.f32 %v2211_v36, %v13545_v4  ;;  %v1814_v36 = vld [vmem:[%s16979_s11 + $0x40] sm:$0xff] }
 0x3ae   : > { %1717 = vrot.lane.b32.xlu0 %v1713_v37, %s12877_s21  ;;  %s12893_s21 = smov 85  }
 0x3af   : > { %v2311_v38 = vpop.permute.xlu1 %2310 }
 0x3b0   : > { %v2313_v52 = vmul.f32 %v2311_v38, %v13545_v4  ;;  %v1815_v38 = vld [vmem:[%s16979_s11 + $0x48] sm:$0xff] }
 0x3b2   : > { %1817 = vrot.lane.b32.xlu0 %v1813_v40, %s12878_s23  ;;  %s12894_s23 = smov 77  }
 0x3b3   : > { %v2411_v41 = vpop.permute.xlu1 %2410 }
 0x3b4   : > { %v2413_v54 = vmul.f32 %v2411_v41, %v13545_v4  ;;  %v1915_v41 = vld [vmem:[%s16979_s11 + $0x58] sm:$0xff] }
 0x3b6   : > { %1917 = vrot.lane.b32.xlu0 %v1913_v42, %s12879_s26  ;;  %s12895_s26 = smov 84   ;;  %v2014_v42 = vld [vmem:[%s16979_s11 + $0x60] sm:$0xff] }
 0x3b7   : > { %v2511_v44 = vpop.permute.xlu1 %2510 }
 0x3b8   : > { %v2513_v56 = vmul.f32 %v2511_v44, %v13545_v4  ;;  %v2015_v44 = vld [vmem:[%s16979_s11 + $0x68] sm:$0xff] }
 0x3ba   : > { %2017 = vrot.lane.b32.xlu0 %v2013_v45, %s12880_s0  ;;  %s12896_s0 = smov 81   ;;  %v2114_v45 = vld [vmem:[%s16979_s11 + $0x70] sm:$0xff] }
 0x3bb   : > { %v2611_v46 = vpop.permute.xlu1 %2610 }
 0x3bc   : > { %v2613_v58 = vmul.f32 %v2611_v46, %v13545_v4 }
 0x3be   : > { %2117 = vrot.lane.b32.xlu0 %v2113_v47, %s12881_s22  ;;  %s12897_s22 = smov 75   ;;  %v2115_v47 = vld [vmem:[%s16979_s11 + $0x78] sm:$0xff] }
 0x3bf   : > { %v2711_v48 = vpop.permute.xlu1 %2710 }
 0x3c0   : > { %v2713_v60 = vmul.f32 %v2711_v48, %v13545_v4  ;;  %v2214_v48 = vld [vmem:[%s16979_s11 + $0x80] sm:$0xff] }
 0x3c2   : > { %2217 = vrot.lane.b32.xlu0 %v2213_v50, %s12882_s20  ;;  %s12898_s20 = smov 79  }
 0x3c3   : > { %v2811_v51 = vpop.permute.xlu1 %2810 }
 0x3c4   : > { %v2813_v62 = vmul.f32 %v2811_v51, %v13545_v4  ;;  %v2215_v51 = vld [vmem:[%s16979_s11 + $0x88] sm:$0xff] }
 0x3c6   : > { %2317 = vrot.lane.b32.xlu0 %v2313_v52, %s12883_s18  ;;  %s12899_s18 = smov 76   ;;  %v2314_v52 = vld [vmem:[%s16979_s11 + $0x90] sm:$0xff] }
 0x3c7   : > { %v2911_v53 = vpop.permute.xlu1 %2910 }
 0x3c8   : > { %v2913_v1 = vmul.f32 %v2911_v53, %v13545_v4 }
 0x3ca   : > { %2417 = vrot.lane.b32.xlu0 %v2413_v54, %s12884_s29  ;;  %v2315_v54 = vld [vmem:[%s16979_s11 + $0x98] sm:$0xff]  ;;  %s12902_s29 = smov 57  }
 0x3cb   : > { %v3011_v55 = vpop.permute.xlu1 %3010 }
 0x3cc   : > { %v3013_v5 = vmul.f32 %v3011_v55, %v13545_v4  ;;  %v2414_v55 = vld [vmem:[%s16979_s11 + $0xa0] sm:$0xff] }
 0x3ce   : > { %2517 = vrot.lane.b32.xlu0 %v2513_v56, %s12885_s4  ;;  %s16993_s4 = smov 64  }
 0x3cf   : > { %v3111_v57 = vpop.permute.xlu1 %3110 }
 0x3d0   : > { %v3113_v8 = vmul.f32 %v3111_v57, %v13545_v4  ;;  %v2415_v57 = vld [vmem:[%s16979_s11 + $0xa8] sm:$0xff] }
 0x3d2   : > { %2617 = vrot.lane.b32.xlu0 %v2613_v58, %s12886_s15  ;;  %v2514_v58 = vld [vmem:[%s16979_s11 + $0xb0] sm:$0xff]  ;;  %s12900_s15 = smov 55  }
 0x3d3   : > { %v3211_v59 = vpop.permute.xlu1 %3210 }
 0x3d4   : > { %v3213_v10 = vmul.f32 %v3211_v59, %v13545_v4  ;;  %v4105_v59 = vld [vmem:[%s16980_s12 + $0x8] sm:$0xff] }
 0x3d6   : > { %2717 = vrot.lane.b32.xlu0 %v2713_v60, %s12848_s24  ;;  %s12891_s24 = smov 80   ;;  %v4330_v60 = vld [vmem:[%s16985_s17] ss:$8 sm:$0xf] }
 0x3d7   : > { %v3311_v61 = vpop.permute.xlu1 %3310 }
 0x3d8   : > { %v3313_v16 = vmul.f32 %v3311_v61, %v13545_v4 }
 0x3da   : > { %2817 = vrot.lane.b32.xlu0 %v2813_v62, %s12887_s2  ;;  %v4335_v62 = vrot.slane %v4330_v60, %v13210_v13  ;;  %s12911_s2 = smov 121  }
 0x3db   : > { %v3411_v63 = vpop.permute.xlu1 %3410 }
 0x3dc   : > { %v3413_v0 = vmul.f32 %v3411_v63, %v13545_v4  ;;  %v4339_v63 = vrot.slane %v4330_v60, %v13451_v49 }
 0x3de   : > { %3417 = vrot.lane.b32.xlu1 %v3413_v0, %s12888_s25  ;;  %2917 = vrot.lane.b32.xlu0 %v2913_v1, %s12889_s1  ;;  %v13700_v0 = vsub.s32 3, %v13207_v12  ;;  %v13703_v1 = vsub.s32 2, %v13207_v12  ;;  %v11091_v12 = vld [vmem:[%s16985_s17 + $0x1] ss:$8 sm:$0xf]  ;;  %s12906_s1 = smov 71  }
 0x3df   : > { %v3511_v3 = vpop.permute.xlu1 %3510  ;;  %s17144_s25 = smov 119  }
 0x3e0   : > { %v3513_v18 = vmul.f32 %v3511_v3, %v13545_v4  ;;  %17243 = vst [vmem:[#allocation20_spill] sm:$0xff] %v13700_v0  ;;  %17244 = vst [vmem:[#allocation21_spill] sm:$0xff] %v13703_v1  ;;  %v4343_v3 = vrot.slane %v4330_v60, %v13703_v1 }
 0x3e2   : > { %3017 = vrot.lane.b32.xlu0 %v3013_v5, %s12890_s27  ;;  %v2515_v5 = vld [vmem:[%s16979_s11 + $0xb8] sm:$0xff]  ;;  %s12908_s27 = smov 73  }
 0x3e3   : > { %v3611_v6 = vpop.permute.xlu1 %3610 }
 0x3e4   : > { %v3613_v7 = vmul.f32 %v3611_v6, %v13545_v4  ;;  %v2614_v6 = vld [vmem:[%s16979_s11 + $0xc0] sm:$0xff] }
 0x3e6   : > { %3617 = vrot.lane.b32.xlu1 %v3613_v7, %s12891_s24  ;;  %3117 = vrot.lane.b32.xlu0 %v3113_v8, %s12892_s30  ;;  %v4347_v7 = vrot.slane %v4330_v60, %v13700_v0  ;;  %v4382_v8 = vrot.slane %v11091_v12, %v13210_v13  ;;  %s16991_s30 = smov 63   ;;  %s17146_s24 = smov 120  }
 0x3e7   : > { %v3711_v9 = vpop.permute.xlu1 %3710 }
 0x3e8   : > { %v3713_v21 = vmul.f32 %v3711_v9, %v13545_v4 }
 0x3ea   : > { %3217 = vrot.lane.b32.xlu0 %v3213_v10, %s12893_s21  ;;  %v4386_v10 = vrot.slane %v11091_v12, %v13451_v49  ;;  %s17173_s21 = smov 56  }
 0x3eb   : > { %v3811_v14 = vpop.permute.xlu1 %3810 }
 0x3ec   : > { %v3813_v15 = vmul.f32 %v3811_v14, %v13545_v4  ;;  %v4390_v14 = vrot.slane %v11091_v12, %v13703_v1 }
 0x3ee   : > { %3817 = vrot.lane.b32.xlu1 %v3813_v15, %s12894_s23  ;;  %3317 = vrot.lane.b32.xlu0 %v3313_v16, %s12895_s26  ;;  %v2615_v15 = vld [vmem:[%s16979_s11 + $0xc8] sm:$0xff]  ;;  %v2714_v16 = vld [vmem:[%s16979_s11 + $0xd0] sm:$0xff]  ;;  %s12905_s26 = smov 65   ;;  %s12915_s23 = smov 8  }
 0x3ef   : > { %v3911_v17 = vpop.permute.xlu1 %3910 }
 0x3f0   : > { %v3913_v23 = vmul.f32 %v3911_v17, %v13545_v4  ;;  %v4394_v17 = vrot.slane %v11091_v12, %v13700_v0 }
 0x3f2   : > { %3517 = vrot.lane.b32.xlu0 %v3513_v18, %s12896_s0  ;;  %v11096_v18 = vld [vmem:[%s16985_s17 + $0x2] ss:$8 sm:$0xf]  ;;  %s17293_s0 = smov 64  }
 0x3f3   : > { %v4011_v19 = vpop.permute.xlu1 %4010 }
 0x3f4   : > { %v4013_v20 = vmul.f32 %v4011_v19, %v13545_v4  ;;  %v4813_v19 = vrot.slane %v11096_v18, %v13210_v13 }
 0x3f6   : > { %4017 = vrot.lane.b32.xlu1 %v4013_v20, %s12897_s22  ;;  %3717 = vrot.lane.b32.xlu0 %v3713_v21, %s12898_s20  ;;  %v4817_v21 = vrot.slane %v11096_v18, %v13451_v49  ;;  %s12912_s20 = smov 127   ;;  %s12914_s22 = smov 7  }
 0x3fa   : > { %3917 = vrot.lane.b32.xlu0 %v3913_v23, %s12899_s18  ;;  %4113 = vperm.xlu1 %12021, %v4105_v59   ;;  %v4821_v23 = vrot.slane %v11096_v18, %v13703_v1  ;;  %v13844_v59 = vld [vmem:[%s16985_s17 + $0x7] ss:$8 sm:$0xf]  ;;  %s12907_s18 = smov 72  }
 0x3fb   : > { %v6026_v60 = vrot.slane %v13844_v59, %v13451_v49 }
 0x3fe   : > { %4108 = vperm.xlu0 %12020, %v4104_v24   ;;  %4350 = vrot.lane.b32.xlu1 %v4339_v63, %s12900_s15  ;;  %v2715_v24 = vld [vmem:[%s16979_s11 + $0xd8] sm:$0xff]  ;;  %v3215_v63 = vld [vmem:[%s16979_s11 + $0x128] sm:$0xff] }
 0x402   : > { %4348 = vrot.lane.b32.xlu0 %v4335_v62, %s12900_s15  ;;  %4354 = vrot.lane.b32.xlu1 %v4347_v7, %s12900_s15  ;;  %v6022_v62 = vrot.slane %v13844_v59, %v13210_v13 }
 0x406   : > { %4352 = vrot.lane.b32.xlu0 %v4343_v3, %s12900_s15  ;;  %4397 = vrot.lane.b32.xlu1 %v4386_v10, %s17173_s21  ;;  %v3314_v3 = vld [vmem:[%s16979_s11 + $0x130] sm:$0xff] }
 0x40a   : > { %4395 = vrot.lane.b32.xlu0 %v4382_v8, %s17173_s21  ;;  %4401 = vrot.lane.b32.xlu1 %v4394_v17, %s17173_s21  ;;  %v3315_v8 = vld [vmem:[%s16979_s11 + $0x138] sm:$0xff]  ;;  %v3415_v17 = vld [vmem:[%s16979_s11 + $0x148] sm:$0xff] }
 0x40e   : > { %4399 = vrot.lane.b32.xlu0 %v4390_v14, %s17173_s21  ;;  %4828 = vrot.lane.b32.xlu1 %v4817_v21, %s12902_s29  ;;  %v13890_v14 = vld [vmem:[%s16985_s17 + $0x21] ss:$8 sm:$0xf] }
 0x412   : > { %4826 = vrot.lane.b32.xlu0 %v4813_v19, %s12902_s29  ;;  %v6512_v19 = vrot.slane %v13890_v14, %v13703_v1 }
 0x414   : > { %v1434_v25 = vpop.permute.xlu0 %1433 }
 0x415   : > { %11271 = vmatprep.subr.msk.mxu1 %vm679_vm1, %v1434_v25 }
 0x416   : > { %11272 = vmatpush3.msk.msra.mxu1 %vm679_vm1, %v1434_v25  ;;  %v2814_v25 = vld [vmem:[%s16979_s11 + $0xe0] sm:$0xff]  ;;  %4830 = vrot.lane.b32.xlu0 %v4821_v23, %s12902_s29 }
 0x417   : > { %11274 = vmatmul.mubr.msk.f32.vlgmr.msra.gmra.mrb[12].mxu1 %vm675_vm2, %v1431_v26  ;;  %v4825_v26 = vrot.slane %v11096_v18, %v13700_v0  ;;  %v3514_v18 = vld [vmem:[%s16979_s11 + $0x150] sm:$0xff] }
 0x418   : > { %v1520_v4 = vpop.permute.xlu0 %1519  ;;  %11278 = vmatprep.mubr.msk.f32.mxu1 %vm675_vm2, %v1418_v27  ;;  %v11099_v27 = vld [vmem:[%s16985_s17 + $0x3] ss:$8 sm:$0xf] }
 0x419   : > { %11276 = vmatprep.subr.msk.mxu1 %vm679_vm1, %v1520_v4  ;;  %4832 = vrot.lane.b32.xlu1 %v4825_v26, %s12902_s29 }
 0x41a   : > { %11277 = vmatpush3.msk.msra.mxu1 %vm679_vm1, %v1520_v4  ;;  %v5060_v4 = vrot.slane %v11099_v27, %v13451_v49 }
 0x41c   : > { %v1618_v28 = vpop.permute.xlu0 %1617  ;;  %5071 = vrot.lane.b32.xlu0 %v5060_v4, %s16991_s30 }
 0x41d   : > { %11281 = vmatprep.subr.msk.mxu1 %vm679_vm1, %v1618_v28 }
 0x41f   : > { %11279 = vmatmul.mubr.msk.f32.vlgmr.msra.gmra.mrb[12].mxu1 %vm675_vm2, %v1419_v29  ;;  %v5056_v29 = vrot.slane %v11099_v27, %v13210_v13 }
 0x420   : > { %11282 = vmatpush3.msk.msra.mxu1 %vm679_vm1, %v1618_v28  ;;  %v1718_v31 = vpop.permute.xlu0 %1717  ;;  %11283 = vmatprep.mubr.msk.f32.mxu1 %vm675_vm2, %v1614_v30  ;;  %v5068_v30 = vrot.slane %v11099_v27, %v13700_v0 }
 0x421   : > { %11286 = vmatprep.subr.msk.mxu1 %vm679_vm1, %v1718_v31  ;;  %5069 = vrot.lane.b32.xlu1 %v5056_v29, %s16991_s30  ;;  %v3615_v29 = vld [vmem:[%s16979_s11 + $0x168] sm:$0xff] }
 0x422   : > { %5075 = vrot.lane.b32.xlu0 %v5068_v30, %s16991_s30  ;;  %v3714_v30 = vld [vmem:[%s16979_s11 + $0x170] sm:$0xff] }
 0x424   : > { %v1818_v34 = vpop.permute.xlu0 %1817 }
 0x427   : > { %11284 = vmatmul.mubr.msk.f32.vlgmr.msra.gmra.mrb[12].mxu1 %vm675_vm2, %v1615_v32  ;;  %v2914_v32 = vld [vmem:[%s16979_s11 + $0xf0] sm:$0xff] }
 0x428   : > { %11287 = vmatpush3.msk.msra.mxu1 %vm679_vm1, %v1718_v31  ;;  %11288 = vmatprep.mubr.msk.f32.mxu1 %vm675_vm2, %v1714_v33  ;;  %v1918_v37 = vpop.permute.xlu0 %1917  ;;  %v2815_v31 = vld [vmem:[%s16979_s11 + $0xe8] sm:$0xff]  ;;  %v5064_v33 = vrot.slane %v11099_v27, %v13703_v1 }
 0x429   : > { %11291 = vmatprep.subr.msk.mxu1 %vm679_vm1, %v1818_v34  ;;  %v13932_v27 = vld [vmem:[%s16985_s17 + $0x23] ss:$8 sm:$0xf] }
 0x42a   : > { %5073 = vrot.lane.b32.xlu1 %v5064_v33, %s16991_s30  ;;  %s17294_s30 = smov 63  }
 0x42c   : > { %v2018_v40 = vpop.permute.xlu0 %2017 }
 0x42f   : > { %11289 = vmatmul.mubr.msk.f32.vlgmr.msra.gmra.mrb[12].mxu1 %vm675_vm2, %v1715_v35 }
 0x430   : > { %11292 = vmatpush3.msk.msra.mxu1 %vm679_vm1, %v1818_v34  ;;  %11293 = vmatprep.mubr.msk.f32.mxu1 %vm675_vm2, %v1814_v36  ;;  %v2118_v43 = vpop.permute.xlu0 %2117  ;;  %v11102_v34 = vld [vmem:[%s16985_s17 + $0x4] ss:$8 sm:$0xf] }
 0x431   : > { %11296 = vmatprep.subr.msk.mxu1 %vm679_vm1, %v1918_v37  ;;  %v5299_v35 = vrot.slane %v11102_v34, %v13210_v13 }
 0x433   : > { %5312 = vrot.lane.b32.xlu0 %v5299_v35, %s16993_s4  ;;  %v3715_v35 = vld [vmem:[%s16979_s11 + $0x178] sm:$0xff] }
 0x434   : > { %v2218_v46 = vpop.permute.xlu0 %2217 }
 0x437   : > { %11294 = vmatmul.mubr.msk.f32.vlgmr.msra.gmra.mrb[12].mxu1 %vm675_vm2, %v1815_v38  ;;  %v5307_v38 = vrot.slane %v11102_v34, %v13703_v1 }
 0x438   : > { %11297 = vmatpush3.msk.msra.mxu1 %vm679_vm1, %v1918_v37  ;;  %11298 = vmatprep.mubr.msk.f32.mxu1 %vm675_vm2, %v1914_v39  ;;  %v2318_v50 = vpop.permute.xlu0 %2317  ;;  %v5303_v37 = vrot.slane %v11102_v34, %v13451_v49  ;;  %v2915_v39 = vld [vmem:[%s16979_s11 + $0xf8] sm:$0xff] }
 0x439   : > { %11301 = vmatprep.subr.msk.mxu1 %vm679_vm1, %v2018_v40  ;;  %5316 = vrot.lane.b32.xlu0 %v5307_v38, %s16993_s4  ;;  %v3815_v38 = vld [vmem:[%s16979_s11 + $0x188] sm:$0xff] }
 0x43a   : > { %5314 = vrot.lane.b32.xlu1 %v5303_v37, %s16993_s4 }
 0x43c   : > { %v2418_v53 = vpop.permute.xlu0 %2417 }
 0x43f   : > { %11299 = vmatmul.mubr.msk.f32.vlgmr.msra.gmra.mrb[12].mxu1 %vm675_vm2, %v1915_v41  ;;  %v5311_v41 = vrot.slane %v11102_v34, %v13700_v0 }
 0x440   : > { %11302 = vmatpush3.msk.msra.mxu1 %vm679_vm1, %v2018_v40  ;;  %11303 = vmatprep.mubr.msk.f32.mxu1 %vm675_vm2, %v2014_v42  ;;  %v2518_v56 = vpop.permute.xlu0 %2517  ;;  %v3014_v40 = vld [vmem:[%s16979_s11 + $0x100] sm:$0xff] }
 0x441   : > { %11306 = vmatprep.subr.msk.mxu1 %vm679_vm1, %v2118_v43  ;;  %v11105_v42 = vld [vmem:[%s16985_s17 + $0x5] ss:$8 sm:$0xf]  ;;  %5318 = vrot.lane.b32.xlu1 %v5311_v41, %s16993_s4  ;;  %s12913_s4 = smov 1  }
 0x442   : > { %v4121_v41 = vld [vmem:[#allocation12 + $0x8] sm:$0xff] }
 0x444   : > { %v2618_v61 = vpop.permute.xlu0 %2617 }
 0x447   : > { %11304 = vmatmul.mubr.msk.f32.vlgmr.msra.gmra.mrb[12].mxu1 %vm675_vm2, %v2015_v44 }
 0x448   : > { %11307 = vmatpush3.msk.msra.mxu1 %vm679_vm1, %v2118_v43  ;;  %11308 = vmatprep.mubr.msk.f32.mxu1 %vm675_vm2, %v2114_v45  ;;  %v2718_v9 = vpop.permute.xlu0 %2717  ;;  %v5544_v43 = vrot.slane %v11105_v42, %v13451_v49  ;;  %v5540_v45 = vrot.slane %v11105_v42, %v13210_v13 }
 0x449   : > { %11311 = vmatprep.subr.msk.mxu1 %vm679_vm1, %v2218_v46 }
 0x44a   : > { %5555 = vrot.lane.b32.xlu0 %v5544_v43, %s12905_s26  ;;  %5553 = vrot.lane.b32.xlu1 %v5540_v45, %s12905_s26  ;;  %v3915_v43 = vld [vmem:[%s16979_s11 + $0x198] sm:$0xff] }
 0x44c   : > { %v2818_v20 = vpop.permute.xlu0 %2817 }
 0x44f   : > { %11309 = vmatmul.mubr.msk.f32.vlgmr.msra.gmra.mrb[12].mxu1 %vm675_vm2, %v2115_v47  ;;  %v3015_v47 = vld [vmem:[%s16979_s11 + $0x108] sm:$0xff] }
 0x450   : > { %11312 = vmatpush3.msk.msra.mxu1 %vm679_vm1, %v2218_v46  ;;  %11313 = vmatprep.mubr.msk.f32.mxu1 %vm675_vm2, %v2214_v48  ;;  %v2918_v28 = vpop.permute.xlu0 %2917  ;;  %v5552_v46 = vrot.slane %v11105_v42, %v13700_v0  ;;  %v3114_v48 = vld [vmem:[%s16979_s11 + $0x110] sm:$0xff]  ;;  %v3418_v7 = vpop.permute.xlu1 %3417 }
 0x451   : > { %11316 = vmatprep.subr.msk.mxu1 %vm679_vm1, %v2318_v50 }
 0x452   : > { %5559 = vrot.lane.b32.xlu0 %v5552_v46, %s12905_s26  ;;  %v4120_v46 = vld [vmem:[#allocation12] sm:$0xff] }
 0x454   : > { %v3018_v36 = vpop.permute.xlu0 %3017 }
 0x457   : > { %11314 = vmatmul.mubr.msk.f32.vlgmr.msra.gmra.mrb[12].mxu1 %vm675_vm2, %v2215_v51  ;;  %v11108_v51 = vld [vmem:[%s16985_s17 + $0x6] ss:$8 sm:$0xf] }
 0x458   : > { %11317 = vmatpush3.msk.msra.mxu1 %vm679_vm1, %v2318_v50  ;;  %11318 = vmatprep.mubr.msk.f32.mxu1 %vm675_vm2, %v2314_v52  ;;  %v3118_v44 = vpop.permute.xlu0 %3117  ;;  %v5548_v50 = vrot.slane %v11105_v42, %v13703_v1  ;;  %v5781_v52 = vrot.slane %v11108_v51, %v13210_v13  ;;  %v3618_v21 = vpop.permute.xlu1 %3617  ;;  %v4125_v42 = vld [vmem:[#allocation12 + $0x28] sm:$0xff] }
 0x459   : > { %11321 = vmatprep.subr.msk.mxu1 %vm679_vm1, %v2418_v53  ;;  %v11477_v45 = vpack.c.bf16 %v4125_v42, %v4121_v41 }
 0x45a   : > { %5557 = vrot.lane.b32.xlu1 %v5548_v50, %s12905_s26  ;;  %5794 = vrot.lane.b32.xlu0 %v5781_v52, %s12906_s1  ;;  %v4133_v50 = vld [vmem:[#allocation12 + $0x68] sm:$0xff] }
 0x45f   : > { %11319 = vmatmul.mubr.msk.f32.vlgmr.msra.gmra.mrb[12].mxu1 %vm675_vm2, %v2315_v54  ;;  %v5785_v54 = vrot.slane %v11108_v51, %v13451_v49 }
 0x460   : > { %11322 = vmatpush3.msk.msra.mxu1 %vm679_vm1, %v2418_v53  ;;  %11323 = vmatprep.mubr.msk.f32.mxu1 %vm675_vm2, %v2414_v55  ;;  %v3218_v53 = vpop.permute.xlu0 %3217  ;;  %v5789_v55 = vrot.slane %v11108_v51, %v13703_v1  ;;  %v3818_v33 = vpop.permute.xlu1 %3817 }
 0x461   : > { %11326 = vmatprep.subr.msk.mxu1 %vm679_vm1, %v2518_v56  ;;  %5796 = vrot.lane.b32.xlu1 %v5785_v54, %s12906_s1  ;;  %v4128_v54 = vld [vmem:[#allocation12 + $0x40] sm:$0xff] }
 0x462   : > { %5798 = vrot.lane.b32.xlu0 %v5789_v55, %s12906_s1  ;;  %v4132_v55 = vld [vmem:[#allocation12 + $0x60] sm:$0xff] }
 0x466   : > { %6037 = vrot.lane.b32.xlu0 %v6026_v60, %s12907_s18 }
 0x467   : > { %11324 = vmatmul.mubr.msk.f32.vlgmr.msra.gmra.mrb[12].mxu1 %vm675_vm2, %v2415_v57  ;;  %v3214_v57 = vld [vmem:[%s16979_s11 + $0x120] sm:$0xff] }
 0x468   : > { %11327 = vmatpush3.msk.msra.mxu1 %vm679_vm1, %v2518_v56  ;;  %11328 = vmatprep.mubr.msk.f32.mxu1 %vm675_vm2, %v2514_v58  ;;  %v3115_v56 = vld [vmem:[%s16979_s11 + $0x118] sm:$0xff]  ;;  %v5793_v58 = vrot.slane %v11108_v51, %v13700_v0  ;;  %v4015_v51 = vld [vmem:[%s16979_s11 + $0x1a8] sm:$0xff] }
 0x469   : > { %11331 = vmatprep.subr.msk.mxu1 %vm679_vm1, %v2618_v61 }
 0x46a   : > { %5800 = vrot.lane.b32.xlu1 %v5793_v58, %s12906_s1  ;;  %v11483_v58 = vpack.c.bf16 %v4132_v55, %v4128_v54 }
 0x46e   : > { %6035 = vrot.lane.b32.xlu1 %v6022_v62, %s12907_s18  ;;  %v4140_v62 = vld [vmem:[#allocation12 + $0xa0] sm:$0xff] }
 0x46f   : > { %11329 = vmatmul.mubr.msk.f32.vlgmr.msra.gmra.mrb[12].mxu1 %vm675_vm2, %v2515_v5  ;;  %v6030_v5 = vrot.slane %v13844_v59, %v13703_v1 }
 0x470   : > { %11332 = vmatpush3.msk.msra.mxu1 %vm679_vm1, %v2618_v61  ;;  %11333 = vmatprep.mubr.msk.f32.mxu1 %vm675_vm2, %v2614_v6  ;;  %v3318_v61 = vpop.permute.xlu0 %3317  ;;  %v13869_v6 = vld [vmem:[%s16985_s17 + $0x20] ss:$8 sm:$0xf] }
 0x471   : > { %11336 = vmatprep.subr.msk.mxu1 %vm679_vm1, %v2718_v9  ;;  %v6267_v12 = vrot.slane %v13869_v6, %v13451_v49  ;;  %v6275_v10 = vrot.slane %v13869_v6, %v13700_v0 }
 0x472   : > { %6039 = vrot.lane.b32.xlu1 %v6030_v5, %s12907_s18 }
 0x476   : > { %6278 = vrot.lane.b32.xlu1 %v6267_v12, %s12908_s27  ;;  %v4145_v12 = vld [vmem:[#allocation12 + $0xc8] sm:$0xff] }
 0x477   : > { %11334 = vmatmul.mubr.msk.f32.vlgmr.msra.gmra.mrb[12].mxu1 %vm675_vm2, %v2615_v15  ;;  %v3518_v15 = vpop.permute.xlu0 %3517 }
 0x478   : > { %11337 = vmatpush3.msk.msra.mxu1 %vm679_vm1, %v2718_v9  ;;  %11338 = vmatprep.mubr.msk.f32.mxu1 %vm675_vm2, %v2714_v16  ;;  %v3414_v9 = vld [vmem:[%s16979_s11 + $0x140] sm:$0xff]  ;;  %v6504_v16 = vrot.slane %v13890_v14, %v13210_v13 }
 0x479   : > { %11341 = vmatprep.subr.msk.mxu1 %vm679_vm1, %v2818_v20 }
 0x47a   : > { %6282 = vrot.lane.b32.xlu1 %v6275_v10, %s12908_s27  ;;  %v4144_v10 = vld [vmem:[#allocation12 + $0xc0] sm:$0xff] }
 0x47b   : > { %v3718_v4 = vpop.permute.xlu0 %3717 }
 0x47e   : > { %6517 = vrot.lane.b32.xlu1 %v6504_v16, %s17144_s25 }
 0x47f   : > { %11339 = vmatmul.mubr.msk.f32.vlgmr.msra.gmra.mrb[12].mxu1 %vm675_vm2, %v2715_v24  ;;  %v3515_v24 = vld [vmem:[%s16979_s11 + $0x158] sm:$0xff]  ;;  %v3918_v37 = vpop.permute.xlu0 %3917 }
 0x480   : > { %11342 = vmatpush3.msk.msra.mxu1 %vm679_vm1, %v2818_v20  ;;  %11343 = vmatprep.mubr.msk.f32.mxu1 %vm675_vm2, %v2814_v25  ;;  %v13911_v20 = vld [vmem:[%s16985_s17 + $0x22] ss:$8 sm:$0xf] }
 0x481   : > { %11346 = vmatprep.subr.msk.mxu1 %vm679_vm1, %v2918_v28  ;;  %v6747_v23 = vrot.slane %v13911_v20, %v13210_v13  ;;  %v3614_v25 = vld [vmem:[%s16979_s11 + $0x160] sm:$0xff]  ;;  %v6755_v26 = vrot.slane %v13911_v20, %v13703_v1 }
 0x482   : > { %6521 = vrot.lane.b32.xlu1 %v6512_v19, %s17144_s25  ;;  %v4123_v19 = vld [vmem:[#allocation12 + $0x18] sm:$0xff] }
 0x486   : > { %6760 = vrot.lane.b32.xlu1 %v6747_v23, %s17146_s24 }
 0x487   : > { %11344 = vmatmul.mubr.msk.f32.vlgmr.msra.gmra.mrb[12].mxu1 %vm675_vm2, %v2815_v31  ;;  %v6998_v31 = vrot.slane %v13932_v27, %v13703_v1 }
 0x488   : > { %11347 = vmatpush3.msk.msra.mxu1 %vm679_vm1, %v2918_v28  ;;  %11348 = vmatprep.mubr.msk.f32.mxu1 %vm675_vm2, %v2914_v32  ;;  %v6990_v28 = vrot.slane %v13932_v27, %v13210_v13  ;;  %v13953_v32 = vld [vmem:[%s16985_s17 + $0x24] ss:$8 sm:$0xf] }
 0x489   : > { %11351 = vmatprep.subr.msk.mxu1 %vm679_vm1, %v3018_v36  ;;  %v7233_v34 = vrot.slane %v13953_v32, %v13210_v13  ;;  %v7237_v42 = vrot.slane %v13953_v32, %v13451_v49 }
 0x48a   : > { %6764 = vrot.lane.b32.xlu1 %v6755_v26, %s17146_s24  ;;  %v6271_v26 = vrot.slane %v13869_v6, %v13703_v1 }
 0x48e   : > { %7003 = vrot.lane.b32.xlu1 %v6990_v28, %s12911_s2 }
 0x48f   : > { %11349 = vmatmul.mubr.msk.f32.vlgmr.msra.gmra.mrb[12].mxu1 %vm675_vm2, %v2915_v39  ;;  %v3914_v39 = vld [vmem:[%s16979_s11 + $0x190] sm:$0xff] }
 0x490   : > { %11352 = vmatpush3.msk.msra.mxu1 %vm679_vm1, %v3018_v36  ;;  %11353 = vmatprep.mubr.msk.f32.mxu1 %vm675_vm2, %v3014_v40  ;;  %v3814_v36 = vld [vmem:[%s16979_s11 + $0x180] sm:$0xff]  ;;  %v4018_v40 = vpop.permute.xlu1 %4017 }
 0x491   : > { %11356 = vmatprep.subr.msk.mxu1 %vm679_vm1, %v3118_v44 }
 0x492   : > { %7007 = vrot.lane.b32.xlu1 %v6998_v31, %s12911_s2 }
 0x496   : > { %7246 = vrot.lane.b32.xlu1 %v7233_v34, %s12912_s20  ;;  %v11132_v34 = vld [vmem:[%s16985_s17 + $0x26] ss:$8 sm:$0xf] }
 0x497   : > { %11354 = vmatmul.mubr.msk.f32.vlgmr.msra.gmra.mrb[12].mxu1 %vm675_vm2, %v3015_v47  ;;  %v4124_v47 = vld [vmem:[#allocation12 + $0x20] sm:$0xff] }
 0x498   : > { %11357 = vmatpush3.msk.msra.mxu1 %vm679_vm1, %v3118_v44  ;;  %11358 = vmatprep.mubr.msk.f32.mxu1 %vm675_vm2, %v3114_v48  ;;  %v4014_v44 = vld [vmem:[%s16979_s11 + $0x1a0] sm:$0xff]  ;;  %v11479_v52 = vpack.c.bf16 %v4124_v47, %v4120_v46 }
 0x499   : > { %11361 = vmatprep.subr.msk.mxu1 %vm679_vm1, %v3218_v53  ;;  %v4129_v48 = vld [vmem:[#allocation12 + $0x48] sm:$0xff] }
 0x49a   : > { %v11138_v46 = vld [vmem:[%s16985_s17 + $0x40] ss:$8 sm:$0xf] }
 0x49f   : > { %11359 = vmatmul.mubr.msk.f32.vlgmr.msra.gmra.mrb[12].mxu1 %vm675_vm2, %v3115_v56  ;;  %v4137_v56 = vld [vmem:[#allocation12 + $0x88] sm:$0xff] }
 0x4a0   : > { %11362 = vmatpush3.msk.msra.mxu1 %vm679_vm1, %v3218_v53  ;;  %11363 = vmatprep.mubr.msk.f32.mxu1 %vm675_vm2, %v3214_v57  ;;  %v11481_v53 = vpack.c.bf16 %v4133_v50, %v4129_v48  ;;  %v4141_v57 = vld [vmem:[#allocation12 + $0xa8] sm:$0xff]  ;;  %v7671_v48 = vrot.slane %v11132_v34, %v13451_v49  ;;  %v8149_v50 = vrot.slane %v11138_v46, %v13210_v13 }
 0x4a1   : > { %11366 = vmatprep.subr.msk.mxu1 %vm679_vm1, %v3318_v61  ;;  %v11485_v60 = vpack.c.bf16 %v4141_v57, %v4137_v56 }
 0x4a7   : > { %11364 = vmatmul.mubr.msk.f32.vlgmr.msra.gmra.mrb[12].mxu1 %vm675_vm2, %v3215_v63 }
 0x4a8   : > { %11367 = vmatpush3.msk.msra.mxu1 %vm679_vm1, %v3318_v61  ;;  %11368 = vmatprep.mubr.msk.f32.mxu1 %vm675_vm2, %v3314_v3  ;;  %v4136_v61 = vld [vmem:[#allocation12 + $0x80] sm:$0xff]  ;;  %v13997_v3 = vpop.permute.xlu1 %4113 }
 0x4a9   : > { %11371 = vmatprep.subr.msk.mxu1 %vm679_vm1, %v3418_v7  ;;  %v11487_v63 = vpack.c.bf16 %v4140_v62, %v4136_v61  ;;  %v8161_v61 = vrot.slane %v11138_v46, %v13700_v0  ;;  %v11141_v62 = vld [vmem:[%s16985_s17 + $0x41] ss:$8 sm:$0xf] }
 0x4ac   : > { %v13999_v5 = vpop.permute.xlu1 %4350 }
 0x4af   : > { %11369 = vmatmul.mubr.msk.f32.vlgmr.msra.gmra.mrb[12].mxu1 %vm675_vm2, %v3315_v8  ;;  %v4149_v8 = vld [vmem:[#allocation12 + $0xe8] sm:$0xff] }
 0x4b0   : > { %11372 = vmatpush3.msk.msra.mxu1 %vm679_vm1, %v3418_v7  ;;  %11373 = vmatprep.mubr.msk.f32.mxu1 %vm675_vm2, %v3414_v9  ;;  %v14001_v7 = vpop.permute.xlu1 %4354  ;;  %v11489_v9 = vpack.c.bf16 %v4149_v8, %v4145_v12  ;;  %v8390_v8 = vrot.slane %v11141_v62, %v13210_v13 }
 0x4b1   : > { %11376 = vmatprep.subr.msk.mxu1 %vm679_vm1, %v3518_v15  ;;  %17245 = vst [vmem:[#allocation22_spill] sm:$0xff] %v14001_v7 }
 0x4b7   : > { %11374 = vmatmul.mubr.msk.f32.vlgmr.msra.gmra.mrb[12].mxu1 %vm675_vm2, %v3415_v17  ;;  %v6034_v17 = vrot.slane %v13844_v59, %v13700_v0 }
 0x4b8   : > { %11377 = vmatpush3.msk.msra.mxu1 %vm679_vm1, %v3518_v15  ;;  %11378 = vmatprep.mubr.msk.f32.mxu1 %vm675_vm2, %v3514_v18  ;;  %v4148_v15 = vld [vmem:[#allocation12 + $0xe0] sm:$0xff]  ;;  %v14005_v18 = vpop.permute.xlu1 %4397 }
 0x4b9   : > { %11381 = vmatprep.subr.msk.mxu1 %vm679_vm1, %v3618_v21  ;;  %v11491_v16 = vpack.c.bf16 %v4148_v15, %v4144_v10  ;;  %6041 = vrot.lane.b32.xlu0 %v6034_v17, %s12907_s18  ;;  %v8394_v15 = vrot.slane %v11141_v62, %v13451_v49 }
 0x4bf   : > { %11379 = vmatmul.mubr.msk.f32.vlgmr.msra.gmra.mrb[12].mxu1 %vm675_vm2, %v3515_v24  ;;  %v6263_v24 = vrot.slane %v13869_v6, %v13210_v13  ;;  %v6751_v6 = vrot.slane %v13911_v20, %v13451_v49 }
 0x4c0   : > { %11382 = vmatpush3.msk.msra.mxu1 %vm679_vm1, %v3618_v21  ;;  %11383 = vmatprep.mubr.msk.f32.mxu1 %vm675_vm2, %v3614_v25  ;;  %v4127_v21 = vld [vmem:[#allocation12 + $0x38] sm:$0xff]  ;;  %v14010_v25 = vpop.permute.xlu1 %4401 }
 0x4c1   : > { %11386 = vmatprep.subr.msk.mxu1 %vm679_vm1, %v3718_v4  ;;  %v11493_v23 = vpack.c.bf16 %v4127_v21, %v4123_v19  ;;  %17246 = vst [vmem:[#allocation23_spill] sm:$0xff] %v14010_v25  ;;  %6276 = vrot.lane.b32.xlu0 %v6263_v24, %s12908_s27  ;;  %v8402_v21 = vrot.slane %v11141_v62, %v13700_v0 }
 0x4c4   : > { %v14015_v59 = vpop.permute.xlu1 %4828 }
 0x4c5   : > { %6280 = vrot.lane.b32.xlu0 %v6271_v26, %s12908_s27 }
 0x4c7   : > { %11384 = vmatmul.mubr.msk.f32.vlgmr.msra.gmra.mrb[12].mxu1 %vm675_vm2, %v3615_v29  ;;  %v6516_v29 = vrot.slane %v13890_v14, %v13700_v0 }
 0x4c8   : > { %11387 = vmatpush3.msk.msra.mxu1 %vm679_vm1, %v3718_v4  ;;  %11388 = vmatprep.mubr.msk.f32.mxu1 %vm675_vm2, %v3714_v30  ;;  %v6508_v4 = vrot.slane %v13890_v14, %v13451_v49  ;;  %v14020_v28 = vpop.permute.xlu1 %4832  ;;  %v7241_v14 = vrot.slane %v13953_v32, %v13703_v1 }
 0x4c9   : > { %11391 = vmatprep.subr.msk.mxu1 %vm679_vm1, %v3818_v33  ;;  %17247 = vst [vmem:[#allocation24_spill] sm:$0xff] %v14020_v28 }
 0x4ca   : > { %6519 = vrot.lane.b32.xlu0 %v6508_v4, %s17144_s25  ;;  %7250 = vrot.lane.b32.xlu1 %v7241_v14, %s12912_s20 }
 0x4cc   : > { %v14025_v30 = vpop.permute.xlu1 %5069 }
 0x4cd   : > { %v14222_v11 = vmul.f32 0.0, %v14025_v30 }
 0x4ce   : > { %6523 = vrot.lane.b32.xlu0 %v6516_v29, %s17144_s25  ;;  %s17560_s25 = smov 120  }
 0x4cf   : > { %11389 = vmatmul.mubr.msk.f32.vlgmr.msra.gmra.mrb[12].mxu1 %vm675_vm2, %v3715_v35  ;;  %17259 = vst [vmem:[#allocation36_spill] sm:$0xff] %v14222_v11 }
 0x4d0   : > { %11392 = vmatpush3.msk.msra.mxu1 %vm679_vm1, %v3818_v33  ;;  %11393 = vmatprep.mubr.msk.f32.mxu1 %vm675_vm2, %v3814_v36  ;;  %v14030_v31 = vpop.permute.xlu1 %5073  ;;  %v6759_v33 = vrot.slane %v13911_v20, %v13700_v0  ;;  %v6994_v36 = vrot.slane %v13932_v27, %v13451_v49  ;;  %v7002_v20 = vrot.slane %v13932_v27, %v13700_v0 }
 0x4d1   : > { %11396 = vmatprep.subr.msk.mxu1 %vm679_vm1, %v3918_v37 }
 0x4d2   : > { %6762 = vrot.lane.b32.xlu0 %v6751_v6, %s17146_s24 }
 0x4d4   : > { %v14038_v35 = vpop.permute.xlu1 %5314 }
 0x4d6   : > { %6766 = vrot.lane.b32.xlu0 %v6759_v33, %s17146_s24  ;;  %s17709_s24 = smov 56  }
 0x4d7   : > { %11394 = vmatmul.mubr.msk.f32.vlgmr.msra.gmra.mrb[12].mxu1 %vm675_vm2, %v3815_v38 }
 0x4d8   : > { %11397 = vmatpush3.msk.msra.mxu1 %vm679_vm1, %v3918_v37  ;;  %11398 = vmatprep.mubr.msk.f32.mxu1 %vm675_vm2, %v3914_v39  ;;  %v7667_v37 = vrot.slane %v11132_v34, %v13210_v13  ;;  %v14047_v38 = vpop.permute.xlu1 %5318  ;;  %v7675_v39 = vrot.slane %v11132_v34, %v13703_v1 }
 0x4d9   : > { %11401 = vmatprep.subr.msk.mxu1 %vm679_vm1, %v4018_v40 }
 0x4da   : > { %7005 = vrot.lane.b32.xlu0 %v6994_v36, %s12911_s2  ;;  %7680 = vrot.lane.b32.xlu1 %v7667_v37, %s12913_s4  ;;  %v11147_v36 = vld [vmem:[%s16985_s17 + $0x43] ss:$8 sm:$0xf] }
 0x4dc   : > { %v14057_v41 = vpop.permute.xlu1 %5553 }
 0x4de   : > { %7009 = vrot.lane.b32.xlu0 %v7002_v20, %s12911_s2  ;;  %7684 = vrot.lane.b32.xlu1 %v7675_v39, %s12913_s4  ;;  %v8872_v39 = vrot.slane %v11147_v36, %v13210_v13 }
 0x4df   : > { %11399 = vmatmul.mubr.msk.f32.vlgmr.msra.gmra.mrb[12].mxu1 %vm675_vm2, %v3915_v43 }
 0x4e0   : > { %11402 = vmatpush3.msk.msra.mxu1 %vm679_vm1, %v4018_v40  ;;  %11403 = vmatprep.mubr.msk.f32.mxu1 %vm675_vm2, %v4014_v44  ;;  %v11135_v40 = vld [vmem:[%s16985_s17 + $0x27] ss:$8 sm:$0xf]  ;;  %v14064_v43 = vpop.permute.xlu1 %5557  ;;  %v7245_v44 = vrot.slane %v13953_v32, %v13700_v0  ;;  %vm7254_vm1 = vcmask 1039360  }
 0x4e1   : > { %11478 = vmatprep.subr.bf16.mxu1 %v11477_v45  ;;  %v7908_v27 = vrot.slane %v11135_v40, %v13210_v13  ;;  %v7916_v45 = vrot.slane %v11135_v40, %v13703_v1  ;;  %v7912_v54 = vrot.slane %v11135_v40, %v13451_v49  ;;  %v7920_v56 = vrot.slane %v11135_v40, %v13700_v0 }
 0x4e2   : > { %7248 = vrot.lane.b32.xlu0 %v7237_v42, %s12912_s20 }
 0x4e3   : > { %7921 = vrot.lane.b32.xlu1 %v7908_v27, %s12914_s22  ;;  %v8876_v27 = vrot.slane %v11147_v36, %v13451_v49 }
 0x4e4   : > { %v14074_v47 = vpop.permute.xlu1 %5796 }
 0x4e6   : > { %7252 = vrot.lane.b32.xlu0 %v7245_v44, %s12912_s20  ;;  %v8880_v44 = vrot.slane %v11147_v36, %v13703_v1 }
 0x4e7   : > { %11404 = vmatmul.mubr.msk.f32.vlgmr.msra.gmra.mrb[12].mxu1 %vm675_vm2, %v4015_v51  ;;  %7925 = vrot.lane.b32.xlu1 %v7916_v45, %s12914_s22  ;;  %v7679_v51 = vrot.slane %v11132_v34, %v13700_v0  ;;  %vm7304_vm2 = vcmask 7168  }
 0x4e8   : > { %11480 = vmatpush1.bf16.msra.mxu1 %v11479_v52  ;;  %4222 = vmatprep.mubr.f32.mxu1 %v16996_v2  ;;  %v14080_v32 = vpop.permute.xlu1 %5800  ;;  %v8157_v52 = vrot.slane %v11138_v46, %v13703_v1 }
 0x4e9   : > { %11482 = vmatprep.subr.bf16.mxu1 %v11481_v53 }
 0x4ea   : > { %7682 = vrot.lane.b32.xlu0 %v7671_v48, %s12913_s4  ;;  %v14160_v48 = vld [vmem:[%s16985_s17 + $0x44] ss:$8 sm:$0xf] }
 0x4eb   : > { %8162 = vrot.lane.b32.xlu1 %v8149_v50, %s12915_s23  ;;  %17249 = vst [vmem:[#allocation26_spill] sm:$0xff] %v14160_v48  ;;  %v9113_v50 = vrot.slane %v14160_v48, %v13210_v13 }
 0x4ec   : > { %11484 = vmatpush1.bf16.msra.mxu1 %v11483_v58  ;;  %v14086_v53 = vpop.permute.xlu1 %6035  ;;  %v8153_v58 = vrot.slane %v11138_v46, %v13451_v49  ;;  %v8884_v46 = vrot.slane %v11147_v36, %v13700_v0  ;;  %v4138_v36 = vld [vmem:[#allocation12 + $0x90] sm:$0xff] }
 0x4ed   : > { %11486 = vmatprep.subr.bf16.mxu1 %v11485_v60 }
 0x4ee   : > { %7686 = vrot.lane.b32.xlu0 %v7679_v51, %s12913_s4  ;;  %v9117_v51 = vrot.slane %v14160_v48, %v13451_v49 }
 0x4ef   : > { %8166 = vrot.lane.b32.xlu1 %v8157_v52, %s12915_s23  ;;  %v9121_v52 = vrot.slane %v14160_v48, %v13703_v1 }
 0x4f0   : > { %11488 = vmatpush1.bf16.msra.mxu1 %v11487_v63  ;;  %v14091_v55 = vpop.permute.xlu1 %6039 }
 0x4f1   : > { %11490 = vmatprep.subr.bf16.mxu1 %v11489_v9 }
 0x4f2   : > { %7923 = vrot.lane.b32.xlu0 %v7912_v54, %s12914_s22 }
 0x4f4   : > { %11492 = vmatpush1.bf16.msra.mxu1 %v11491_v16  ;;  %v14095_v57 = vpop.permute.xlu1 %6278  ;;  %v8398_v16 = vrot.slane %v11141_v62, %v13703_v1 }
 0x4f5   : > { %11494 = vmatprep.subr.bf16.mxu1 %v11493_v23  ;;  %v11144_v23 = vld [vmem:[%s16985_s17 + $0x42] ss:$8 sm:$0xf] }
 0x4f6   : > { %7927 = vrot.lane.b32.xlu0 %v7920_v56, %s12914_s22  ;;  %v8631_v4 = vrot.slane %v11144_v23, %v13210_v13  ;;  %v8635_v29 = vrot.slane %v11144_v23, %v13451_v49  ;;  %v8639_v34 = vrot.slane %v11144_v23, %v13703_v1  ;;  %v8643_v14 = vrot.slane %v11144_v23, %v13700_v0  ;;  %v4122_v56 = vld [vmem:[#allocation12 + $0x10] sm:$0xff] }
 0x4f7   : > { %v4130_v23 = vld [vmem:[#allocation12 + $0x50] sm:$0xff]  ;;  %v14241_v13 = vmul.f32 0.0, %v14057_v41 }
 0x4f8   : > { %v14099_v60 = vpop.permute.xlu1 %6282 }
 0x4f9   : > { %17248 = vst [vmem:[#allocation25_spill] sm:$0xff] %v14099_v60  ;;  %17263 = vst [vmem:[#allocation40_spill] sm:$0xff] %v14241_v13 }
 0x4fa   : > { %8164 = vrot.lane.b32.xlu0 %v8153_v58, %s12915_s23  ;;  %v4126_v58 = vld [vmem:[#allocation12 + $0x30] sm:$0xff] }
 0x4fc   : > { %v14106_v63 = vpop.permute.xlu1 %6517 }
 0x4fd   : > { %v6534_v12 = vmul.f32 0.0, %v14106_v63 }
 0x4fe   : > { %8168 = vrot.lane.b32.xlu0 %v8161_v61, %s12915_s23  ;;  %v4109_v61 = vpop.permute.xlu0 %4108 }
 0x4ff   : > { %v12022_v9 = vpack.i.bf16 %v6534_v12, %v6534_v12  ;;  %v4131_v12 = vld [vmem:[#allocation12 + $0x58] sm:$0xff] }
 0x500   : > { %v14111_v10 = vpop.permute.xlu1 %6521 }
 0x501   : > { %12023 = vrot.lane.b32.xlu1 %v12022_v9, %s12916_s28 }
 0x502   : > { %8403 = vrot.lane.b32.xlu0 %v8390_v8, %s12916_s28  ;;  %v4135_v8 = vld [vmem:[#allocation12 + $0x78] sm:$0xff] }
 0x504   : > { %v14117_v17 = vpop.permute.xlu1 %6760 }
 0x505   : > { %v6777_v19 = vmul.f32 0.0, %v14117_v17  ;;  %8405 = vrot.lane.b32.xlu1 %v8394_v15, %s12916_s28  ;;  %v11495_v15 = vpack.c.bf16 %v4126_v58, %v4122_v56 }
 0x506   : > { %8407 = vrot.lane.b32.xlu0 %v8398_v16, %s12916_s28 }
 0x507   : > { %v12027_v24 = vpack.i.bf16 %v6777_v19, %v6777_v19 }
 0x508   : > { %v14126_v26 = vpop.permute.xlu1 %6764 }
 0x509   : > { %8409 = vrot.lane.b32.xlu1 %v8402_v21, %s12916_s28  ;;  %v11497_v21 = vpack.c.bf16 %v4135_v8, %v4131_v12 }
 0x50a   : > { %12028 = vrot.lane.b32.xlu0 %v12027_v24, %s12915_s23  ;;  %v4134_v24 = vld [vmem:[#allocation12 + $0x70] sm:$0xff] }
 0x50c   : > { %v14132_v6 = vpop.permute.xlu1 %7003 }
 0x50d   : > { %8644 = vrot.lane.b32.xlu1 %v8631_v4, %s12900_s15  ;;  %v7020_v33 = vmul.f32 0.0, %v14132_v6  ;;  %v4139_v4 = vld [vmem:[#allocation12 + $0x98] sm:$0xff] }
 0x50e   : > { %8646 = vrot.lane.b32.xlu0 %v8635_v29, %s12900_s15  ;;  %v4143_v29 = vld [vmem:[#allocation12 + $0xb8] sm:$0xff] }
 0x50f   : > { %v12032_v20 = vpack.i.bf16 %v7020_v33, %v7020_v33  ;;  %v11499_v33 = vpack.c.bf16 %v4134_v24, %v4130_v23 }
 0x510   : > { %v14142_v37 = vpop.permute.xlu1 %7007 }
 0x511   : > { %8648 = vrot.lane.b32.xlu1 %v8639_v34, %s12900_s15 }
 0x512   : > { %8650 = vrot.lane.b32.xlu0 %v8643_v14, %s12900_s15  ;;  %v11501_v14 = vpack.c.bf16 %v4143_v29, %v4139_v4 }
 0x514   : > { %v14147_v40 = vpop.permute.xlu1 %7246 }
 0x515   : > { %12033 = vrot.lane.b32.xlu1 %v12032_v20, %s12914_s22  ;;  %v7263_v42 = vmul.f32 0.0, %v14147_v40  ;;  %v4142_v20 = vld [vmem:[#allocation12 + $0xb0] sm:$0xff] }
 0x516   : > { %8885 = vrot.lane.b32.xlu0 %v8872_v39, %s17173_s21  ;;  %v4147_v39 = vld [vmem:[#allocation12 + $0xd8] sm:$0xff] }
 0x517   : > { %v12037_v45 = vpack.i.bf16 %v7263_v42, %v7263_v42  ;;  %v4151_v42 = vld [vmem:[#allocation12 + $0xf8] sm:$0xff] }
 0x519   : > { %8887 = vrot.lane.b32.xlu1 %v8876_v27, %s17173_s21  ;;  %v11505_v27 = vpack.c.bf16 %v4151_v42, %v4147_v39 }
 0x51a   : > { %8889 = vrot.lane.b32.xlu0 %v8880_v44, %s17173_s21  ;;  %v4146_v44 = vld [vmem:[#allocation12 + $0xd0] sm:$0xff] }
 0x51d   : > { %8891 = vrot.lane.b32.xlu1 %v8884_v46, %s17173_s21 }
 0x51e   : > { %12038 = vrot.lane.b32.xlu0 %v12037_v45, %s12913_s4  ;;  %v4150_v45 = vld [vmem:[#allocation12 + $0xf0] sm:$0xff] }
 0x51f   : > { %v11507_v46 = vpack.c.bf16 %v4150_v45, %v4146_v44 }
 0x521   : > { %9126 = vrot.lane.b32.xlu1 %v9113_v50, %s12902_s29  ;;  %v4349_v50 = vpop.permute.xlu0 %4348 }
 0x522   : > { %9128 = vrot.lane.b32.xlu0 %v9117_v51, %s12902_s29  ;;  %v14228_v22 = vmul.f32 0.0, %v4349_v50 }
 0x524   : > { %17260 = vst [vmem:[#allocation37_spill] sm:$0xff] %v14228_v22 }
 0x525   : > { %9130 = vrot.lane.b32.xlu1 %v9121_v52, %s12902_s29  ;;  %v4353_v51 = vpop.permute.xlu0 %4352 }
 0x526   : > { %v14232_v48 = vsel %vm4356_vm6, %v13999_v5, %v4353_v51  ;;  %v14236_v1 = vsel %vm4356_vm6, %v4353_v51, %v14001_v7 }
 0x527   : > { %17261 = vst [vmem:[#allocation38_spill] sm:$0xff] %v14236_v1 }
 0x529   : > { %v4396_v52 = vpop.permute.xlu0 %4395 }
 0x52a   : > { %v14245_v49 = vsel %vm4403_vm7, %v4396_v52, %v14005_v18 }
 0x53c   : > { %v14209_v42 = vpop.permute.xlu1 %7250 }
 0x5ba   : > { %v11405_v54 = vpop.f32.mrb[12].mxu1 }
 0x5bb   : > { %v4093_v62 = vpop.f32.mrb[13].mxu1  ;;  %v4117_v16 = vadd.f32 %v11405_v54, %v13997_v3  ;;  %v11503_v3 = vpack.c.bf16 %v4142_v20, %v4138_v36  ;;  %v4400_v54 = vpop.permute.xlu0 %4399 }
 0x5bc   : > { %v4116_v9 = vadd.f32 %v4109_v61, %v4093_v62  ;;  %v14255_v51 = vsel %vm4403_vm7, %v4400_v54, %v14010_v25  ;;  %v14276_v25 = vmul.f32 0.0, %v14086_v53 }
 0x5bd   : > { %v4119_v34 = vmax.f32 %v4117_v16, 0.0  ;;  %17265 = vst [vmem:[#allocation42_spill] sm:$0xff] %v14255_v51 }
 0x5be   : > { %v4118_v19 = vmax.f32 %v4116_v9, 0.0  ;;  %17267 = vst [vmem:[#allocation44_spill] sm:$0xff] %v14276_v25 }
 0x5bf   : > { %v4827_v56 = vpop.permute.xlu0 %4826 }
 0x5c0   : > { %11087 = vmatmul.mubr.msk.f32.vlgmr.msra.gmra.mrb[14].mxu1 %vm960_vm4, %v4118_v19  ;;  %v14261_v7 = vmul.f32 0.0, %v4827_v56 }
 0x5c1   : > { %11496 = vmatpush1.bf16.msra.mxu1 %v11495_v15  ;;  %4228 = vmatprep.mubr.f32.mxu1 %v16996_v2 }
 0x5c2   : > { %11498 = vmatprep.subr.bf16.mxu1 %v11497_v21  ;;  %17266 = vst [vmem:[#allocation43_spill] sm:$0xff] %v14261_v7 }
 0x5c3   : > { %v4831_v58 = vpop.permute.xlu0 %4830 }
 0x5c4   : > { %11088 = vmatmul.mubr.msk.f32.gmra.mrb[16].mxu1 %vm960_vm4, %v4119_v34  ;;  %v14269_v1 = vsel %vm4834_vm8, %v4831_v58, %v14020_v28 }
 0x5c5   : > { %11500 = vmatpush1.bf16.msra.mxu1 %v11499_v33  ;;  %4299 = vmatprep.mubr.f32.mxu1 %v16996_v2 }
 0x5c6   : > { %11502 = vmatprep.subr.bf16.mxu1 %v11501_v14 }
 0x5c7   : > { %v5072_v61 = vpop.permute.xlu0 %5071 }
 0x5c8   : > { %v14280_v51 = vsel %vm5077_vm9, %v5072_v61, %v14030_v31 }
 0x5c9   : > { %11504 = vmatpush1.bf16.msra.mxu1 %v11503_v3 }
 0x5ca   : > { %11506 = vmatprep.subr.bf16.mxu1 %v11505_v27  ;;  %v14213_v27 = vpop.permute.xlu1 %7680 }
 0x5cb   : > { %v14181_v62 = vpop.permute.xlu0 %5075  ;;  %17256 = vst [vmem:[#allocation33_spill] sm:$0xff] %v14213_v27 }
 0x5cc   : > { %17250 = vst [vmem:[#allocation27_spill] sm:$0xff] %v14181_v62 }
 0x5cd   : > { %11508 = vmatpush1.bf16.msra.mxu1 %v11507_v46 }
 0x5ce   : > { %v14217_v45 = vpop.permute.xlu1 %7684 }
 0x5cf   : > { %v5313_v12 = vpop.permute.xlu0 %5312  ;;  %17257 = vst [vmem:[#allocation34_spill] sm:$0xff] %v14217_v45 }
 0x5d0   : > { %11089 = vmatmul.mubr.msk.f32.vlgmr.msra.gmra.mrb[18].mxu1 %vm960_vm4, %v4118_v19 }
 0x5d1   : > { %4305 = vmatprep.mubr.f32.mxu1 %v16996_v2  ;;  %v14226_v2 = vsel %vm4356_vm6, %v4349_v50, %v13999_v5  ;;  %v14247_v50 = vmul.f32 0.0, %v4396_v52  ;;  %v14251_v5 = vsel %vm4403_vm7, %v14005_v18, %v4400_v54  ;;  %v14259_v52 = vsel %vm4834_vm8, %v4827_v56, %v14015_v59 }
 0x5d2   : > { %v14238_v0 = vpop.permute.xlu1 %7921  ;;  %v14265_v18 = vsel %vm4834_vm8, %v14015_v59, %v4831_v58  ;;  %v14273_v54 = vsel %vm5077_vm9, %v14025_v30, %v5072_v61  ;;  %v14285_v59 = vsel %vm5077_vm9, %v14030_v31, %v14181_v62  ;;  %v14289_v56 = vsel %vm960_vm4, %v5313_v12, %v14038_v35 }
 0x5d3   : > { %v5317_v8 = vpop.permute.xlu0 %5316  ;;  %17262 = vst [vmem:[#allocation39_spill] sm:$0xff] %v14238_v0  ;;  %17264 = vst [vmem:[#allocation41_spill] sm:$0xff] %v14247_v50  ;;  %v14293_v30 = vmul.f32 0.0, %v5313_v12 }
 0x5d4   : > { %11090 = vmatmul.mubr.msk.f32.gmra.mrb[20].mxu1 %vm960_vm4, %v4119_v34  ;;  %17268 = vst [vmem:[#allocation45_spill] sm:$0xff] %v14285_v59  ;;  %v14297_v28 = vsel %vm960_vm4, %v14038_v35, %v5317_v8  ;;  %v14301_v61 = vsel %vm960_vm4, %v5317_v8, %v14047_v38 }
 0x5d5   : > { %17270 = vst [vmem:[#allocation47_spill] sm:$0xff] %v14293_v30 }
 0x5d6   : > { %v14291_v58 = vpop.permute.xlu1 %7925 }
 0x5d7   : > { %v5556_v9 = vpop.permute.xlu0 %5555  ;;  %17269 = vst [vmem:[#allocation46_spill] sm:$0xff] %v14291_v58 }
 0x5d8   : > { %v14305_v31 = vsel %vm5127_vm10, %v14057_v41, %v5556_v9  ;;  %v14309_v62 = vsel %vm5127_vm10, %v5556_v9, %v14064_v43 }
 0x5db   : > { %v14183_v15 = vpop.permute.xlu0 %5559 }
 0x5dc   : > { %v14314_v12 = vsel %vm5127_vm10, %v14064_v43, %v14183_v15 }
 0x5df   : > { %v5795_v16 = vpop.permute.xlu0 %5794 }
 0x5e0   : > { %v14318_v35 = vsel %vm4884_vm11, %v5795_v16, %v14074_v47  ;;  %v14320_v59 = vmul.f32 0.0, %v5795_v16 }
 0x5e2   : > { %17271 = vst [vmem:[#allocation48_spill] sm:$0xff] %v14320_v59 }
 0x5e3   : > { %v14185_v19 = vpop.permute.xlu0 %5798 }
 0x5e4   : > { %v14325_v41 = vsel %vm4884_vm11, %v14074_v47, %v14185_v19  ;;  %v14330_v8 = vsel %vm4884_vm11, %v14185_v19, %v14080_v32 }
 0x5e7   : > { %v14187_v21 = vpop.permute.xlu0 %6037 }
 0x5e8   : > { %v14335_v43 = vsel %vm4453_vm12, %v14086_v53, %v14187_v21  ;;  %v14340_v9 = vsel %vm4453_vm12, %v14187_v21, %v14091_v55 }
 0x5eb   : > { %v14189_v23 = vpop.permute.xlu0 %6041 }
 0x5ec   : > { %17251 = vst [vmem:[#allocation28_spill] sm:$0xff] %v14189_v23  ;;  %v14345_v47 = vsel %vm4453_vm12, %v14091_v55, %v14189_v23 }
 0x5ef   : > { %v14191_v24 = vpop.permute.xlu0 %6276 }
 0x5f0   : > { %v14350_v16 = vsel %vm4645_vm13, %v14191_v24, %v14095_v57 }
 0x5f3   : > { %v14193_v4 = vpop.permute.xlu0 %6280 }
 0x5f4   : > { %v14355_v53 = vsel %vm4645_vm13, %v14095_v57, %v14193_v4  ;;  %v14360_v19 = vsel %vm4645_vm13, %v14193_v4, %v14099_v60 }
 0x5f7   : > { %v14195_v29 = vpop.permute.xlu0 %6519 }
 0x5f8   : > { %v14367_v55 = vsel %vm17112_vm14, %v14106_v63, %v14195_v29  ;;  %v14372_v23 = vsel %vm17112_vm14, %v14195_v29, %v14111_v10 }
 0x5fb   : > { %v14197_v33 = vpop.permute.xlu0 %6523 }
 0x5fc   : > { %17252 = vst [vmem:[#allocation29_spill] sm:$0xff] %v14197_v33  ;;  %v14377_v57 = vsel %vm17112_vm14, %v14111_v10, %v14197_v33  ;;  %vm6818_vm14 = vcmask 64512  }
 0x5fd   : > { %17273 = vst [vmem:[#allocation50_spill] sm:$0xff] %v14377_v57 }
 0x5ff   : > { %v14199_v34 = vpop.permute.xlu0 %6762 }
 0x600   : > { %v14382_v4 = vsel %vm17125_vm15, %v14117_v17, %v14199_v34  ;;  %v14387_v63 = vsel %vm17125_vm15, %v14199_v34, %v14126_v26 }
 0x603   : > { %v14201_v14 = vpop.permute.xlu0 %6766 }
 0x604   : > { %17253 = vst [vmem:[#allocation30_spill] sm:$0xff] %v14201_v14  ;;  %v14392_v29 = vsel %vm17125_vm15, %v14126_v26, %v14201_v14  ;;  %vm6575_vm15 = vcmask 72704  }
 0x605   : > { %17274 = vst [vmem:[#allocation51_spill] sm:$0xff] %v14392_v29 }
 0x607   : > { %v14203_v36 = vpop.permute.xlu0 %7005 }
 0x608   : > { %v14397_v10 = vsel %vm7011_vm0, %v14132_v6, %v14203_v36  ;;  %v14402_v17 = vsel %vm7011_vm0, %v14203_v36, %v14142_v37 }
 0x60b   : > { %v14205_v20 = vpop.permute.xlu0 %7009 }
 0x60c   : > { %17254 = vst [vmem:[#allocation31_spill] sm:$0xff] %v14205_v20  ;;  %v14409_v34 = vsel %vm7011_vm0, %v14142_v37, %v14205_v20 }
 0x60d   : > { %17276 = vst [vmem:[#allocation53_spill] sm:$0xff] %v14409_v34 }
 0x60f   : > { %v14207_v39 = vpop.permute.xlu0 %7248 }
 0x610   : > { %v14414_v26 = vsel %vm7254_vm1, %v14147_v40, %v14207_v39  ;;  %v14419_v6 = vsel %vm7254_vm1, %v14207_v39, %v14209_v42 }
 0x613   : > { %v14211_v3 = vpop.permute.xlu0 %7252 }
 0x614   : > { %17255 = vst [vmem:[#allocation32_spill] sm:$0xff] %v14211_v3  ;;  %v14424_v36 = vsel %vm7254_vm1, %v14209_v42, %v14211_v3 }
 0x615   : > { %17277 = vst [vmem:[#allocation54_spill] sm:$0xff] %v14424_v36 }
 0x617   : > { %v14215_v44 = vpop.permute.xlu0 %7682 }
 0x618   : > { %v14429_v37 = vsel %vm7304_vm2, %v14213_v27, %v14215_v44  ;;  %v14434_v40 = vsel %vm7304_vm2, %v14215_v44, %v14217_v45 }
 0x619   : > { %17278 = vst [vmem:[#allocation55_spill] sm:$0xff] %v14429_v37  ;;  %17279 = vst [vmem:[#allocation56_spill] sm:$0xff] %v14434_v40 }
 0x61b   : > { %v14219_v46 = vpop.permute.xlu0 %7686 }
 0x61c   : > { %17258 = vst [vmem:[#allocation35_spill] sm:$0xff] %v14219_v46 }
 0x61f   : > { %v7924_v46 = vpop.permute.xlu0 %7923 }
 0x620   : > { %v14442_v39 = vsel %vm7061_vm5, %v7924_v46, %v14291_v58 }
 0x621   : > { %17281 = vst [vmem:[#allocation58_spill] sm:$0xff] %v14442_v39 }
 0x623   : > { %v14362_v21 = vpop.permute.xlu0 %7927 }
 0x624   : > { %17272 = vst [vmem:[#allocation49_spill] sm:$0xff] %v14362_v21  ;;  %v14404_v21 = vpop.permute.xlu1 %8162 }
 0x625   : > { %17275 = vst [vmem:[#allocation52_spill] sm:$0xff] %v14404_v21  ;;  %v14438_v21 = vsel %vm7061_vm5, %v14238_v0, %v7924_v46 }
 0x626   : > { %17280 = vst [vmem:[#allocation57_spill] sm:$0xff] %v14438_v21 }
 0x627   : > { %v14456_v0 = vpop.permute.xlu0 %8164 }
 0x628   : > { %17283 = vst [vmem:[#allocation60_spill] sm:$0xff] %v14456_v0  ;;  %v14474_v34 = vpop.permute.xlu1 %8166 }
 0x629   : > { %17284 = vst [vmem:[#allocation61_spill] sm:$0xff] %v14474_v34 }
 0x693   : > { %v14444_v42 = vpop.f32.mrb[14].mxu1 }
 0x694   : > { %17282 = vst [vmem:[#allocation59_spill] sm:$0xff] %v14444_v42  ;;  %v14446_v3 = vpop.f32.mrb[15].mxu1  ;;  %v4366_v27 = vmul.f32 %v14226_v2, %v14444_v42  ;;  %v4413_v37 = vmul.f32 %v14245_v49, %v14444_v42  ;;  %v4844_v44 = vmul.f32 %v14259_v52, %v14444_v42  ;;  %v5087_v45 = vmul.f32 %v14273_v54, %v14444_v42 }
 0x695   : > { %v5329_v46 = vmul.f32 %v14289_v56, %v14444_v42  ;;  %v5570_v58 = vmul.f32 %v14305_v31, %v14444_v42  ;;  %v14464_v39 = vmul.f32 %v14318_v35, %v14444_v42  ;;  %v14468_v21 = vmul.f32 %v14335_v43, %v14444_v42 }
 0x696   : > { %v12047_v40 = vpack.i.bf16 %v4366_v27, %v14228_v22  ;;  %v12042_v36 = vpack.i.bf16 %v4413_v37, %v14247_v50  ;;  %v12052_v0 = vpack.i.bf16 %v4844_v44, %v14261_v7  ;;  %v12057_v20 = vpack.i.bf16 %v5087_v45, %v14222_v11  ;;  %v17352_v7 = vld [vmem:[#allocation51_spill] sm:$0xff]  ;;  %v17354_v22 = vld [vmem:[#allocation53_spill] sm:$0xff] }
 0x697   : > { %v14476_v14 = vpop.f32.mrb[16].mxu1  ;;  %v12062_v29 = vpack.i.bf16 %v5329_v46, %v14293_v30  ;;  %v12067_v33 = vpack.i.bf16 %v5570_v58, %v14241_v13  ;;  %v12072_v57 = vpack.i.bf16 %v14464_v39, %v14320_v59  ;;  %v12077_v27 = vpack.i.bf16 %v14468_v21, %v14276_v25  ;;  %v14531_v59 = vpop.permute.xlu0 %8168  ;;  %v17357_v50 = vld [vmem:[#allocation31_spill] sm:$0xff] }
 0x698   : > { %v14485_v37 = vmul.f32 0.0, %v14191_v24  ;;  %v14487_v44 = vpop.f32.mrb[17].mxu1  ;;  %12048 = vrot.lane.b32.xlu1 %v12047_v40, %s12908_s27  ;;  %12043 = vrot.lane.b32.xlu0 %v12042_v36, %s12907_s18  ;;  %v14493_v45 = vmul.f32 %v14350_v16, %v14444_v42  ;;  %v14497_v58 = vmul.f32 %v14367_v55, %v14444_v42  ;;  %v14501_v21 = vmul.f32 %v14372_v23, %v14446_v3 }
 0x699   : > { %v14505_v24 = vmul.f32 %v14382_v4, %v14444_v42  ;;  %v14509_v40 = vmul.f32 %v14387_v63, %v14446_v3  ;;  %v14513_v36 = vmul.f32 %v14397_v10, %v14444_v42  ;;  %v14517_v39 = vmul.f32 %v14402_v17, %v14446_v3  ;;  %17286 = vst [vmem:[#allocation63_spill] sm:$0xff] %v14531_v59  ;;  %v14557_v59 = vpop.permute.xlu1 %12023 }
 0x69a   : > { %17285 = vst [vmem:[#allocation62_spill] sm:$0xff] %v14485_v37  ;;  %v14525_v25 = vmul.f32 %v14245_v49, %v14476_v14  ;;  %v14529_v60 = vmul.f32 %v14251_v5, %v14487_v44  ;;  %v14539_v46 = vmul.f32 %v14414_v26, %v14444_v42  ;;  %v14543_v49 = vmul.f32 %v14419_v6, %v14446_v3 }
 0x69b   : > { %v14551_v13 = vmul.f32 %v14259_v52, %v14476_v14  ;;  %v14555_v30 = vmul.f32 %v14265_v18, %v14487_v44  ;;  %17288 = vst [vmem:[#allocation65_spill] sm:$0xff] %v14557_v59  ;;  %v14571_v52 = vmul.f32 %v14289_v56, %v14476_v14  ;;  %v14577_v59 = vmul.f32 %v14297_v28, %v14487_v44 }
 0x69c   : > { %12053 = vrot.lane.b32.xlu0 %v12052_v0, %s12906_s1  ;;  %12058 = vrot.lane.b32.xlu1 %v12057_v20, %s12905_s26  ;;  %v14563_v0 = vmul.f32 %v14226_v2, %v14476_v14  ;;  %v14567_v20 = vmul.f32 %v14232_v48, %v14487_v44  ;;  %v14581_v42 = vmul.f32 %v14273_v54, %v14476_v14 }
 0x69d   : > { %17287 = vst [vmem:[#allocation64_spill] sm:$0xff] %v14551_v13  ;;  %v14585_v2 = vmul.f32 %v14280_v51, %v14487_v44  ;;  %v14591_v56 = vmul.f32 %v14318_v35, %v14476_v14  ;;  %v14595_v34 = vmul.f32 %v14325_v41, %v14487_v44  ;;  %v14599_v13 = vmul.f32 %v14305_v31, %v14476_v14 }
 0x69e   : > { %17289 = vst [vmem:[#allocation66_spill] sm:$0xff] %v14563_v0  ;;  %v14609_v35 = vmul.f32 %v14309_v62, %v14487_v44  ;;  %v14611_v0 = vpop.permute.xlu0 %8403  ;;  %v14625_v11 = vmul.f32 %v14335_v43, %v14476_v14  ;;  %v14635_v31 = vmul.f32 %v14382_v4, %v14476_v14  ;;  %v14649_v54 = vmul.f32 %v14367_v55, %v14476_v14 }
 0x69f   : > { %17290 = vst [vmem:[#allocation67_spill] sm:$0xff] %v14591_v56  ;;  %17291 = vst [vmem:[#allocation68_spill] sm:$0xff] %v14595_v34  ;;  %v14641_v56 = vpop.permute.xlu1 %8405  ;;  %v14657_v4 = vmul.f32 %v14414_v26, %v14476_v14  ;;  %v14693_v26 = vmul.f32 %v14232_v48, %v14446_v3  ;;  %v14707_v55 = vmul.f32 %v14265_v18, %v14446_v3 }
 0x6a0   : > { %17292 = vst [vmem:[#allocation69_spill] sm:$0xff] %v14599_v13  ;;  %12063 = vrot.lane.b32.xlu0 %v12062_v29, %s17293_s0  ;;  %12068 = vrot.lane.b32.xlu1 %v12067_v33, %s17294_s30  ;;  %17295 = vst [vmem:[#allocation70_spill] sm:$0xff] %v14611_v0  ;;  %v14617_v29 = vmul.f32 %v14350_v16, %v14476_v14  ;;  %v14621_v33 = vmul.f32 %v14355_v53, %v14487_v44 }
 0x6a1   : > { %v14631_v0 = vmul.f32 %v14340_v9, %v14487_v44  ;;  %17296 = vst [vmem:[#allocation71_spill] sm:$0xff] %v14635_v31  ;;  %v14639_v16 = vmul.f32 %v14387_v63, %v14487_v44  ;;  %17297 = vst [vmem:[#allocation72_spill] sm:$0xff] %v14641_v56  ;;  %v14653_v13 = vmul.f32 %v14372_v23, %v14487_v44 }
 0x6a2   : > { %17298 = vst [vmem:[#allocation73_spill] sm:$0xff] %v14649_v54  ;;  %17300 = vst [vmem:[#allocation75_spill] sm:$0xff] %v14657_v4  ;;  %v14669_v23 = vmul.f32 %v14419_v6, %v14487_v44  ;;  %v14675_v56 = vmul.f32 %v14397_v10, %v14476_v14  ;;  %v17304_v6 = vld [vmem:[#allocation42_spill] sm:$0xff]  ;;  %v14715_v48 = vmul.f32 %v14280_v51, %v14446_v3  ;;  %v17314_v51 = vld [vmem:[#allocation45_spill] sm:$0xff] }
 0x6a3   : > { %v14643_v34 = vpop.f32.mrb[18].mxu1  ;;  %17299 = vst [vmem:[#allocation74_spill] sm:$0xff] %v14653_v13  ;;  %17305 = vst [vmem:[#allocation42_spill] sm:$0xff] %v14693_v26  ;;  %v17306_v10 = vld [vmem:[#allocation38_spill] sm:$0xff]  ;;  %v17313_v18 = vpack.i.bf16 %v14501_v21, %v14497_v58  ;;  %v14735_v31 = vpop.permute.xlu1 %8409  ;;  %v14749_v21 = vmul.f32 %v14309_v62, %v14446_v3  ;;  %v14769_v62 = vmul.f32 %v14340_v9, %v14446_v3 }
 0x6a4   : > { %v14659_v63 = vpop.f32.mrb[19].mxu1  ;;  %12073 = vrot.lane.b32.xlu0 %v12072_v57, %s12902_s29  ;;  %12078 = vrot.lane.b32.xlu1 %v12077_v27, %s17173_s21  ;;  %17301 = vst [vmem:[#allocation76_spill] sm:$0xff] %v14669_v23  ;;  %17302 = vst [vmem:[#allocation77_spill] sm:$0xff] %v14675_v56  ;;  %v14679_v57 = vmul.f32 %v14402_v17, %v14487_v44  ;;  %v14683_v27 = vmul.f32 %v14251_v5, %v14446_v3  ;;  %v14699_v17 = vpop.permute.xlu0 %8407 }
 0x6a5   : > { %v14689_v43 = vmul.f32 %v17304_v6, %v14643_v34  ;;  %v14697_v54 = vmul.f32 %v17306_v10, %v14643_v34  ;;  %17307 = vst [vmem:[#allocation38_spill] sm:$0xff] %v14699_v17  ;;  %17308 = vst [vmem:[#allocation79_spill] sm:$0xff] %v14707_v55  ;;  %v14711_v4 = vmul.f32 %v14269_v1, %v14643_v34  ;;  %v17359_v55 = vld [vmem:[#allocation64_spill] sm:$0xff]  ;;  %v17361_v26 = vld [vmem:[#allocation66_spill] sm:$0xff] }
 0x6a6   : > { %17303 = vst [vmem:[#allocation78_spill] sm:$0xff] %v14679_v57  ;;  %17310 = vst [vmem:[#allocation81_spill] sm:$0xff] %v14715_v48  ;;  %v17312_v17 = vpack.i.bf16 %v14493_v45, %v14485_v37  ;;  %v14733_v57 = vmul.f32 %v17314_v51, %v14643_v34  ;;  %v14745_v58 = vmul.f32 %v14301_v61, %v14643_v34 }
 0x6a7   : > { %v14701_v13 = vpop.f32.mrb[20].mxu1  ;;  %17309 = vst [vmem:[#allocation80_spill] sm:$0xff] %v14711_v4  ;;  %17316 = vst [vmem:[#allocation83_spill] sm:$0xff] %v14735_v31  ;;  %v14755_v56 = vmul.f32 %v14314_v12, %v14643_v34  ;;  %v14759_v45 = vmul.f32 %v14325_v41, %v14446_v3  ;;  %v14777_v31 = vmul.f32 %v14355_v53, %v14446_v3 }
 0x6a8   : > { %v14717_v23 = vpop.f32.mrb[21].mxu1  ;;  %12083 = vrot.lane.b32.xlu0 %v17312_v17, %s12900_s15  ;;  %12088 = vrot.lane.b32.xlu1 %v17313_v18, %s12916_s28  ;;  %17315 = vst [vmem:[#allocation45_spill] sm:$0xff] %v14733_v57  ;;  %v14741_v17 = vmul.f32 %v14297_v28, %v14446_v3  ;;  %17318 = vst [vmem:[#allocation85_spill] sm:$0xff] %v14745_v58  ;;  %v14763_v28 = vmul.f32 %v14330_v8, %v14643_v34  ;;  %v14795_v58 = vpop.permute.xlu0 %12028 }
 0x6a9   : > { %17311 = vst [vmem:[#allocation82_spill] sm:$0xff] %v14717_v23  ;;  %17319 = vst [vmem:[#allocation86_spill] sm:$0xff] %v14749_v21  ;;  %v14773_v18 = vmul.f32 %v14345_v47, %v14643_v34  ;;  %v17326_v41 = vpack.i.bf16 %v14509_v40, %v14505_v24  ;;  %v17327_v5 = vpack.i.bf16 %v14517_v39, %v14513_v36  ;;  %v17330_v40 = vld [vmem:[#allocation23_spill] sm:$0xff]  ;;  %v17332_v36 = vld [vmem:[#allocation22_spill] sm:$0xff] }
 0x6aa   : > { %17317 = vst [vmem:[#allocation84_spill] sm:$0xff] %v14741_v17  ;;  %17320 = vst [vmem:[#allocation87_spill] sm:$0xff] %v14755_v56  ;;  %v14793_v53 = vmul.f32 %v14360_v19, %v14643_v34  ;;  %v14805_v39 = vmul.f32 %v17332_v36, %v14659_v63  ;;  %v14819_v24 = vmul.f32 %v14047_v38, %v14659_v63 }
 0x6ab   : > { %17321 = vst [vmem:[#allocation88_spill] sm:$0xff] %v14759_v45  ;;  %17322 = vst [vmem:[#allocation89_spill] sm:$0xff] %v14763_v28  ;;  %v17341_v21 = vpack.i.bf16 %v14529_v60, %v14525_v25  ;;  %v17342_v56 = vpack.i.bf16 %v14543_v49, %v14539_v46  ;;  %v17347_v25 = vld [vmem:[#allocation28_spill] sm:$0xff]  ;;  %v17350_v49 = vld [vmem:[#allocation50_spill] sm:$0xff]  ;;  %v14889_v48 = vmul.f32 %v17357_v50, %v14659_v63 }
 0x6ac   : > { %17323 = vst [vmem:[#allocation90_spill] sm:$0xff] %v14769_v62  ;;  %17324 = vst [vmem:[#allocation91_spill] sm:$0xff] %v14773_v18  ;;  %12093 = vrot.lane.b32.xlu0 %v17326_v41, %s12915_s23  ;;  %12098 = vrot.lane.b32.xlu1 %v17327_v5, %s12914_s22  ;;  %v14801_v41 = vmul.f32 %v17330_v40, %v14659_v63  ;;  %v17334_v5 = vld [vmem:[#allocation24_spill] sm:$0xff]  ;;  %v14823_v62 = vmul.f32 %v14183_v15, %v14659_v63  ;;  %v14825_v18 = vpop.permute.xlu1 %8644  ;;  %v17369_v28 = vld [vmem:[#allocation55_spill] sm:$0xff] }
 0x6ad   : > { %17325 = vst [vmem:[#allocation92_spill] sm:$0xff] %v14777_v31  ;;  %17328 = vst [vmem:[#allocation93_spill] sm:$0xff] %v14793_v53  ;;  %v14809_v17 = vmul.f32 %v17334_v5, %v14659_v63  ;;  %v14835_v53 = vmul.f32 %v14080_v32, %v14659_v63  ;;  %v14855_v60 = vmul.f32 %v17347_v25, %v14659_v63  ;;  %v17351_v31 = vld [vmem:[#allocation29_spill] sm:$0xff] }
 0x6ae   : > { %17329 = vst [vmem:[#allocation94_spill] sm:$0xff] %v14795_v58  ;;  %17331 = vst [vmem:[#allocation23_spill] sm:$0xff] %v14801_v41  ;;  %v17336_v58 = vld [vmem:[#allocation27_spill] sm:$0xff]  ;;  %v14867_v9 = vmul.f32 %v17351_v31, %v14659_v63  ;;  %v17353_v41 = vld [vmem:[#allocation30_spill] sm:$0xff]  ;;  %v14893_v57 = vmul.f32 %v17304_v6, %v14701_v13  ;;  %v17360_v4 = vpack.i.bf16 %v14555_v30, %v17359_v55 }
 0x6af   : > { %17333 = vst [vmem:[#allocation22_spill] sm:$0xff] %v14805_v39  ;;  %17335 = vst [vmem:[#allocation24_spill] sm:$0xff] %v14809_v17  ;;  %v14815_v45 = vmul.f32 %v17336_v58, %v14659_v63  ;;  %v14879_v17 = vmul.f32 %v17354_v22, %v14643_v34  ;;  %v17356_v39 = vld [vmem:[#allocation44_spill] sm:$0xff]  ;;  %v14909_v6 = vmul.f32 %v17330_v40, %v14717_v23  ;;  %v17367_v55 = vld [vmem:[#allocation54_spill] sm:$0xff] }
 0x6b0   : > { %17338 = vst [vmem:[#allocation95_spill] sm:$0xff] %v14819_v24  ;;  %17339 = vst [vmem:[#allocation96_spill] sm:$0xff] %v14823_v62  ;;  %12108 = vrot.lane.b32.xlu1 %v17341_v21, %s12907_s18  ;;  %12103 = vrot.lane.b32.xlu0 %v17342_v56, %s12913_s4  ;;  %v17348_v21 = vld [vmem:[#allocation25_spill] sm:$0xff]  ;;  %v14863_v56 = vmul.f32 %v17350_v49, %v14643_v34  ;;  %v14871_v62 = vmul.f32 %v17352_v7, %v14643_v34  ;;  %v14881_v24 = vpop.permute.xlu0 %8646  ;;  %v14911_v37 = vpop.permute.xlu1 %8648  ;;  %v17368_v40 = vld [vmem:[#allocation32_spill] sm:$0xff] }
 0x6b1   : > { %17337 = vst [vmem:[#allocation27_spill] sm:$0xff] %v14815_v45  ;;  %17340 = vst [vmem:[#allocation97_spill] sm:$0xff] %v14835_v53  ;;  %v14859_v46 = vmul.f32 %v17348_v21, %v14659_v63  ;;  %v14875_v53 = vmul.f32 %v17353_v41, %v14659_v63  ;;  %v17362_v45 = vpack.i.bf16 %v14567_v20, %v17361_v26 }
 0x6b2   : > { %17355 = vst [vmem:[#allocation25_spill] sm:$0xff] %v14879_v17  ;;  %17358 = vst [vmem:[#allocation50_spill] sm:$0xff] %v14893_v57  ;;  %v14921_v20 = vmul.f32 %v17332_v36, %v14717_v23  ;;  %v14925_v26 = vmul.f32 %v17367_v55, %v14643_v34  ;;  %v14935_v30 = vmul.f32 %v14269_v1, %v14701_v13 }
 0x6b3   : > { %17349 = vst [vmem:[#allocation28_spill] sm:$0xff] %v14859_v46  ;;  %17363 = vst [vmem:[#allocation29_spill] sm:$0xff] %v14909_v6  ;;  %v14931_v46 = vmul.f32 %v17368_v40, %v14659_v63  ;;  %v14945_v17 = vmul.f32 %v17369_v28, %v14446_v3  ;;  %v14953_v6 = vmul.f32 %v17314_v51, %v14701_v13 }
 0x6b4   : > { %12118 = vrot.lane.b32.xlu1 %v17360_v4, %s12906_s1  ;;  %12113 = vrot.lane.b32.xlu0 %v17362_v45, %s12908_s27  ;;  %17364 = vst [vmem:[#allocation51_spill] sm:$0xff] %v14911_v37  ;;  %v14917_v4 = vmul.f32 %v17306_v10, %v14701_v13  ;;  %17366 = vst [vmem:[#allocation53_spill] sm:$0xff] %v14921_v20  ;;  %v14939_v10 = vmul.f32 %v17334_v5, %v14717_v23  ;;  %v17370_v45 = vld [vmem:[#allocation56_spill] sm:$0xff]  ;;  %v14971_v20 = vpop.permute.xlu0 %8650 }
 0x6b5   : > { %v14949_v57 = vmul.f32 %v17370_v45, %v14643_v34  ;;  %17371 = vst [vmem:[#allocation44_spill] sm:$0xff] %v14953_v6  ;;  %v17372_v1 = vpack.i.bf16 %v14577_v59, %v14571_v52  ;;  %v17373_v5 = vpack.i.bf16 %v14585_v2, %v14581_v42  ;;  %v14969_v51 = vmul.f32 %v17336_v58, %v14717_v23  ;;  %v17378_v2 = vld [vmem:[#allocation59_spill] sm:$0xff] }
 0x6b6   : > { %17365 = vst [vmem:[#allocation30_spill] sm:$0xff] %v14917_v4  ;;  %17375 = vst [vmem:[#allocation64_spill] sm:$0xff] %v14971_v20  ;;  %v14977_v52 = vmul.f32 %v17369_v28, %v14487_v44  ;;  %v14981_v42 = vmul.f32 %v17370_v45, %v14701_v13  ;;  %v14995_v59 = vmul.f32 %v14301_v61, %v14701_v13  ;;  %v15001_v45 = vpop.permute.xlu1 %12033  ;;  %v17386_v20 = vld [vmem:[#allocation67_spill] sm:$0xff]  ;;  %v17388_v61 = vld [vmem:[#allocation69_spill] sm:$0xff] }
 0x6b7   : > { %17374 = vst [vmem:[#allocation31_spill] sm:$0xff] %v14969_v51  ;;  %v14999_v28 = vmul.f32 %v14047_v38, %v14717_v23  ;;  %v15007_v58 = vmul.f32 %v14314_v12, %v14701_v13  ;;  %v17389_v51 = vpack.i.bf16 %v14609_v35, %v17388_v61  ;;  %v15023_v12 = vmul.f32 %v14183_v15, %v14717_v23  ;;  %v17393_v35 = vld [vmem:[#allocation58_spill] sm:$0xff]  ;;  %v17394_v61 = vld [vmem:[#allocation61_spill] sm:$0xff] }
 0x6b8   : > { %12128 = vrot.lane.b32.xlu1 %v17372_v1, %s17293_s0  ;;  %12123 = vrot.lane.b32.xlu0 %v17373_v5, %s12905_s26  ;;  %17376 = vst [vmem:[#allocation66_spill] sm:$0xff] %v14977_v52  ;;  %17377 = vst [vmem:[#allocation54_spill] sm:$0xff] %v14981_v42  ;;  %v17379_v1 = vld [vmem:[#allocation33_spill] sm:$0xff]  ;;  %v17391_v52 = vld [vmem:[#allocation52_spill] sm:$0xff] }
 0x6b9   : > { %v14985_v5 = vmul.f32 %v17379_v1, %v17378_v2  ;;  %v14991_v4 = vmul.f32 %v17379_v1, %v14476_v14  ;;  %17382 = vst [vmem:[#allocation56_spill] sm:$0xff] %v14995_v59  ;;  %17383 = vst [vmem:[#allocation59_spill] sm:$0xff] %v14999_v28  ;;  %v17385_v1 = vld [vmem:[#allocation68_spill] sm:$0xff]  ;;  %v15047_v59 = vmul.f32 %v17393_v35, %v14701_v13  ;;  %v15049_v28 = vpop.permute.xlu0 %8885  ;;  %v17407_v15 = vld [vmem:[#allocation73_spill] sm:$0xff] }
 0x6ba   : > { %17384 = vst [vmem:[#allocation33_spill] sm:$0xff] %v15001_v45  ;;  %v17387_v6 = vpack.i.bf16 %v17385_v1, %v17386_v20  ;;  %v17390_v45 = vld [vmem:[#allocation60_spill] sm:$0xff] }
 0x6bb   : > { %17380 = vst [vmem:[#allocation32_spill] sm:$0xff] %v14985_v5  ;;  %17381 = vst [vmem:[#allocation55_spill] sm:$0xff] %v14991_v4  ;;  %v8170_v20 = vsel %vm6818_vm14, %v17391_v52, %v17390_v45  ;;  %v8171_v36 = vsel %vm6818_vm14, %v17390_v45, %v17394_v61  ;;  %v17395_v4 = vld [vmem:[#allocation39_spill] sm:$0xff]  ;;  %v17399_v5 = vpack.i.bf16 %v14631_v0, %v14625_v11  ;;  %v15083_v61 = vpop.permute.xlu1 %8887 }
 0x6bc   : > { %12138 = vrot.lane.b32.xlu1 %v17387_v6, %s12902_s29  ;;  %12133 = vrot.lane.b32.xlu0 %v17389_v51, %s17294_s30  ;;  %v17392_v6 = vld [vmem:[#allocation57_spill] sm:$0xff]  ;;  %v15034_v51 = vmul.f32 %v17393_v35, %v14643_v34  ;;  %v15055_v42 = vmul.f32 %v17395_v4, %v17378_v2  ;;  %v15059_v45 = vmul.f32 %v17395_v4, %v14476_v14 }
 0x6bd   : > { %v15030_v1 = vmul.f32 %v17392_v6, %v14446_v3  ;;  %v15043_v38 = vmul.f32 %v17392_v6, %v14487_v44  ;;  %v15063_v6 = vmul.f32 %v14330_v8, %v14701_v13  ;;  %v17398_v35 = vpack.i.bf16 %v14621_v33, %v14617_v29  ;;  %v17406_v29 = vld [vmem:[#allocation74_spill] sm:$0xff] }
 0x6be   : > { %17396 = vst [vmem:[#allocation68_spill] sm:$0xff] %v15055_v42  ;;  %v15077_v4 = vmul.f32 %v14080_v32, %v14717_v23  ;;  %v15081_v8 = vmul.f32 %v14345_v47, %v14701_v13  ;;  %v15089_v11 = vmul.f32 %v17347_v25, %v14717_v23  ;;  %v15094_v32 = vmul.f32 %v8170_v20, %v14446_v3  ;;  %v15126_v42 = vpop.permute.xlu0 %8889  ;;  %v17417_v47 = vld [vmem:[#allocation75_spill] sm:$0xff] }
 0x6bf   : > { %17397 = vst [vmem:[#allocation67_spill] sm:$0xff] %v15063_v6  ;;  %v15097_v33 = vmul.f32 %v8171_v36, %v14643_v34  ;;  %v15107_v25 = vmul.f32 %v17391_v52, %v14476_v14  ;;  %v17408_v6 = vpack.i.bf16 %v17406_v29, %v17407_v15  ;;  %17411 = vst [vmem:[#allocation58_spill] sm:$0xff] %v15126_v42 }
 0x6c0   : > { %12148 = vrot.lane.b32.xlu1 %v17398_v35, %s12900_s15  ;;  %12143 = vrot.lane.b32.xlu0 %v17399_v5, %s17173_s21  ;;  %17400 = vst [vmem:[#allocation69_spill] sm:$0xff] %v15077_v4  ;;  %17401 = vst [vmem:[#allocation60_spill] sm:$0xff] %v15081_v8  ;;  %v15103_v5 = vmul.f32 %v17391_v52, %v17378_v2  ;;  %v17404_v35 = vld [vmem:[#allocation71_spill] sm:$0xff]  ;;  %v15121_v8 = vmul.f32 %v14360_v19, %v14701_v13  ;;  %v17410_v52 = vld [vmem:[#allocation70_spill] sm:$0xff] }
 0x6c1   : > { %17402 = vst [vmem:[#allocation52_spill] sm:$0xff] %v15089_v11  ;;  %v17405_v0 = vpack.i.bf16 %v14639_v16, %v17404_v35  ;;  %v17409_v11 = vld [vmem:[#allocation72_spill] sm:$0xff]  ;;  %v15132_v15 = vmul.f32 %v17348_v21, %v14717_v23  ;;  %v15138_v29 = vmul.f32 %v8171_v36, %v14701_v13  ;;  %v15142_v19 = vmul.f32 %v17350_v49, %v14701_v13  ;;  %v17412_v35 = vld [vmem:[#allocation38_spill] sm:$0xff]  ;;  %v15151_v21 = vpop.permute.xlu1 %8891 }
 0x6c2   : > { %17403 = vst [vmem:[#allocation57_spill] sm:$0xff] %v15103_v5  ;;  %v8411_v4 = vsel %vm6575_vm15, %v17410_v52, %v17409_v11  ;;  %v8412_v16 = vsel %vm6575_vm15, %v17409_v11, %v17412_v35  ;;  %17413 = vst [vmem:[#allocation39_spill] sm:$0xff] %v15151_v21  ;;  %v15157_v36 = vmul.f32 %v17352_v7, %v14701_v13  ;;  %v17419_v11 = vld [vmem:[#allocation78_spill] sm:$0xff]  ;;  %v17420_v35 = vld [vmem:[#allocation77_spill] sm:$0xff] }
 0x6c3   : > { %v15161_v49 = vmul.f32 %v17353_v41, %v14717_v23  ;;  %v17421_v21 = vpack.i.bf16 %v17419_v11, %v17420_v35  ;;  %v8652_v41 = vsel %vm4356_vm6, %v14825_v18, %v14881_v24  ;;  %v15184_v35 = vmul.f32 %v8411_v4, %v14487_v44 }
 0x6c4   : > { %12158 = vrot.lane.b32.xlu1 %v17405_v0, %s12915_s23  ;;  %12153 = vrot.lane.b32.xlu0 %v17408_v6, %s12916_s28  ;;  %v15135_v6 = vmul.f32 %v8170_v20, %v14487_v44  ;;  %v15146_v0 = vmul.f32 %v17351_v31, %v14717_v23  ;;  %17414 = vst [vmem:[#allocation71_spill] sm:$0xff] %v15157_v36  ;;  %v17416_v31 = vld [vmem:[#allocation76_spill] sm:$0xff] }
 0x6c5   : > { %17415 = vst [vmem:[#allocation74_spill] sm:$0xff] %v15161_v49  ;;  %v17418_v5 = vpack.i.bf16 %v17416_v31, %v17417_v47  ;;  %v8653_v47 = vsel %vm4356_vm6, %v14881_v24, %v14911_v37  ;;  %17422 = vst [vmem:[#allocation73_spill] sm:$0xff] %v15184_v35  ;;  %v15190_v31 = vmul.f32 %v8411_v4, %v14446_v3  ;;  %v15199_v24 = vpop.permute.xlu0 %12038  ;;  %v9127_v36 = vpop.permute.xlu1 %9126 }
 0x6c6   : > { %v15193_v11 = vmul.f32 %v8412_v16, %v14643_v34  ;;  %v15197_v7 = vmul.f32 %v17354_v22, %v14701_v13  ;;  %17427 = vst [vmem:[#allocation78_spill] sm:$0xff] %v15199_v24  ;;  %v15207_v20 = vmul.f32 %v17367_v55, %v14701_v13  ;;  %v15211_v4 = vmul.f32 %v17368_v40, %v14717_v23 }
 0x6c7   : > { %17424 = vst [vmem:[#allocation70_spill] sm:$0xff] %v15190_v31  ;;  %v17432_v22 = vpack.i.bf16 %v14689_v43, %v14683_v27  ;;  %v15231_v37 = vmul.f32 %v17410_v52, %v14476_v14  ;;  %v15252_v43 = vmul.f32 %v14825_v18, %v17378_v2  ;;  %v15258_v55 = vmul.f32 %v14825_v18, %v14476_v14  ;;  %v17444_v18 = vld [vmem:[#allocation80_spill] sm:$0xff] }
 0x6c8   : > { %12168 = vrot.lane.b32.xlu1 %v17418_v5, %s12913_s4  ;;  %12163 = vrot.lane.b32.xlu0 %v17421_v21, %s12914_s22  ;;  %v15187_v21 = vmul.f32 %v8412_v16, %v14701_v13  ;;  %17425 = vst [vmem:[#allocation76_spill] sm:$0xff] %v15193_v11  ;;  %17426 = vst [vmem:[#allocation75_spill] sm:$0xff] %v15197_v7  ;;  %v15203_v5 = vmul.f32 %v17357_v50, %v14717_v23  ;;  %v17433_v50 = vld [vmem:[#allocation42_spill] sm:$0xff]  ;;  %v17463_v11 = vld [vmem:[#allocation17_spill] sm:$0xff] }
 0x6c9   : > { %17429 = vst [vmem:[#allocation98_spill] sm:$0xff] %v15207_v20  ;;  %17430 = vst [vmem:[#allocation99_spill] sm:$0xff] %v15211_v4  ;;  %v15215_v16 = vmul.f32 %v17410_v52, %v17378_v2  ;;  %v17434_v24 = vpack.i.bf16 %v14697_v54, %v17433_v50  ;;  %v15238_v54 = vmul.f32 %v8652_v41, %v14446_v3  ;;  %v17439_v50 = vld [vmem:[#allocation34_spill] sm:$0xff]  ;;  %v15287_v7 = vpop.permute.xlu1 %9130 }
 0x6ca   : > { %17423 = vst [vmem:[#allocation72_spill] sm:$0xff] %v15187_v21  ;;  %17428 = vst [vmem:[#allocation77_spill] sm:$0xff] %v15203_v5  ;;  %v15261_v20 = vmul.f32 %v8652_v41, %v14487_v44  ;;  %v8893_v52 = vsel %vm4403_vm7, %v15049_v28, %v15083_v61  ;;  %v8894_v27 = vsel %vm4403_vm7, %v15083_v61, %v15126_v42  ;;  %v17447_v41 = vld [vmem:[#allocation45_spill] sm:$0xff]  ;;  %v17462_v5 = vld [vmem:[#allocation19_spill] sm:$0xff] }
 0x6cb   : > { %17431 = vst [vmem:[#allocation100_spill] sm:$0xff] %v15215_v16  ;;  %17435 = vst [vmem:[#allocation42_spill] sm:$0xff] %v15231_v37  ;;  %v9129_v37 = vpop.permute.xlu0 %9128  ;;  %v17456_v61 = vld [vmem:[#allocation85_spill] sm:$0xff]  ;;  %v15360_v49 = vmul.f32 %v9127_v36, %v17378_v2 }
 0x6cc   : > { %12173 = vrot.lane.b32.xlu1 %v17432_v22, %s12907_s18  ;;  %12178 = vrot.lane.b32.xlu0 %v17434_v24, %s12908_s27  ;;  %17436 = vst [vmem:[#allocation101_spill] sm:$0xff] %v15238_v54  ;;  %v15241_v24 = vmul.f32 %v8653_v47, %v14643_v34  ;;  %v17438_v22 = vld [vmem:[#allocation35_spill] sm:$0xff]  ;;  %17441 = vst [vmem:[#allocation34_spill] sm:$0xff] %v15258_v55  ;;  %v9134_v42 = vsel %vm4834_vm8, %v9127_v36, %v9129_v37 }
 0x6cd   : > { %v15246_v40 = vsel %vm7304_vm2, %v17439_v50, %v17438_v22  ;;  %17440 = vst [vmem:[#allocation35_spill] sm:$0xff] %v15252_v43  ;;  %17442 = vst [vmem:[#allocation103_spill] sm:$0xff] %v15261_v20  ;;  %v15264_v50 = vmul.f32 %v8653_v47, %v14701_v13  ;;  %v15267_v4 = vmul.f32 0.0, %v17438_v22  ;;  %v17445_v54 = vld [vmem:[#allocation79_spill] sm:$0xff]  ;;  %v17448_v47 = vld [vmem:[#allocation81_spill] sm:$0xff] }
 0x6ce   : > { %17437 = vst [vmem:[#allocation102_spill] sm:$0xff] %v15241_v24  ;;  %v17446_v24 = vpack.i.bf16 %v17444_v18, %v17445_v54  ;;  %v17449_v16 = vpack.i.bf16 %v17447_v41, %v17448_v47  ;;  %v15285_v22 = vmul.f32 %v15246_v40, %v14717_v23  ;;  %17451 = vst [vmem:[#allocation79_spill] sm:$0xff] %v15287_v7  ;;  %v11129_v18 = vld [vmem:[%s16985_s17 + $0x25] ss:$8 sm:$0xf] }
 0x6cf   : > { %17443 = vst [vmem:[#allocation104_spill] sm:$0xff] %v15264_v50  ;;  %v15305_v41 = vmul.f32 %v8893_v52, %v14446_v3  ;;  %v15308_v47 = vmul.f32 %v8894_v27, %v14643_v34  ;;  %v9135_v54 = vsel %vm4834_vm8, %v9129_v37, %v15287_v7  ;;  %v17459_v50 = vld [vmem:[#allocation87_spill] sm:$0xff]  ;;  %v17460_v43 = vld [vmem:[#allocation86_spill] sm:$0xff]  ;;  %v7480_v31 = vrot.slane %v11129_v18, %v17462_v5 }
 0x6d0   : > { %12183 = vrot.lane.b32.xlu1 %v17446_v24, %s12906_s1  ;;  %12188 = vrot.lane.b32.xlu0 %v17449_v16, %s12905_s26  ;;  %17450 = vst [vmem:[#allocation80_spill] sm:$0xff] %v15285_v22  ;;  %v15296_v24 = vmul.f32 %v8893_v52, %v14487_v44  ;;  %v15299_v16 = vmul.f32 %v8894_v27, %v14701_v13  ;;  %v17457_v22 = vld [vmem:[#allocation84_spill] sm:$0xff]  ;;  %17476 = vst [vmem:[#allocation19_spill] sm:$0xff] %v15360_v49  ;;  %v17488_v49 = vld [vmem:[#allocation23_spill] sm:$0xff] }
 0x6d1   : > { %17454 = vst [vmem:[#allocation105_spill] sm:$0xff] %v15305_v41  ;;  %17455 = vst [vmem:[#allocation106_spill] sm:$0xff] %v15308_v47  ;;  %v17458_v20 = vpack.i.bf16 %v17456_v61, %v17457_v22  ;;  %v17461_v55 = vpack.i.bf16 %v17459_v50, %v17460_v43  ;;  %v7476_v37 = vrot.slane %v11129_v18, %v17463_v11  ;;  %v17464_v43 = vld [vmem:[#allocation20_spill] sm:$0xff]  ;;  %v17465_v50 = vld [vmem:[#allocation21_spill] sm:$0xff] }
 0x6d2   : > { %17452 = vst [vmem:[#allocation45_spill] sm:$0xff] %v15296_v24  ;;  %17453 = vst [vmem:[#allocation81_spill] sm:$0xff] %v15299_v16  ;;  %v15329_v7 = vmul.f32 %v15049_v28, %v17378_v2  ;;  %v7484_v22 = vrot.slane %v11129_v18, %v17465_v50  ;;  %v15338_v61 = vmul.f32 %v9134_v42, %v14446_v3  ;;  %v17470_v47 = vld [vmem:[#allocation89_spill] sm:$0xff]  ;;  %v17473_v16 = vld [vmem:[#allocation91_spill] sm:$0xff] }
 0x6d3   : > { %v15341_v27 = vmul.f32 %v9135_v54, %v14643_v34  ;;  %v15344_v52 = vmul.f32 %v9134_v42, %v14487_v44  ;;  %v15347_v41 = vmul.f32 %v9135_v54, %v14701_v13  ;;  %v15363_v42 = vmul.f32 %v9127_v36, %v14476_v14  ;;  %v17485_v54 = vld [vmem:[#allocation92_spill] sm:$0xff] }
 0x6d4   : > { %12193 = vrot.lane.b32.xlu1 %v17458_v20, %s17293_s0  ;;  %12198 = vrot.lane.b32.xlu0 %v17461_v55, %s17294_s30  ;;  %v15333_v20 = vmul.f32 %v15049_v28, %v14476_v14  ;;  %v7488_v55 = vrot.slane %v11129_v18, %v17464_v43  ;;  %17466 = vst [vmem:[#allocation85_spill] sm:$0xff] %v15338_v61  ;;  %v17471_v28 = vld [vmem:[#allocation88_spill] sm:$0xff]  ;;  %v17474_v18 = vld [vmem:[#allocation90_spill] sm:$0xff] }
 0x6d5   : > { %17467 = vst [vmem:[#allocation84_spill] sm:$0xff] %v15341_v27  ;;  %17468 = vst [vmem:[#allocation87_spill] sm:$0xff] %v15344_v52  ;;  %v17472_v24 = vpack.i.bf16 %v17470_v47, %v17471_v28  ;;  %v17475_v35 = vpack.i.bf16 %v17473_v16, %v17474_v18  ;;  %v15375_v16 = vmul.f32 %v7480_v31, %v14487_v44  ;;  %v17484_v47 = vld [vmem:[#allocation93_spill] sm:$0xff] }
 0x6d6   : > { %17469 = vst [vmem:[#allocation86_spill] sm:$0xff] %v15347_v41  ;;  %17477 = vst [vmem:[#allocation20_spill] sm:$0xff] %v15363_v42  ;;  %v15378_v28 = vmul.f32 %v7476_v37, %v17378_v2  ;;  %v15381_v36 = vmul.f32 %v7476_v37, %v14476_v14  ;;  %v15384_v18 = vmul.f32 %v7488_v55, %v14659_v63  ;;  %v17496_v37 = vld [vmem:[#allocation24_spill] sm:$0xff] }
 0x6d7   : > { %17479 = vst [vmem:[#allocation89_spill] sm:$0xff] %v15375_v16  ;;  %v17486_v21 = vpack.i.bf16 %v17484_v47, %v17485_v54  ;;  %v15400_v52 = vmul.f32 %v7484_v22, %v14643_v34  ;;  %v15403_v41 = vmul.f32 %v7484_v22, %v14701_v13  ;;  %v17498_v22 = vld [vmem:[#allocation36_spill] sm:$0xff]  ;;  %v17499_v16 = vld [vmem:[#allocation27_spill] sm:$0xff] }
 0x6d8   : > { %12203 = vrot.lane.b32.xlu1 %v17472_v24, %s12902_s29  ;;  %12208 = vrot.lane.b32.xlu0 %v17475_v35, %s17173_s21  ;;  %v15372_v35 = vmul.f32 %v7480_v31, %v14446_v3  ;;  %17480 = vst [vmem:[#allocation88_spill] sm:$0xff] %v15378_v28  ;;  %17481 = vst [vmem:[#allocation91_spill] sm:$0xff] %v15381_v36  ;;  %v15387_v24 = vmul.f32 %v7488_v55, %v14717_v23  ;;  %v17487_v31 = vld [vmem:[#allocation41_spill] sm:$0xff]  ;;  %v17504_v54 = vld [vmem:[#allocation40_spill] sm:$0xff] }
 0x6d9   : > { %17482 = vst [vmem:[#allocation90_spill] sm:$0xff] %v15384_v18  ;;  %v17489_v42 = vpack.i.bf16 %v17487_v31, %v17488_v49  ;;  %17490 = vst [vmem:[#allocation93_spill] sm:$0xff] %v15400_v52  ;;  %v17492_v49 = vld [vmem:[#allocation37_spill] sm:$0xff]  ;;  %v17495_v31 = vld [vmem:[#allocation43_spill] sm:$0xff]  ;;  %v17500_v55 = vpack.i.bf16 %v17498_v22, %v17499_v16 }
 0x6da   : > { %17478 = vst [vmem:[#allocation21_spill] sm:$0xff] %v15372_v35  ;;  %17483 = vst [vmem:[#allocation107_spill] sm:$0xff] %v15387_v24  ;;  %v17497_v35 = vpack.i.bf16 %v17495_v31, %v17496_v37  ;;  %v17502_v18 = vld [vmem:[#allocation95_spill] sm:$0xff]  ;;  %v17505_v52 = vld [vmem:[#allocation96_spill] sm:$0xff] }
 0x6db   : > { %17491 = vst [vmem:[#allocation92_spill] sm:$0xff] %v15403_v41  ;;  %v17511_v16 = vld [vmem:[#allocation62_spill] sm:$0xff] }
 0x6dc   : > { %12213 = vrot.lane.b32.xlu1 %v17486_v21, %s12900_s15  ;;  %12218 = vrot.lane.b32.xlu0 %v17489_v42, %s12907_s18  ;;  %v17493_v42 = vld [vmem:[#allocation22_spill] sm:$0xff]  ;;  %v17501_v21 = vld [vmem:[#allocation47_spill] sm:$0xff] }
 0x6dd   : > { %v17494_v47 = vpack.i.bf16 %v17492_v49, %v17493_v42  ;;  %v17503_v24 = vpack.i.bf16 %v17501_v21, %v17502_v18  ;;  %v17506_v49 = vpack.i.bf16 %v17504_v54, %v17505_v52  ;;  %v17507_v42 = vld [vmem:[#allocation48_spill] sm:$0xff]  ;;  %v17514_v52 = vpack.i.bf16 %v14867_v9, %v14863_v56  ;;  %v17516_v21 = vld [vmem:[#allocation25_spill] sm:$0xff]  ;;  %v17519_v54 = vld [vmem:[#allocation50_spill] sm:$0xff] }
 0x6de   : > { %v11153_v9 = vld [vmem:[%s16985_s17 + $0x45] ss:$8 sm:$0xf] }
 0x6df   : > { %v17521_v56 = vld [vmem:[#allocation53_spill] sm:$0xff]  ;;  %v17522_v22 = vld [vmem:[#allocation30_spill] sm:$0xff] }
 0x6e0   : > { %12223 = vrot.lane.b32.xlu1 %v17494_v47, %s12908_s27  ;;  %12228 = vrot.lane.b32.xlu0 %v17497_v35, %s12906_s1  ;;  %v17508_v47 = vld [vmem:[#allocation97_spill] sm:$0xff]  ;;  %v17510_v35 = vpack.i.bf16 %v17356_v39, %v14855_v60  ;;  %v17517_v39 = vpack.i.bf16 %v14889_v48, %v17516_v21  ;;  %v9354_v48 = vrot.slane %v11153_v9, %v17463_v11  ;;  %v17534_v21 = vld [vmem:[#allocation55_spill] sm:$0xff] }
 0x6e1   : > { %v17509_v37 = vpack.i.bf16 %v17507_v42, %v17508_v47  ;;  %v17518_v60 = vld [vmem:[#allocation29_spill] sm:$0xff]  ;;  %v9362_v47 = vrot.slane %v11153_v9, %v17465_v50 }
 0x6e2   : > { %v17520_v31 = vpack.i.bf16 %v17518_v60, %v17519_v54 }
 0x6e4   : > { %12233 = vrot.lane.b32.xlu1 %v17500_v55, %s12905_s26  ;;  %12238 = vrot.lane.b32.xlu0 %v17503_v24, %s17293_s0  ;;  %v17512_v55 = vld [vmem:[#allocation28_spill] sm:$0xff]  ;;  %v17515_v24 = vpack.i.bf16 %v14875_v53, %v14871_v62  ;;  %v17524_v62 = vpack.i.bf16 %v14931_v46, %v14925_v26  ;;  %v17525_v53 = vld [vmem:[#allocation26_spill] sm:$0xff]  ;;  %v17526_v46 = vpack.i.bf16 %v14939_v10, %v14935_v30 }
 0x6e5   : > { %v17513_v18 = vpack.i.bf16 %v17511_v16, %v17512_v55  ;;  %v9125_v42 = vrot.slane %v17525_v53, %v17464_v43  ;;  %v17527_v26 = vpack.i.bf16 %v14949_v57, %v14945_v17  ;;  %v17528_v16 = vld [vmem:[#allocation31_spill] sm:$0xff]  ;;  %v17529_v55 = vld [vmem:[#allocation44_spill] sm:$0xff]  ;;  %v17531_v57 = vld [vmem:[#allocation54_spill] sm:$0xff] }
 0x6e6   : > { %v17532_v17 = vld [vmem:[#allocation66_spill] sm:$0xff]  ;;  %v17537_v53 = vld [vmem:[#allocation59_spill] sm:$0xff] }
 0x6e8   : > { %12243 = vrot.lane.b32.xlu1 %v17506_v49, %s17294_s30  ;;  %12248 = vrot.lane.b32.xlu0 %v17509_v37, %s12902_s29  ;;  %v17523_v49 = vpack.i.bf16 %v17521_v56, %v17522_v22  ;;  %v9358_v37 = vrot.slane %v11153_v9, %v17462_v5  ;;  %v7699_v22 = vmul.f32 %v15246_v40, %v14659_v63 }
 0x6ec   : > { %12253 = vrot.lane.b32.xlu1 %v17510_v35, %s17173_s21  ;;  %12258 = vrot.lane.b32.xlu0 %v17513_v18, %s12900_s15  ;;  %v9366_v35 = vrot.slane %v11153_v9, %v17464_v43  ;;  %v17530_v18 = vpack.i.bf16 %v17528_v16, %v17529_v55 }
 0x6f0   : > { %12263 = vrot.lane.b32.xlu1 %v17514_v52, %s12916_s28  ;;  %12268 = vrot.lane.b32.xlu0 %v17515_v24, %s12915_s23  ;;  %v11156_v52 = vld [vmem:[%s16985_s17 + $0x46] ss:$8 sm:$0xf]  ;;  %v17533_v24 = vpack.i.bf16 %v17531_v57, %v17532_v17  ;;  %v11159_v57 = vld [vmem:[%s16985_s17 + $0x47] ss:$8 sm:$0xf] }
 0x6f1   : > { %v9595_v54 = vrot.slane %v11156_v52, %v17463_v11 }
 0x6f4   : > { %12273 = vrot.lane.b32.xlu1 %v17517_v39, %s12914_s22  ;;  %12278 = vrot.lane.b32.xlu0 %v17520_v31, %s12907_s18  ;;  %v17535_v39 = vld [vmem:[#allocation32_spill] sm:$0xff]  ;;  %v9599_v31 = vrot.slane %v11156_v52, %v17462_v5 }
 0x6f5   : > { %v17536_v60 = vpack.i.bf16 %v17534_v21, %v17535_v39  ;;  %v17551_v39 = vld [vmem:[#allocation49_spill] sm:$0xff] }
 0x6f8   : > { %12288 = vrot.lane.b32.xlu1 %v17523_v49, %s12908_s27  ;;  %12283 = vrot.lane.b32.xlu0 %v17524_v62, %s12913_s4 }
 0x6fc   : > { %9367 = vrot.lane.b32.xlu1 %v9354_v48, %s17294_s30  ;;  %9132 = vrot.lane.b32.xlu0 %v9125_v42, %s12902_s29  ;;  %v12322_v48 = vpack.i.bf16 %v15267_v4, %v7699_v22  ;;  %v17538_v42 = vld [vmem:[#allocation56_spill] sm:$0xff]  ;;  %v15580_v22 = vmul.f32 0.0, %v17551_v39 }
 0x700   : > { %9371 = vrot.lane.b32.xlu1 %v9362_v47, %s17294_s30  ;;  %9369 = vrot.lane.b32.xlu0 %v9358_v37, %s17294_s30  ;;  %v17539_v47 = vpack.i.bf16 %v17537_v53, %v17538_v42  ;;  %v9603_v37 = vrot.slane %v11156_v52, %v17465_v50 }
 0x704   : > { %12293 = vrot.lane.b32.xlu0 %v17526_v46, %s12906_s1  ;;  %12298 = vrot.lane.b32.xlu1 %v17527_v26, %s12912_s20  ;;  %v17541_v26 = vpack.i.bf16 %v15023_v12, %v15007_v58  ;;  %v17547_v12 = vpack.i.bf16 %v15047_v59, %v15043_v38  ;;  %v17553_v59 = vld [vmem:[#allocation69_spill] sm:$0xff]  ;;  %v17554_v38 = vld [vmem:[#allocation67_spill] sm:$0xff] }
 0x708   : > { %9373 = vrot.lane.b32.xlu0 %v9366_v35, %s17294_s30  ;;  %12308 = vrot.lane.b32.xlu1 %v17530_v18, %s12905_s26  ;;  %v9607_v35 = vrot.slane %v11156_v52, %v17464_v43  ;;  %v17544_v18 = vpack.i.bf16 %v15034_v51, %v15030_v1  ;;  %v17548_v52 = vld [vmem:[#allocation68_spill] sm:$0xff]  ;;  %v9836_v1 = vrot.slane %v11159_v57, %v17463_v11 }
 0x70a   : > { %v15496_v30 = vpop.permute.xlu1 %12048  ;;  %v15498_v10 = vpop.permute.xlu0 %12043 }
 0x70c   : > { %12303 = vrot.lane.b32.xlu0 %v17533_v24, %s12912_s20  ;;  %12313 = vrot.lane.b32.xlu1 %v17536_v60, %s12912_s20  ;;  %v17549_v24 = vpack.i.bf16 %v15059_v45, %v17548_v52  ;;  %v17552_v60 = vld [vmem:[#allocation46_spill] sm:$0xff]  ;;  %v9840_v45 = vrot.slane %v11159_v57, %v17462_v5 }
 0x70e   : > { %v15510_v9 = vpop.permute.xlu1 %12058  ;;  %v15512_v56 = vpop.permute.xlu0 %12053 }
 0x710   : > { %9608 = vrot.lane.b32.xlu0 %v9595_v54, %s17293_s0  ;;  %9610 = vrot.lane.b32.xlu1 %v9599_v31, %s17293_s0  ;;  %v15571_v54 = vsel %vm7061_vm5, %v17552_v60, %v17551_v39  ;;  %v17555_v31 = vpack.i.bf16 %v17553_v59, %v17554_v38  ;;  %v17561_v60 = vpack.i.bf16 %v15097_v33, %v15094_v32  ;;  %v11162_v59 = vld [vmem:[%s16985_s17 + $0x60] ss:$8 sm:$0xf] }
 0x711   : > { %v7940_v42 = vmul.f32 %v15571_v54, %v14659_v63  ;;  %v17568_v33 = vpack.i.bf16 %v15132_v15, %v15121_v8 }
 0x712   : > { %v15518_v49 = vpop.permute.xlu1 %12068  ;;  %v15520_v62 = vpop.permute.xlu0 %12063 }
 0x713   : > { %v12357_v52 = vpack.i.bf16 %v15580_v22, %v7940_v42 }
 0x714   : > { %12318 = vrot.lane.b32.xlu0 %v17539_v47, %s17293_s0  ;;  %12323 = vrot.lane.b32.xlu1 %v12322_v48, %s12912_s20  ;;  %v17556_v47 = vld [vmem:[#allocation52_spill] sm:$0xff] }
 0x716   : > { %v15529_v40 = vpop.permute.xlu1 %12078  ;;  %v15531_v46 = vpop.permute.xlu0 %12073 }
 0x717   : > { %17540 = vst [vmem:[#allocation41_spill] sm:$0xff] %v15529_v40 }
 0x718   : > { %9612 = vrot.lane.b32.xlu0 %v9603_v37, %s17293_s0  ;;  %12328 = vrot.lane.b32.xlu1 %v17541_v26, %s17294_s30  ;;  %v17557_v37 = vld [vmem:[#allocation60_spill] sm:$0xff] }
 0x719   : > { %v17558_v26 = vpack.i.bf16 %v17556_v47, %v17557_v37  ;;  %v17566_v47 = vld [vmem:[#allocation57_spill] sm:$0xff]  ;;  %v10081_v37 = vrot.slane %v11162_v59, %v17462_v5 }
 0x71a   : > { %v15539_v16 = vpop.permute.xlu1 %12088  ;;  %v15541_v55 = vpop.permute.xlu0 %12083  ;;  %v17567_v32 = vpack.i.bf16 %v15107_v25, %v17566_v47  ;;  %v17571_v25 = vpack.i.bf16 %v15138_v29, %v15135_v6 }
 0x71b   : > { %17542 = vst [vmem:[#allocation23_spill] sm:$0xff] %v15539_v16  ;;  %17543 = vst [vmem:[#allocation37_spill] sm:$0xff] %v15541_v55 }
 0x71c   : > { %9614 = vrot.lane.b32.xlu1 %v9607_v35, %s17293_s0  ;;  %12333 = vrot.lane.b32.xlu0 %v17544_v18, %s12911_s2  ;;  %v9844_v35 = vrot.slane %v11159_v57, %v17465_v50 }
 0x71e   : > { %v15551_v17 = vpop.permute.xlu1 %12098  ;;  %v15553_v58 = vpop.permute.xlu0 %12093 }
 0x71f   : > { %17545 = vst [vmem:[#allocation22_spill] sm:$0xff] %v15551_v17  ;;  %17546 = vst [vmem:[#allocation43_spill] sm:$0xff] %v15553_v58 }
 0x720   : > { %12338 = vrot.lane.b32.xlu1 %v17547_v12, %s12911_s2  ;;  %12343 = vrot.lane.b32.xlu0 %v17549_v24, %s12911_s2  ;;  %v9848_v24 = vrot.slane %v11159_v57, %v17464_v43  ;;  %v17564_v57 = vld [vmem:[#allocation63_spill] sm:$0xff] }
 0x722   : > { %v15564_v51 = vpop.permute.xlu1 %12108  ;;  %v15566_v21 = vpop.permute.xlu0 %12103 }
 0x723   : > { %17550 = vst [vmem:[#allocation24_spill] sm:$0xff] %v15566_v21  ;;  %v17178_v47 = vunpack.i.h.bf16 %v15564_v51  ;;  %v12110_v6 = vunpack.i.l.bf16 %v15564_v51 }
 0x724   : > { %9849 = vrot.lane.b32.xlu1 %v9836_v1, %s12905_s26  ;;  %12348 = vrot.lane.b32.xlu0 %v17555_v31, %s12902_s29 }
 0x725   : > { %v4459_v41 = vsel %vm4453_vm12, %v12110_v6, %v17178_v47  ;;  %v17581_v47 = vld [vmem:[#allocation73_spill] sm:$0xff] }
 0x726   : > { %v15582_v48 = vpop.permute.xlu1 %12118  ;;  %v15584_v53 = vpop.permute.xlu0 %12113 }
 0x727   : > { %v12120_v27 = vunpack.i.l.bf16 %v15582_v48 }
 0x728   : > { %12353 = vrot.lane.b32.xlu1 %v17558_v26, %s17173_s21  ;;  %9851 = vrot.lane.b32.xlu0 %v9840_v45, %s12905_s26  ;;  %v17565_v45 = vld [vmem:[#allocation61_spill] sm:$0xff]  ;;  %v15633_v26 = vmul.f32 0.0, %v17564_v57 }
 0x729   : > { %v15621_v42 = vsel %vm6818_vm14, %v17565_v45, %v17564_v57  ;;  %v17574_v57 = vpack.i.bf16 %v15146_v0, %v15142_v19  ;;  %v10077_v45 = vrot.slane %v11162_v59, %v17463_v11  ;;  %v10089_v19 = vrot.slane %v11162_v59, %v17464_v43 }
 0x72a   : > { %v15594_v18 = vpop.permute.xlu1 %12128  ;;  %v15596_v12 = vpop.permute.xlu0 %12123  ;;  %v10085_v0 = vrot.slane %v11162_v59, %v17465_v50  ;;  %v11165_v59 = vld [vmem:[%s16985_s17 + $0x61] ss:$8 sm:$0xf] }
 0x72c   : > { %9853 = vrot.lane.b32.xlu1 %v9844_v35, %s12905_s26  ;;  %12358 = vrot.lane.b32.xlu0 %v12357_v52, %s12911_s2 }
 0x72e   : > { %v15602_v1 = vpop.permute.xlu1 %12138  ;;  %v15604_v39 = vpop.permute.xlu0 %12133 }
 0x72f   : > { %17559 = vst [vmem:[#allocation36_spill] sm:$0xff] %v15604_v39 }
 0x730   : > { %12363 = vrot.lane.b32.xlu1 %v17561_v60, %s17560_s25  ;;  %9855 = vrot.lane.b32.xlu0 %v9848_v24, %s12905_s26  ;;  %v8181_v24 = vmul.f32 %v15621_v42, %v14659_v63 }
 0x732   : > { %v15614_v38 = vpop.permute.xlu1 %12148  ;;  %v15616_v31 = vpop.permute.xlu0 %12143  ;;  %v12387_v60 = vpack.i.bf16 %v15633_v26, %v8181_v24  ;;  %v17575_v24 = vld [vmem:[#allocation74_spill] sm:$0xff] }
 0x733   : > { %17562 = vst [vmem:[#allocation27_spill] sm:$0xff] %v15614_v38  ;;  %17563 = vst [vmem:[#allocation47_spill] sm:$0xff] %v15616_v31 }
 0x734   : > { %12378 = vrot.lane.b32.xlu1 %v17567_v32, %s17560_s25  ;;  %12368 = vrot.lane.b32.xlu0 %v17568_v33, %s12900_s15  ;;  %v12046_v33 = vunpack.i.h.bf16 %v15498_v10 }
 0x736   : > { %v15635_v35 = vpop.permute.xlu1 %12158  ;;  %v15637_v52 = vpop.permute.xlu0 %12153 }
 0x737   : > { %17569 = vst [vmem:[#allocation95_spill] sm:$0xff] %v15635_v35  ;;  %17570 = vst [vmem:[#allocation40_spill] sm:$0xff] %v15637_v52  ;;  %v17594_v35 = vld [vmem:[#allocation99_spill] sm:$0xff]  ;;  %v10322_v52 = vrot.slane %v11165_v59, %v17462_v5 }
 0x738   : > { %10092 = vrot.lane.b32.xlu1 %v10081_v37, %s12906_s1  ;;  %12373 = vrot.lane.b32.xlu0 %v17571_v25, %s17560_s25  ;;  %v17576_v25 = vld [vmem:[#allocation71_spill] sm:$0xff] }
 0x73a   : > { %v15646_v8 = vpop.permute.xlu1 %12168  ;;  %v15648_v15 = vpop.permute.xlu0 %12163 }
 0x73b   : > { %17572 = vst [vmem:[#allocation96_spill] sm:$0xff] %v15646_v8  ;;  %17573 = vst [vmem:[#allocation48_spill] sm:$0xff] %v15648_v15  ;;  %v17588_v8 = vld [vmem:[#allocation77_spill] sm:$0xff]  ;;  %v17589_v15 = vld [vmem:[#allocation75_spill] sm:$0xff] }
 0x73c   : > { %12388 = vrot.lane.b32.xlu1 %v12387_v60, %s17560_s25  ;;  %12383 = vrot.lane.b32.xlu0 %v17574_v57, %s12916_s28  ;;  %v17577_v60 = vpack.i.bf16 %v17575_v24, %v17576_v25  ;;  %s17579_s28 = smov 119   ;;  %v17590_v17 = vpack.i.bf16 %v17588_v8, %v17589_v15  ;;  %v17597_v8 = vld [vmem:[#allocation42_spill] sm:$0xff] }
 0x73e   : > { %v15659_v29 = vpop.permute.xlu1 %12173  ;;  %v15661_v32 = vpop.permute.xlu0 %12178 }
 0x73f   : > { %v17179_v37 = vunpack.i.l.bf16 %v15659_v29 }
 0x740   : > { %12393 = vrot.lane.b32.xlu1 %v17577_v60, %s12915_s23  ;;  %10090 = vrot.lane.b32.xlu0 %v10077_v45, %s12906_s1  ;;  %v17580_v60 = vld [vmem:[#allocation72_spill] sm:$0xff] }
 0x741   : > { %v4455_v57 = vsel %vm4453_vm12, %v12046_v33, %v17179_v37  ;;  %v17582_v37 = vpack.i.bf16 %v17580_v60, %v17581_v47  ;;  %v12045_v47 = vunpack.i.l.bf16 %v15498_v10  ;;  %v10326_v10 = vrot.slane %v11165_v59, %v17465_v50 }
 0x742   : > { %v15678_v28 = vpop.permute.xlu1 %12183  ;;  %v15680_v36 = vpop.permute.xlu0 %12188  ;;  %v11509_v24 = vpack.c.bf16 %v4459_v41, %v4455_v57  ;;  %v17583_v41 = vld [vmem:[#allocation76_spill] sm:$0xff]  ;;  %v17584_v57 = vld [vmem:[#allocation70_spill] sm:$0xff] }
 0x744   : > { %10096 = vrot.lane.b32.xlu1 %v10089_v19, %s12906_s1  ;;  %10094 = vrot.lane.b32.xlu0 %v10085_v0, %s12906_s1  ;;  %v17585_v19 = vpack.i.bf16 %v17583_v41, %v17584_v57  ;;  %v10318_v0 = vrot.slane %v11165_v59, %v17463_v11  ;;  %v17592_v41 = vld [vmem:[#allocation83_spill] sm:$0xff]  ;;  %v17593_v57 = vld [vmem:[#allocation38_spill] sm:$0xff] }
 0x745   : > { %11510 = vmatprep.subr.bf16.mxu0 %v11509_v24  ;;  %v15731_v38 = vmul.f32 0.0, %v17592_v41 }
 0x746   : > { %v15687_v45 = vpop.permute.xlu1 %12193  ;;  %v15689_v25 = vpop.permute.xlu0 %12198 }
 0x747   : > { %17578 = vst [vmem:[#allocation97_spill] sm:$0xff] %v15689_v25 }
 0x748   : > { %12403 = vrot.lane.b32.xlu1 %v17582_v37, %s17579_s28  ;;  %12398 = vrot.lane.b32.xlu0 %v17585_v19, %s17579_s28  ;;  %v8413_v19 = vsel %vm6575_vm15, %v17593_v57, %v17592_v41 }
 0x74a   : > { %v15700_v24 = vpop.permute.xlu1 %12203  ;;  %v15702_v21 = vpop.permute.xlu0 %12208 }
 0x74b   : > { %17586 = vst [vmem:[#allocation62_spill] sm:$0xff] %v15700_v24  ;;  %17587 = vst [vmem:[#allocation28_spill] sm:$0xff] %v15702_v21  ;;  %v17612_v21 = vld [vmem:[#allocation35_spill] sm:$0xff] }
 0x74c   : > { %10331 = vrot.lane.b32.xlu1 %v10318_v0, %s12907_s18  ;;  %12408 = vrot.lane.b32.xlu0 %v17590_v17, %s12914_s22  ;;  %v17595_v0 = vld [vmem:[#allocation98_spill] sm:$0xff]  ;;  %v17598_v17 = vld [vmem:[#allocation100_spill] sm:$0xff]  ;;  %s17748_s22 = sld [smem:[#allocation112_spill]] }
 0x74d   : > { %v17596_v16 = vpack.i.bf16 %v17594_v35, %v17595_v0  ;;  %v17599_v15 = vpack.i.bf16 %v17597_v8, %v17598_v17  ;;  %v8422_v0 = vmul.f32 %v8413_v19, %v14659_v63  ;;  %v15759_v17 = vld [vmem:[%s16985_s17 + $0x62] ss:$8 sm:$0xf] }
 0x74e   : > { %v15710_v37 = vpop.permute.xlu1 %12213  ;;  %v15712_v60 = vpop.permute.xlu0 %12218 }
 0x74f   : > { %17591 = vst [vmem:[#allocation25_spill] sm:$0xff] %v15710_v37  ;;  %v12221_v58 = vunpack.i.h.bf16 %v15712_v60  ;;  %v4454_v37 = vsel %vm4453_vm12, %v12045_v47, %v12046_v33  ;;  %v17601_v47 = vld [vmem:[#allocation102_spill] sm:$0xff] }
 0x750   : > { %12418 = vrot.lane.b32.xlu1 %v17596_v16, %s12913_s4  ;;  %12413 = vrot.lane.b32.xlu0 %v17599_v15, %s17579_s28  ;;  %v17604_v15 = vld [vmem:[#allocation64_spill] sm:$0xff]  ;;  %s17747_s4 = sshll.u32 %s17752_s19, 2 }
 0x751   : > { %v4458_v57 = vsel %vm4453_vm12, %v12221_v58, %v12110_v6  ;;  %v12422_v58 = vpack.i.bf16 %v15731_v38, %v8422_v0  ;;  %v15748_v6 = vld [vmem:[%s16982_s14 + $0x1] sm:$0x1]  ;;  %v15782_v40 = vmul.f32 0.0, %v17604_v15 }
 0x752   : > { %v15733_v55 = vpop.permute.xlu1 %12223  ;;  %v15735_v35 = vpop.permute.xlu0 %12228  ;;  %v11511_v16 = vpack.c.bf16 %v4458_v57, %v4454_v37  ;;  %v17602_v37 = vld [vmem:[#allocation101_spill] sm:$0xff] }
 0x753   : > { %v17603_v41 = vpack.i.bf16 %v17601_v47, %v17602_v37  ;;  %v17608_v47 = vmov 0.0   ;;  %17614 = vst [vmem:[#allocation30_spill] sm:$0xff] %v15782_v40 }
 0x754   : > { %10335 = vrot.lane.b32.xlu1 %v10326_v10, %s12907_s18  ;;  %10333 = vrot.lane.b32.xlu0 %v10322_v52, %s12907_s18  ;;  %v10330_v52 = vrot.slane %v11165_v59, %v17464_v43  ;;  %v17605_v10 = vld [vmem:[#allocation51_spill] sm:$0xff]  ;;  %v17610_v59 = vld [vmem:[#allocation58_spill] sm:$0xff] }
 0x755   : > { %11512 = vmatpush1.bf16.msra.mxu0 %v11511_v16  ;;  %v8654_v57 = vsel %vm4356_vm6, %v17605_v10, %v17604_v15  ;;  %v10563_v10 = vrot.slane %v15759_v17, %v17462_v5  ;;  %v15799_v5 = vmul.f32 %v15621_v42, %v14717_v23 }
 0x756   : > { %v15740_v8 = vpop.permute.xlu1 %12233  ;;  %v15742_v33 = vpop.permute.xlu0 %12238  ;;  %v15805_v15 = vmul.f32 %v8654_v57, %v14717_v23 }
 0x757   : > { %17600 = vst [vmem:[#allocation29_spill] sm:$0xff] %v15742_v33 }
 0x758   : > { %12428 = vrot.lane.b32.xlu1 %v17603_v41, %s12908_s27  ;;  %12423 = vrot.lane.b32.xlu0 %v12422_v58, %s17579_s28  ;;  %v17609_v58 = vld [vmem:[#allocation39_spill] sm:$0xff]  ;;  %v17611_v41 = vld [vmem:[#allocation34_spill] sm:$0xff]  ;;  %17617 = vst [vmem:[#allocation44_spill] sm:$0xff] %v15805_v15 }
 0x759   : > { %11092 = vmatmul.mubr.msk.f32.vlgmr.msra.gmra.mrb[2].mxu0 %vm771_vm3, %v15748_v6  ;;  %v8895_v37 = vsel %vm4403_vm7, %v17610_v59, %v17609_v58  ;;  %v17613_v31 = vpack.i.bf16 %v17611_v41, %v17612_v21  ;;  %v7945_v21 = vmul.f32 %v15571_v54, %v14717_v23  ;;  %v17619_v54 = vld [vmem:[#allocation104_spill] sm:$0xff]  ;;  %v17620_v41 = vld [vmem:[#allocation103_spill] sm:$0xff] }
 0x75a   : > { %v15766_v16 = vpop.permute.xlu1 %12243  ;;  %v15768_v0 = vpop.permute.xlu0 %12248  ;;  %4608 = vmatprep.mubr.f32.mxu0 %v17608_v47 }
 0x75b   : > { %17606 = vst [vmem:[#allocation50_spill] sm:$0xff] %v15766_v16  ;;  %17607 = vst [vmem:[#allocation53_spill] sm:$0xff] %v15768_v0  ;;  %v15785_v0 = vmul.f32 0.0, %v17609_v58  ;;  %v8663_v16 = vmul.f32 %v8654_v57, %v14659_v63  ;;  %v15808_v58 = vmul.f32 %v8895_v37, %v14717_v23 }
 0x75c   : > { %12438 = vrot.lane.b32.xlu1 %v17613_v31, %s12908_s27  ;;  %10337 = vrot.lane.b32.xlu0 %v10330_v52, %s12907_s18  ;;  %v15795_v31 = vmul.f32 %v8895_v37, %v14659_v63  ;;  %v15802_v52 = vmul.f32 %v8413_v19, %v14717_v23  ;;  %v12452_v19 = vpack.i.bf16 %v15580_v22, %v7945_v21  ;;  %v12051_v21 = vunpack.i.h.bf16 %v15496_v30 }
 0x75d   : > { %17618 = vst [vmem:[#allocation54_spill] sm:$0xff] %v15808_v58  ;;  %v12176_v37 = vunpack.i.h.bf16 %v15659_v29  ;;  %v12060_v22 = vunpack.i.l.bf16 %v15510_v9  ;;  %v12115_v23 = vunpack.i.l.bf16 %v15584_v53 }
 0x75e   : > { %v15788_v24 = vpop.permute.xlu1 %12253  ;;  %v15790_v59 = vpop.permute.xlu0 %12258 }
 0x75f   : > { %17615 = vst [vmem:[#allocation26_spill] sm:$0xff] %v15788_v24  ;;  %17616 = vst [vmem:[#allocation31_spill] sm:$0xff] %v15790_v59  ;;  %v17621_v59 = vpack.i.bf16 %v17619_v54, %v17620_v41  ;;  %v12447_v24 = vpack.i.bf16 %v15782_v40, %v8663_v16  ;;  %v10571_v16 = vrot.slane %v15759_v17, %v17464_v43  ;;  %v12050_v41 = vunpack.i.l.bf16 %v15496_v30 }
 0x760   : > { %10574 = vrot.lane.b32.xlu1 %v10563_v10, %s12908_s27  ;;  %v17624_v10 = vld [vmem:[#allocation80_spill] sm:$0xff]  ;;  %v10567_v43 = vrot.slane %v15759_v17, %v17465_v50  ;;  %v12220_v30 = vunpack.i.l.bf16 %v15712_v60  ;;  %v12116_v60 = vunpack.i.h.bf16 %v15584_v53  ;;  %v12226_v50 = vunpack.i.h.bf16 %v15733_v55 }
 0x761   : > { %12433 = vrot.lane.b32.xlu0 %v17621_v59, %s12908_s27  ;;  %v10559_v59 = vrot.slane %v15759_v17, %v17463_v11  ;;  %v17625_v57 = vpack.i.bf16 %v15267_v4, %v17624_v10  ;;  %v12180_v4 = vunpack.i.l.bf16 %v15661_v32  ;;  %v12065_v17 = vunpack.i.l.bf16 %v15520_v62 }
 0x762   : > { %v15816_v42 = vpop.permute.xlu1 %12263  ;;  %v15818_v25 = vpop.permute.xlu0 %12268  ;;  %v4457_v11 = vsel %vm4453_vm12, %v12176_v37, %v12220_v30  ;;  %v12075_v53 = vunpack.i.l.bf16 %v15531_v46  ;;  %v12185_v30 = vunpack.i.l.bf16 %v15678_v28 }
 0x763   : > { %17622 = vst [vmem:[#allocation66_spill] sm:$0xff] %v15816_v42  ;;  %17623 = vst [vmem:[#allocation55_spill] sm:$0xff] %v15818_v25  ;;  %v12055_v25 = vunpack.i.l.bf16 %v15512_v56  ;;  %v12070_v42 = vunpack.i.l.bf16 %v15518_v49 }
 0x764   : > { %12448 = vrot.lane.b32.xlu1 %v12447_v24, %s12908_s27  ;;  %v17627_v24 = vunpack.i.l.bf16 %v15659_v29 }
 0x765   : > { %12443 = vrot.lane.b32.xlu0 %v17625_v57, %s12912_s20 }
 0x766   : > { %v15853_v57 = vpop.permute.xlu1 %12273  ;;  %v12279_v10 = vpop.permute.xlu0 %12278  ;;  %v4456_v15 = vsel %vm4453_vm12, %v17627_v24, %v12176_v37  ;;  %v17629_v37 = vunpack.i.h.bf16 %v15510_v9 }
 0x767   : > { %17626 = vst [vmem:[#allocation32_spill] sm:$0xff] %v15853_v57  ;;  %v12281_v54 = vunpack.i.h.bf16 %v12279_v10  ;;  %v12280_v58 = vunpack.i.l.bf16 %v12279_v10  ;;  %v17628_v57 = vunpack.i.h.bf16 %v15564_v51 }
 0x768   : > { %12453 = vrot.lane.b32.xlu1 %v12452_v19, %s12911_s2  ;;  %v4647_v19 = vsel %vm4645_vm13, %v12051_v21, %v12180_v4 }
 0x769   : > { %10572 = vrot.lane.b32.xlu0 %v10559_v59, %s12908_s27  ;;  %v4460_v10 = vsel %vm4453_vm12, %v17628_v57, %v12280_v58  ;;  %v4461_v40 = vsel %vm4453_vm12, %v12280_v58, %v12281_v54  ;;  %v17213_v59 = vunpack.i.h.bf16 %v15582_v48  ;;  %v4646_v57 = vsel %vm4645_vm13, %v12050_v41, %v12051_v21 }
 0x76a   : > { %v12289_v33 = vpop.permute.xlu1 %12288  ;;  %v15872_v29 = vpop.permute.xlu0 %12283  ;;  %v11513_v24 = vpack.c.bf16 %v4461_v40, %v4457_v11  ;;  %v11515_v61 = vpack.c.bf16 %v4460_v10, %v4456_v15  ;;  %v15881_v58 = vsel %vm5127_vm10, %v12060_v22, %v17629_v37  ;;  %v12225_v54 = vunpack.i.l.bf16 %v15733_v55 }
 0x76b   : > { %v12291_v51 = vunpack.i.h.bf16 %v12289_v33  ;;  %v12290_v39 = vunpack.i.l.bf16 %v12289_v33  ;;  %v4651_v11 = vsel %vm4645_vm13, %v12115_v23, %v12116_v60  ;;  %v17630_v40 = vunpack.i.h.bf16 %v15512_v56 }
 0x76c   : > { %10578 = vrot.lane.b32.xlu1 %v10571_v16, %s12908_s27  ;;  %v17631_v33 = vunpack.i.h.bf16 %v15518_v49  ;;  %v4650_v22 = vsel %vm4645_vm13, %v12226_v50, %v12115_v23  ;;  %11514 = vmatprep.subr.bf16.mxu0 %v11513_v24  ;;  %v11517_v55 = vpack.c.bf16 %v4651_v11, %v4647_v19  ;;  %v17632_v16 = vunpack.i.h.bf16 %v15520_v62  ;;  %v17634_v19 = vld [vmem:[#allocation81_spill] sm:$0xff]  ;;  %v17637_v11 = vld [vmem:[#allocation106_spill] sm:$0xff] }
 0x76d   : > { %10576 = vrot.lane.b32.xlu0 %v10567_v43, %s12908_s27  ;;  %v15890_v15 = vsel %vm4884_vm11, %v12055_v25, %v17630_v40  ;;  %v12181_v43 = vunpack.i.h.bf16 %v15661_v32  ;;  %11516 = vmatpush1.bf16.msra.mxu0 %v11515_v61  ;;  %v17633_v37 = vunpack.i.h.bf16 %v15531_v46  ;;  %v4890_v61 = vsel %vm4884_vm11, %v12120_v27, %v17213_v59  ;;  %v17638_v40 = vld [vmem:[#allocation105_spill] sm:$0xff] }
 0x76e   : > { %v15895_v21 = vsel %vm5077_vm9, %v12070_v42, %v17631_v33  ;;  %v15901_v41 = vsel %vm960_vm4, %v12065_v17, %v17632_v16  ;;  %v9368_v25 = vpop.permute.xlu1 %9367  ;;  %v15905_v10 = vpop.permute.xlu0 %9132  ;;  %v4653_v42 = vsel %vm4645_vm13, %v12290_v39, %v12291_v51  ;;  %11518 = vmatprep.subr.bf16.mxu0 %v11517_v55  ;;  %v12126_v32 = vunpack.i.h.bf16 %v15596_v12  ;;  %v17635_v51 = vld [vmem:[#allocation45_spill] sm:$0xff] }
 0x76f   : > { %v15911_v23 = vsel %vm4834_vm8, %v12075_v53, %v17633_v37  ;;  %v15914_v50 = vmul.f32 %v9368_v25, %v17378_v2  ;;  %v15917_v17 = vmul.f32 %v9368_v25, %v14476_v14  ;;  %v4652_v24 = vsel %vm4645_vm13, %v12116_v60, %v12290_v39 }
 0x770   : > { %v17636_v53 = vpack.i.bf16 %v17634_v19, %v17635_v51  ;;  %v17639_v33 = vpack.i.bf16 %v17637_v11, %v17638_v40  ;;  %v11519_v16 = vpack.c.bf16 %v4650_v22, %v4646_v57  ;;  %v4649_v55 = vsel %vm4645_vm13, %v12181_v43, %v12225_v54  ;;  %11093 = vmatmul.mubr.msk.f32.vlgmr.msra.gmra.mrb[4].mxu0 %vm771_vm3, %v15748_v6  ;;  %v4375_v6 = vld [vmem:[%s16982_s14] sm:$0x1] }
 0x771   : > { %v12125_v37 = vunpack.i.l.bf16 %v15596_v12  ;;  %v12231_v59 = vunpack.i.h.bf16 %v15735_v35  ;;  %v11521_v39 = vpack.c.bf16 %v4653_v42, %v4649_v55  ;;  %v4648_v19 = vsel %vm4645_vm13, %v12180_v4, %v12181_v43  ;;  %4729 = vmatprep.mubr.f32.mxu0 %v17608_v47 }
 0x772   : > { %12463 = vrot.lane.b32.xlu1 %v17636_v53, %s12907_s18  ;;  %12458 = vrot.lane.b32.xlu0 %v17639_v33, %s12907_s18  ;;  %v12186_v51 = vunpack.i.h.bf16 %v15678_v28  ;;  %v12190_v53 = vunpack.i.l.bf16 %v15680_v36  ;;  %v15942_v57 = vpop.permute.xlu1 %9371  ;;  %v9370_v54 = vpop.permute.xlu0 %9369  ;;  %v17640_v22 = vunpack.i.h.bf16 %v15512_v56  ;;  %v12230_v4 = vunpack.i.l.bf16 %v15735_v35 }
 0x773   : > { %11520 = vmatpush1.bf16.msra.mxu0 %v11519_v16  ;;  %v9375_v28 = vsel %vm5077_vm9, %v9368_v25, %v9370_v54  ;;  %v9376_v43 = vsel %vm5077_vm9, %v9370_v54, %v15942_v57  ;;  %v11523_v11 = vpack.c.bf16 %v4652_v24, %v4648_v19  ;;  %v17641_v35 = vpack.i.bf16 %v15785_v0, %v15795_v31 }
 0x774   : > { %v4886_v42 = vsel %vm4884_vm11, %v17640_v22, %v12185_v30  ;;  %11522 = vmatprep.subr.bf16.mxu0 %v11521_v39  ;;  %v15956_v40 = vmul.f32 %v9376_v43, %v14643_v34  ;;  %v15959_v33 = vmul.f32 %v9375_v28, %v14487_v44  ;;  %v15962_v16 = vmul.f32 %v9376_v43, %v14701_v13 }
 0x775   : > { %v15965_v56 = vmul.f32 %v9375_v28, %v14446_v3  ;;  %v12131_v25 = vunpack.i.h.bf16 %v15594_v18  ;;  %v12130_v24 = vunpack.i.l.bf16 %v15594_v18  ;;  %v4889_v55 = vsel %vm4884_vm11, %v12231_v59, %v12120_v27  ;;  %v17643_v59 = vld [vmem:[#allocation79_spill] sm:$0xff] }
 0x776   : > { %12478 = vrot.lane.b32.xlu1 %v17641_v35, %s12907_s18  ;;  %v17642_v39 = vpack.i.bf16 %v15633_v26, %v15799_v5  ;;  %11094 = vmatmul.mubr.msk.f32.vlgmr.msra.gmra.mrb[2].mxu0 %vm771_vm3, %v4375_v6  ;;  %v11525_v19 = vpack.c.bf16 %v4890_v61, %v4886_v42  ;;  %v12517_v31 = vpack.i.bf16 %v15962_v16, %v15959_v33  ;;  %v15984_v28 = vpop.permute.xlu1 %12298  ;;  %v12294_v27 = vpop.permute.xlu0 %12293  ;;  %v17646_v22 = vunpack.i.h.bf16 %v15582_v48  ;;  %v17662_v16 = vld [vmem:[#allocation30_spill] sm:$0xff] }
 0x777   : > { %11524 = vmatpush1.bf16.msra.mxu0 %v11523_v11  ;;  %4800 = vmatprep.mubr.f32.mxu0 %v17608_v47  ;;  %v5133_v26 = vsel %vm5127_vm10, %v12125_v37, %v12126_v32  ;;  %v4887_v5 = vsel %vm4884_vm11, %v12185_v30, %v12186_v51  ;;  %v15996_v61 = vsel %vm4834_vm8, %v17643_v59, %v15905_v10  ;;  %v12296_v42 = vunpack.i.h.bf16 %v12294_v27 }
 0x778   : > { %12468 = vrot.lane.b32.xlu0 %v17642_v39, %s17560_s25  ;;  %v12295_v43 = vunpack.i.l.bf16 %v12294_v27  ;;  %11526 = vmatprep.subr.bf16.mxu0 %v11525_v19  ;;  %v17214_v11 = vunpack.i.l.bf16 %v15687_v45  ;;  %v17644_v35 = vpack.i.bf16 %v15731_v38, %v15802_v52  ;;  %v11527_v39 = vpack.c.bf16 %v4889_v55, %v15890_v15 }
 0x779   : > { %v4888_v60 = vsel %vm4884_vm11, %v12186_v51, %v12230_v4  ;;  %v17645_v30 = vunpack.i.h.bf16 %v15510_v9  ;;  %v12236_v27 = vunpack.i.h.bf16 %v15740_v8  ;;  %v12235_v19 = vunpack.i.l.bf16 %v15740_v8  ;;  %v17648_v4 = vld [vmem:[#allocation36_spill] sm:$0xff] }
 0x77a   : > { %12483 = vrot.lane.b32.xlu1 %v17644_v35, %s17579_s28  ;;  %v4891_v54 = vsel %vm4884_vm11, %v17646_v22, %v12295_v43  ;;  %v17647_v38 = vpack.i.bf16 %v15333_v20, %v15329_v7  ;;  %11095 = vmatmul.mubr.msk.f32.vlgmr.msra.gmra.mrb[4].mxu0 %vm771_vm3, %v4375_v6  ;;  %v4892_v52 = vsel %vm4884_vm11, %v12295_v43, %v12296_v42  ;;  %v16022_v9 = vmul.f32 0.0, %v15905_v10  ;;  %v12309_v8 = vpop.permute.xlu1 %12308  ;;  %v9374_v48 = vpop.permute.xlu0 %9373  ;;  %v4853_v7 = vld [vmem:[%s16982_s14 + $0x2] sm:$0x1] }
 0x77b   : > { %v5129_v59 = vsel %vm5127_vm10, %v17645_v30, %v12190_v53  ;;  %v9145_v15 = vmul.f32 %v15996_v61, %v14659_v63  ;;  %11528 = vmatpush1.bf16.msra.mxu0 %v11527_v39  ;;  %4968 = vmatprep.mubr.f32.mxu0 %v17608_v47  ;;  %v11529_v51 = vpack.c.bf16 %v4892_v52, %v4888_v60  ;;  %v12311_v10 = vunpack.i.h.bf16 %v12309_v8  ;;  %v17649_v39 = vld [vmem:[#allocation84_spill] sm:$0xff]  ;;  %v17650_v60 = vld [vmem:[#allocation85_spill] sm:$0xff]  ;;  %v17652_v52 = vld [vmem:[#allocation86_spill] sm:$0xff] }
 0x77c   : > { %12473 = vrot.lane.b32.xlu0 %v17647_v38, %s12907_s18  ;;  %v11531_v20 = vpack.c.bf16 %v4891_v54, %v4887_v5  ;;  %v12310_v22 = vunpack.i.l.bf16 %v12309_v8  ;;  %v12191_v42 = vunpack.i.h.bf16 %v15680_v36  ;;  %v12301_v43 = vunpack.i.h.bf16 %v15984_v28  ;;  %v17653_v8 = vld [vmem:[#allocation87_spill] sm:$0xff] }
 0x77d   : > { %v12300_v35 = vunpack.i.l.bf16 %v15984_v28  ;;  %v17651_v30 = vpack.i.bf16 %v17649_v39, %v17650_v60  ;;  %11530 = vmatprep.subr.bf16.mxu0 %v11529_v51  ;;  %v11533_v38 = vpack.c.bf16 %v5133_v26, %v5129_v59  ;;  %v12135_v54 = vunpack.i.l.bf16 %v17648_v4 }
 0x77e   : > { %v5132_v5 = vsel %vm5127_vm10, %v12236_v27, %v12125_v37  ;;  %v17654_v6 = vpack.i.bf16 %v17652_v52, %v17653_v8  ;;  %11097 = vmatmul.mubr.msk.f32.vlgmr.msra.gmra.mrb[2].mxu0 %vm771_vm3, %v4853_v7  ;;  %v5135_v55 = vsel %vm5127_vm10, %v12310_v22, %v12311_v10  ;;  %v17655_v51 = vunpack.i.h.bf16 %v15520_v62  ;;  %v12314_v27 = vpop.permute.xlu1 %12313 }
 0x77f   : > { %12488 = vrot.lane.b32.xlu1 %v17651_v30, %s12906_s1  ;;  %v12502_v39 = vpack.i.bf16 %v16022_v9, %v9145_v15  ;;  %v16058_v37 = vsel %vm5077_vm9, %v15942_v57, %v9374_v48  ;;  %11532 = vmatpush1.bf16.msra.mxu0 %v11531_v20  ;;  %v5131_v10 = vsel %vm5127_vm10, %v12191_v42, %v12235_v19  ;;  %v12316_v60 = vunpack.i.h.bf16 %v12314_v27  ;;  %v17656_v15 = vld [vmem:[#allocation20_spill] sm:$0xff]  ;;  %v17657_v20 = vld [vmem:[#allocation19_spill] sm:$0xff] }
 0x780   : > { %12493 = vrot.lane.b32.xlu0 %v17654_v6, %s12906_s1  ;;  %v5370_v26 = vsel %vm960_vm4, %v17655_v51, %v17214_v11  ;;  %v16060_v6 = vpop.permute.xlu0 %12303  ;;  %5039 = vmatprep.mubr.f32.mxu0 %v17608_v47  ;;  %v12315_v62 = vunpack.i.l.bf16 %v12314_v27  ;;  %v5134_v57 = vsel %vm5127_vm10, %v12126_v32, %v12310_v22  ;;  %v17658_v8 = vpack.i.bf16 %v17656_v15, %v17657_v20  ;;  %v17659_v27 = vld [vmem:[#allocation29_spill] sm:$0xff] }
 0x781   : > { %v17215_v30 = vunpack.i.h.bf16 %v16060_v6  ;;  %v12305_v52 = vunpack.i.l.bf16 %v16060_v6  ;;  %11534 = vmatprep.subr.bf16.mxu0 %v11533_v38  ;;  %v11535_v51 = vpack.c.bf16 %v5132_v5, %v15881_v58  ;;  %v11537_v11 = vpack.c.bf16 %v5135_v55, %v5131_v10  ;;  %v17660_v10 = vld [vmem:[#allocation97_spill] sm:$0xff] }
 0x782   : > { %v16077_v19 = vsel %vm7254_vm1, %v12300_v35, %v12301_v43  ;;  %v12241_v59 = vunpack.i.h.bf16 %v17659_v27  ;;  %v16081_v38 = vsel %vm7254_vm1, %v12315_v62, %v12300_v35  ;;  %11098 = vmatmul.mubr.msk.f32.vlgmr.msra.gmra.mrb[4].mxu0 %vm771_vm3, %v4853_v7  ;;  %v16093_v32 = vmul.f32 0.0, %v9374_v48  ;;  %v9611_v35 = vpop.permute.xlu1 %9610  ;;  %v5096_v7 = vld [vmem:[%s16982_s14 + $0x3] sm:$0x1] }
 0x783   : > { %12498 = vrot.lane.b32.xlu1 %v17658_v8, %s12906_s1  ;;  %v16084_v12 = vsel %vm7254_vm1, %v12316_v60, %v12305_v52  ;;  %v16091_v58 = vsel %vm7254_vm1, %v12305_v52, %v17215_v30  ;;  %v9386_v55 = vmul.f32 %v16058_v37, %v14659_v63  ;;  %11536 = vmatpush1.bf16.msra.mxu0 %v11535_v51  ;;  %v12200_v60 = vunpack.i.l.bf16 %v17660_v10 }
 0x784   : > { %12503 = vrot.lane.b32.xlu0 %v12502_v39, %s12906_s1  ;;  %v9609_v5 = vpop.permute.xlu0 %9608  ;;  %5211 = vmatprep.mubr.f32.mxu0 %v17608_v47  ;;  %v5130_v48 = vsel %vm5127_vm10, %v12190_v53, %v12191_v42  ;;  %v12240_v15 = vunpack.i.l.bf16 %v17659_v27  ;;  %v5374_v36 = vsel %vm960_vm4, %v12130_v24, %v12131_v25  ;;  %v17661_v53 = vunpack.i.h.bf16 %v17648_v4 }
 0x785   : > { %v16110_v62 = vmul.f32 %v9609_v5, %v17378_v2  ;;  %v16113_v52 = vmul.f32 %v9609_v5, %v14476_v14  ;;  %11538 = vmatprep.subr.bf16.mxu0 %v11537_v11  ;;  %v11539_v20 = vpack.c.bf16 %v5134_v57, %v5130_v48  ;;  %v5373_v42 = vsel %vm960_vm4, %v12241_v59, %v12130_v24 }
 0x786   : > { %v16130_v11 = vsel %vm5077_vm9, %v12135_v54, %v17661_v53  ;;  %11100 = vmatmul.mubr.msk.f32.vlgmr.msra.gmra.mrb[2].mxu0 %vm771_vm3, %v5096_v7  ;;  %v11541_v8 = vpack.c.bf16 %v5374_v36, %v5370_v26  ;;  %v17665_v51 = vunpack.i.h.bf16 %v15687_v45  ;;  %v17666_v27 = vunpack.i.l.bf16 %v15687_v45  ;;  %v16148_v24 = vpop.permute.xlu1 %12323 }
 0x787   : > { %12518 = vrot.lane.b32.xlu1 %v12517_v31, %s12905_s26  ;;  %v12552_v33 = vpack.i.bf16 %v16113_v52, %v16110_v62  ;;  %v17663_v31 = vld [vmem:[#allocation44_spill] sm:$0xff]  ;;  %v12532_v53 = vpack.i.bf16 %v16093_v32, %v9386_v55  ;;  %11540 = vmatpush1.bf16.msra.mxu0 %v11539_v20  ;;  %v17218_v36 = vunpack.i.l.bf16 %v16148_v24  ;;  %v17669_v55 = vunpack.i.h.bf16 %v15518_v49 }
 0x788   : > { %v17664_v57 = vpack.i.bf16 %v17662_v16, %v17663_v31  ;;  %v5371_v48 = vsel %vm960_vm4, %v17666_v27, %v17665_v51  ;;  %v12319_v59 = vpop.permute.xlu0 %12318  ;;  %5282 = vmatprep.mubr.f32.mxu0 %v17608_v47  ;;  %v17667_v16 = vunpack.i.h.bf16 %v15602_v1  ;;  %v17668_v31 = vunpack.i.l.bf16 %v15602_v1  ;;  %11542 = vmatprep.subr.bf16.mxu0 %v11541_v8  ;;  %v17670_v51 = vld [vmem:[#allocation62_spill] sm:$0xff] }
 0x789   : > { %v12320_v22 = vunpack.i.l.bf16 %v12319_v59  ;;  %v5611_v20 = vsel %vm5077_vm9, %v17669_v55, %v12200_v60  ;;  %v12205_v27 = vunpack.i.l.bf16 %v17670_v51  ;;  %v9616_v30 = vsel %vm960_vm4, %v9609_v5, %v9611_v35 }
 0x78a   : > { %12508 = vrot.lane.b32.xlu0 %v17664_v57, %s12908_s27  ;;  %v16156_v26 = vsel %vm4834_vm8, %v17668_v31, %v17667_v16  ;;  %v12321_v57 = vunpack.i.h.bf16 %v12319_v59  ;;  %v11543_v16 = vpack.c.bf16 %v5373_v42, %v15901_v41  ;;  %v17671_v31 = vunpack.i.h.bf16 %v15687_v45  ;;  %v17672_v59 = vld [vmem:[#allocation50_spill] sm:$0xff]  ;;  %11101 = vmatmul.mubr.msk.f32.vlgmr.msra.gmra.mrb[4].mxu0 %vm771_vm3, %v5096_v7  ;;  %v12329_v28 = vpop.permute.xlu1 %12328 }
 0x78b   : > { %12533 = vrot.lane.b32.xlu1 %v12532_v53, %s12905_s26  ;;  %v12246_v8 = vunpack.i.h.bf16 %v17672_v59  ;;  %v16177_v49 = vsel %vm7254_vm1, %v12301_v43, %v17218_v36  ;;  %v5375_v5 = vsel %vm960_vm4, %v12131_v25, %v12320_v22  ;;  %v17673_v41 = vpack.i.bf16 %v15956_v40, %v15965_v56  ;;  %5452 = vmatprep.mubr.f32.mxu0 %v17608_v47  ;;  %v5338_v25 = vld [vmem:[%s16982_s14 + $0x4] sm:$0x1] }
 0x78c   : > { %v5372_v39 = vsel %vm960_vm4, %v17671_v31, %v12240_v15  ;;  %v5376_v45 = vsel %vm960_vm4, %v12320_v22, %v12321_v57  ;;  %v12201_v15 = vunpack.i.h.bf16 %v17660_v10  ;;  %v11547_v42 = vpack.c.bf16 %v5375_v5, %v5371_v48  ;;  %11544 = vmatpush1.bf16.msra.mxu0 %v11543_v16  ;;  %v9613_v43 = vpop.permute.xlu0 %9612  ;;  %v17675_v31 = vld [vmem:[#allocation54_spill] sm:$0xff]  ;;  %v17678_v5 = vld [vmem:[#allocation41_spill] sm:$0xff] }
 0x78d   : > { %v11545_v18 = vpack.c.bf16 %v5376_v45, %v5372_v39  ;;  %v11549_v40 = vpack.c.bf16 %v16130_v11, %v5611_v20  ;;  %v12245_v56 = vunpack.i.l.bf16 %v17672_v59  ;;  %v12331_v7 = vunpack.i.h.bf16 %v12329_v28  ;;  %v17674_v11 = vld [vmem:[#allocation82_spill] sm:$0xff] }
 0x78e   : > { %12513 = vrot.lane.b32.xlu0 %v17673_v41, %s12905_s26  ;;  %v12330_v53 = vunpack.i.l.bf16 %v12329_v28  ;;  %v9617_v22 = vsel %vm960_vm4, %v9611_v35, %v9613_v43  ;;  %v9625_v48 = vmul.f32 %v9616_v30, %v14446_v3  ;;  %v9630_v57 = vmul.f32 %v9616_v30, %v14487_v44  ;;  %v17679_v28 = vld [vmem:[#allocation47_spill] sm:$0xff] }
 0x78f   : > { %v9631_v55 = vmul.f32 %v9617_v22, %v14701_v13  ;;  %v9626_v39 = vmul.f32 %v9617_v22, %v14643_v34  ;;  %11546 = vmatprep.subr.bf16.mxu0 %v11545_v18  ;;  %v5614_v16 = vsel %vm5077_vm9, %v12246_v8, %v12135_v54  ;;  %v9150_v20 = vmul.f32 %v15996_v61, %v17674_v11  ;;  %v9615_v8 = vpop.permute.xlu1 %9614  ;;  %v17680_v22 = vld [vmem:[#allocation53_spill] sm:$0xff] }
 0x790   : > { %v17676_v35 = vpack.i.bf16 %v15785_v0, %v17675_v31  ;;  %11103 = vmatmul.mubr.msk.f32.vlgmr.msra.gmra.mrb[2].mxu0 %vm771_vm3, %v5338_v25  ;;  %v17677_v30 = vunpack.i.h.bf16 %v15531_v46  ;;  %v12081_v41 = vunpack.i.h.bf16 %v17678_v5  ;;  %v16216_v61 = vpop.permute.xlu0 %12333  ;;  %v5617_v0 = vsel %vm5077_vm9, %v12330_v53, %v12331_v7 }
 0x791   : > { %v12542_v45 = vpack.i.bf16 %v9631_v55, %v9630_v57  ;;  %v12537_v54 = vpack.i.bf16 %v9626_v39, %v9625_v48  ;;  %11548 = vmatpush1.bf16.msra.mxu0 %v11547_v42  ;;  %5523 = vmatprep.mubr.f32.mxu0 %v17608_v47  ;;  %v12146_v18 = vunpack.i.h.bf16 %v17679_v28  ;;  %v5612_v46 = vsel %vm5077_vm9, %v12200_v60, %v12201_v15 }
 0x792   : > { %12523 = vrot.lane.b32.xlu0 %v17676_v35, %s12907_s18  ;;  %v5852_v59 = vsel %vm4834_vm8, %v17677_v30, %v12205_v27  ;;  %v12251_v31 = vunpack.i.h.bf16 %v17680_v22  ;;  %v16226_v35 = vsel %vm960_vm4, %v9613_v43, %v9615_v8  ;;  %11550 = vmatprep.subr.bf16.mxu0 %v11549_v40  ;;  %v17217_v42 = vunpack.i.h.bf16 %v16216_v61  ;;  %s653_s18 = scalar_lea.vmem %s17748_s22, %s17747_s4 }
 0x793   : > { %v12335_v48 = vunpack.i.l.bf16 %v16216_v61  ;;  %12538 = vrot.lane.b32.xlu1 %v12537_v54, %s17293_s0  ;;  %v11551_v7 = vpack.c.bf16 %v5614_v16, %v15895_v21  ;;  %v5613_v57 = vsel %vm5077_vm9, %v12201_v15, %v12245_v56  ;;  %v12206_v10 = vunpack.i.h.bf16 %v17670_v51 }
 0x794   : > { %v17681_v60 = vunpack.i.h.bf16 %v17648_v4  ;;  %v17682_v43 = vpack.i.bf16 %v15917_v17, %v15914_v50  ;;  %11104 = vmatmul.mubr.msk.f32.vlgmr.msra.gmra.mrb[4].mxu0 %vm771_vm3, %v5338_v25  ;;  %v11553_v40 = vpack.c.bf16 %v5617_v0, %v5613_v57  ;;  %v11557_v39 = vpack.c.bf16 %v16156_v26, %v5852_v59  ;;  %v12344_v16 = vpop.permute.xlu0 %12343  ;;  %v5579_v50 = vld [vmem:[%s16982_s14 + $0x5] sm:$0x1] }
 0x795   : > { %v12250_v21 = vunpack.i.l.bf16 %v17680_v22  ;;  %v12547_v15 = vpack.i.bf16 %v16022_v9, %v9150_v20  ;;  %v16245_v56 = vmul.f32 0.0, %v9615_v8  ;;  %v9627_v4 = vmul.f32 %v16226_v35, %v14659_v63  ;;  %11552 = vmatpush1.bf16.msra.mxu0 %v11551_v7  ;;  %5693 = vmatprep.mubr.f32.mxu0 %v17608_v47 }
 0x796   : > { %v5616_v55 = vsel %vm5077_vm9, %v17681_v60, %v12330_v53  ;;  %12528 = vrot.lane.b32.xlu0 %v17682_v43, %s12905_s26  ;;  %v16249_v53 = vpop.permute.xlu1 %12338  ;;  %v12346_v9 = vunpack.i.h.bf16 %v12344_v16  ;;  %v12345_v25 = vunpack.i.l.bf16 %v12344_v16  ;;  %11554 = vmatprep.subr.bf16.mxu0 %v11553_v40  ;;  %v17683_v20 = vunpack.i.l.bf16 %v15602_v1  ;;  %v17690_v60 = vld [vmem:[#allocation31_spill] sm:$0xff] }
 0x797   : > { %v17216_v17 = vunpack.i.h.bf16 %v16249_v53  ;;  %v12340_v26 = vunpack.i.l.bf16 %v16249_v53  ;;  %v9391_v59 = vmul.f32 %v16058_v37, %v17674_v11  ;;  %v11555_v54 = vpack.c.bf16 %v5616_v55, %v5612_v46  ;;  %12548 = vrot.lane.b32.xlu1 %v12547_v15, %s12906_s1  ;;  %v17684_v46 = vld [vmem:[#allocation28_spill] sm:$0xff] }
 0x798   : > { %v5855_v30 = vsel %vm4834_vm8, %v12251_v31, %v17683_v20  ;;  %v16266_v8 = vsel %vm7011_vm0, %v12335_v48, %v17217_v42  ;;  %v12145_v0 = vunpack.i.l.bf16 %v17679_v28  ;;  %v16273_v7 = vsel %vm7011_vm0, %v12345_v25, %v12335_v48  ;;  %11106 = vmatmul.mubr.msk.f32.vlgmr.msra.gmra.mrb[2].mxu0 %vm771_vm3, %v5579_v50  ;;  %v12349_v48 = vpop.permute.xlu0 %12348  ;;  %v17701_v42 = vld [vmem:[#allocation33_spill] sm:$0xff] }
 0x799   : > { %v16270_v22 = vsel %vm7011_vm0, %v12346_v9, %v12340_v26  ;;  %v16280_v37 = vsel %vm7011_vm0, %v12340_v26, %v17216_v17  ;;  %v12210_v31 = vunpack.i.l.bf16 %v17684_v46  ;;  %v12557_v57 = vpack.i.bf16 %v16245_v56, %v9627_v4  ;;  %11556 = vmatpush1.bf16.msra.mxu0 %v11555_v54  ;;  %5764 = vmatprep.mubr.f32.mxu0 %v17608_v47  ;;  %v17685_v26 = vld [vmem:[#allocation26_spill] sm:$0xff] }
 0x79a   : > { %12543 = vrot.lane.b32.xlu0 %v12542_v45, %s17293_s0  ;;  %v9850_v55 = vpop.permute.xlu1 %9849  ;;  %v12351_v15 = vunpack.i.h.bf16 %v12349_v48  ;;  %v12350_v16 = vunpack.i.l.bf16 %v12349_v48  ;;  %11558 = vmatprep.subr.bf16.mxu0 %v11557_v39  ;;  %v5853_v4 = vsel %vm4834_vm8, %v12205_v27, %v12206_v10  ;;  %v12256_v9 = vunpack.i.h.bf16 %v17685_v26 }
 0x79b   : > { %v16290_v43 = vmul.f32 %v9850_v55, %v17378_v2  ;;  %v16293_v40 = vmul.f32 %v9850_v55, %v14476_v14  ;;  %12553 = vrot.lane.b32.xlu1 %v12552_v33, %s17293_s0  ;;  %v11559_v25 = vpack.c.bf16 %v5855_v30, %v15911_v23  ;;  %v5854_v20 = vsel %vm4834_vm8, %v12206_v10, %v12250_v21  ;;  %v5820_v21 = vld [vmem:[%s16982_s14 + $0x6] sm:$0x1] }
 0x79c   : > { %v12080_v54 = vunpack.i.l.bf16 %v17678_v5  ;;  %v17686_v51 = vunpack.i.h.bf16 %v15602_v1  ;;  %11107 = vmatmul.mubr.msk.f32.vlgmr.msra.gmra.mrb[4].mxu0 %vm771_vm3, %v5579_v50  ;;  %v5858_v62 = vsel %vm4834_vm8, %v12350_v16, %v12351_v15  ;;  %v9852_v33 = vpop.permute.xlu0 %9851  ;;  %v6093_v1 = vsel %vm4403_vm7, %v12081_v41, %v12210_v31 }
 0x79d   : > { %v12577_v39 = vpack.i.bf16 %v16293_v40, %v16290_v43  ;;  %11560 = vmatpush1.bf16.msra.mxu0 %v11559_v25  ;;  %5934 = vmatprep.mubr.f32.mxu0 %v17608_v47  ;;  %v11561_v10 = vpack.c.bf16 %v5858_v62, %v5854_v20  ;;  %v12255_v50 = vunpack.i.l.bf16 %v17685_v26  ;;  %v12562_v30 = vpack.i.bf16 %v16093_v32, %v9391_v59  ;;  %v17687_v59 = vld [vmem:[#allocation37_spill] sm:$0xff] }
 0x79e   : > { %v5857_v27 = vsel %vm4834_vm8, %v17686_v51, %v12350_v16  ;;  %12558 = vrot.lane.b32.xlu0 %v12557_v57, %s17293_s0  ;;  %v12354_v23 = vpop.permute.xlu1 %12353  ;;  %v6096_v15 = vsel %vm4403_vm7, %v12256_v9, %v12145_v0  ;;  %v6097_v16 = vsel %vm4403_vm7, %v12145_v0, %v12146_v18  ;;  %v12211_v25 = vunpack.i.h.bf16 %v17684_v46  ;;  %v17688_v9 = vld [vmem:[#allocation27_spill] sm:$0xff] }
 0x79f   : > { %v11563_v52 = vpack.c.bf16 %v5857_v27, %v5853_v4  ;;  %v12356_v57 = vunpack.i.h.bf16 %v12354_v23  ;;  %v12355_v48 = vunpack.i.l.bf16 %v12354_v23  ;;  %11562 = vmatprep.subr.bf16.mxu0 %v11561_v10  ;;  %v6092_v4 = vsel %vm4403_vm7, %v12080_v54, %v12081_v41  ;;  %v17689_v27 = vld [vmem:[#allocation25_spill] sm:$0xff] }
 0x7a0   : > { %v9857_v20 = vsel %vm5127_vm10, %v9850_v55, %v9852_v33  ;;  %11109 = vmatmul.mubr.msk.f32.vlgmr.msra.gmra.mrb[2].mxu0 %vm771_vm3, %v5820_v21  ;;  %v11565_v32 = vpack.c.bf16 %v6097_v16, %v6093_v1  ;;  %v12086_v26 = vunpack.i.h.bf16 %v17687_v59  ;;  %v12151_v51 = vunpack.i.h.bf16 %v17688_v9  ;;  %v16339_v5 = vpop.permute.xlu0 %12358 }
 0x7a1   : > { %v12215_v62 = vunpack.i.l.bf16 %v17689_v27  ;;  %11564 = vmatpush1.bf16.msra.mxu0 %v11563_v52  ;;  %6005 = vmatprep.mubr.f32.mxu0 %v17608_v47  ;;  %v6099_v41 = vsel %vm4403_vm7, %v12355_v48, %v12356_v57  ;;  %v12150_v55 = vunpack.i.l.bf16 %v17688_v9  ;;  %v11567_v23 = vpack.c.bf16 %v6096_v15, %v6092_v4  ;;  %v6302_v9 = vld [vmem:[%s16982_s14 + $0x8] sm:$0x1] }
 0x7a2   : > { %12563 = vrot.lane.b32.xlu0 %v12562_v30, %s12905_s26  ;;  %v9854_v0 = vpop.permute.xlu1 %9853  ;;  %11566 = vmatprep.subr.bf16.mxu0 %v11565_v32  ;;  %v6095_v10 = vsel %vm4403_vm7, %v12211_v25, %v12255_v50  ;;  %v9866_v1 = vmul.f32 %v9857_v20, %v14446_v3  ;;  %v9871_v30 = vmul.f32 %v9857_v20, %v14487_v44  ;;  %v12261_v45 = vunpack.i.h.bf16 %v17690_v60 }
 0x7a3   : > { %v9858_v54 = vsel %vm5127_vm10, %v9852_v33, %v9854_v0  ;;  %v6098_v57 = vsel %vm4403_vm7, %v12146_v18, %v12355_v48  ;;  %v11569_v33 = vpack.c.bf16 %v6099_v41, %v6095_v10  ;;  %v12085_v15 = vunpack.i.l.bf16 %v17687_v59  ;;  %v17691_v41 = vld [vmem:[#allocation40_spill] sm:$0xff] }
 0x7a4   : > { %v9867_v52 = vmul.f32 %v9858_v54, %v14643_v34  ;;  %v9872_v16 = vmul.f32 %v9858_v54, %v14701_v13  ;;  %11110 = vmatmul.mubr.msk.f32.vlgmr.msra.gmra.mrb[4].mxu0 %vm771_vm3, %v5820_v21  ;;  %v9856_v20 = vpop.permute.xlu0 %9855  ;;  %v6061_v54 = vld [vmem:[%s16982_s14 + $0x7] sm:$0x1]  ;;  %v6334_v28 = vsel %vm4356_vm6, %v12086_v26, %v12215_v62  ;;  %v6094_v18 = vsel %vm4403_vm7, %v12210_v31, %v12211_v25 }
 0x7a5   : > { %11568 = vmatpush1.bf16.msra.mxu0 %v11567_v23  ;;  %6175 = vmatprep.mubr.f32.mxu0 %v17608_v47  ;;  %v16367_v21 = vsel %vm5127_vm10, %v9854_v0, %v9856_v20  ;;  %v16369_v48 = vmul.f32 0.0, %v9856_v20  ;;  %v6338_v59 = vsel %vm4356_vm6, %v12150_v55, %v12151_v51  ;;  %v12156_v23 = vunpack.i.h.bf16 %v17691_v41 }
 0x7a6   : > { %v12572_v50 = vpack.i.bf16 %v9872_v16, %v9871_v30  ;;  %v12567_v4 = vpack.i.bf16 %v9867_v52, %v9866_v1  ;;  %v16356_v32 = vpop.permute.xlu1 %12363  ;;  %11570 = vmatprep.subr.bf16.mxu0 %v11569_v33  ;;  %v12155_v10 = vunpack.i.l.bf16 %v17691_v41  ;;  %v11571_v1 = vpack.c.bf16 %v6098_v57, %v6094_v18  ;;  %v6544_v41 = vld [vmem:[%s16982_s14 + $0x9] sm:$0x1] }
 0x7a7   : > { %v9868_v46 = vmul.f32 %v16367_v21, %v14659_v63  ;;  %v12216_v31 = vunpack.i.h.bf16 %v17689_v27  ;;  %v6337_v25 = vsel %vm4356_vm6, %v12261_v45, %v12150_v55  ;;  %v12260_v0 = vunpack.i.l.bf16 %v17690_v60  ;;  %v17692_v60 = vld [vmem:[#allocation23_spill] sm:$0xff] }
 0x7a8   : > { %12573 = vrot.lane.b32.xlu1 %v12572_v50, %s17294_s30  ;;  %12568 = vrot.lane.b32.xlu0 %v12567_v4, %s17294_s30  ;;  %v11573_v30 = vpack.c.bf16 %v6338_v59, %v6334_v28  ;;  %v9632_v52 = vmul.f32 %v16226_v35, %v17674_v11  ;;  %v12369_v33 = vpop.permute.xlu0 %12368  ;;  %v6333_v27 = vsel %vm4356_vm6, %v12085_v15, %v12086_v26  ;;  %v12091_v55 = vunpack.i.h.bf16 %v17692_v60 }
 0x7a9   : > { %11112 = vmatmul.mubr.msk.f32.vlgmr.msra.gmra.mrb[2].mxu0 %vm771_vm3, %v6061_v54  ;;  %v12582_v16 = vpack.i.bf16 %v16369_v48, %v9868_v46  ;;  %v12371_v50 = vunpack.i.h.bf16 %v12369_v33  ;;  %v12370_v45 = vunpack.i.l.bf16 %v12369_v33  ;;  %v12090_v4 = vunpack.i.l.bf16 %v17692_v60  ;;  %v17694_v46 = vld [vmem:[#allocation95_spill] sm:$0xff] }
 0x7aa   : > { %11572 = vmatpush1.bf16.msra.mxu0 %v11571_v1  ;;  %v16387_v57 = vpop.permute.xlu1 %12378  ;;  %6246 = vmatprep.mubr.f32.mxu0 %v17608_v47  ;;  %v11575_v35 = vpack.c.bf16 %v6337_v25, %v6333_v27  ;;  %v6581_v20 = vsel %vm6575_vm15, %v12155_v10, %v12156_v23  ;;  %v6335_v26 = vsel %vm4356_vm6, %v12215_v62, %v12216_v31  ;;  %v12036_v36 = vunpack.i.h.bf16 %v17701_v42 }
 0x7ab   : > { %11574 = vmatprep.subr.bf16.mxu0 %v11573_v30  ;;  %v6339_v15 = vsel %vm4356_vm6, %v12151_v51, %v12370_v45  ;;  %v6336_v28 = vsel %vm4356_vm6, %v12216_v31, %v12260_v0  ;;  %v6340_v43 = vsel %vm4356_vm6, %v12370_v45, %v12371_v50  ;;  %v12587_v40 = vpack.i.bf16 %v16245_v56, %v9632_v52  ;;  %v17693_v51 = vld [vmem:[#allocation65_spill] sm:$0xff]  ;;  %v17695_v30 = vld [vmem:[#allocation66_spill] sm:$0xff] }
 0x7ac   : > { %12578 = vrot.lane.b32.xlu0 %v12577_v39, %s17294_s30  ;;  %12583 = vrot.lane.b32.xlu1 %v12582_v16, %s17294_s30  ;;  %v11579_v39 = vpack.c.bf16 %v6339_v15, %v6335_v26  ;;  %v16411_v59 = vpop.permute.xlu0 %12373  ;;  %v11577_v62 = vpack.c.bf16 %v6340_v43, %v6336_v28  ;;  %v12025_v1 = vunpack.i.l.bf16 %v17693_v51  ;;  %v12161_v31 = vunpack.i.h.bf16 %v17694_v46  ;;  %v17696_v45 = vld [vmem:[#allocation94_spill] sm:$0xff] }
 0x7ad   : > { %11113 = vmatmul.mubr.msk.f32.vlgmr.msra.gmra.mrb[4].mxu0 %vm771_vm3, %v6061_v54  ;;  %v12026_v54 = vunpack.i.h.bf16 %v17693_v51  ;;  %v12160_v56 = vunpack.i.l.bf16 %v17694_v46  ;;  %v6577_v25 = vsel %vm6575_vm15, %v12090_v4, %v12091_v55  ;;  %v12266_v52 = vunpack.i.h.bf16 %v17695_v30 }
 0x7ae   : > { %11576 = vmatpush1.bf16.msra.mxu0 %v11575_v35  ;;  %v16409_v18 = vpop.permute.xlu1 %10092  ;;  %6416 = vmatprep.mubr.f32.mxu0 %v17608_v47  ;;  %v12265_v16 = vunpack.i.l.bf16 %v17695_v30  ;;  %v11581_v33 = vpack.c.bf16 %v6581_v20, %v6577_v25  ;;  %v12031_v60 = vunpack.i.h.bf16 %v17696_v45  ;;  %v6576_v35 = vsel %vm6575_vm15, %v12025_v1, %v12090_v4 }
 0x7af   : > { %11578 = vmatprep.subr.bf16.mxu0 %v11577_v62  ;;  %v6580_v0 = vsel %vm6575_vm15, %v12026_v54, %v12155_v10  ;;  %v17697_v10 = vld [vmem:[#allocation43_spill] sm:$0xff]  ;;  %v6824_v20 = vsel %vm6818_vm14, %v12160_v56, %v12161_v31 }
 0x7b0   : > { %12588 = vrot.lane.b32.xlu1 %v12587_v40, %s17293_s0  ;;  %v12384_v50 = vpop.permute.xlu0 %12383  ;;  %v12096_v28 = vunpack.i.h.bf16 %v17697_v10  ;;  %v12095_v43 = vunpack.i.l.bf16 %v17697_v10  ;;  %v11583_v40 = vpack.c.bf16 %v6580_v0, %v6576_v35  ;;  %v6579_v4 = vsel %vm6575_vm15, %v12265_v16, %v12266_v52  ;;  %v17698_v54 = vld [vmem:[#allocation55_spill] sm:$0xff] }
 0x7b1   : > { %11115 = vmatmul.mubr.msk.f32.vlgmr.msra.gmra.mrb[2].mxu0 %vm771_vm3, %v6302_v9  ;;  %v12386_v26 = vunpack.i.h.bf16 %v12384_v50  ;;  %v12385_v15 = vunpack.i.l.bf16 %v12384_v50  ;;  %v12271_v1 = vunpack.i.h.bf16 %v17698_v54  ;;  %v12270_v25 = vunpack.i.l.bf16 %v17698_v54 }
 0x7b2   : > { %11580 = vmatpush1.bf16.msra.mxu0 %v11579_v39  ;;  %v16427_v27 = vpop.permute.xlu1 %12388  ;;  %6487 = vmatprep.mubr.f32.mxu0 %v17608_v47  ;;  %v6578_v39 = vsel %vm6575_vm15, %v12091_v55, %v12265_v16  ;;  %v12030_v50 = vunpack.i.l.bf16 %v17696_v45  ;;  %v6823_v35 = vsel %vm6818_vm14, %v12031_v60, %v12160_v56 }
 0x7b3   : > { %11582 = vmatprep.subr.bf16.mxu0 %v11581_v33  ;;  %v6582_v62 = vsel %vm6575_vm15, %v12156_v23, %v12385_v15  ;;  %v6583_v51 = vsel %vm6575_vm15, %v12385_v15, %v12386_v26  ;;  %v6820_v26 = vsel %vm6818_vm14, %v12095_v43, %v12096_v28  ;;  %v17699_v15 = vld [vmem:[#allocation22_spill] sm:$0xff] }
 0x7b4   : > { %v11587_v0 = vpack.c.bf16 %v6582_v62, %v6578_v39  ;;  %v10091_v33 = vpop.permute.xlu0 %10090  ;;  %v11585_v55 = vpack.c.bf16 %v6583_v51, %v6579_v4  ;;  %v12101_v10 = vunpack.i.h.bf16 %v17699_v15  ;;  %v11589_v62 = vpack.c.bf16 %v6824_v20, %v6820_v26  ;;  %v17700_v51 = vld [vmem:[#allocation48_spill] sm:$0xff] }
 0x7b5   : > { %11116 = vmatmul.mubr.msk.f32.vlgmr.msra.gmra.mrb[4].mxu0 %vm771_vm3, %v6302_v9  ;;  %v16451_v52 = vmul.f32 %v10091_v33, %v17378_v2  ;;  %v16454_v16 = vmul.f32 %v10091_v33, %v14476_v14  ;;  %v10098_v39 = vsel %vm4884_vm11, %v10091_v33, %v16409_v18  ;;  %v6819_v4 = vsel %vm6818_vm14, %v12030_v50, %v12095_v43 }
 0x7b6   : > { %11584 = vmatpush1.bf16.msra.mxu0 %v11583_v40  ;;  %v12394_v30 = vpop.permute.xlu1 %12393  ;;  %6659 = vmatprep.mubr.f32.mxu0 %v17608_v47  ;;  %v17219_v45 = vunpack.i.h.bf16 %v17700_v51  ;;  %v12165_v56 = vunpack.i.l.bf16 %v17700_v51  ;;  %v11591_v20 = vpack.c.bf16 %v6823_v35, %v6819_v4  ;;  %v6822_v43 = vsel %vm6818_vm14, %v12270_v25, %v12271_v1 }
 0x7b7   : > { %v12396_v23 = vunpack.i.h.bf16 %v12394_v30  ;;  %v12395_v9 = vunpack.i.l.bf16 %v12394_v30  ;;  %11586 = vmatprep.subr.bf16.mxu0 %v11585_v55  ;;  %v12602_v40 = vpack.i.bf16 %v16454_v16, %v16451_v52  ;;  %v12100_v55 = vunpack.i.l.bf16 %v17699_v15  ;;  %v17707_v52 = vld [vmem:[#allocation78_spill] sm:$0xff] }
 0x7b8   : > { %v10095_v54 = vpop.permute.xlu0 %10094  ;;  %v10107_v50 = vmul.f32 %v10098_v39, %v14446_v3  ;;  %v10112_v26 = vmul.f32 %v10098_v39, %v14487_v44  ;;  %v9873_v1 = vmul.f32 %v16367_v21, %v17674_v11  ;;  %v7067_v46 = vsel %vm7061_vm5, %v12165_v56, %v17219_v45 }
 0x7b9   : > { %11118 = vmatmul.mubr.msk.f32.vlgmr.msra.gmra.mrb[2].mxu0 %vm771_vm3, %v6544_v41  ;;  %v6826_v30 = vsel %vm6818_vm14, %v12395_v9, %v12396_v23  ;;  %v10099_v33 = vsel %vm4884_vm11, %v16409_v18, %v10095_v54  ;;  %v6825_v23 = vsel %vm6818_vm14, %v12161_v31, %v12395_v9  ;;  %v12035_v31 = vunpack.i.l.bf16 %v17701_v42  ;;  %v17702_v9 = vld [vmem:[#allocation96_spill] sm:$0xff] }
 0x7ba   : > { %11588 = vmatpush1.bf16.msra.mxu0 %v11587_v0  ;;  %v10097_v60 = vpop.permute.xlu1 %10096  ;;  %6730 = vmatprep.mubr.f32.mxu0 %v17608_v47  ;;  %v10113_v0 = vmul.f32 %v10099_v33, %v14701_v13  ;;  %v10108_v17 = vmul.f32 %v10099_v33, %v14643_v34  ;;  %v11593_v18 = vpack.c.bf16 %v6826_v30, %v6822_v43  ;;  %v6787_v33 = vld [vmem:[%s16982_s14 + $0xa] sm:$0x1]  ;;  %v17703_v43 = vld [vmem:[#allocation32_spill] sm:$0xff]  ;;  %v12041_v16 = vunpack.i.h.bf16 %v17707_v52 }
 0x7bb   : > { %11590 = vmatprep.subr.bf16.mxu0 %v11589_v62  ;;  %v16498_v21 = vsel %vm4884_vm11, %v10095_v54, %v10097_v60  ;;  %v7062_v42 = vsel %vm7061_vm5, %v12035_v31, %v12100_v55  ;;  %v12607_v45 = vpack.i.bf16 %v16369_v48, %v9873_v1  ;;  %v16515_v30 = vmul.f32 0.0, %v10097_v60 }
 0x7bc   : > { %v12597_v35 = vpack.i.bf16 %v10113_v0, %v10112_v26  ;;  %v12592_v62 = vpack.i.bf16 %v10108_v17, %v10107_v50  ;;  %v16487_v4 = vpop.permute.xlu0 %12398  ;;  %v7063_v17 = vsel %vm7061_vm5, %v12100_v55, %v12101_v10  ;;  %v12275_v50 = vunpack.i.l.bf16 %v17703_v43  ;;  %v17704_v0 = vld [vmem:[#allocation24_spill] sm:$0xff] }
 0x7bd   : > { %11119 = vmatmul.mubr.msk.f32.vlgmr.msra.gmra.mrb[4].mxu0 %vm771_vm3, %v6544_v41  ;;  %v6821_v41 = vsel %vm6818_vm14, %v12096_v28, %v12270_v25  ;;  %v7066_v28 = vsel %vm7061_vm5, %v12036_v36, %v12165_v56  ;;  %v12276_v25 = vunpack.i.h.bf16 %v17703_v43  ;;  %v11597_v54 = vpack.c.bf16 %v7067_v46, %v7063_v17 }
 0x7be   : > { %11592 = vmatpush1.bf16.msra.mxu0 %v11591_v20  ;;  %v16485_v39 = vpop.permute.xlu1 %12403  ;;  %6902 = vmatprep.mubr.f32.mxu0 %v17608_v47  ;;  %v12170_v20 = vunpack.i.l.bf16 %v17702_v9  ;;  %v11595_v26 = vpack.c.bf16 %v6825_v23, %v6821_v41  ;;  %v10109_v23 = vmul.f32 %v16498_v21, %v14659_v63  ;;  %v12105_v48 = vunpack.i.l.bf16 %v17704_v0 }
 0x7bf   : > { %11594 = vmatprep.subr.bf16.mxu0 %v11593_v18  ;;  %12598 = vrot.lane.b32.xlu0 %v12597_v35, %s12902_s29  ;;  %v12106_v18 = vunpack.i.h.bf16 %v17704_v0  ;;  %v7064_v60 = vsel %vm7061_vm5, %v12101_v10, %v12275_v50  ;;  %v11599_v1 = vpack.c.bf16 %v7066_v28, %v7062_v42  ;;  %v17705_v31 = vunpack.i.h.bf16 %v17702_v9 }
 0x7c0   : > { %12593 = vrot.lane.b32.xlu1 %v12592_v62, %s12902_s29  ;;  %v12409_v62 = vpop.permute.xlu0 %12408  ;;  %v17706_v43 = vunpack.i.h.bf16 %v17700_v51  ;;  %v7065_v10 = vsel %vm7061_vm5, %v12275_v50, %v12276_v25  ;;  %v12286_v50 = vunpack.i.h.bf16 %v15872_v29  ;;  %v12285_v25 = vunpack.i.l.bf16 %v15872_v29 }
 0x7c1   : > { %11121 = vmatmul.mubr.msk.f32.vlgmr.msra.gmra.mrb[2].mxu0 %vm771_vm3, %v6787_v33  ;;  %v12411_v55 = vunpack.i.h.bf16 %v12409_v62  ;;  %v12410_v46 = vunpack.i.l.bf16 %v12409_v62  ;;  %v7310_v41 = vsel %vm7304_vm2, %v12170_v20, %v17705_v31  ;;  %vm17729_vm14 = vcmask 982016  }
 0x7c2   : > { %11596 = vmatpush1.bf16.msra.mxu0 %v11595_v26  ;;  %v10332_v35 = vpop.permute.xlu1 %10331  ;;  %6973 = vmatprep.mubr.f32.mxu0 %v17608_v47  ;;  %vm17731_vm15 = vmmov %vm17729_vm14 }
 0x7c3   : > { %v16521_v36 = vmul.f32 %v10332_v35, %v17378_v2  ;;  %v16524_v56 = vmul.f32 %v10332_v35, %v14476_v14  ;;  %11598 = vmatprep.subr.bf16.mxu0 %v11597_v54  ;;  %12608 = vrot.lane.b32.xlu0 %v12607_v45, %s17294_s30  ;;  %v7068_v15 = vsel %vm7061_vm5, %v17706_v43, %v12410_v46 }
 0x7c4   : > { %12603 = vrot.lane.b32.xlu1 %v12602_v40, %s12902_s29  ;;  %v7069_v45 = vsel %vm7061_vm5, %v12410_v46, %v12411_v55  ;;  %v12612_v40 = vpack.i.bf16 %v16515_v30, %v10109_v23  ;;  %v11603_v26 = vpack.c.bf16 %v7068_v15, %v7064_v60  ;;  %v16548_v28 = vpop.permute.xlu0 %12413  ;;  %v12040_v23 = vunpack.i.l.bf16 %v17707_v52 }
 0x7c5   : > { %v12627_v17 = vpack.i.bf16 %v16524_v56, %v16521_v36  ;;  %11122 = vmatmul.mubr.msk.f32.vlgmr.msra.gmra.mrb[4].mxu0 %vm771_vm3, %v6787_v33  ;;  %v11601_v51 = vpack.c.bf16 %v7069_v45, %v7065_v10  ;;  %v7030_v33 = vld [vmem:[%s16982_s14 + $0xb] sm:$0x1]  ;;  %v7309_v55 = vsel %vm7304_vm2, %v12041_v16, %v12170_v20  ;;  %v7306_v46 = vsel %vm7304_vm2, %v12105_v48, %v12106_v18  ;;  %v17717_v36 = vld [vmem:[#allocation90_spill] sm:$0xff] }
 0x7c6   : > { %11600 = vmatpush1.bf16.msra.mxu0 %v11599_v1  ;;  %v12419_v42 = vpop.permute.xlu1 %12418  ;;  %7145 = vmatprep.mubr.f32.mxu0 %v17608_v47  ;;  %v11605_v60 = vpack.c.bf16 %v7310_v41, %v7306_v46  ;;  %v7305_v1 = vsel %vm7304_vm2, %v12040_v23, %v12105_v48  ;;  %v7308_v45 = vsel %vm7304_vm2, %v12285_v25, %v12286_v50 }
 0x7c7   : > { %v12421_v54 = vunpack.i.h.bf16 %v12419_v42  ;;  %v12420_v62 = vunpack.i.l.bf16 %v12419_v42  ;;  %12613 = vrot.lane.b32.xlu0 %v12612_v40, %s12902_s29  ;;  %11602 = vmatprep.subr.bf16.mxu0 %v11601_v51  ;;  %v11607_v10 = vpack.c.bf16 %v7309_v55, %v7305_v1  ;;  %v17708_v40 = vunpack.i.h.bf16 %v17702_v9  ;;  %v7273_v9 = vld [vmem:[%s16982_s14 + $0xc] sm:$0x1] }
 0x7c8   : > { %v10334_v31 = vpop.permute.xlu0 %10333  ;;  %v10114_v42 = vmul.f32 %v16498_v21, %v17674_v11 }
 0x7c9   : > { %11124 = vmatmul.mubr.msk.f32.vlgmr.msra.gmra.mrb[2].mxu0 %vm771_vm3, %v7030_v33  ;;  %v7312_v43 = vsel %vm7304_vm2, %v12420_v62, %v12421_v54  ;;  %v10339_v20 = vsel %vm4453_vm12, %v10332_v35, %v10334_v31 }
 0x7ca   : > { %11604 = vmatpush1.bf16.msra.mxu0 %v11603_v26  ;;  %v10336_v29 = vpop.permute.xlu1 %10335  ;;  %7216 = vmatprep.mubr.f32.mxu0 %v17608_v47  ;;  %v10353_v41 = vmul.f32 %v10339_v20, %v14487_v44  ;;  %v10348_v16 = vmul.f32 %v10339_v20, %v14446_v3  ;;  %v7311_v26 = vsel %vm7304_vm2, %v17708_v40, %v12420_v62  ;;  %v17713_v20 = vld [vmem:[#allocation91_spill] sm:$0xff]  ;;  %v17720_v40 = vld [vmem:[#allocation93_spill] sm:$0xff] }
 0x7cb   : > { %v10340_v15 = vsel %vm4453_vm12, %v10334_v31, %v10336_v29  ;;  %11606 = vmatprep.subr.bf16.mxu0 %v11605_v60  ;;  %v11609_v35 = vpack.c.bf16 %v7312_v43, %v7308_v45  ;;  %v12632_v21 = vpack.i.bf16 %v16515_v30, %v10114_v42 }
 0x7cc   : > { %v10349_v52 = vmul.f32 %v10340_v15, %v14643_v34  ;;  %v10354_v48 = vmul.f32 %v10340_v15, %v14701_v13  ;;  %v16581_v23 = vpop.permute.xlu0 %12423  ;;  %v17714_v15 = vld [vmem:[#allocation88_spill] sm:$0xff] }
 0x7cd   : > { %11125 = vmatmul.mubr.msk.f32.vlgmr.msra.gmra.mrb[4].mxu0 %vm771_vm3, %v7030_v33  ;;  %v7307_v33 = vsel %vm7304_vm2, %v12106_v18, %v12285_v25  ;;  %v17710_v18 = vld [vmem:[#allocation89_spill] sm:$0xff] }
 0x7ce   : > { %v12622_v51 = vpack.i.bf16 %v10354_v48, %v10353_v41  ;;  %v12617_v50 = vpack.i.bf16 %v10349_v52, %v10348_v16  ;;  %11608 = vmatpush1.bf16.msra.mxu0 %v11607_v10  ;;  %v16579_v54 = vpop.permute.xlu1 %12428  ;;  %7388 = vmatprep.mubr.f32.mxu0 %v17608_v47  ;;  %v11611_v62 = vpack.c.bf16 %v7311_v26, %v7307_v33  ;;  %v17711_v25 = vld [vmem:[#allocation21_spill] sm:$0xff]  ;;  %v7501_v41 = vld [vmem:[%s16982_s14 + $0xd] sm:$0x1]  ;;  %v17719_v16 = vld [vmem:[#allocation92_spill] sm:$0xff]  ;;  %v12360_v33 = vunpack.i.l.bf16 %v16339_v5 }
 0x7cf   : > { %11610 = vmatprep.subr.bf16.mxu0 %v11609_v35  ;;  %v17712_v1 = vpack.c.bf16 %v17710_v18, %v17711_v25  ;;  %v17715_v10 = vpack.c.bf16 %v17713_v20, %v17714_v15  ;;  %v17716_v48 = vld [vmem:[#allocation107_spill] sm:$0xff]  ;;  %v17721_v26 = vpack.c.bf16 %v17719_v16, %v17720_v40  ;;  %v12361_v18 = vunpack.i.h.bf16 %v16339_v5 }
 0x7d0   : > { %12623 = vrot.lane.b32.xlu1 %v12622_v51, %s17709_s24  ;;  %12618 = vrot.lane.b32.xlu0 %v12617_v50, %s17709_s24  ;;  %v10338_v46 = vpop.permute.xlu0 %10337  ;;  %v17718_v56 = vpack.c.bf16 %v17716_v48, %v17717_v36  ;;  %v12376_v5 = vunpack.i.h.bf16 %v16411_v59  ;;  %v17727_v20 = vunpack.i.h.bf16 %v16249_v53  ;;  %v12366_v53 = vunpack.i.h.bf16 %v16356_v32 }
 0x7d1   : > { %11127 = vmatmul.mubr.msk.f32.vlgmr.msra.gmra.mrb[2].mxu0 %vm771_vm3, %v7273_v9  ;;  %v10341_v0 = vsel %vm4453_vm12, %v10336_v29, %v10338_v46  ;;  %v10351_v60 = vmul.f32 0.0, %v10338_v46  ;;  %v17724_v46 = vunpack.i.l.bf16 %v16148_v24  ;;  %v7981_v48 = vsel %vm7011_vm0, %v12360_v33, %v12361_v18 }
 0x7d2   : > { %11612 = vmatpush1.bf16.msra.mxu0 %v11611_v62  ;;  %v16594_v55 = vpop.permute.xlu1 %12438  ;;  %7459 = vmatprep.mubr.f32.mxu0 %v17608_v47  ;;  %v10355_v31 = vmul.f32 %v10341_v0, %v17674_v11  ;;  %v10350_v43 = vmul.f32 %v10341_v0, %v14659_v63  ;;  %v17723_v62 = vunpack.i.h.bf16 %v16060_v6  ;;  %v17728_v40 = vpack.c.bf16 %v16280_v37, %v16266_v8 }
 0x7d3   : > { %11614 = vmatprep.subr.bf16.mxu0 %v17712_v1  ;;  %v12401_v18 = vunpack.i.h.bf16 %v16487_v4 }
 0x7d4   : > { %12633 = vrot.lane.b32.xlu1 %v12632_v21, %s12902_s29  ;;  %12628 = vrot.lane.b32.xlu0 %v12627_v17, %s17709_s24  ;;  %v12647_v30 = vpack.i.bf16 %v10351_v60, %v10355_v31  ;;  %v12637_v29 = vpack.i.bf16 %v10351_v60, %v10350_v43  ;;  %v16612_v52 = vpop.permute.xlu0 %12433  ;;  %v12326_v17 = vunpack.i.h.bf16 %v16148_v24  ;;  %v7706_v24 = vld [vmem:[%s16982_s14 + $0xe] sm:$0x1] }
 0x7d5   : > { %11128 = vmatmul.mubr.msk.f32.vlgmr.msra.gmra.mrb[4].mxu0 %vm771_vm3, %v7273_v9  ;;  %v17722_v9 = vpack.c.bf16 %v16091_v58, %v16077_v19  ;;  %v17725_v19 = vpack.c.bf16 %v16084_v12, %v16081_v38  ;;  %v17726_v38 = vunpack.i.h.bf16 %v16216_v61 }
 0x7d6   : > { %11616 = vmatpush1.bf16.msra.mxu0 %v17715_v10  ;;  %v10575_v45 = vpop.permute.xlu1 %10574  ;;  %7569 = vmatprep.mubr.f32.mxu0 %v17608_v47  ;;  %v7740_v0 = vsel %vm7254_vm1, %v17724_v46, %v12326_v17  ;;  %v12391_v46 = vunpack.i.h.bf16 %v16427_v27 }
 0x7d7   : > { %11618 = vmatprep.subr.bf16.mxu0 %v17718_v56  ;;  %v7980_v12 = vsel %vm7011_vm0, %v17726_v38, %v12360_v33  ;;  %v12365_v56 = vunpack.i.l.bf16 %v16356_v32  ;;  %v12380_v32 = vunpack.i.l.bf16 %v16387_v57  ;;  %v10794_v38 = vld [vmem:[#allocation4] sm:$0x1] }
 0x7d8   : > { %12648 = vrot.lane.b32.xlu0 %v12647_v30, %s17709_s24  ;;  %12638 = vrot.lane.b32.xlu1 %v12637_v29, %s17709_s24  ;;  %v12444_v42 = vpop.permute.xlu0 %12443  ;;  %v12375_v29 = vunpack.i.l.bf16 %v16411_v59  ;;  %v12426_v59 = vunpack.i.h.bf16 %v16581_v23 }
 0x7d9   : > { %11130 = vmatmul.mubr.msk.f32.vlgmr.msra.gmra.mrb[2].mxu0 %vm771_vm3, %v7501_v41  ;;  %v12446_v51 = vunpack.i.h.bf16 %v12444_v42  ;;  %v12445_v50 = vunpack.i.l.bf16 %v12444_v42 }
 0x7da   : > { %11620 = vmatpush1.bf16.msra.mxu0 %v17721_v26  ;;  %v16628_v35 = vpop.permute.xlu1 %12448  ;;  %7640 = vmatprep.mubr.f32.mxu0 %v17608_v47  ;;  %v8224_v8 = vsel %vm17729_vm14, %v12375_v29, %v12376_v5 }
 0x7db   : > { %11622 = vmatprep.subr.bf16.mxu0 %v17722_v9  ;;  %v7743_v21 = vsel %vm7254_vm1, %v17723_v62, %v12445_v50  ;;  %v7744_v60 = vsel %vm7254_vm1, %v12445_v50, %v12446_v51  ;;  %v12381_v9 = vunpack.i.h.bf16 %v16387_v57  ;;  %v7947_v57 = vld [vmem:[%s16982_s14 + $0xf] sm:$0x1] }
 0x7dc   : > { %v11627_v25 = vpack.c.bf16 %v7743_v21, %v16177_v49  ;;  %v10573_v6 = vpop.permute.xlu0 %10572  ;;  %v11625_v1 = vpack.c.bf16 %v7744_v60, %v7740_v0  ;;  %v8220_v21 = vsel %vm17731_vm15, %v12365_v56, %v12366_v53  ;;  %v12406_v0 = vunpack.i.h.bf16 %v16485_v39 }
 0x7dd   : > { %11131 = vmatmul.mubr.msk.f32.vlgmr.msra.gmra.mrb[4].mxu0 %vm771_vm3, %v7501_v41  ;;  %v16653_v30 = vmul.f32 %v10573_v6, %v17378_v2  ;;  %v16656_v49 = vmul.f32 %v10573_v6, %v14476_v14  ;;  %v10580_v10 = vsel %vm4645_vm13, %v10573_v6, %v10575_v45  ;;  %v12405_v60 = vunpack.i.l.bf16 %v16485_v39 }
 0x7de   : > { %11624 = vmatpush1.bf16.msra.mxu0 %v17725_v19  ;;  %v12454_v58 = vpop.permute.xlu1 %12453  ;;  %7820 = vmatprep.mubr.f32.mxu0 %v17608_v47  ;;  %v10589_v26 = vmul.f32 %v10580_v10, %v14446_v3  ;;  %v10594_v42 = vmul.f32 %v10580_v10, %v14487_v44  ;;  %v8188_v10 = vld [vmem:[%s16982_s14 + $0x10] sm:$0x1] }
 0x7df   : > { %v12456_v31 = vunpack.i.h.bf16 %v12454_v58  ;;  %v12455_v43 = vunpack.i.l.bf16 %v12454_v58  ;;  %11626 = vmatprep.subr.bf16.mxu0 %v11625_v1  ;;  %v12657_v2 = vpack.i.bf16 %v16656_v49, %v16653_v30  ;;  %v12415_v49 = vunpack.i.l.bf16 %v16548_v28 }
 0x7e0   : > { %v10577_v41 = vpop.permute.xlu0 %10576 }
 0x7e1   : > { %v7984_v15 = vsel %vm7011_vm0, %v17727_v20, %v12455_v43  ;;  %11133 = vmatmul.mubr.msk.f32.vlgmr.msra.gmra.mrb[2].mxu0 %vm771_vm3, %v7706_v24  ;;  %v7985_v36 = vsel %vm7011_vm0, %v12455_v43, %v12456_v31  ;;  %v10581_v16 = vsel %vm4645_vm13, %v10575_v45, %v10577_v41  ;;  %vm17732_vm0 = vmmov %vm17729_vm14  ;;  %vm17736_vm14 = vcmask 973824  }
 0x7e2   : > { %v11635_v14 = vpack.c.bf16 %v7984_v15, %v7980_v12  ;;  %11628 = vmatpush1.bf16.msra.mxu0 %v11627_v25  ;;  %v10579_v61 = vpop.permute.xlu1 %10578  ;;  %7891 = vmatprep.mubr.f32.mxu0 %v17608_v47  ;;  %v10595_v51 = vmul.f32 %v10581_v16, %v14701_v13  ;;  %v10590_v50 = vmul.f32 %v10581_v16, %v14643_v34  ;;  %v12400_v25 = vunpack.i.l.bf16 %v16487_v4  ;;  %vm17733_vm1 = vmmov %vm17732_vm0 }
 0x7e3   : > { %v10582_v17 = vsel %vm4645_vm13, %v10577_v41, %v10579_v61  ;;  %11630 = vmatprep.subr.bf16.mxu0 %v17728_v40  ;;  %v11633_v33 = vpack.c.bf16 %v7985_v36, %v7981_v48  ;;  %v10592_v37 = vmul.f32 0.0, %v10579_v61  ;;  %v17730_v13 = vpack.c.bf16 %v16270_v22, %v16273_v7  ;;  %vm17734_vm2 = vmmov %vm17732_vm0 }
 0x7e4   : > { %v10591_v3 = vmul.f32 %v10582_v17, %v14659_v63  ;;  %v12652_v45 = vpack.i.bf16 %v10595_v51, %v10594_v42  ;;  %v12642_v44 = vpack.i.bf16 %v10590_v50, %v10589_v26  ;;  %v16696_v62 = vpop.permute.xlu0 %12458  ;;  %v8223_v63 = vsel %vm17732_vm0, %v12381_v9, %v12375_v29  ;;  %vm17735_vm5 = vmmov %vm17732_vm0 }
 0x7e5   : > { %11134 = vmatmul.mubr.msk.f32.vlgmr.msra.gmra.mrb[4].mxu0 %vm771_vm3, %v7706_v24  ;;  %v12390_v22 = vunpack.i.l.bf16 %v16427_v27  ;;  %v11637_v7 = vpack.c.bf16 %v8224_v8, %v8220_v21  ;;  %v8219_v19 = vsel %vm17733_vm1, %v12380_v32, %v12365_v56  ;;  %v10596_v58 = vmul.f32 %v10582_v17, %v17674_v11  ;;  %vm17737_vm15 = vmmov %vm17736_vm14 }
 0x7e6   : > { %11632 = vmatpush1.bf16.msra.mxu0 %v17730_v13  ;;  %v16694_v34 = vpop.permute.xlu1 %12463  ;;  %8061 = vmatprep.mubr.f32.mxu0 %v17608_v47  ;;  %v12662_v27 = vpack.i.bf16 %v10592_v37, %v10591_v3  ;;  %v11639_v1 = vpack.c.bf16 %v8223_v63, %v8219_v19  ;;  %v12416_v11 = vunpack.i.h.bf16 %v16548_v28  ;;  %v8461_v12 = vsel %vm17736_vm14, %v12400_v25, %v12401_v18  ;;  %vm17738_vm1 = vmmov %vm17732_vm0 }
 0x7e7   : > { %11634 = vmatprep.subr.bf16.mxu0 %v11633_v33  ;;  %12653 = vrot.lane.b32.xlu0 %v12652_v45, %s12900_s15  ;;  %v8221_v39 = vsel %vm17734_vm2, %v12366_v53, %v12390_v22  ;;  %v8222_v30 = vsel %vm17735_vm5, %v12390_v22, %v12391_v46  ;;  %v8465_v29 = vsel %vm17737_vm15, %v12405_v60, %v12406_v0  ;;  %vm17739_vm2 = vmmov %vm17736_vm14  ;;  %v12436_v16 = vunpack.i.h.bf16 %v16612_v52 }
 0x7e8   : > { %12643 = vrot.lane.b32.xlu1 %v12642_v44, %s12900_s15  ;;  %v12667_v20 = vpack.i.bf16 %v10592_v37, %v10596_v58  ;;  %v11645_v53 = vpack.c.bf16 %v8465_v29, %v8461_v12  ;;  %v8464_v56 = vsel %vm17739_vm2, %v12416_v11, %v12405_v60  ;;  %vm17740_vm5 = vmmov %vm17739_vm2  ;;  %v12435_v40 = vunpack.i.l.bf16 %v16612_v52  ;;  %v8670_v11 = vld [vmem:[%s16982_s14 + $0x12] sm:$0x1] }
 0x7e9   : > { %11136 = vmatmul.mubr.msk.f32.vlgmr.msra.gmra.mrb[2].mxu0 %vm771_vm3, %v7947_v57  ;;  %v8460_v17 = vsel %vm17740_vm5, %v12415_v49, %v12400_v25  ;;  %vm17741_vm14 = vmmov %vm17739_vm2  ;;  %v12431_v42 = vunpack.i.h.bf16 %v16579_v54  ;;  %v12430_v51 = vunpack.i.l.bf16 %v16579_v54  ;;  %v12441_v37 = vunpack.i.h.bf16 %v16594_v55  ;;  %v8429_v54 = vld [vmem:[%s16982_s14 + $0x11] sm:$0x1] }
 0x7ea   : > { %11636 = vmatpush1.bf16.msra.mxu0 %v11635_v14  ;;  %v16715_v6 = vpop.permute.xlu1 %12478  ;;  %8132 = vmatprep.mubr.f32.mxu0 %v17608_v47  ;;  %v12469_v24 = vpop.permute.xlu0 %12468  ;;  %v11647_v9 = vpack.c.bf16 %v8464_v56, %v8460_v17  ;;  %vm17742_vm15 = vmmov %vm17739_vm2  ;;  %v8706_v8 = vsel %vm4645_vm13, %v12435_v40, %v12436_v16  ;;  %v12440_v3 = vunpack.i.l.bf16 %v16594_v55  ;;  %v12450_v21 = vunpack.i.l.bf16 %v16628_v35 }
 0x7eb   : > { %11638 = vmatprep.subr.bf16.mxu0 %v11637_v7  ;;  %v12471_v31 = vunpack.i.h.bf16 %v12469_v24  ;;  %v12470_v43 = vunpack.i.l.bf16 %v12469_v24  ;;  %12663 = vrot.lane.b32.xlu0 %v12662_v27, %s12900_s15  ;;  %v8705_v55 = vsel %vm4645_vm13, %v12441_v37, %v12435_v40  ;;  %v12466_v22 = vunpack.i.h.bf16 %v16694_v34 }
 0x7ec   : > { %12658 = vrot.lane.b32.xlu1 %v12657_v2, %s12900_s15  ;;  %v12465_v7 = vunpack.i.l.bf16 %v16694_v34  ;;  %v12460_v4 = vunpack.i.l.bf16 %v16696_v62  ;;  %v8701_v60 = vsel %vm4645_vm13, %v12440_v3, %v12430_v51  ;;  %v8703_v24 = vsel %vm4645_vm13, %v12431_v42, %v12450_v21 }
 0x7ed   : > { %11137 = vmatmul.mubr.msk.f32.vlgmr.msra.gmra.mrb[4].mxu0 %vm771_vm3, %v7947_v57  ;;  %v8225_v15 = vsel %vm17732_vm0, %v12376_v5, %v12470_v43  ;;  %v8226_v28 = vsel %vm17738_vm1, %v12470_v43, %v12471_v31  ;;  %v12425_v5 = vunpack.i.l.bf16 %v16581_v23  ;;  %vm17743_vm0 = vmmov %vm17739_vm2  ;;  %v8702_v57 = vsel %vm4645_vm13, %v12430_v51, %v12431_v42  ;;  %v8911_v51 = vld [vmem:[%s16982_s14 + $0x13] sm:$0x1] }
 0x7ee   : > { %11640 = vmatpush1.bf16.msra.mxu0 %v11639_v1  ;;  %v12484_v2 = vpop.permute.xlu1 %12483  ;;  %8302 = vmatprep.mubr.f32.mxu0 %v17608_v47  ;;  %v11643_v14 = vpack.c.bf16 %v8225_v15, %v8221_v39  ;;  %v16737_v48 = vpop.permute.xlu0 %12473  ;;  %v11641_v36 = vpack.c.bf16 %v8226_v28, %v8222_v30  ;;  %vm17744_vm1 = vmmov %vm17743_vm0  ;;  %v11653_v46 = vpack.c.bf16 %v8706_v8, %v8702_v57  ;;  %v12480_v28 = vunpack.i.l.bf16 %v16715_v6 }
 0x7ef   : > { %v12486_v61 = vunpack.i.h.bf16 %v12484_v2  ;;  %v12485_v41 = vunpack.i.l.bf16 %v12484_v2  ;;  %10797 = vperm.xlu0 %12020, %v10794_v38   ;;  %v8463_v52 = vsel %vm17742_vm15, %v12425_v5, %v12426_v59  ;;  %v8462_v44 = vsel %vm17744_vm1, %v12401_v18, %v12425_v5 }
 0x7f0   : > { %12668 = vrot.lane.b32.xlu1 %v12667_v20, %s12900_s15  ;;  %11642 = vmatprep.subr.bf16.mxu0 %v11641_v36  ;;  %v12451_v18 = vunpack.i.h.bf16 %v16628_v35  ;;  %v11655_v25 = vpack.c.bf16 %v8705_v55, %v8701_v60  ;;  %v12476_v58 = vunpack.i.h.bf16 %v16737_v48  ;;  %v12475_v34 = vunpack.i.l.bf16 %v16737_v48 }
 0x7f1   : > { %11139 = vmatmul.mubr.msk.f32.vlgmr.msra.gmra.mrb[2].mxu0 %vm771_vm3, %v8188_v10  ;;  %v8467_v23 = vsel %vm17741_vm14, %v12485_v41, %v12486_v61  ;;  %v8466_v32 = vsel %vm17743_vm0, %v12406_v0, %v12485_v41  ;;  %v12461_v0 = vunpack.i.h.bf16 %v16696_v62  ;;  %v8947_v39 = vsel %vm4453_vm12, %v12465_v7, %v12466_v22 }
 0x7f2   : > { %11644 = vmatpush1.bf16.msra.mxu0 %v11643_v14  ;;  %v16747_v26 = vpop.permute.xlu1 %12488  ;;  %8373 = vmatprep.mubr.f32.mxu0 %v17608_v47  ;;  %v16753_v50 = vpop.permute.xlu0 %12493  ;;  %v11649_v33 = vpack.c.bf16 %v8467_v23, %v8463_v52  ;;  %v11651_v63 = vpack.c.bf16 %v8466_v32, %v8462_v44  ;;  %v8704_v43 = vsel %vm4645_vm13, %v12450_v21, %v12451_v18  ;;  %v12481_v2 = vunpack.i.h.bf16 %v16715_v6 }
 0x7f3   : > { %11646 = vmatprep.subr.bf16.mxu0 %v11645_v53  ;;  %v8943_v35 = vsel %vm4453_vm12, %v12460_v4, %v12461_v0  ;;  %v8946_v29 = vsel %vm4453_vm12, %v12476_v58, %v12465_v7  ;;  %v8942_v20 = vsel %vm4453_vm12, %v12475_v34, %v12460_v4  ;;  %v12490_v14 = vunpack.i.l.bf16 %v16747_v26  ;;  %v9152_v34 = vld [vmem:[%s16982_s14 + $0x14] sm:$0x1] }
 0x7f4   : > { %v11661_v15 = vpack.c.bf16 %v8947_v39, %v8943_v35  ;;  %v12496_v61 = vunpack.i.h.bf16 %v16753_v50  ;;  %v12495_v41 = vunpack.i.l.bf16 %v16753_v50  ;;  %v11663_v36 = vpack.c.bf16 %v8946_v29, %v8942_v20 }
 0x7f5   : > { %11140 = vmatmul.mubr.msk.f32.vlgmr.msra.gmra.mrb[4].mxu0 %vm771_vm3, %v8188_v10  ;;  %v12491_v10 = vunpack.i.h.bf16 %v16747_v26  ;;  %v8944_v17 = vsel %vm4453_vm12, %v12461_v0, %v12480_v28 }
 0x7f6   : > { %11648 = vmatpush1.bf16.msra.mxu0 %v11647_v9  ;;  %v16761_v45 = vpop.permute.xlu1 %12498  ;;  %8543 = vmatprep.mubr.f32.mxu0 %v17608_v47  ;;  %v16770_v13 = vpop.permute.xlu0 %12503  ;;  %v9188_v50 = vsel %vm4884_vm11, %v12495_v41, %v12496_v61 }
 0x7f7   : > { %11650 = vmatprep.subr.bf16.mxu0 %v11649_v33  ;;  %v12501_v6 = vunpack.i.h.bf16 %v16761_v45  ;;  %v12500_v5 = vunpack.i.l.bf16 %v16761_v45  ;;  %v9184_v40 = vsel %vm4884_vm11, %v12490_v14, %v12491_v10  ;;  %v12506_v37 = vunpack.i.h.bf16 %v16770_v13 }
 0x7f8   : > { %v12505_v3 = vunpack.i.l.bf16 %v16770_v13  ;;  %v11669_v45 = vpack.c.bf16 %v9188_v50, %v9184_v40 }
 0x7f9   : > { %11142 = vmatmul.mubr.msk.f32.vlgmr.msra.gmra.mrb[2].mxu0 %vm771_vm3, %v8429_v54  ;;  %v9183_v33 = vsel %vm4884_vm11, %v12500_v5, %v12490_v14  ;;  %v9187_v8 = vsel %vm4884_vm11, %v12501_v6, %v12495_v41 }
 0x7fa   : > { %11652 = vmatpush1.bf16.msra.mxu0 %v11651_v63  ;;  %8614 = vmatprep.mubr.f32.mxu0 %v17608_v47  ;;  %v16785_v27 = vpop.permute.xlu1 %12518  ;;  %v11671_v55 = vpack.c.bf16 %v9187_v8, %v9183_v33  ;;  %v9185_v13 = vsel %vm4884_vm11, %v12491_v10, %v12505_v3  ;;  %v9186_v0 = vsel %vm4884_vm11, %v12505_v3, %v12506_v37 }
 0x7fb   : > { %11654 = vmatprep.subr.bf16.mxu0 %v11653_v46  ;;  %v12520_v7 = vunpack.i.l.bf16 %v16785_v27 }
 0x7fc   : > { %v12509_v19 = vpop.permute.xlu0 %12508 }
 0x7fd   : > { %v12511_v1 = vunpack.i.h.bf16 %v12509_v19  ;;  %v12510_v62 = vunpack.i.l.bf16 %v12509_v19  ;;  %11143 = vmatmul.mubr.msk.f32.vlgmr.msra.gmra.mrb[4].mxu0 %vm771_vm3, %v8429_v54 }
 0x7fe   : > { %11656 = vmatpush1.bf16.msra.mxu0 %v11655_v25  ;;  %8784 = vmatprep.mubr.f32.mxu0 %v17608_v47  ;;  %v16809_v48 = vpop.permute.xlu1 %12533 }
 0x7ff   : > { %v8707_v31 = vsel %vm4645_vm13, %v12436_v16, %v12510_v62  ;;  %v8708_v30 = vsel %vm4645_vm13, %v12510_v62, %v12511_v1  ;;  %v8945_v16 = vsel %vm4453_vm12, %v12480_v28, %v12481_v2  ;;  %v12536_v62 = vunpack.i.h.bf16 %v16809_v48 }
 0x800   : > { %v11659_v49 = vpack.c.bf16 %v8707_v31, %v8703_v24  ;;  %v16798_v38 = vpop.permute.xlu0 %12513  ;;  %v11657_v12 = vpack.c.bf16 %v8708_v30, %v8704_v43  ;;  %v12535_v35 = vunpack.i.l.bf16 %v16809_v48 }
 0x801   : > { %11145 = vmatmul.mubr.msk.f32.vlgmr.msra.gmra.mrb[2].mxu0 %vm771_vm3, %v8670_v11  ;;  %v12516_v54 = vunpack.i.h.bf16 %v16798_v38  ;;  %v12515_v44 = vunpack.i.l.bf16 %v16798_v38 }
 0x802   : > { %11658 = vmatprep.subr.bf16.mxu0 %v11657_v12  ;;  %8855 = vmatprep.mubr.f32.mxu0 %v17608_v47 }
 0x803   : > { %11660 = vmatpush1.bf16.msra.mxu0 %v11659_v49  ;;  %v9426_v28 = vsel %vm5127_vm10, %v12516_v54, %v12535_v35 }
 0x804   : > { %v12524_v59 = vpop.permute.xlu0 %12523  ;;  %11662 = vmatprep.subr.bf16.mxu0 %v11661_v15 }
 0x805   : > { %v12526_v53 = vunpack.i.h.bf16 %v12524_v59  ;;  %v12525_v56 = vunpack.i.l.bf16 %v12524_v59  ;;  %v16819_v23 = vpop.permute.xlu1 %12538 }
 0x806   : > { %11146 = vmatmul.mubr.msk.f32.vlgmr.msra.gmra.mrb[4].mxu0 %vm771_vm3, %v8670_v11  ;;  %v12541_v38 = vunpack.i.h.bf16 %v16819_v23  ;;  %v12540_v29 = vunpack.i.l.bf16 %v16819_v23 }
 0x807   : > { %v8948_v26 = vsel %vm4453_vm12, %v12466_v22, %v12525_v56  ;;  %11664 = vmatpush1.bf16.msra.mxu0 %v11663_v36  ;;  %9025 = vmatprep.mubr.f32.mxu0 %v17608_v47  ;;  %v8949_v42 = vsel %vm4453_vm12, %v12525_v56, %v12526_v53  ;;  %v12521_v22 = vunpack.i.h.bf16 %v16785_v27  ;;  %v9425_v27 = vsel %vm5127_vm10, %v12515_v44, %v12516_v54  ;;  %v9393_v36 = vld [vmem:[%s16982_s14 + $0x15] sm:$0x1] }
 0x808   : > { %v11667_v9 = vpack.c.bf16 %v8948_v26, %v8944_v17  ;;  %v12529_v52 = vpop.permute.xlu0 %12528  ;;  %v11665_v32 = vpack.c.bf16 %v8949_v42, %v8945_v16  ;;  %v9666_v53 = vsel %vm960_vm4, %v12540_v29, %v12541_v38 }
 0x809   : > { %v12549_v57 = vpop.permute.xlu1 %12548  ;;  %v12531_v4 = vunpack.i.h.bf16 %v12529_v52  ;;  %v12530_v60 = vunpack.i.l.bf16 %v12529_v52  ;;  %v9429_v24 = vsel %vm5127_vm10, %v12520_v7, %v12521_v22 }
 0x80a   : > { %11666 = vmatprep.subr.bf16.mxu0 %v11665_v32  ;;  %11148 = vmatmul.mubr.msk.f32.vlgmr.msra.gmra.mrb[2].mxu0 %vm771_vm3, %v8911_v51  ;;  %v12551_v21 = vunpack.i.h.bf16 %v12549_v57  ;;  %v12550_v63 = vunpack.i.l.bf16 %v12549_v57  ;;  %v11677_v43 = vpack.c.bf16 %v9429_v24, %v9425_v27 }
 0x80b   : > { %11668 = vmatpush1.bf16.msra.mxu0 %v11667_v9  ;;  %9096 = vmatprep.mubr.f32.mxu0 %v17608_v47  ;;  %v9428_v39 = vsel %vm5127_vm10, %v12531_v4, %v12520_v7  ;;  %v9424_v31 = vsel %vm5127_vm10, %v12530_v60, %v12515_v44 }
 0x80c   : > { %v16835_v46 = vpop.permute.xlu0 %12543  ;;  %11670 = vmatprep.subr.bf16.mxu0 %v11669_v45  ;;  %v9189_v18 = vsel %vm4884_vm11, %v12496_v61, %v12550_v63  ;;  %v9190_v25 = vsel %vm4884_vm11, %v12550_v63, %v12551_v21  ;;  %v11679_v20 = vpack.c.bf16 %v9428_v39, %v9424_v31  ;;  %v9427_v61 = vsel %vm5127_vm10, %v12535_v35, %v12536_v62 }
 0x80d   : > { %v11675_v19 = vpack.c.bf16 %v9189_v18, %v9185_v13  ;;  %v11673_v58 = vpack.c.bf16 %v9190_v25, %v9186_v0  ;;  %v12546_v30 = vunpack.i.h.bf16 %v16835_v46  ;;  %v12545_v11 = vunpack.i.l.bf16 %v16835_v46  ;;  %v12554_v49 = vpop.permute.xlu1 %12553 }
 0x80e   : > { %11149 = vmatmul.mubr.msk.f32.vlgmr.msra.gmra.mrb[4].mxu0 %vm771_vm3, %v8911_v51  ;;  %v12556_v10 = vunpack.i.h.bf16 %v12554_v49  ;;  %v12555_v14 = vunpack.i.l.bf16 %v12554_v49  ;;  %v9634_v51 = vld [vmem:[%s16982_s14 + $0x16] sm:$0x1] }
 0x80f   : > { %11672 = vmatpush1.bf16.msra.mxu0 %v11671_v55  ;;  %9266 = vmatprep.mubr.f32.mxu0 %v17608_v47  ;;  %v9670_v59 = vsel %vm960_vm4, %v12545_v11, %v12546_v30 }
 0x810   : > { %v16849_v1 = vpop.permute.xlu0 %12558  ;;  %11674 = vmatprep.subr.bf16.mxu0 %v11673_v58  ;;  %v9665_v56 = vsel %vm960_vm4, %v12555_v14, %v12540_v29  ;;  %v9669_v17 = vsel %vm960_vm4, %v12556_v10, %v12545_v11  ;;  %v11685_v16 = vpack.c.bf16 %v9670_v59, %v9666_v53 }
 0x811   : > { %v11687_v23 = vpack.c.bf16 %v9669_v17, %v9665_v56  ;;  %v12561_v50 = vunpack.i.h.bf16 %v16849_v1  ;;  %v12560_v9 = vunpack.i.l.bf16 %v16849_v1 }
 0x812   : > { %11151 = vmatmul.mubr.msk.f32.vlgmr.msra.gmra.mrb[2].mxu0 %vm771_vm3, %v9152_v34 }
 0x813   : > { %11676 = vmatpush1.bf16.msra.mxu0 %v11675_v19  ;;  %9337 = vmatprep.mubr.f32.mxu0 %v17608_v47  ;;  %v9667_v44 = vsel %vm960_vm4, %v12541_v38, %v12560_v9  ;;  %v9668_v21 = vsel %vm960_vm4, %v12560_v9, %v12561_v50  ;;  %v9875_v19 = vld [vmem:[%s16982_s14 + $0x17] sm:$0x1] }
 0x814   : > { %v12564_v12 = vpop.permute.xlu0 %12563  ;;  %11678 = vmatprep.subr.bf16.mxu0 %v11677_v43 }
 0x815   : > { %v12566_v15 = vunpack.i.h.bf16 %v12564_v12  ;;  %v12565_v2 = vunpack.i.l.bf16 %v12564_v12 }
 0x816   : > { %11152 = vmatmul.mubr.msk.f32.vlgmr.msra.gmra.mrb[4].mxu0 %vm771_vm3, %v9152_v34 }
 0x817   : > { %v9430_v41 = vsel %vm5127_vm10, %v12521_v22, %v12565_v2  ;;  %11680 = vmatpush1.bf16.msra.mxu0 %v11679_v20  ;;  %9507 = vmatprep.mubr.f32.mxu0 %v17608_v47  ;;  %v9431_v48 = vsel %vm5127_vm10, %v12565_v2, %v12566_v15 }
 0x818   : > { %v11683_v6 = vpack.c.bf16 %v9430_v41, %v9426_v28  ;;  %v11681_v5 = vpack.c.bf16 %v9431_v48, %v9427_v61 }
 0x81a   : > { %11682 = vmatprep.subr.bf16.mxu0 %v11681_v5  ;;  %11154 = vmatmul.mubr.msk.f32.vlgmr.msra.gmra.mrb[2].mxu0 %vm771_vm3, %v9393_v36  ;;  %v16876_v40 = vpop.permute.xlu1 %12573  ;;  %v12569_v26 = vpop.permute.xlu0 %12568 }
 0x81b   : > { %11684 = vmatpush1.bf16.msra.mxu0 %v11683_v6  ;;  %9578 = vmatprep.mubr.f32.mxu0 %v17608_v47  ;;  %v12576_v52 = vunpack.i.h.bf16 %v16876_v40  ;;  %v12575_v32 = vunpack.i.l.bf16 %v16876_v40  ;;  %v12571_v33 = vunpack.i.h.bf16 %v12569_v26  ;;  %v12570_v8 = vunpack.i.l.bf16 %v12569_v26  ;;  %v10116_v6 = vld [vmem:[%s16982_s14 + $0x18] sm:$0x1] }
 0x81c   : > { %11686 = vmatprep.subr.bf16.mxu0 %v11685_v16 }
 0x81d   : > { %v9907_v13 = vsel %vm5077_vm9, %v12570_v8, %v12571_v33  ;;  %v9911_v22 = vsel %vm5077_vm9, %v12575_v32, %v12576_v52 }
 0x81e   : > { %11155 = vmatmul.mubr.msk.f32.vlgmr.msra.gmra.mrb[4].mxu0 %vm771_vm3, %v9393_v36  ;;  %v12584_v42 = vpop.permute.xlu1 %12583  ;;  %v12579_v37 = vpop.permute.xlu0 %12578  ;;  %v11693_v18 = vpack.c.bf16 %v9911_v22, %v9907_v13 }
 0x81f   : > { %11688 = vmatpush1.bf16.msra.mxu0 %v11687_v23  ;;  %9748 = vmatprep.mubr.f32.mxu0 %v17608_v47  ;;  %v12581_v57 = vunpack.i.h.bf16 %v12579_v37  ;;  %v12580_v55 = vunpack.i.l.bf16 %v12579_v37  ;;  %v12586_v27 = vunpack.i.h.bf16 %v12584_v42  ;;  %v12585_v1 = vunpack.i.l.bf16 %v12584_v42 }
 0x821   : > { %v9910_v4 = vsel %vm5077_vm9, %v12581_v57, %v12575_v32  ;;  %v9906_v60 = vsel %vm5077_vm9, %v12580_v55, %v12570_v8  ;;  %v9908_v49 = vsel %vm5077_vm9, %v12571_v33, %v12585_v1  ;;  %v9909_v29 = vsel %vm5077_vm9, %v12585_v1, %v12586_v27  ;;  %v10357_v27 = vld [vmem:[%s16982_s14 + $0x19] sm:$0x1] }
 0x822   : > { %11157 = vmatmul.mubr.msk.f32.vlgmr.msra.gmra.mrb[2].mxu0 %vm771_vm3, %v9634_v51  ;;  %v12589_v3 = vpop.permute.xlu1 %12588  ;;  %v11695_v25 = vpack.c.bf16 %v9910_v4, %v9906_v60 }
 0x823   : > { %9819 = vmatprep.mubr.f32.mxu0 %v17608_v47  ;;  %v12591_v45 = vunpack.i.h.bf16 %v12589_v3  ;;  %v12590_v54 = vunpack.i.l.bf16 %v12589_v3 }
 0x825   : > { %v9671_v63 = vsel %vm960_vm4, %v12546_v30, %v12590_v54  ;;  %v9672_v46 = vsel %vm960_vm4, %v12590_v54, %v12591_v45 }
 0x826   : > { %v11691_v7 = vpack.c.bf16 %v9671_v63, %v9667_v44  ;;  %v11689_v0 = vpack.c.bf16 %v9672_v46, %v9668_v21 }
 0x828   : > { %11690 = vmatprep.subr.bf16.mxu0 %v11689_v0 }
 0x829   : > { %11692 = vmatpush1.bf16.msra.mxu0 %v11691_v7 }
 0x82a   : > { %11694 = vmatprep.subr.bf16.mxu0 %v11693_v18 }
 0x82c   : > { %11158 = vmatmul.mubr.msk.f32.vlgmr.msra.gmra.mrb[4].mxu0 %vm771_vm3, %v9634_v51 }
 0x82d   : > { %11696 = vmatpush1.bf16.msra.mxu0 %v11695_v25  ;;  %9989 = vmatprep.mubr.f32.mxu0 %v17608_v47 }
 0x830   : > { %11160 = vmatmul.mubr.msk.f32.vlgmr.msra.gmra.mrb[2].mxu0 %vm771_vm3, %v9875_v19 }
 0x831   : > { %10060 = vmatprep.mubr.f32.mxu0 %v17608_v47  ;;  %v12599_v34 = vpop.permute.xlu0 %12598 }
 0x832   : > { %v12594_v58 = vpop.permute.xlu1 %12593  ;;  %v12601_v35 = vunpack.i.h.bf16 %v12599_v34  ;;  %v12600_v39 = vunpack.i.l.bf16 %v12599_v34 }
 0x833   : > { %v12596_v62 = vunpack.i.h.bf16 %v12594_v58  ;;  %v12595_v24 = vunpack.i.l.bf16 %v12594_v58 }
 0x834   : > { %v10152_v28 = vsel %vm4834_vm8, %v12600_v39, %v12601_v35 }
 0x835   : > { %v12609_v43 = vpop.permute.xlu0 %12608  ;;  %v10148_v2 = vsel %vm4834_vm8, %v12595_v24, %v12596_v62 }
 0x836   : > { %v12604_v31 = vpop.permute.xlu1 %12603  ;;  %v12611_v30 = vunpack.i.h.bf16 %v12609_v43  ;;  %v12610_v11 = vunpack.i.l.bf16 %v12609_v43  ;;  %v11701_v48 = vpack.c.bf16 %v10152_v28, %v10148_v2 }
 0x837   : > { %v12606_v38 = vunpack.i.h.bf16 %v12604_v31  ;;  %v12605_v12 = vunpack.i.l.bf16 %v12604_v31 }
 0x838   : > { %v9912_v20 = vsel %vm5077_vm9, %v12576_v52, %v12610_v11  ;;  %v9913_v15 = vsel %vm5077_vm9, %v12610_v11, %v12611_v30 }
 0x839   : > { %v11699_v10 = vpack.c.bf16 %v9912_v20, %v9908_v49  ;;  %v11697_v14 = vpack.c.bf16 %v9913_v15, %v9909_v29  ;;  %v10147_v61 = vsel %vm4834_vm8, %v12605_v12, %v12595_v24  ;;  %v10151_v41 = vsel %vm4834_vm8, %v12606_v38, %v12600_v39  ;;  %v12614_v36 = vpop.permute.xlu0 %12613 }
 0x83a   : > { %v11703_v59 = vpack.c.bf16 %v10151_v41, %v10147_v61  ;;  %v12616_v56 = vunpack.i.h.bf16 %v12614_v36  ;;  %v12615_v17 = vunpack.i.l.bf16 %v12614_v36  ;;  %v10598_v36 = vld [vmem:[%s16982_s14 + $0x1a] sm:$0x1] }
 0x83b   : > { %11698 = vmatprep.subr.bf16.mxu0 %v11697_v14 }
 0x83c   : > { %11700 = vmatpush1.bf16.msra.mxu0 %v11699_v10  ;;  %v10149_v52 = vsel %vm4834_vm8, %v12596_v62, %v12615_v17  ;;  %v10150_v8 = vsel %vm4834_vm8, %v12615_v17, %v12616_v56 }
 0x83d   : > { %11702 = vmatprep.subr.bf16.mxu0 %v11701_v48 }
 0x83f   : > { %11161 = vmatmul.mubr.msk.f32.vlgmr.msra.gmra.mrb[4].mxu0 %vm771_vm3, %v9875_v19 }
 0x840   : > { %11704 = vmatpush1.bf16.msra.mxu0 %v11703_v59  ;;  %10230 = vmatprep.mubr.f32.mxu0 %v17608_v47 }
 0x842   : > { %v12624_v5 = vpop.permute.xlu1 %12623  ;;  %v12619_v53 = vpop.permute.xlu0 %12618 }
 0x843   : > { %11163 = vmatmul.mubr.msk.f32.vlgmr.msra.gmra.mrb[2].mxu0 %vm771_vm3, %v10116_v6  ;;  %v12626_v16 = vunpack.i.h.bf16 %v12624_v5  ;;  %v12625_v40 = vunpack.i.l.bf16 %v12624_v5  ;;  %v12621_v26 = vunpack.i.h.bf16 %v12619_v53  ;;  %v12620_v23 = vunpack.i.l.bf16 %v12619_v53 }
 0x844   : > { %10301 = vmatprep.mubr.f32.mxu0 %v17608_v47 }
 0x845   : > { %v10389_v45 = vsel %vm4403_vm7, %v12620_v23, %v12621_v26  ;;  %v10393_v54 = vsel %vm4403_vm7, %v12625_v40, %v12626_v16 }
 0x846   : > { %v12634_v42 = vpop.permute.xlu1 %12633  ;;  %v12629_v51 = vpop.permute.xlu0 %12628  ;;  %v11709_v4 = vpack.c.bf16 %v10393_v54, %v10389_v45 }
 0x847   : > { %v12636_v50 = vunpack.i.h.bf16 %v12634_v42  ;;  %v12635_v9 = vunpack.i.l.bf16 %v12634_v42  ;;  %v12631_v32 = vunpack.i.h.bf16 %v12629_v51  ;;  %v12630_v33 = vunpack.i.l.bf16 %v12629_v51 }
 0x849   : > { %v10153_v37 = vsel %vm4834_vm8, %v12601_v35, %v12635_v9  ;;  %v10154_v3 = vsel %vm4834_vm8, %v12635_v9, %v12636_v50  ;;  %v10392_v7 = vsel %vm4403_vm7, %v12631_v32, %v12625_v40  ;;  %v10388_v0 = vsel %vm4403_vm7, %v12630_v33, %v12620_v23  ;;  %v17745_v40 = vld [vmem:[#allocation17_spill] sm:$0xff] }
 0x84a   : > { %v11707_v44 = vpack.c.bf16 %v10153_v37, %v10149_v52  ;;  %v12639_v57 = vpop.permute.xlu1 %12638  ;;  %v12649_v55 = vpop.permute.xlu0 %12648  ;;  %v11705_v21 = vpack.c.bf16 %v10154_v3, %v10150_v8  ;;  %v11711_v25 = vpack.c.bf16 %v10392_v7, %v10388_v0  ;;  %v17746_v3 = vld [vmem:[#allocation18_spill] sm:$0xff] }
 0x84b   : > { %v12641_v63 = vunpack.i.h.bf16 %v12639_v57  ;;  %v12640_v46 = vunpack.i.l.bf16 %v12639_v57  ;;  %v12651_v13 = vunpack.i.h.bf16 %v12649_v55  ;;  %v12650_v22 = vunpack.i.l.bf16 %v12649_v55 }
 0x84c   : > { %11706 = vmatprep.subr.bf16.mxu0 %v11705_v21 }
 0x84d   : > { %11708 = vmatpush1.bf16.msra.mxu0 %v11707_v44  ;;  %v10391_v60 = vsel %vm4403_vm7, %v12640_v46, %v12641_v63  ;;  %v10395_v18 = vsel %vm4403_vm7, %v12650_v22, %v12651_v13  ;;  %v10390_v19 = vsel %vm4403_vm7, %v12621_v26, %v12640_v46  ;;  %v10394_v58 = vsel %vm4403_vm7, %v12626_v16, %v12650_v22 }
 0x84e   : > { %11710 = vmatprep.subr.bf16.mxu0 %v11709_v4  ;;  %v11713_v34 = vpack.c.bf16 %v10395_v18, %v10391_v60  ;;  %v11715_v1 = vpack.c.bf16 %v10394_v58, %v10390_v19  ;;  %v17749_v44 = vlaneseq }
 0x850   : > { %11164 = vmatmul.mubr.msk.f32.vlgmr.msra.gmra.mrb[4].mxu0 %vm771_vm3, %v10116_v6 }
 0x851   : > { %11712 = vmatpush1.bf16.msra.mxu0 %v11711_v25  ;;  %10471 = vmatprep.mubr.f32.mxu0 %v17608_v47 }
 0x852   : > { %11714 = vmatprep.subr.bf16.mxu0 %v11713_v34 }
 0x854   : > { %11166 = vmatmul.mubr.msk.f32.vlgmr.msra.gmra.mrb[2].mxu0 %vm771_vm3, %v10357_v27 }
 0x855   : > { %11716 = vmatpush1.bf16.msra.mxu0 %v11715_v1  ;;  %10542 = vmatprep.mubr.f32.mxu0 %v17608_v47 }
 0x858   : > { %11167 = vmatmul.mubr.msk.f32.vlgmr.msra.gmra.mrb[4].mxu0 %vm771_vm3, %v10357_v27 }
 0x859   : > { %10712 = vmatprep.mubr.f32.mxu0 %v17608_v47  ;;  %v12654_v24 = vpop.permute.xlu0 %12653 }
 0x85a   : > { %v12644_v62 = vpop.permute.xlu1 %12643  ;;  %v12656_v31 = vunpack.i.h.bf16 %v12654_v24  ;;  %v12655_v43 = vunpack.i.l.bf16 %v12654_v24 }
 0x85b   : > { %v12646_v35 = vunpack.i.h.bf16 %v12644_v62  ;;  %v12645_v39 = vunpack.i.l.bf16 %v12644_v62 }
 0x85c   : > { %v10634_v11 = vsel %vm4356_vm6, %v12655_v43, %v12656_v31 }
 0x85d   : > { %v10630_v30 = vsel %vm4356_vm6, %v12645_v39, %v12646_v35  ;;  %v12664_v38 = vpop.permute.xlu0 %12663 }
 0x85e   : > { %v12659_v49 = vpop.permute.xlu1 %12658  ;;  %v11717_v12 = vpack.c.bf16 %v10634_v11, %v10630_v30  ;;  %v12666_v28 = vunpack.i.h.bf16 %v12664_v38  ;;  %v12665_v10 = vunpack.i.l.bf16 %v12664_v38 }
 0x85f   : > { %v12661_v29 = vunpack.i.h.bf16 %v12659_v49  ;;  %v12660_v20 = vunpack.i.l.bf16 %v12659_v49 }
 0x860   : > { %11718 = vmatprep.subr.bf16.mxu0 %v11717_v12  ;;  %v10631_v59 = vsel %vm4356_vm6, %v12646_v35, %v12665_v10  ;;  %v10632_v5 = vsel %vm4356_vm6, %v12665_v10, %v12666_v28 }
 0x861   : > { %v10629_v15 = vsel %vm4356_vm6, %v12660_v20, %v12645_v39  ;;  %v10633_v2 = vsel %vm4356_vm6, %v12661_v29, %v12655_v43 }
 0x862   : > { %v11719_v14 = vpack.c.bf16 %v10633_v2, %v10629_v15  ;;  %v12669_v61 = vpop.permute.xlu1 %12668 }
 0x863   : > { %v12671_v41 = vunpack.i.h.bf16 %v12669_v61  ;;  %v12670_v48 = vunpack.i.l.bf16 %v12669_v61 }
 0x864   : > { %11720 = vmatpush1.bf16.msra.mxu0 %v11719_v14 }
 0x865   : > { %v10635_v6 = vsel %vm4356_vm6, %v12656_v31, %v12670_v48  ;;  %v10636_v53 = vsel %vm4356_vm6, %v12670_v48, %v12671_v41 }
 0x866   : > { %v11723_v56 = vpack.c.bf16 %v10635_v6, %v10631_v59  ;;  %v11721_v17 = vpack.c.bf16 %v10636_v53, %v10632_v5 }
 0x867   : > { %11169 = vmatmul.mubr.msk.f32.vlgmr.msra.gmra.mrb[2].mxu0 %vm771_vm3, %v10598_v36 }
 0x868   : > { %11722 = vmatprep.subr.bf16.mxu0 %v11721_v17  ;;  %10783 = vmatprep.mubr.f32.mxu0 %v17608_v47 }
 0x869   : > { %11724 = vmatpush1.bf16.msra.mxu0 %v11723_v56 }
 0x86c   : > { %11170 = vmatmul.mubr.msk.f32.vlgmr.msra.gmra.mrb[4].mxu0 %vm771_vm3, %v10598_v36  ;;  %vm10839_vm3 = vcmp.lt.s32.totalorder %v17749_v44, 512 }
 0x86e   : > { %v10798_v16 = vpop.permute.xlu0 %10797 }
 0x86f   : > { %v10803_v26 = vrot.slane %v10798_v16, %v17745_v40 }
 0x93a   : > { %v10714_v23 = vpop.f32.mrb[2].mxu0 }
 0x93b   : > { %v10804_v42 = vadd.f32 %v10803_v26, %v10714_v23  ;;  %v10716_v51 = vpop.f32.mrb[3].mxu0 }
 0x93c   : > { %v10805_v50 = vadd.f32 %v10803_v26, %v10716_v51 }
 0x93e   : > { %v10812_v9 = vcombine.low %v10804_v42, %v10805_v50 }
 0x93f   : > { %v10785_v52 = vpop.f32.mrb[4].mxu0 }
 0x940   : > { %v10806_v32 = vadd.f32 %v10803_v26, %v10785_v52  ;;  %v10787_v33 = vpop.f32.mrb[5].mxu0  ;;  %v10820_v45 = vrot.slane %v10812_v9, %v17746_v3 }
 0x941   : > { %v10807_v8 = vadd.f32 %v10803_v26, %v10787_v33 }
 0x943   : > { %v10813_v37 = vcombine.low %v10806_v32, %v10807_v8 }
 0x945   : > { %v10827_v47 = vrot.slane %v10813_v37, %v17746_v3 }
 0x947   : > { %v10828_v54 = vcombine.low %v10820_v45, %v10827_v47 }
 0x949   : > { %v10835_v57 = vrot.slane %v10828_v54, %v17746_v3 }
 0x94b   : > { %10841 = vst.msk [vmem:[%s653_s18] sm:$0xf] %vm10839_vm3, %v10835_v57 }
 0x94c PF: > { %s17750_s24 = sld [smem:[#allocation16_spill]] }
 0x952   : > { %s33_s29 = sadd.s32 1, %s17750_s24  }
 0x953   : > { %p30_p9 = scmp.ge.s32.totalorder %s33_s29, 4  }
 0x955   :  { %32 = sbr.rel (!%p30_p9) target bundleno = 9 (0x9), region = 172 }
 0x95c   :  { %10861 = vsyncpa [#allocation6], 1 }
 0x95d   :  { %10863 = vsyncpa [#allocation6 + $0x1], 1 }
 0x95e   :  { %10864 = vsyncpa [#allocation8], 1 }
 0x95f   :  { %10865 = vsyncpa [#allocation11], 1 }

</bundles_post_ra>
